<compile_context>
chip_gen: v6e
topology: v6e:2x2x1
jax: 0.10.0
libtpu: 0.0.40
codegen_flags: <defaults>
</compile_context>

<pallas_src>
import jax
import jax.numpy as jnp
from jax import lax
from jax.experimental import pallas as pl
from jax.experimental.pallas import tpu as pltpu

LANE = 128


def basic_block_kernel(xpad_ref, res_ref, w1_ref, s1_ref, b1_ref,
                       w2_ref, s2_ref, b2_ref, out_ref, mid_ref):
    # xpad_ref : (B, H+2, W+2, Cp) bf16   spatially + lane padded input
    # res_ref  : (B, H,   W,   Cp) f32    un-quantized identity / skip path
    # w1/w2    : (3, 3*Cp, Cp)     bf16   conv weights, kw folded into K
    # s*/b*    : (1, Cp)           f32    folded BN scale / bias
    # out_ref  : (B, H, W, Cp)     out dtype
    # mid_ref  : VMEM (B, H+2, W+2, Cp) bf16 scratch for the padded intermediate
    B, H, W, Cp = out_ref.shape
    M = B * H * W

    # Only the top/bottom halo rows need explicit zeroing: the left/right halo
    # columns are rewritten (as zeros) by the full-width interior store below,
    # and the interior is fully overwritten every step.  Done unconditionally
    # so the kernel stays correct when the batch axis is sharded across
    # TensorCores (each core has its own scratch).
    zrow = jnp.zeros((B, 1, W + 2, Cp), mid_ref.dtype)
    mid_ref[:, 0:1] = zrow
    mid_ref[:, H + 1:H + 2] = zrow

    def conv3x3(src, w_ref):
        # src: (B, H+2, W+2, Cp) bf16.  Each 3x3 conv = 3 MXU matmuls with
        # K = 3*Cp: the kw taps are merged into the contraction dim via a
        # lane-dense channel concat that matches the (3, 3*Cp, Cp) weights.
        # (An XLU pltpu.roll variant for the kw-shifted slices was considered;
        #  it needs a bundle dump to confirm it reduces copy traffic, so the
        #  proven slice-concat form is kept.)
        acc = None
        for kh in range(3):
            rows = src[:, kh:kh + H]                               # (B,H,W+2,Cp)
            patch = jnp.concatenate(
                [rows[:, :, 0:W], rows[:, :, 1:W + 1], rows[:, :, 2:W + 2]],
                axis=-1)                                           # (B,H,W,3Cp)
            dot = jnp.dot(patch.reshape(M, 3 * Cp), w_ref[kh],
                          preferred_element_type=jnp.float32)
            acc = dot if acc is None else acc + dot                # no zero-init
        return acc                                                 # (M, Cp) f32

    # conv1 -> BN1 -> ReLU
    acc1 = conv3x3(xpad_ref[...], w1_ref)
    y = jnp.maximum(acc1 * s1_ref[0] + b1_ref[0], 0.0)             # (M, Cp) f32
    y = y.reshape(B, H, W, Cp).astype(mid_ref.dtype)
    # Sublane-aligned full-width row store: zero edge columns are baked into
    # the stored value so the store starts at W-offset 0 (unmasked vst) and
    # re-establishes the left/right halo every step.
    zcol = jnp.zeros((B, H, 1, Cp), mid_ref.dtype)
    mid_ref[:, 1:H + 1] = jnp.concatenate([zcol, y, zcol], axis=2)

    # conv2 -> BN2 -> +residual(f32) -> ReLU
    acc2 = conv3x3(mid_ref[...], w2_ref)
    z = (acc2 * s2_ref[0] + b2_ref[0]).reshape(B, H, W, Cp) + res_ref[...]
    out_ref[...] = jnp.maximum(z, 0.0).astype(out_ref.dtype)


def basic_block_forward(x_nchw, w1, g1, beta1, m1, v1, w2, g2, beta2, m2, v2,
                        eps=1e-5, out_dtype=jnp.float32, images_per_step=None):
    """BasicBlock forward (stride=1, no downsample).  x_nchw: (N,C,H,W) f32.
    Conv weights w1/w2 in HWIO layout (3, 3, Cin, Cout)."""
    x = jnp.transpose(x_nchw, (0, 2, 3, 1)).astype(jnp.float32)    # NCHW -> NHWC
    N, H, W, Cin = x.shape
    Cout = w1.shape[-1]
    assert Cin == Cout, "default BasicBlock (stride=1, no downsample) needs Cin == Cout"

    # Pad channels to a lane-dense multiple of 128; padded in-channels get zero
    # weights and padded out-channels zero scale/bias, so they stay exactly
    # zero and are sliced off at the end.
    Cp = ((Cout + LANE - 1) // LANE) * LANE
    pc_in, pc_out = Cp - Cin, Cp - Cout

    # Fold BatchNorm (inference mode) into per-channel scale / bias.
    inv1 = g1 / jnp.sqrt(v1 + eps)
    inv2 = g2 / jnp.sqrt(v2 + eps)
    s1 = jnp.pad(inv1, (0, pc_out)).reshape(1, Cp)
    b1 = jnp.pad(beta1 - m1 * inv1, (0, pc_out)).reshape(1, Cp)
    s2 = jnp.pad(inv2, (0, pc_out)).reshape(1, Cp)
    b2 = jnp.pad(beta2 - m2 * inv2, (0, pc_out)).reshape(1, Cp)

    # Spatial 1-px halo + channel lane padding; bf16 for the MXU inputs.
    xpad = jnp.pad(x, ((0, 0), (1, 1), (1, 1), (0, pc_in))).astype(jnp.bfloat16)
    # Full-precision identity path (no bf16 quantization of the residual).
    xres = jnp.pad(x, ((0, 0), (0, 0), (0, 0), (0, pc_in)))        # f32 (N,H,W,Cp)

    def prep_w(w):
        wp = jnp.pad(w, ((0, 0), (0, 0), (0, pc_in), (0, pc_out)))
        # (3, 3, Cp, Cp) -> (3, 3*Cp, Cp): kw folded into the contraction dim
        # (kw outer, cin inner) to match the in-kernel patch concat order.
        return wp.reshape(3, 3 * Cp, Cp).astype(jnp.bfloat16)

    w1p, w2p = prep_w(w1), prep_w(w2)

    # Per-generation VMEM budget with headroom (≈51 MiB on v7x, ≈102 MiB v6e/v5e).
    try:
        vmem_cap = int(pltpu.get_tpu_info().vmem_capacity_bytes)
    except Exception:
        vmem_cap = 64 * 1024 * 1024            # conservative (v7x) fallback
    budget = int(0.80 * vmem_cap)

    out_bytes = jnp.dtype(out_dtype).itemsize

    def vmem_need(b):
        xblk = b * (H + 2) * (W + 2) * Cp * 2          # bf16 input block
        rblk = b * H * W * Cp * 4                      # f32 residual block
        oblk = b * H * W * Cp * out_bytes              # output block
        wblk = 2 * 3 * 3 * Cp * Cp * 2                 # weights (single-buffered)
        sb = 4 * 8 * Cp * 4                            # scale/bias (sublane-padded)
        scr = b * (H + 2) * (W + 2) * Cp * 2           # bf16 scratch
        live = (b * H * W * 3 * Cp * 2                 # im2col patch (bf16)
                + b * H * W * Cp * 4                   # f32 accumulator
                + b * H * (W + 2) * Cp * 2)            # full-width mid rows
        return 2 * (xblk + rblk + oblk) + wblk + sb + scr + live

    # Images per grid step: largest divisor of N that fits the VMEM budget and
    # keeps >= 2 grid steps (so megacore parts still get a parallel axis).
    if images_per_step is None:
        B = 1
        for d in sorted([d for d in range(1, N + 1) if N % d == 0], reverse=True):
            if (N // d >= 2 or N == 1) and vmem_need(d) <= budget:
                B = d
                break
    else:
        B = int(images_per_step)
        assert N % B == 0, "images_per_step must divide the batch"

    need = vmem_need(B)
    vmem_limit = int(min(budget, max(1.5 * need, 16 * 1024 * 1024)))

    cost = pl.CostEstimate(
        flops=2 * 2 * 9 * N * H * W * Cp * Cp,          # actual padded MXU work
        transcendentals=0,
        bytes_accessed=int(xpad.size * 2 + xres.size * 4
                           + (w1p.size + w2p.size) * 2
                           + (s1.size + b1.size + s2.size + b2.size) * 4
                           + N * H * W * Cp * out_bytes))

    def make_call(single_buffer_constants):
        # Grid-invariant operands get a single pipeline buffer (their
        # index_map is constant across the grid, so no double buffer needed).
        cmode = ({"pipeline_mode": pl.Buffered(1)}
                 if single_buffer_constants else {})
        return pl.pallas_call(
            basic_block_kernel,
            out_shape=jax.ShapeDtypeStruct((N, H, W, Cp), out_dtype),
            grid_spec=pltpu.PrefetchScalarGridSpec(
                num_scalar_prefetch=0,
                grid=(N // B,),
                in_specs=[
                    pl.BlockSpec((B, H + 2, W + 2, Cp), lambda n: (n, 0, 0, 0)),
                    pl.BlockSpec((B, H, W, Cp), lambda n: (n, 0, 0, 0)),
                    pl.BlockSpec((3, 3 * Cp, Cp), lambda n: (0, 0, 0), **cmode),
                    pl.BlockSpec((1, Cp), lambda n: (0, 0), **cmode),
                    pl.BlockSpec((1, Cp), lambda n: (0, 0), **cmode),
                    pl.BlockSpec((3, 3 * Cp, Cp), lambda n: (0, 0, 0), **cmode),
                    pl.BlockSpec((1, Cp), lambda n: (0, 0), **cmode),
                    pl.BlockSpec((1, Cp), lambda n: (0, 0), **cmode),
                ],
                out_specs=pl.BlockSpec((B, H, W, Cp), lambda n: (n, 0, 0, 0)),
                scratch_shapes=[pltpu.VMEM((B, H + 2, W + 2, Cp), jnp.bfloat16)],
            ),
            compiler_params=pltpu.CompilerParams(
                dimension_semantics=("parallel",),
                vmem_limit_bytes=vmem_limit),
            cost_estimate=cost,
        )

    args = (xpad, xres, w1p, s1, b1, w2p, s2, b2)
    try:
        out_padded = make_call(True)(*args)
    except Exception:
        # Fallback if this JAX/Mosaic build rejects single-buffered
        # pipeline_mode — costs only the extra weight double-buffer.
        out_padded = make_call(False)(*args)

    out = out_padded[..., :Cout]                   # drop lane padding
    return jnp.transpose(out, (0, 3, 1, 2))        # NHWC -> NCHW


def reference_forward(x_nchw, w1, g1, beta1, m1, v1, w2, g2, beta2, m2, v2,
                      eps=1e-5):
    """Pure-JAX f32 reference (NHWC convs via lax) for the correctness check."""
    x = jnp.transpose(x_nchw, (0, 2, 3, 1))

    def conv(inp, w):
        return lax.conv_general_dilated(
            inp, w, window_strides=(1, 1), padding="SAME",
            dimension_numbers=("NHWC", "HWIO", "NHWC"))

    def bn(inp, g, b, m, v):
        return (inp - m) / jnp.sqrt(v + eps) * g + b

    y = jnp.maximum(bn(conv(x, w1), g1, beta1, m1, v1), 0.0)
    z = bn(conv(y, w2), g2, beta2, m2, v2)
    out = jnp.maximum(z + x, 0.0)
    return jnp.transpose(out, (0, 3, 1, 2))


if __name__ == "__main__":
    # Small shapes: batch=2, inplanes=planes=4, spatial=16x16 (stride=1, no downsample).
    N, C, H, W = 2, 4, 16, 16
    key = jax.random.PRNGKey(0)
    kx, k1, k2, kg1, kb1, kg2, kb2, km1, kv1, km2, kv2 = jax.random.split(key, 11)

    x = jax.random.normal(kx, (N, C, H, W), dtype=jnp.float32)

    # Conv weights in HWIO (3, 3, Cin, Cout), deterministic.
    w1 = jax.random.normal(k1, (3, 3, C, C), dtype=jnp.float32) * 0.1
    w2 = jax.random.normal(k2, (3, 3, C, C), dtype=jnp.float32) * 0.1

    # BatchNorm parameters + running stats (inference mode), deterministic.
    g1 = 1.0 + 0.1 * jax.random.normal(kg1, (C,), dtype=jnp.float32)
    b1 = 0.1 * jax.random.normal(kb1, (C,), dtype=jnp.float32)
    m1 = 0.1 * jax.random.normal(km1, (C,), dtype=jnp.float32)
    v1 = 0.5 + jnp.abs(jax.random.normal(kv1, (C,), dtype=jnp.float32))
    g2 = 1.0 + 0.1 * jax.random.normal(kg2, (C,), dtype=jnp.float32)
    b2 = 0.1 * jax.random.normal(kb2, (C,), dtype=jnp.float32)
    m2 = 0.1 * jax.random.normal(km2, (C,), dtype=jnp.float32)
    v2 = 0.5 + jnp.abs(jax.random.normal(kv2, (C,), dtype=jnp.float32))

    out = basic_block_forward(x, w1, g1, b1, m1, v1, w2, g2, b2, m2, v2)
    out = jax.block_until_ready(out)

    ref = reference_forward(x, w1, g1, b1, m1, v1, w2, g2, b2, m2, v2)
    assert out.shape == (N, C, H, W)
    # Tolerance accounts for bf16 MXU inputs / bf16 mid scratch (f32
    # accumulation and f32 skip path): small deviations vs. the pure-f32
    # reference are expected.
    assert jnp.allclose(out, ref, atol=5e-2, rtol=5e-2), "mismatch vs reference"

    print("KERNEL_OK")
</pallas_src>

<mosaic_0001>
module attributes {stable_mosaic.version = 11 : i64} {
  func.func @basic_block_kernel(%arg0: i32, %arg1: memref<1x18x18x128xbf16, #tpu.memory_space<vmem>>, %arg2: memref<1x16x16x128xf32, #tpu.memory_space<vmem>>, %arg3: memref<3x384x128xbf16, #tpu.memory_space<vmem>>, %arg4: memref<1x128xf32, #tpu.memory_space<vmem>>, %arg5: memref<1x128xf32, #tpu.memory_space<vmem>>, %arg6: memref<3x384x128xbf16, #tpu.memory_space<vmem>>, %arg7: memref<1x128xf32, #tpu.memory_space<vmem>>, %arg8: memref<1x128xf32, #tpu.memory_space<vmem>>, %arg9: memref<1x16x16x128xf32, #tpu.memory_space<vmem>>, %arg10: memref<1x18x18x128xbf16, #tpu.memory_space<vmem>>) attributes {dimension_semantics = [#tpu.dimension_semantics<parallel>], iteration_bounds = array<i64: 2>, scalar_prefetch = 0 : i64, scratch_operands = 1 : i64, tpu.core_type = #tpu.core_type<tc>, window_params = [{transform_indices = @transform_0, window_bounds = array<i64: 1, 18, 18, 128>}, {transform_indices = @transform_1, window_bounds = array<i64: 1, 16, 16, 128>}, {pipeline_mode = #tpu.pipeline_mode<synchronous>, transform_indices = @transform_2, window_bounds = array<i64: 3, 384, 128>}, {pipeline_mode = #tpu.pipeline_mode<synchronous>, transform_indices = @transform_3, window_bounds = array<i64: 1, 128>}, {pipeline_mode = #tpu.pipeline_mode<synchronous>, transform_indices = @transform_4, window_bounds = array<i64: 1, 128>}, {pipeline_mode = #tpu.pipeline_mode<synchronous>, transform_indices = @transform_5, window_bounds = array<i64: 3, 384, 128>}, {pipeline_mode = #tpu.pipeline_mode<synchronous>, transform_indices = @transform_6, window_bounds = array<i64: 1, 128>}, {pipeline_mode = #tpu.pipeline_mode<synchronous>, transform_indices = @transform_7, window_bounds = array<i64: 1, 128>}, {transform_indices = @transform_8, window_bounds = array<i64: 1, 16, 16, 128>}]} {
    %cst = arith.constant 0.000000e+00 : bf16
    %0 = vector.broadcast %cst : bf16 to vector<1x1x18x128xbf16>
    %c0 = arith.constant 0 : index
    %c0_0 = arith.constant 0 : index
    %c0_1 = arith.constant 0 : index
    %c0_2 = arith.constant 0 : index
    %1 = vector.load %arg10[%c0, %c0_0, %c0_1, %c0_2] : memref<1x18x18x128xbf16, #tpu.memory_space<vmem>>, vector<1x1x18x128xbf16>
    tpu.vector_store %arg10[%c0, %c0_0, %c0_1, %c0_2], %0 {strides = array<i32>} : memref<1x18x18x128xbf16, #tpu.memory_space<vmem>>, vector<1x1x18x128xbf16>,
    %c0_3 = arith.constant 0 : index
    %c17 = arith.constant 17 : index
    %c0_4 = arith.constant 0 : index
    %c0_5 = arith.constant 0 : index
    %2 = vector.load %arg10[%c0_3, %c17, %c0_4, %c0_5] : memref<1x18x18x128xbf16, #tpu.memory_space<vmem>>, vector<1x1x18x128xbf16>
    tpu.vector_store %arg10[%c0_3, %c17, %c0_4, %c0_5], %0 {strides = array<i32>} : memref<1x18x18x128xbf16, #tpu.memory_space<vmem>>, vector<1x1x18x128xbf16>,
    %c0_6 = arith.constant 0 : index
    %c0_7 = arith.constant 0 : index
    %c0_8 = arith.constant 0 : index
    %c0_9 = arith.constant 0 : index
    %3 = vector.load %arg1[%c0_6, %c0_7, %c0_8, %c0_9] : memref<1x18x18x128xbf16, #tpu.memory_space<vmem>>, vector<1x18x18x128xbf16>
    %4 = vector.extract_strided_slice %3 {offsets = [0, 0, 0, 0], sizes = [1, 16, 18, 128], strides = [1, 1, 1, 1]} : vector<1x18x18x128xbf16> to vector<1x16x18x128xbf16>
    %5 = vector.extract_strided_slice %4 {offsets = [0, 0, 0, 0], sizes = [1, 16, 16, 128], strides = [1, 1, 1, 1]} : vector<1x16x18x128xbf16> to vector<1x16x16x128xbf16>
    %6 = vector.extract_strided_slice %4 {offsets = [0, 0, 1, 0], sizes = [1, 16, 16, 128], strides = [1, 1, 1, 1]} : vector<1x16x18x128xbf16> to vector<1x16x16x128xbf16>
    %7 = vector.extract_strided_slice %4 {offsets = [0, 0, 2, 0], sizes = [1, 16, 16, 128], strides = [1, 1, 1, 1]} : vector<1x16x18x128xbf16> to vector<1x16x16x128xbf16>
    %8 = tpu.concatenate %5, %6, %7 in 3 : vector<1x16x16x128xbf16>, vector<1x16x16x128xbf16>, vector<1x16x16x128xbf16> -> vector<1x16x16x384xbf16>
    %9 = vector.shape_cast %8 : vector<1x16x16x384xbf16> to vector<256x384xbf16>
    %c0_10 = arith.constant 0 : index
    %c0_11 = arith.constant 0 : index
    %c0_12 = arith.constant 0 : index
    %10 = vector.load %arg3[%c0_10, %c0_11, %c0_12] : memref<3x384x128xbf16, #tpu.memory_space<vmem>>, vector<1x384x128xbf16>
    %11 = vector.shape_cast %10 : vector<1x384x128xbf16> to vector<384x128xbf16>
    %cst_13 = arith.constant dense<0.000000e+00> : vector<256x128xf32>
    %12 = tpu.matmul %9, %11, %cst_13 {dimension_numbers = #tpu.dot_dimension_numbers<[1], [0], [0], [1], [0, 0, 1, 1], [], []>} : vector<256x384xbf16>, vector<384x128xbf16>, vector<256x128xf32> -> vector<256x128xf32>
    %13 = vector.extract_strided_slice %3 {offsets = [0, 1, 0, 0], sizes = [1, 16, 18, 128], strides = [1, 1, 1, 1]} : vector<1x18x18x128xbf16> to vector<1x16x18x128xbf16>
    %14 = vector.extract_strided_slice %13 {offsets = [0, 0, 0, 0], sizes = [1, 16, 16, 128], strides = [1, 1, 1, 1]} : vector<1x16x18x128xbf16> to vector<1x16x16x128xbf16>
    %15 = vector.extract_strided_slice %13 {offsets = [0, 0, 1, 0], sizes = [1, 16, 16, 128], strides = [1, 1, 1, 1]} : vector<1x16x18x128xbf16> to vector<1x16x16x128xbf16>
    %16 = vector.extract_strided_slice %13 {offsets = [0, 0, 2, 0], sizes = [1, 16, 16, 128], strides = [1, 1, 1, 1]} : vector<1x16x18x128xbf16> to vector<1x16x16x128xbf16>
    %17 = tpu.concatenate %14, %15, %16 in 3 : vector<1x16x16x128xbf16>, vector<1x16x16x128xbf16>, vector<1x16x16x128xbf16> -> vector<1x16x16x384xbf16>
    %18 = vector.shape_cast %17 : vector<1x16x16x384xbf16> to vector<256x384xbf16>
    %c1 = arith.constant 1 : index
    %c0_14 = arith.constant 0 : index
    %c0_15 = arith.constant 0 : index
    %19 = vector.load %arg3[%c1, %c0_14, %c0_15] : memref<3x384x128xbf16, #tpu.memory_space<vmem>>, vector<1x384x128xbf16>
    %20 = vector.shape_cast %19 : vector<1x384x128xbf16> to vector<384x128xbf16>
    %cst_16 = arith.constant dense<0.000000e+00> : vector<256x128xf32>
    %21 = tpu.matmul %18, %20, %cst_16 {dimension_numbers = #tpu.dot_dimension_numbers<[1], [0], [0], [1], [0, 0, 1, 1], [], []>} : vector<256x384xbf16>, vector<384x128xbf16>, vector<256x128xf32> -> vector<256x128xf32>
    %22 = arith.addf %12, %21 : vector<256x128xf32>
    %23 = vector.extract_strided_slice %3 {offsets = [0, 2, 0, 0], sizes = [1, 16, 18, 128], strides = [1, 1, 1, 1]} : vector<1x18x18x128xbf16> to vector<1x16x18x128xbf16>
    %24 = vector.extract_strided_slice %23 {offsets = [0, 0, 0, 0], sizes = [1, 16, 16, 128], strides = [1, 1, 1, 1]} : vector<1x16x18x128xbf16> to vector<1x16x16x128xbf16>
    %25 = vector.extract_strided_slice %23 {offsets = [0, 0, 1, 0], sizes = [1, 16, 16, 128], strides = [1, 1, 1, 1]} : vector<1x16x18x128xbf16> to vector<1x16x16x128xbf16>
    %26 = vector.extract_strided_slice %23 {offsets = [0, 0, 2, 0], sizes = [1, 16, 16, 128], strides = [1, 1, 1, 1]} : vector<1x16x18x128xbf16> to vector<1x16x16x128xbf16>
    %27 = tpu.concatenate %24, %25, %26 in 3 : vector<1x16x16x128xbf16>, vector<1x16x16x128xbf16>, vector<1x16x16x128xbf16> -> vector<1x16x16x384xbf16>
    %28 = vector.shape_cast %27 : vector<1x16x16x384xbf16> to vector<256x384xbf16>
    %c2 = arith.constant 2 : index
    %c0_17 = arith.constant 0 : index
    %c0_18 = arith.constant 0 : index
    %29 = vector.load %arg3[%c2, %c0_17, %c0_18] : memref<3x384x128xbf16, #tpu.memory_space<vmem>>, vector<1x384x128xbf16>
    %30 = vector.shape_cast %29 : vector<1x384x128xbf16> to vector<384x128xbf16>
    %cst_19 = arith.constant dense<0.000000e+00> : vector<256x128xf32>
    %31 = tpu.matmul %28, %30, %cst_19 {dimension_numbers = #tpu.dot_dimension_numbers<[1], [0], [0], [1], [0, 0, 1, 1], [], []>} : vector<256x384xbf16>, vector<384x128xbf16>, vector<256x128xf32> -> vector<256x128xf32>
    %32 = arith.addf %22, %31 : vector<256x128xf32>
    %c0_20 = arith.constant 0 : index
    %c0_21 = arith.constant 0 : index
    %33 = vector.load %arg4[%c0_20, %c0_21] : memref<1x128xf32, #tpu.memory_space<vmem>>, vector<1x128xf32>
    %34 = vector.shape_cast %33 : vector<1x128xf32> to vector<128xf32>
    %35 = vector.shape_cast %34 : vector<128xf32> to vector<1x128xf32>
    %36 = vector.broadcast %35 : vector<1x128xf32> to vector<256x128xf32>
    %37 = arith.mulf %32, %36 : vector<256x128xf32>
    %c0_22 = arith.constant 0 : index
    %c0_23 = arith.constant 0 : index
    %38 = vector.load %arg5[%c0_22, %c0_23] : memref<1x128xf32, #tpu.memory_space<vmem>>, vector<1x128xf32>
    %39 = vector.shape_cast %38 : vector<1x128xf32> to vector<128xf32>
    %40 = vector.shape_cast %39 : vector<128xf32> to vector<1x128xf32>
    %41 = vector.broadcast %40 : vector<1x128xf32> to vector<256x128xf32>
    %42 = arith.addf %37, %41 : vector<256x128xf32>
    %cst_24 = arith.constant 0.000000e+00 : f32
    %43 = vector.broadcast %cst_24 : f32 to vector<256x128xf32>
    %44 = arith.maximumf %42, %43 : vector<256x128xf32>
    %45 = vector.shape_cast %44 : vector<256x128xf32> to vector<1x16x16x128xf32>
    %46 = arith.truncf %45 : vector<1x16x16x128xf32> to vector<1x16x16x128xbf16>
    %cst_25 = arith.constant 0.000000e+00 : bf16
    %47 = vector.broadcast %cst_25 : bf16 to vector<1x16x1x128xbf16>
    %48 = tpu.concatenate %47, %46, %47 in 2 : vector<1x16x1x128xbf16>, vector<1x16x16x128xbf16>, vector<1x16x1x128xbf16> -> vector<1x16x18x128xbf16>
    %c0_26 = arith.constant 0 : index
    %c1_27 = arith.constant 1 : index
    %c0_28 = arith.constant 0 : index
    %c0_29 = arith.constant 0 : index
    %49 = vector.load %arg10[%c0_26, %c1_27, %c0_28, %c0_29] : memref<1x18x18x128xbf16, #tpu.memory_space<vmem>>, vector<1x16x18x128xbf16>
    tpu.vector_store %arg10[%c0_26, %c1_27, %c0_28, %c0_29], %48 {strides = array<i32>} : memref<1x18x18x128xbf16, #tpu.memory_space<vmem>>, vector<1x16x18x128xbf16>,
    %c0_30 = arith.constant 0 : index
    %c0_31 = arith.constant 0 : index
    %c0_32 = arith.constant 0 : index
    %c0_33 = arith.constant 0 : index
    %50 = vector.load %arg10[%c0_30, %c0_31, %c0_32, %c0_33] : memref<1x18x18x128xbf16, #tpu.memory_space<vmem>>, vector<1x18x18x128xbf16>
    %51 = vector.extract_strided_slice %50 {offsets = [0, 0, 0, 0], sizes = [1, 16, 18, 128], strides = [1, 1, 1, 1]} : vector<1x18x18x128xbf16> to vector<1x16x18x128xbf16>
    %52 = vector.extract_strided_slice %51 {offsets = [0, 0, 0, 0], sizes = [1, 16, 16, 128], strides = [1, 1, 1, 1]} : vector<1x16x18x128xbf16> to vector<1x16x16x128xbf16>
    %53 = vector.extract_strided_slice %51 {offsets = [0, 0, 1, 0], sizes = [1, 16, 16, 128], strides = [1, 1, 1, 1]} : vector<1x16x18x128xbf16> to vector<1x16x16x128xbf16>
    %54 = vector.extract_strided_slice %51 {offsets = [0, 0, 2, 0], sizes = [1, 16, 16, 128], strides = [1, 1, 1, 1]} : vector<1x16x18x128xbf16> to vector<1x16x16x128xbf16>
    %55 = tpu.concatenate %52, %53, %54 in 3 : vector<1x16x16x128xbf16>, vector<1x16x16x128xbf16>, vector<1x16x16x128xbf16> -> vector<1x16x16x384xbf16>
    %56 = vector.shape_cast %55 : vector<1x16x16x384xbf16> to vector<256x384xbf16>
    %c0_34 = arith.constant 0 : index
    %c0_35 = arith.constant 0 : index
    %c0_36 = arith.constant 0 : index
    %57 = vector.load %arg6[%c0_34, %c0_35, %c0_36] : memref<3x384x128xbf16, #tpu.memory_space<vmem>>, vector<1x384x128xbf16>
    %58 = vector.shape_cast %57 : vector<1x384x128xbf16> to vector<384x128xbf16>
    %cst_37 = arith.constant dense<0.000000e+00> : vector<256x128xf32>
    %59 = tpu.matmul %56, %58, %cst_37 {dimension_numbers = #tpu.dot_dimension_numbers<[1], [0], [0], [1], [0, 0, 1, 1], [], []>} : vector<256x384xbf16>, vector<384x128xbf16>, vector<256x128xf32> -> vector<256x128xf32>
    %60 = vector.extract_strided_slice %50 {offsets = [0, 1, 0, 0], sizes = [1, 16, 18, 128], strides = [1, 1, 1, 1]} : vector<1x18x18x128xbf16> to vector<1x16x18x128xbf16>
    %61 = vector.extract_strided_slice %60 {offsets = [0, 0, 0, 0], sizes = [1, 16, 16, 128], strides = [1, 1, 1, 1]} : vector<1x16x18x128xbf16> to vector<1x16x16x128xbf16>
    %62 = vector.extract_strided_slice %60 {offsets = [0, 0, 1, 0], sizes = [1, 16, 16, 128], strides = [1, 1, 1, 1]} : vector<1x16x18x128xbf16> to vector<1x16x16x128xbf16>
    %63 = vector.extract_strided_slice %60 {offsets = [0, 0, 2, 0], sizes = [1, 16, 16, 128], strides = [1, 1, 1, 1]} : vector<1x16x18x128xbf16> to vector<1x16x16x128xbf16>
    %64 = tpu.concatenate %61, %62, %63 in 3 : vector<1x16x16x128xbf16>, vector<1x16x16x128xbf16>, vector<1x16x16x128xbf16> -> vector<1x16x16x384xbf16>
    %65 = vector.shape_cast %64 : vector<1x16x16x384xbf16> to vector<256x384xbf16>
    %c1_38 = arith.constant 1 : index
    %c0_39 = arith.constant 0 : index
    %c0_40 = arith.constant 0 : index
    %66 = vector.load %arg6[%c1_38, %c0_39, %c0_40] : memref<3x384x128xbf16, #tpu.memory_space<vmem>>, vector<1x384x128xbf16>
    %67 = vector.shape_cast %66 : vector<1x384x128xbf16> to vector<384x128xbf16>
    %cst_41 = arith.constant dense<0.000000e+00> : vector<256x128xf32>
    %68 = tpu.matmul %65, %67, %cst_41 {dimension_numbers = #tpu.dot_dimension_numbers<[1], [0], [0], [1], [0, 0, 1, 1], [], []>} : vector<256x384xbf16>, vector<384x128xbf16>, vector<256x128xf32> -> vector<256x128xf32>
    %69 = arith.addf %59, %68 : vector<256x128xf32>
    %70 = vector.extract_strided_slice %50 {offsets = [0, 2, 0, 0], sizes = [1, 16, 18, 128], strides = [1, 1, 1, 1]} : vector<1x18x18x128xbf16> to vector<1x16x18x128xbf16>
    %71 = vector.extract_strided_slice %70 {offsets = [0, 0, 0, 0], sizes = [1, 16, 16, 128], strides = [1, 1, 1, 1]} : vector<1x16x18x128xbf16> to vector<1x16x16x128xbf16>
    %72 = vector.extract_strided_slice %70 {offsets = [0, 0, 1, 0], sizes = [1, 16, 16, 128], strides = [1, 1, 1, 1]} : vector<1x16x18x128xbf16> to vector<1x16x16x128xbf16>
    %73 = vector.extract_strided_slice %70 {offsets = [0, 0, 2, 0], sizes = [1, 16, 16, 128], strides = [1, 1, 1, 1]} : vector<1x16x18x128xbf16> to vector<1x16x16x128xbf16>
    %74 = tpu.concatenate %71, %72, %73 in 3 : vector<1x16x16x128xbf16>, vector<1x16x16x128xbf16>, vector<1x16x16x128xbf16> -> vector<1x16x16x384xbf16>
    %75 = vector.shape_cast %74 : vector<1x16x16x384xbf16> to vector<256x384xbf16>
    %c2_42 = arith.constant 2 : index
    %c0_43 = arith.constant 0 : index
    %c0_44 = arith.constant 0 : index
    %76 = vector.load %arg6[%c2_42, %c0_43, %c0_44] : memref<3x384x128xbf16, #tpu.memory_space<vmem>>, vector<1x384x128xbf16>
    %77 = vector.shape_cast %76 : vector<1x384x128xbf16> to vector<384x128xbf16>
    %cst_45 = arith.constant dense<0.000000e+00> : vector<256x128xf32>
    %78 = tpu.matmul %75, %77, %cst_45 {dimension_numbers = #tpu.dot_dimension_numbers<[1], [0], [0], [1], [0, 0, 1, 1], [], []>} : vector<256x384xbf16>, vector<384x128xbf16>, vector<256x128xf32> -> vector<256x128xf32>
    %79 = arith.addf %69, %78 : vector<256x128xf32>
    %c0_46 = arith.constant 0 : index
    %c0_47 = arith.constant 0 : index
    %80 = vector.load %arg7[%c0_46, %c0_47] : memref<1x128xf32, #tpu.memory_space<vmem>>, vector<1x128xf32>
    %81 = vector.shape_cast %80 : vector<1x128xf32> to vector<128xf32>
    %82 = vector.shape_cast %81 : vector<128xf32> to vector<1x128xf32>
    %83 = vector.broadcast %82 : vector<1x128xf32> to vector<256x128xf32>
    %84 = arith.mulf %79, %83 : vector<256x128xf32>
    %c0_48 = arith.constant 0 : index
    %c0_49 = arith.constant 0 : index
    %85 = vector.load %arg8[%c0_48, %c0_49] : memref<1x128xf32, #tpu.memory_space<vmem>>, vector<1x128xf32>
    %86 = vector.shape_cast %85 : vector<1x128xf32> to vector<128xf32>
    %87 = vector.shape_cast %86 : vector<128xf32> to vector<1x128xf32>
    %88 = vector.broadcast %87 : vector<1x128xf32> to vector<256x128xf32>
    %89 = arith.addf %84, %88 : vector<256x128xf32>
    %90 = vector.shape_cast %89 : vector<256x128xf32> to vector<1x16x16x128xf32>
    %c0_50 = arith.constant 0 : index
    %c0_51 = arith.constant 0 : index
    %c0_52 = arith.constant 0 : index
    %c0_53 = arith.constant 0 : index
    %91 = vector.load %arg2[%c0_50, %c0_51, %c0_52, %c0_53] : memref<1x16x16x128xf32, #tpu.memory_space<vmem>>, vector<1x16x16x128xf32>
    %92 = arith.addf %90, %91 : vector<1x16x16x128xf32>
    %cst_54 = arith.constant 0.000000e+00 : f32
    %93 = vector.broadcast %cst_54 : f32 to vector<1x16x16x128xf32>
    %94 = arith.maximumf %92, %93 : vector<1x16x16x128xf32>
    %c0_55 = arith.constant 0 : index
    %c0_56 = arith.constant 0 : index
    %c0_57 = arith.constant 0 : index
    %c0_58 = arith.constant 0 : index
    %95 = vector.load %arg9[%c0_55, %c0_56, %c0_57, %c0_58] : memref<1x16x16x128xf32, #tpu.memory_space<vmem>>, vector<1x16x16x128xf32>
    tpu.vector_store %arg9[%c0_55, %c0_56, %c0_57, %c0_58], %94 {strides = array<i32>} : memref<1x16x16x128xf32, #tpu.memory_space<vmem>>, vector<1x16x16x128xf32>,
    return
  }
  func.func @transform_0(%arg0: i32) -> (i32, i32, i32, i32) {
    %c0_i32 = arith.constant 0 : i32
    %c0_i32_0 = arith.constant 0 : i32
    %c0_i32_1 = arith.constant 0 : i32
    %c0_i32_2 = arith.constant 0 : i32
    return %arg0, %c0_i32, %c0_i32_0, %c0_i32_1 : i32, i32, i32, i32
  }
  func.func @transform_1(%arg0: i32) -> (i32, i32, i32, i32) {
    %c0_i32 = arith.constant 0 : i32
    %c0_i32_0 = arith.constant 0 : i32
    %c0_i32_1 = arith.constant 0 : i32
    %c0_i32_2 = arith.constant 0 : i32
    return %arg0, %c0_i32, %c0_i32_0, %c0_i32_1 : i32, i32, i32, i32
  }
  func.func @transform_2(%arg0: i32) -> (i32, i32, i32) {
    %c0_i32 = arith.constant 0 : i32
    %c0_i32_0 = arith.constant 0 : i32
    %c0_i32_1 = arith.constant 0 : i32
    %c0_i32_2 = arith.constant 0 : i32
    return %c0_i32, %c0_i32_0, %c0_i32_1 : i32, i32, i32
  }
  func.func @transform_3(%arg0: i32) -> (i32, i32) {
    %c0_i32 = arith.constant 0 : i32
    %c0_i32_0 = arith.constant 0 : i32
    %c0_i32_1 = arith.constant 0 : i32
    return %c0_i32, %c0_i32_0 : i32, i32
  }
  func.func @transform_4(%arg0: i32) -> (i32, i32) {
    %c0_i32 = arith.constant 0 : i32
    %c0_i32_0 = arith.constant 0 : i32
    %c0_i32_1 = arith.constant 0 : i32
    return %c0_i32, %c0_i32_0 : i32, i32
  }
  func.func @transform_5(%arg0: i32) -> (i32, i32, i32) {
    %c0_i32 = arith.constant 0 : i32
    %c0_i32_0 = arith.constant 0 : i32
    %c0_i32_1 = arith.constant 0 : i32
    %c0_i32_2 = arith.constant 0 : i32
    return %c0_i32, %c0_i32_0, %c0_i32_1 : i32, i32, i32
  }
  func.func @transform_6(%arg0: i32) -> (i32, i32) {
    %c0_i32 = arith.constant 0 : i32
    %c0_i32_0 = arith.constant 0 : i32
    %c0_i32_1 = arith.constant 0 : i32
    return %c0_i32, %c0_i32_0 : i32, i32
  }
  func.func @transform_7(%arg0: i32) -> (i32, i32) {
    %c0_i32 = arith.constant 0 : i32
    %c0_i32_0 = arith.constant 0 : i32
    %c0_i32_1 = arith.constant 0 : i32
    return %c0_i32, %c0_i32_0 : i32, i32
  }
  func.func @transform_8(%arg0: i32) -> (i32, i32, i32, i32) {
    %c0_i32 = arith.constant 0 : i32
    %c0_i32_0 = arith.constant 0 : i32
    %c0_i32_1 = arith.constant 0 : i32
    %c0_i32_2 = arith.constant 0 : i32
    return %arg0, %c0_i32, %c0_i32_0, %c0_i32_1 : i32, i32, i32, i32
  }
}

module attributes {stable_mosaic.version = 11 : i64} {
  func.func @basic_block_kernel(%arg0: i32, %arg1: memref<1x18x18x128xbf16, #tpu.memory_space<vmem>>, %arg2: memref<1x16x16x128xf32, #tpu.memory_space<vmem>>, %arg3: memref<3x384x128xbf16, #tpu.memory_space<vmem>>, %arg4: memref<1x128xf32, #tpu.memory_space<vmem>>, %arg5: memref<1x128xf32, #tpu.memory_space<vmem>>, %arg6: memref<3x384x128xbf16, #tpu.memory_space<vmem>>, %arg7: memref<1x128xf32, #tpu.memory_space<vmem>>, %arg8: memref<1x128xf32, #tpu.memory_space<vmem>>, %arg9: memref<1x16x16x128xf32, #tpu.memory_space<vmem>>, %arg10: memref<1x18x18x128xbf16, #tpu.memory_space<vmem>>) attributes {dimension_semantics = [#tpu.dimension_semantics<parallel>], iteration_bounds = array<i64: 2>, scalar_prefetch = 0 : i64, scratch_operands = 1 : i64, tpu.core_type = #tpu.core_type<tc>, window_params = [{transform_indices = @transform_0, window_bounds = array<i64: 1, 18, 18, 128>}, {transform_indices = @transform_1, window_bounds = array<i64: 1, 16, 16, 128>}, {pipeline_mode = #tpu.pipeline_mode<synchronous>, transform_indices = @transform_2, window_bounds = array<i64: 3, 384, 128>}, {pipeline_mode = #tpu.pipeline_mode<synchronous>, transform_indices = @transform_3, window_bounds = array<i64: 1, 128>}, {pipeline_mode = #tpu.pipeline_mode<synchronous>, transform_indices = @transform_4, window_bounds = array<i64: 1, 128>}, {pipeline_mode = #tpu.pipeline_mode<synchronous>, transform_indices = @transform_5, window_bounds = array<i64: 3, 384, 128>}, {pipeline_mode = #tpu.pipeline_mode<synchronous>, transform_indices = @transform_6, window_bounds = array<i64: 1, 128>}, {pipeline_mode = #tpu.pipeline_mode<synchronous>, transform_indices = @transform_7, window_bounds = array<i64: 1, 128>}, {transform_indices = @transform_8, window_bounds = array<i64: 1, 16, 16, 128>}]} {
    %cst = arith.constant 0.000000e+00 : bf16
    %0 = vector.broadcast %cst : bf16 to vector<1x1x18x128xbf16>
    %c0 = arith.constant 0 : index
    %c0_0 = arith.constant 0 : index
    %c0_1 = arith.constant 0 : index
    %c0_2 = arith.constant 0 : index
    %1 = vector.load %arg10[%c0, %c0_0, %c0_1, %c0_2] : memref<1x18x18x128xbf16, #tpu.memory_space<vmem>>, vector<1x1x18x128xbf16>
    tpu.vector_store %arg10[%c0, %c0_0, %c0_1, %c0_2], %0 {strides = array<i32>} : memref<1x18x18x128xbf16, #tpu.memory_space<vmem>>, vector<1x1x18x128xbf16>,
    %c0_3 = arith.constant 0 : index
    %c17 = arith.constant 17 : index
    %c0_4 = arith.constant 0 : index
    %c0_5 = arith.constant 0 : index
    %2 = vector.load %arg10[%c0_3, %c17, %c0_4, %c0_5] : memref<1x18x18x128xbf16, #tpu.memory_space<vmem>>, vector<1x1x18x128xbf16>
    tpu.vector_store %arg10[%c0_3, %c17, %c0_4, %c0_5], %0 {strides = array<i32>} : memref<1x18x18x128xbf16, #tpu.memory_space<vmem>>, vector<1x1x18x128xbf16>,
    %c0_6 = arith.constant 0 : index
    %c0_7 = arith.constant 0 : index
    %c0_8 = arith.constant 0 : index
    %c0_9 = arith.constant 0 : index
    %3 = vector.load %arg1[%c0_6, %c0_7, %c0_8, %c0_9] : memref<1x18x18x128xbf16, #tpu.memory_space<vmem>>, vector<1x18x18x128xbf16>
    %4 = vector.extract_strided_slice %3 {offsets = [0, 0, 0, 0], sizes = [1, 16, 18, 128], strides = [1, 1, 1, 1]} : vector<1x18x18x128xbf16> to vector<1x16x18x128xbf16>
    %5 = vector.extract_strided_slice %4 {offsets = [0, 0, 0, 0], sizes = [1, 16, 16, 128], strides = [1, 1, 1, 1]} : vector<1x16x18x128xbf16> to vector<1x16x16x128xbf16>
    %6 = vector.extract_strided_slice %4 {offsets = [0, 0, 1, 0], sizes = [1, 16, 16, 128], strides = [1, 1, 1, 1]} : vector<1x16x18x128xbf16> to vector<1x16x16x128xbf16>
    %7 = vector.extract_strided_slice %4 {offsets = [0, 0, 2, 0], sizes = [1, 16, 16, 128], strides = [1, 1, 1, 1]} : vector<1x16x18x128xbf16> to vector<1x16x16x128xbf16>
    %8 = tpu.concatenate %5, %6, %7 in 3 : vector<1x16x16x128xbf16>, vector<1x16x16x128xbf16>, vector<1x16x16x128xbf16> -> vector<1x16x16x384xbf16>
    %9 = vector.shape_cast %8 : vector<1x16x16x384xbf16> to vector<256x384xbf16>
    %c0_10 = arith.constant 0 : index
    %c0_11 = arith.constant 0 : index
    %c0_12 = arith.constant 0 : index
    %10 = vector.load %arg3[%c0_10, %c0_11, %c0_12] : memref<3x384x128xbf16, #tpu.memory_space<vmem>>, vector<1x384x128xbf16>
    %11 = vector.shape_cast %10 : vector<1x384x128xbf16> to vector<384x128xbf16>
    %cst_13 = arith.constant dense<0.000000e+00> : vector<256x128xf32>
    %12 = tpu.matmul %9, %11, %cst_13 {dimension_numbers = #tpu.dot_dimension_numbers<[1], [0], [0], [1], [0, 0, 1, 1], [], []>} : vector<256x384xbf16>, vector<384x128xbf16>, vector<256x128xf32> -> vector<256x128xf32>
    %13 = vector.extract_strided_slice %3 {offsets = [0, 1, 0, 0], sizes = [1, 16, 18, 128], strides = [1, 1, 1, 1]} : vector<1x18x18x128xbf16> to vector<1x16x18x128xbf16>
    %14 = vector.extract_strided_slice %13 {offsets = [0, 0, 0, 0], sizes = [1, 16, 16, 128], strides = [1, 1, 1, 1]} : vector<1x16x18x128xbf16> to vector<1x16x16x128xbf16>
    %15 = vector.extract_strided_slice %13 {offsets = [0, 0, 1, 0], sizes = [1, 16, 16, 128], strides = [1, 1, 1, 1]} : vector<1x16x18x128xbf16> to vector<1x16x16x128xbf16>
    %16 = vector.extract_strided_slice %13 {offsets = [0, 0, 2, 0], sizes = [1, 16, 16, 128], strides = [1, 1, 1, 1]} : vector<1x16x18x128xbf16> to vector<1x16x16x128xbf16>
    %17 = tpu.concatenate %14, %15, %16 in 3 : vector<1x16x16x128xbf16>, vector<1x16x16x128xbf16>, vector<1x16x16x128xbf16> -> vector<1x16x16x384xbf16>
    %18 = vector.shape_cast %17 : vector<1x16x16x384xbf16> to vector<256x384xbf16>
    %c1 = arith.constant 1 : index
    %c0_14 = arith.constant 0 : index
    %c0_15 = arith.constant 0 : index
    %19 = vector.load %arg3[%c1, %c0_14, %c0_15] : memref<3x384x128xbf16, #tpu.memory_space<vmem>>, vector<1x384x128xbf16>
    %20 = vector.shape_cast %19 : vector<1x384x128xbf16> to vector<384x128xbf16>
    %cst_16 = arith.constant dense<0.000000e+00> : vector<256x128xf32>
    %21 = tpu.matmul %18, %20, %cst_16 {dimension_numbers = #tpu.dot_dimension_numbers<[1], [0], [0], [1], [0, 0, 1, 1], [], []>} : vector<256x384xbf16>, vector<384x128xbf16>, vector<256x128xf32> -> vector<256x128xf32>
    %22 = arith.addf %12, %21 : vector<256x128xf32>
    %23 = vector.extract_strided_slice %3 {offsets = [0, 2, 0, 0], sizes = [1, 16, 18, 128], strides = [1, 1, 1, 1]} : vector<1x18x18x128xbf16> to vector<1x16x18x128xbf16>
    %24 = vector.extract_strided_slice %23 {offsets = [0, 0, 0, 0], sizes = [1, 16, 16, 128], strides = [1, 1, 1, 1]} : vector<1x16x18x128xbf16> to vector<1x16x16x128xbf16>
    %25 = vector.extract_strided_slice %23 {offsets = [0, 0, 1, 0], sizes = [1, 16, 16, 128], strides = [1, 1, 1, 1]} : vector<1x16x18x128xbf16> to vector<1x16x16x128xbf16>
    %26 = vector.extract_strided_slice %23 {offsets = [0, 0, 2, 0], sizes = [1, 16, 16, 128], strides = [1, 1, 1, 1]} : vector<1x16x18x128xbf16> to vector<1x16x16x128xbf16>
    %27 = tpu.concatenate %24, %25, %26 in 3 : vector<1x16x16x128xbf16>, vector<1x16x16x128xbf16>, vector<1x16x16x128xbf16> -> vector<1x16x16x384xbf16>
    %28 = vector.shape_cast %27 : vector<1x16x16x384xbf16> to vector<256x384xbf16>
    %c2 = arith.constant 2 : index
    %c0_17 = arith.constant 0 : index
    %c0_18 = arith.constant 0 : index
    %29 = vector.load %arg3[%c2, %c0_17, %c0_18] : memref<3x384x128xbf16, #tpu.memory_space<vmem>>, vector<1x384x128xbf16>
    %30 = vector.shape_cast %29 : vector<1x384x128xbf16> to vector<384x128xbf16>
    %cst_19 = arith.constant dense<0.000000e+00> : vector<256x128xf32>
    %31 = tpu.matmul %28, %30, %cst_19 {dimension_numbers = #tpu.dot_dimension_numbers<[1], [0], [0], [1], [0, 0, 1, 1], [], []>} : vector<256x384xbf16>, vector<384x128xbf16>, vector<256x128xf32> -> vector<256x128xf32>
    %32 = arith.addf %22, %31 : vector<256x128xf32>
    %c0_20 = arith.constant 0 : index
    %c0_21 = arith.constant 0 : index
    %33 = vector.load %arg4[%c0_20, %c0_21] : memref<1x128xf32, #tpu.memory_space<vmem>>, vector<1x128xf32>
    %34 = vector.shape_cast %33 : vector<1x128xf32> to vector<128xf32>
    %35 = vector.shape_cast %34 : vector<128xf32> to vector<1x128xf32>
    %36 = vector.broadcast %35 : vector<1x128xf32> to vector<256x128xf32>
    %37 = arith.mulf %32, %36 : vector<256x128xf32>
    %c0_22 = arith.constant 0 : index
    %c0_23 = arith.constant 0 : index
    %38 = vector.load %arg5[%c0_22, %c0_23] : memref<1x128xf32, #tpu.memory_space<vmem>>, vector<1x128xf32>
    %39 = vector.shape_cast %38 : vector<1x128xf32> to vector<128xf32>
    %40 = vector.shape_cast %39 : vector<128xf32> to vector<1x128xf32>
    %41 = vector.broadcast %40 : vector<1x128xf32> to vector<256x128xf32>
    %42 = arith.addf %37, %41 : vector<256x128xf32>
    %cst_24 = arith.constant 0.000000e+00 : f32
    %43 = vector.broadcast %cst_24 : f32 to vector<256x128xf32>
    %44 = arith.maximumf %42, %43 : vector<256x128xf32>
    %45 = vector.shape_cast %44 : vector<256x128xf32> to vector<1x16x16x128xf32>
    %46 = arith.truncf %45 : vector<1x16x16x128xf32> to vector<1x16x16x128xbf16>
    %cst_25 = arith.constant 0.000000e+00 : bf16
    %47 = vector.broadcast %cst_25 : bf16 to vector<1x16x1x128xbf16>
    %48 = tpu.concatenate %47, %46, %47 in 2 : vector<1x16x1x128xbf16>, vector<1x16x16x128xbf16>, vector<1x16x1x128xbf16> -> vector<1x16x18x128xbf16>
    %c0_26 = arith.constant 0 : index
    %c1_27 = arith.constant 1 : index
    %c0_28 = arith.constant 0 : index
    %c0_29 = arith.constant 0 : index
    %49 = vector.load %arg10[%c0_26, %c1_27, %c0_28, %c0_29] : memref<1x18x18x128xbf16, #tpu.memory_space<vmem>>, vector<1x16x18x128xbf16>
    tpu.vector_store %arg10[%c0_26, %c1_27, %c0_28, %c0_29], %48 {strides = array<i32>} : memref<1x18x18x128xbf16, #tpu.memory_space<vmem>>, vector<1x16x18x128xbf16>,
    %c0_30 = arith.constant 0 : index
    %c0_31 = arith.constant 0 : index
    %c0_32 = arith.constant 0 : index
    %c0_33 = arith.constant 0 : index
    %50 = vector.load %arg10[%c0_30, %c0_31, %c0_32, %c0_33] : memref<1x18x18x128xbf16, #tpu.memory_space<vmem>>, vector<1x18x18x128xbf16>
    %51 = vector.extract_strided_slice %50 {offsets = [0, 0, 0, 0], sizes = [1, 16, 18, 128], strides = [1, 1, 1, 1]} : vector<1x18x18x128xbf16> to vector<1x16x18x128xbf16>
    %52 = vector.extract_strided_slice %51 {offsets = [0, 0, 0, 0], sizes = [1, 16, 16, 128], strides = [1, 1, 1, 1]} : vector<1x16x18x128xbf16> to vector<1x16x16x128xbf16>
    %53 = vector.extract_strided_slice %51 {offsets = [0, 0, 1, 0], sizes = [1, 16, 16, 128], strides = [1, 1, 1, 1]} : vector<1x16x18x128xbf16> to vector<1x16x16x128xbf16>
    %54 = vector.extract_strided_slice %51 {offsets = [0, 0, 2, 0], sizes = [1, 16, 16, 128], strides = [1, 1, 1, 1]} : vector<1x16x18x128xbf16> to vector<1x16x16x128xbf16>
    %55 = tpu.concatenate %52, %53, %54 in 3 : vector<1x16x16x128xbf16>, vector<1x16x16x128xbf16>, vector<1x16x16x128xbf16> -> vector<1x16x16x384xbf16>
    %56 = vector.shape_cast %55 : vector<1x16x16x384xbf16> to vector<256x384xbf16>
    %c0_34 = arith.constant 0 : index
    %c0_35 = arith.constant 0 : index
    %c0_36 = arith.constant 0 : index
    %57 = vector.load %arg6[%c0_34, %c0_35, %c0_36] : memref<3x384x128xbf16, #tpu.memory_space<vmem>>, vector<1x384x128xbf16>
    %58 = vector.shape_cast %57 : vector<1x384x128xbf16> to vector<384x128xbf16>
    %cst_37 = arith.constant dense<0.000000e+00> : vector<256x128xf32>
    %59 = tpu.matmul %56, %58, %cst_37 {dimension_numbers = #tpu.dot_dimension_numbers<[1], [0], [0], [1], [0, 0, 1, 1], [], []>} : vector<256x384xbf16>, vector<384x128xbf16>, vector<256x128xf32> -> vector<256x128xf32>
    %60 = vector.extract_strided_slice %50 {offsets = [0, 1, 0, 0], sizes = [1, 16, 18, 128], strides = [1, 1, 1, 1]} : vector<1x18x18x128xbf16> to vector<1x16x18x128xbf16>
    %61 = vector.extract_strided_slice %60 {offsets = [0, 0, 0, 0], sizes = [1, 16, 16, 128], strides = [1, 1, 1, 1]} : vector<1x16x18x128xbf16> to vector<1x16x16x128xbf16>
    %62 = vector.extract_strided_slice %60 {offsets = [0, 0, 1, 0], sizes = [1, 16, 16, 128], strides = [1, 1, 1, 1]} : vector<1x16x18x128xbf16> to vector<1x16x16x128xbf16>
    %63 = vector.extract_strided_slice %60 {offsets = [0, 0, 2, 0], sizes = [1, 16, 16, 128], strides = [1, 1, 1, 1]} : vector<1x16x18x128xbf16> to vector<1x16x16x128xbf16>
    %64 = tpu.concatenate %61, %62, %63 in 3 : vector<1x16x16x128xbf16>, vector<1x16x16x128xbf16>, vector<1x16x16x128xbf16> -> vector<1x16x16x384xbf16>
    %65 = vector.shape_cast %64 : vector<1x16x16x384xbf16> to vector<256x384xbf16>
    %c1_38 = arith.constant 1 : index
    %c0_39 = arith.constant 0 : index
    %c0_40 = arith.constant 0 : index
    %66 = vector.load %arg6[%c1_38, %c0_39, %c0_40] : memref<3x384x128xbf16, #tpu.memory_space<vmem>>, vector<1x384x128xbf16>
    %67 = vector.shape_cast %66 : vector<1x384x128xbf16> to vector<384x128xbf16>
    %cst_41 = arith.constant dense<0.000000e+00> : vector<256x128xf32>
    %68 = tpu.matmul %65, %67, %cst_41 {dimension_numbers = #tpu.dot_dimension_numbers<[1], [0], [0], [1], [0, 0, 1, 1], [], []>} : vector<256x384xbf16>, vector<384x128xbf16>, vector<256x128xf32> -> vector<256x128xf32>
    %69 = arith.addf %59, %68 : vector<256x128xf32>
    %70 = vector.extract_strided_slice %50 {offsets = [0, 2, 0, 0], sizes = [1, 16, 18, 128], strides = [1, 1, 1, 1]} : vector<1x18x18x128xbf16> to vector<1x16x18x128xbf16>
    %71 = vector.extract_strided_slice %70 {offsets = [0, 0, 0, 0], sizes = [1, 16, 16, 128], strides = [1, 1, 1, 1]} : vector<1x16x18x128xbf16> to vector<1x16x16x128xbf16>
    %72 = vector.extract_strided_slice %70 {offsets = [0, 0, 1, 0], sizes = [1, 16, 16, 128], strides = [1, 1, 1, 1]} : vector<1x16x18x128xbf16> to vector<1x16x16x128xbf16>
    %73 = vector.extract_strided_slice %70 {offsets = [0, 0, 2, 0], sizes = [1, 16, 16, 128], strides = [1, 1, 1, 1]} : vector<1x16x18x128xbf16> to vector<1x16x16x128xbf16>
    %74 = tpu.concatenate %71, %72, %73 in 3 : vector<1x16x16x128xbf16>, vector<1x16x16x128xbf16>, vector<1x16x16x128xbf16> -> vector<1x16x16x384xbf16>
    %75 = vector.shape_cast %74 : vector<1x16x16x384xbf16> to vector<256x384xbf16>
    %c2_42 = arith.constant 2 : index
    %c0_43 = arith.constant 0 : index
    %c0_44 = arith.constant 0 : index
    %76 = vector.load %arg6[%c2_42, %c0_43, %c0_44] : memref<3x384x128xbf16, #tpu.memory_space<vmem>>, vector<1x384x128xbf16>
    %77 = vector.shape_cast %76 : vector<1x384x128xbf16> to vector<384x128xbf16>
    %cst_45 = arith.constant dense<0.000000e+00> : vector<256x128xf32>
    %78 = tpu.matmul %75, %77, %cst_45 {dimension_numbers = #tpu.dot_dimension_numbers<[1], [0], [0], [1], [0, 0, 1, 1], [], []>} : vector<256x384xbf16>, vector<384x128xbf16>, vector<256x128xf32> -> vector<256x128xf32>
    %79 = arith.addf %69, %78 : vector<256x128xf32>
    %c0_46 = arith.constant 0 : index
    %c0_47 = arith.constant 0 : index
    %80 = vector.load %arg7[%c0_46, %c0_47] : memref<1x128xf32, #tpu.memory_space<vmem>>, vector<1x128xf32>
    %81 = vector.shape_cast %80 : vector<1x128xf32> to vector<128xf32>
    %82 = vector.shape_cast %81 : vector<128xf32> to vector<1x128xf32>
    %83 = vector.broadcast %82 : vector<1x128xf32> to vector<256x128xf32>
    %84 = arith.mulf %79, %83 : vector<256x128xf32>
    %c0_48 = arith.constant 0 : index
    %c0_49 = arith.constant 0 : index
    %85 = vector.load %arg8[%c0_48, %c0_49] : memref<1x128xf32, #tpu.memory_space<vmem>>, vector<1x128xf32>
    %86 = vector.shape_cast %85 : vector<1x128xf32> to vector<128xf32>
    %87 = vector.shape_cast %86 : vector<128xf32> to vector<1x128xf32>
    %88 = vector.broadcast %87 : vector<1x128xf32> to vector<256x128xf32>
    %89 = arith.addf %84, %88 : vector<256x128xf32>
    %90 = vector.shape_cast %89 : vector<256x128xf32> to vector<1x16x16x128xf32>
    %c0_50 = arith.constant 0 : index
    %c0_51 = arith.constant 0 : index
    %c0_52 = arith.constant 0 : index
    %c0_53 = arith.constant 0 : index
    %91 = vector.load %arg2[%c0_50, %c0_51, %c0_52, %c0_53] : memref<1x16x16x128xf32, #tpu.memory_space<vmem>>, vector<1x16x16x128xf32>
    %92 = arith.addf %90, %91 : vector<1x16x16x128xf32>
    %cst_54 = arith.constant 0.000000e+00 : f32
    %93 = vector.broadcast %cst_54 : f32 to vector<1x16x16x128xf32>
    %94 = arith.maximumf %92, %93 : vector<1x16x16x128xf32>
    %c0_55 = arith.constant 0 : index
    %c0_56 = arith.constant 0 : index
    %c0_57 = arith.constant 0 : index
    %c0_58 = arith.constant 0 : index
    %95 = vector.load %arg9[%c0_55, %c0_56, %c0_57, %c0_58] : memref<1x16x16x128xf32, #tpu.memory_space<vmem>>, vector<1x16x16x128xf32>
    tpu.vector_store %arg9[%c0_55, %c0_56, %c0_57, %c0_58], %94 {strides = array<i32>} : memref<1x16x16x128xf32, #tpu.memory_space<vmem>>, vector<1x16x16x128xf32>,
    return
  }
  func.func @transform_0(%arg0: i32) -> (i32, i32, i32, i32) {
    %c0_i32 = arith.constant 0 : i32
    %c0_i32_0 = arith.constant 0 : i32
    %c0_i32_1 = arith.constant 0 : i32
    %c0_i32_2 = arith.constant 0 : i32
    return %arg0, %c0_i32, %c0_i32_0, %c0_i32_1 : i32, i32, i32, i32
  }
  func.func @transform_1(%arg0: i32) -> (i32, i32, i32, i32) {
    %c0_i32 = arith.constant 0 : i32
    %c0_i32_0 = arith.constant 0 : i32
    %c0_i32_1 = arith.constant 0 : i32
    %c0_i32_2 = arith.constant 0 : i32
    return %arg0, %c0_i32, %c0_i32_0, %c0_i32_1 : i32, i32, i32, i32
  }
  func.func @transform_2(%arg0: i32) -> (i32, i32, i32) {
    %c0_i32 = arith.constant 0 : i32
    %c0_i32_0 = arith.constant 0 : i32
    %c0_i32_1 = arith.constant 0 : i32
    %c0_i32_2 = arith.constant 0 : i32
    return %c0_i32, %c0_i32_0, %c0_i32_1 : i32, i32, i32
  }
  func.func @transform_3(%arg0: i32) -> (i32, i32) {
    %c0_i32 = arith.constant 0 : i32
    %c0_i32_0 = arith.constant 0 : i32
    %c0_i32_1 = arith.constant 0 : i32
    return %c0_i32, %c0_i32_0 : i32, i32
  }
  func.func @transform_4(%arg0: i32) -> (i32, i32) {
    %c0_i32 = arith.constant 0 : i32
    %c0_i32_0 = arith.constant 0 : i32
    %c0_i32_1 = arith.constant 0 : i32
    return %c0_i32, %c0_i32_0 : i32, i32
  }
  func.func @transform_5(%arg0: i32) -> (i32, i32, i32) {
    %c0_i32 = arith.constant 0 : i32
    %c0_i32_0 = arith.constant 0 : i32
    %c0_i32_1 = arith.constant 0 : i32
    %c0_i32_2 = arith.constant 0 : i32
    return %c0_i32, %c0_i32_0, %c0_i32_1 : i32, i32, i32
  }
  func.func @transform_6(%arg0: i32) -> (i32, i32) {
    %c0_i32 = arith.constant 0 : i32
    %c0_i32_0 = arith.constant 0 : i32
    %c0_i32_1 = arith.constant 0 : i32
    return %c0_i32, %c0_i32_0 : i32, i32
  }
  func.func @transform_7(%arg0: i32) -> (i32, i32) {
    %c0_i32 = arith.constant 0 : i32
    %c0_i32_0 = arith.constant 0 : i32
    %c0_i32_1 = arith.constant 0 : i32
    return %c0_i32, %c0_i32_0 : i32, i32
  }
  func.func @transform_8(%arg0: i32) -> (i32, i32, i32, i32) {
    %c0_i32 = arith.constant 0 : i32
    %c0_i32_0 = arith.constant 0 : i32
    %c0_i32_1 = arith.constant 0 : i32
    %c0_i32_2 = arith.constant 0 : i32
    return %arg0, %c0_i32, %c0_i32_0, %c0_i32_1 : i32, i32, i32, i32
  }
}

</mosaic_0001>

<bundles_post_ra>
// kernel: tpu_custom_call.1
= control target key start
LH: loop header
LB: loop body
LE: loop exit
PB: predicated region body
PF: predicated region fallthrough
CT: control target
= control target key end

     0   :  { %s9595_s0 = inlined_call_operand.vmem [shape: bf16[2,18,18,128], index: 0, kind: input, shape index: {}]   ;;  %s9596_s1 = inlined_call_operand.hbm [shape: f32[2,16,16,128], index: 1, kind: input, shape index: {}]   ;;  %s9597_s2 = inlined_call_operand.vmem [shape: bf16[3,384,128], index: 2, kind: input, shape index: {}]   ;;  %s9598_s3 = inlined_call_operand.vmem [shape: f32[1,128], index: 3, kind: input, shape index: {}]   ;;  %s9599_s4 = inlined_call_operand.vmem [shape: f32[1,128], index: 4, kind: input, shape index: {}]   ;;  %s9600_s5 = inlined_call_operand.hbm [shape: bf16[3,384,128], index: 5, kind: input, shape index: {}]   ;;  %s9601_s6 = inlined_call_operand.vmem [shape: f32[1,128], index: 6, kind: input, shape index: {}]   ;;  %s9602_s7 = inlined_call_operand.vmem [shape: f32[1,128], index: 7, kind: input, shape index: {}]   ;;  %s9603_s8 = inlined_call_operand.hbm [shape: f32[2,16,16,128], index: 8, kind: output, shape index: {}]  }
   0x1   :  { %9616 = sst [smem:[#allocation22_spill]] %s9600_s5 }
   0x2   :  { %13 = vsyncpa [#allocation4], 0 }
   0x3   :  { %15 = vsyncpa [#allocation4 + $0x1], 0 }
   0x4   :  { %16 = vsyncpa [#allocation7], 0 }
   0x5   :  { %17 = vsyncpa [#allocation5], 0 }
   0x6   :  { %19 = vsyncpa [#allocation5 + $0x1], 0  ;;  %s7382_s27 = smov 0   ;;  %s7384_s28 = smov 0  }
   0x7   :  { %s7386_s29 = smov 0   ;;  %s7388_s30 = smov 0  }
   0x8 LB: > { %s7403_s9 = sadd.s32 4294967295, %s7325_s30   ;;  %s5410_s10 = sadd.s32 4294967294, %s7325_s30   ;;  %s7325_s30 = sphi %s7388_s30, %s9659_s30   ;;  %s7321_s29 = sphi %s7386_s29, %s9662_s29   ;;  %s7317_s28 = sphi %s7384_s28, %s9661_s28   ;;  %s7313_s27 = sphi %s7382_s27, %s9660_s27  }
   0x9   : > { %p71_p0 = scmp.ne.s32.totalorder %s7317_s28, %s7313_s27  ;;  %p9606_p1 = scmp.eq.s32.totalorder %s7403_s9, 0 }
   0xa   : > { %p227_p3 = scmp.eq.s32.totalorder %s5410_s10, 1  ;;  %p5411_p5 = scmp.ge.s32.totalorder %s7325_s30, 1 }
   0xb   : > { %p7412_p4 = por %p9606_p1, %p71_p0  ;;  %p234_p7 = scmp.lt.s32.totalorder %s7325_s30, 3 }
   0xc   : > { %p7417_p6 = por %p227_p3, %p71_p0  ;;  %s7327_s14 = smov [#allocation6]  }
   0xd   : > { %s9617_s11 = scalar_select %p7412_p4, 1, 0 }
   0xe   : > { %s9618_s12 = scalar_select %p7417_p6, 1, 0 }
   0xf   : > { %p7422_p8 = pnand %p5411_p5, %p234_p7  ;;  %s255_s15 = sshll.u32 %s7327_s14, 4  ;;  %s256_s15 = int_to_ptr.vmem [resolvable:$true] %s255_s15 }
  0x10   : > { %s7436_s17 = sadd.s32 1, %s7325_s30   ;;  %s58_s18 = sadd.s32 1, %s7321_s29 }
  0x11   : > { %s9619_s13 = scalar_select %p7422_p8, 1, 0 }
  0x12   : > { %p6906_p9 = pneg %p7422_p8  ;;  %9621 = sst [smem:[#allocation12_spill]] %s7436_s17 }
  0x13   : > { %s55_s19 = ssub.s32 %s7325_s30, %s7436_s17  ;;  %s7214_s20 = scalar_lea.vmem %s256_s15, 9216 }
  0x14   : > { %p7431_p11 = pnand %p6906_p9, %p9606_p1  ;;  %p7215_p13 = scmp.ne.s32.totalorder %s256_s15, %s7214_s20 }
  0x15   : > { %p7222_p5 = scmp.lt.s32.totalorder %s256_s15, %s256_s15  ;;  %p7223_p7 = scmp.lt.s32.totalorder %s7214_s20, %s7214_s20 }
  0x16   : > { %p7205_p12 = pneg %p7431_p11 }
  0x17   : > { %p7224_p10 = por %p7223_p7, %p7222_p5 }
  0x18   : > { %p7217_p0 = pnand %p7215_p13, %p7205_p12 }
  0x1a   : > { %p7218_p3 = pneg %p7217_p0 }
  0x1c   : > { %p7225_p2 = pnand %p7224_p10, %p7218_p3 }
  0x1e   : > { %7228 = shalt.err (!%p7225_p2)
}
  0x1f   : > { %s7328_s21 = smov 64   ;;  %s7329_s22 = smov 4  }
  0x20   : > { %s9622_s5 = sld [smem:[#allocation22_spill]]  ;;  %p56_p9 = scmp.eq.s32.totalorder %s55_s19, 0 }
  0x21   : > { %p65_p12 = scmp.ne.s32.totalorder %s7321_s29, %s7317_s28  ;;  %p66_p10 = scmp.eq.s32.totalorder %s7325_s30, 0 }
  0x22   : > { %p6919_p2 = scmp.lt.s32.totalorder %s7325_s30, 2  ;;  %p9623_p0 = scmp.eq.s32.totalorder %s7403_s9, 1 }
  0x23   : > { %s7453_s25 = scalar_select %p56_p9, %s7321_s29, %s58_s18  }
  0x24   : > { %p67_p13 = por %p66_p10, %p65_p12  ;;  %p7457_p3 = por %p9623_p0, %p65_p12 }
  0x25   : > { %s283_s10 = sand.u32 1, %s7321_s29   ;;  %s5791_s14 = sshll.u32 %s7325_s30, 12 }
  0x26   : > { %6909 = dma.hbm_to_vmem [thread:$0]  (!%p7431_p11), %s9622_s5, 9216, %s256_s15, [#allocation7], %s7328_s21, %s7328_s21, %s7329_s22  }
  0x27   : > { %s9624_s26 = scalar_select %p7457_p3, 1, 0 }
  0x28   : > { %s5414_s20 = sshll.u32 %s283_s10, 8  ;;  %s7466_s23 = scalar_lea.hbm %s9596_s1, %s5791_s14 }
  0x29   : > { %s287_s15 = scalar_lea.vmem [#allocation3], %s5414_s20  ;;  %p7468_p11 = pnand %p6919_p2, %p67_p13 }
  0x2a   : > { %s294_s18 = sshll.u32 %s287_s15, 4  ;;  %s7474_s21 = scalar_lea.sflag [#allocation4], %s283_s10  ;;  %s7472_s18 = int_to_ptr.vmem [resolvable:$true] %s294_s18 }
  0x2b   : > { %s7229_s22 = scalar_lea.hbm %s7466_s23, 4096  ;;  %p7231_p7 = pneg %p7468_p11 }
  0x2c   : > { %p7230_p5 = scmp.ne.s32.totalorder %s7466_s23, %s7229_s22  ;;  %s7234_s14 = scalar_lea.hbm %s9596_s1, 8192 }
  0x2d   : > { %p7235_p10 = scmp.lt.s32.totalorder %s7466_s23, %s9596_s1  ;;  %p7236_p2 = scmp.lt.s32.totalorder %s7234_s14, %s7229_s22 }
  0x2e   : > { %p7232_p9 = pnand %p7231_p7, %p7230_p5 }
  0x2f   : > { %p7237_p13 = por %p7236_p2, %p7235_p10 }
  0x30   : > { %p7233_p12 = pneg %p7232_p9 }
  0x32   : > { %p7238_p0 = pnand %p7237_p13, %p7233_p12 }
  0x34   : > { %7241 = shalt.err (!%p7238_p0)
}
  0x35   : > { %s7242_s10 = scalar_lea.vmem %s7472_s18, 4096  ;;  %s7330_s15 = smov [#allocation3]  }
  0x36   : > { %p7243_p1 = scmp.ne.s32.totalorder %s7472_s18, %s7242_s10  ;;  %s7247_s5 = sshll.u32 %s7330_s15, 4  ;;  %s7248_s5 = int_to_ptr.vmem [resolvable:$false] %s7247_s5 }
  0x37   : > { %s7249_s17 = scalar_lea.vmem %s7248_s5, 8192  ;;  %p7250_p9 = scmp.lt.s32.totalorder %s7472_s18, %s7248_s5 }
  0x38   : > { %p7245_p6 = pnand %p7243_p1, %p7231_p7  ;;  %p7251_p3 = scmp.lt.s32.totalorder %s7249_s17, %s7242_s10 }
  0x3a   : > { %p7246_p5 = pneg %p7245_p6  ;;  %p7252_p4 = por %p7251_p3, %p7250_p9 }
  0x3c   : > { %p7253_p8 = pnand %p7252_p4, %p7246_p5 }
  0x3e   : > { %7256 = shalt.err (!%p7253_p8)
}
  0x3f   : > { %s7331_s22 = smov 128   ;;  %s7332_s24 = smov 8  }
  0x40   : > { %6913 = dma.hbm_to_vmem [thread:$0]  (!%p7468_p11), %s7466_s23, 4096, %s7472_s18, %s7474_s21, %s7331_s22, %s7331_s22, %s7332_s24  }
  0x41   : > { %p9626_p1 = scmp.ne.s32.totalorder %s9619_s13, 0 }
  0x43   : > { %306 = sbr.rel (%p9626_p1) target bundleno = 1091 (0x443), region = 52 }
  0x48   : > { %s7498_s14 = sand.u32 1, %s7317_s28   ;;  %p9627_p4 = scmp.ne.s32.totalorder %s9617_s11, 0 }
  0x49   : > { %s5418_s5 = sshll.u32 %s7498_s14, 8  ;;  %s309_s20 = scalar_lea.sflag [#allocation4], %s7498_s14 }
  0x4a   : > { %s7504_s16 = scalar_lea.vmem [#allocation3], %s5418_s5 }
  0x4b   : > { %7300 = dma.done.wait (%p9627_p4), %s309_s20, 4096  }
  0x4c   : > { %7302 = vsyncadd (%p9627_p4), %s309_s20, 4294963200  ;;  %p9628_p6 = scmp.eq.s32.totalorder %s7403_s9, 0 }
  0x4e   : > { %7304 = dma.done.wait (%p9628_p6), [#allocation7], 9216   ;;  %p9629_p8 = pmov %p9628_p6 }
  0x4f   : > { %v6962_v0 = vld [vmem:[%s9597_s2 + $0x138] sm:$0xff]   ;;  %v6965_v3 = vld [vmem:[%s9597_s2 + $0x130] sm:$0xff]   ;;  %v6968_v6 = vld [vmem:[%s9597_s2 + $0x128] sm:$0xff]   ;;  %p354_p3 = scmp.lt.s32.totalorder %s7403_s9, 1  ;;  %vm565_vm0 = vsmask.f32 7424 }
  0x50   : > { %7306 = vsyncadd (%p9629_p8), [#allocation7], 4294958080  ;;  %v6963_v1 = vld [vmem:[%s9597_s2 + $0x178] sm:$0xff]   ;;  %5793 = vmatprep.subr.bf16.mxu0 %v6962_v0  ;;  %v6966_v4 = vld [vmem:[%s9597_s2 + $0x170] sm:$0xff]   ;;  %vm774_vm1 = vcmask 1046528   ;;  %vm2737_vm2 = vcmask 1040384  }
  0x51   : > { %v6964_v2 = vld [vmem:[%s9597_s2 + $0xf8] sm:$0xff]   ;;  %6609 = vmatprep.subr.bf16.mxu1 %v6963_v1  ;;  %v6967_v5 = vld [vmem:[%s9597_s2 + $0xf0] sm:$0xff]   ;;  %v6969_v7 = vld [vmem:[%s9597_s2 + $0x168] sm:$0xff]   ;;  %s355_s21 = scalar_select %p354_p3, %s7403_s9, 1  ;;  %vm2738_vm3 = vsmask.f32 256 }
  0x52   : > { %5794 = vmatpush3.bf16.msra.mxu0 %v6964_v2  ;;  %6610 = vmatpush3.bf16.msra.mxu1 %v6963_v1  ;;  %v6970_v8 = vld [vmem:[%s9597_s2 + $0xe8] sm:$0xff]   ;;  %v6971_v9 = vld [vmem:[%s9597_s2 + $0x120] sm:$0xff]   ;;  %v6974_v12 = vld [vmem:[%s9597_s2 + $0x118] sm:$0xff]   ;;  %p9656_p7 = scmp.ne.s32.totalorder %s9624_s26, 0 }
  0x53   : > { %5795 = vmatprep.subr.bf16.mxu0 %v6965_v3  ;;  %6611 = vmatprep.subr.bf16.mxu1 %v6966_v4  ;;  %v6972_v10 = vld [vmem:[%s9597_s2 + $0x160] sm:$0xff]   ;;  %v6975_v13 = vld [vmem:[%s9597_s2 + $0x158] sm:$0xff]   ;;  %v6977_v15 = vld [vmem:[%s9597_s2 + $0x110] sm:$0xff]   ;;  %s6897_s20 = smul.u32 216, %s355_s21 }
  0x54   : > { %v6973_v11 = vld [vmem:[%s9597_s2 + $0xe0] sm:$0xff]   ;;  %v6976_v14 = vld [vmem:[%s9597_s2 + $0xd8] sm:$0xff]   ;;  %v6978_v16 = vld [vmem:[%s9597_s2 + $0x150] sm:$0xff]  }
  0x55   : > { %v6979_v17 = vld [vmem:[%s9597_s2 + $0xd0] sm:$0xff]   ;;  %v6980_v18 = vld [vmem:[%s9597_s2 + $0x108] sm:$0xff]   ;;  %s7582_s24 = scalar_lea.vmem %s9595_s0, %s6897_s20  ;;  %v6983_v21 = vld [vmem:[%s9597_s2 + $0x100] sm:$0xff]  }
  0x56   : > { %5796 = vmatpush3.bf16.msra.mxu0 %v6967_v5  ;;  %6612 = vmatpush3.bf16.msra.mxu1 %v6966_v4  ;;  %v6981_v19 = vld [vmem:[%s9597_s2 + $0x148] sm:$0xff]   ;;  %v6984_v22 = vld [vmem:[%s9597_s2 + $0x140] sm:$0xff]   ;;  %v6987_v24 = vld [vmem:[%s7582_s24 + $0x14] ss:$0 sps:$4 sm:$0x11]  }
  0x57   : > { %5797 = vmatprep.subr.bf16.mxu0 %v6968_v6  ;;  %6613 = vmatprep.subr.bf16.mxu1 %v6969_v7  ;;  %v6982_v20 = vld [vmem:[%s9597_s2 + $0xc8] sm:$0xff]   ;;  %v6985_v25 = vld [vmem:[%s9597_s2 + $0xc0] sm:$0xff]   ;;  %v7598_v26 = vld [vmem:[%s7582_s24 + $0x18] sm:$0xff]   ;;  %v586_v29 = vshll.u32 %v6987_v24, 16  ;;  %v779_v31 = vrot.slane %v6987_v24, 1 }
  0x58   : > { %v7591_v23 = vld [vmem:[%s7582_s24 + $0xc] sm:$0xff]   ;;  %v6989_v32 = vld [vmem:[%s7582_s24 + $0x20] ss:$0 sps:$4 sm:$0x11]   ;;  %v781_v33 = vrot.slane %v7598_v26, 1  ;;  %v6990_v34 = vld [vmem:[%s9597_s2 + $0xb8] sm:$0xff]  }
  0x59   : > { %v579_v27 = vshrl.u32 %v7591_v23, 16  ;;  %v581_v28 = vshll.u32 %v7591_v23, 16  ;;  %v778_v30 = vrot.slane %v7591_v23, 1  ;;  %v588_v36 = vrot.slane %v586_v29, 1  ;;  %v6991_v39 = vld [vmem:[%s9597_s2 + $0x78] sm:$0xff]   ;;  %v7627_v49 = vld [vmem:[%s7582_s24 + $0x24] sm:$0xff]   ;;  %vm8460_vm4 = vmand %vm2737_vm2, %vm2738_vm3 }
  0x5a   : > { %5798 = vmatpush3.bf16.msra.mxu0 %v6970_v8  ;;  %6614 = vmatpush3.bf16.msra.mxu1 %v6969_v7  ;;  %v782_v38 = vrot.slane %v6989_v32, 1  ;;  %v6992_v41 = vld [vmem:[%s9597_s2 + $0x38] sm:$0xff]   ;;  %v591_v42 = vshrl.u32 %v7598_v26, 16  ;;  %v593_v43 = vshll.u32 %v7598_v26, 16  ;;  %v598_v44 = vshll.u32 %v6989_v32, 16  ;;  %v7635_v54 = vld [vmem:[%s7582_s24 + $0x30] sm:$0xff]  }
  0x5b   : > { %5799 = vmatprep.subr.bf16.mxu0 %v6971_v9  ;;  %6615 = vmatprep.subr.bf16.mxu1 %v6972_v10  ;;  %v583_v35 = vrot.slane %v581_v28, 1  ;;  %v7609_v37 = vsel %vm774_vm1, %v778_v30, %v779_v31  ;;  %v6994_v50 = vld [vmem:[%s7582_s24 + $0x2c] ss:$0 sps:$4 sm:$0x11]   ;;  %v784_v52 = vrot.slane %v7627_v49, 1  ;;  %v6997_v56 = vld [vmem:[%s9597_s2 + $0x70] sm:$0xff]  }
  0x5c   : > { %6625 = vmatprep.mubr.bf16.mxu1 %v7609_v37  ;;  %v7621_v45 = vsel %vm774_vm1, %v781_v33, %v782_v38  ;;  %v595_v47 = vrot.slane %v593_v43, 1  ;;  %v600_v48 = vrot.slane %v598_v44, 1  ;;  %v785_v53 = vrot.slane %v6994_v50, 1  ;;  %v6996_v55 = vld [vmem:[%s7582_s24 + $0x38] ss:$0 sps:$4 sm:$0x11]  }
  0x5d   : > { %v584_v40 = vor.u32 %v583_v35, %v579_v27  ;;  %v603_v57 = vshrl.u32 %v7627_v49, 16  ;;  %v787_v60 = vrot.slane %v7635_v54, 1  ;;  %v788_v61 = vrot.slane %v6996_v55, 1  ;;  %v6998_v62 = vld [vmem:[%s9597_s2 + $0x30] sm:$0xff]   ;;  %v7656_v1 = vld [vmem:[%s7582_s24 + $0x3c] sm:$0xff]   ;;  %v7664_v7 = vld [vmem:[%s7582_s24 + $0x48] sm:$0xff]  }
  0x5e   : > { %5800 = vmatpush3.bf16.msra.mxu0 %v6973_v11  ;;  %6616 = vmatpush3.bf16.msra.mxu1 %v6972_v10  ;;  %v596_v51 = vor.u32 %v595_v47, %v591_v42  ;;  %v7646_v59 = vsel %vm774_vm1, %v784_v52, %v785_v53  ;;  %v605_v63 = vshll.u32 %v7627_v49, 16  ;;  %v610_v0 = vshll.u32 %v6994_v50, 16  ;;  %v7000_v5 = vld [vmem:[%s7582_s24 + $0x44] ss:$0 sps:$4 sm:$0x11]   ;;  %v7733_v44 = vld [vmem:[%s7582_s24 + $0x78] sm:$0xff]  }
  0x5f   : > { %5801 = vmatprep.subr.bf16.mxu0 %v6974_v12  ;;  %6617 = vmatprep.subr.bf16.mxu1 %v6975_v13  ;;  %v7624_v46 = vsel %vm565_vm0, %v584_v40, %v588_v36  ;;  %v7659_v2 = vsel %vm774_vm1, %v787_v60, %v788_v61  ;;  %v790_v6 = vrot.slane %v7656_v1, 1  ;;  %v615_v8 = vshrl.u32 %v7635_v54, 16  ;;  %v7668_v11 = vld [vmem:[%s7582_s24 + $0x50] ss:$0 sps:$4 sm:$0x11]   ;;  %v7704_v31 = vld [vmem:[%s7582_s24 + $0x60] sm:$0xff]  }
  0x60   : > { %1138 = vmatprep.mubr.bf16.mxu0 %v7624_v46  ;;  %v7643_v58 = vsel %vm565_vm0, %v596_v51, %v600_v48  ;;  %v607_v3 = vrot.slane %v605_v63, 1  ;;  %v612_v4 = vrot.slane %v610_v0, 1  ;;  %v791_v10 = vrot.slane %v7000_v5, 1  ;;  %v7707_v32 = vld [vmem:[%s7582_s24 + $0x68] ss:$0 sps:$4 sm:$0x11]  }
  0x61   : > { %v793_v12 = vrot.slane %v7664_v7, 1  ;;  %v7010_v33 = vld [vmem:[%s9597_s2 + $0x60] sm:$0xff]   ;;  %v799_v36 = vrot.slane %v7704_v31, 1  ;;  %v800_v38 = vrot.slane %v7707_v32, 1  ;;  %v7726_v40 = vld [vmem:[%s7582_s24 + $0x6c] sm:$0xff]   ;;  %v629_v42 = vshll.u32 %v7656_v1, 16 }
  0x62   : > { %5802 = vmatpush3.bf16.msra.mxu0 %v6976_v14  ;;  %6618 = vmatpush3.bf16.msra.mxu1 %v6975_v13  ;;  %v608_v9 = vor.u32 %v607_v3, %v603_v57  ;;  %v7003_v13 = vld [vmem:[%s9597_s2 + $0xb0] sm:$0xff]   ;;  %v634_v43 = vshll.u32 %v7000_v5, 16  ;;  %v7016_v47 = vld [vmem:[%s9597_s2 + $0xa8] sm:$0xff]   ;;  %v802_v52 = vrot.slane %v7726_v40, 1  ;;  %v7017_v63 = vld [vmem:[%s9597_s2 + $0x58] sm:$0xff]   ;;  %v639_v3 = vshrl.u32 %v7664_v7, 16 }
  0x63   : > { %5803 = vmatprep.subr.bf16.mxu0 %v6977_v15  ;;  %6619 = vmatprep.subr.bf16.mxu1 %v6978_v16  ;;  %v7680_v15 = vsel %vm774_vm1, %v790_v6, %v791_v10  ;;  %v631_v48 = vrot.slane %v629_v42, 1  ;;  %v7739_v51 = vld [vmem:[%s7582_s24 + $0x74] ss:$0 sps:$4 sm:$0x11]   ;;  %v7743_v53 = vsel %vm774_vm1, %v799_v36, %v800_v38  ;;  %v7018_v0 = vld [vmem:[%s9597_s2 + $0x18] sm:$0xff]   ;;  %v646_v5 = vshll.u32 %v7668_v11, 16 }
  0x64   : > { %v7677_v14 = vsel %vm565_vm0, %v608_v9, %v612_v4  ;;  %v636_v50 = vrot.slane %v634_v43, 1  ;;  %v7747_v57 = vld [vmem:[%s7582_s24 + $0x80] ss:$0 sps:$4 sm:$0x11]   ;;  %v641_v4 = vshll.u32 %v7664_v7, 16 }
  0x65   : > { %v806_v6 = vrot.slane %v7747_v57, 1  ;;  %v648_v10 = vrot.slane %v646_v5, 1  ;;  %v7804_v38 = vld [vmem:[%s7582_s24 + $0x9c] sm:$0xff]   ;;  %v665_v5 = vshll.u32 %v7704_v31, 16 }
  0x66   : > { %5804 = vmatpush3.bf16.msra.mxu0 %v6979_v17  ;;  %6620 = vmatpush3.bf16.msra.mxu1 %v6978_v16  ;;  %v794_v16 = vrot.slane %v7668_v11, 1  ;;  %v7004_v17 = vld [vmem:[%s9597_s2 + $0x68] sm:$0xff]   ;;  %v643_v9 = vrot.slane %v641_v4, 1  ;;  %v7023_v11 = vld [vmem:[%s9597_s2 + $0x50] sm:$0xff]   ;;  %v663_v4 = vshrl.u32 %v7704_v31, 16 }
  0x67   : > { %5805 = vmatprep.subr.bf16.mxu0 %v6980_v18  ;;  %6621 = vmatprep.subr.bf16.mxu1 %v6981_v19  ;;  %v7005_v18 = vld [vmem:[%s9597_s2 + $0x28] sm:$0xff]  }
  0x68   : > { %v7700_v28 = vsel %vm774_vm1, %v793_v12, %v794_v16  ;;  %v7774_v12 = vld [vmem:[%s7582_s24 + $0x8c] ss:$0 sps:$4 sm:$0x11]  }
  0x6a   : > { %5806 = vmatpush3.bf16.msra.mxu0 %v6982_v20  ;;  %6622 = vmatpush3.bf16.msra.mxu1 %v6981_v19  ;;  %v617_v19 = vshll.u32 %v7635_v54, 16  ;;  %v622_v20 = vshll.u32 %v6996_v55, 16 }
  0x6b   : > { %5807 = vmatprep.subr.bf16.mxu0 %v6983_v21  ;;  %6623 = vmatprep.subr.bf16.mxu1 %v6984_v22  ;;  %v7693_v21 = vld [vmem:[%s7582_s24 + $0x54] sm:$0xff]  }
  0x6c   : > { %v624_v24 = vrot.slane %v622_v20, 1  ;;  %v796_v27 = vrot.slane %v7693_v21, 1 }
  0x6e   : > { %5808 = vmatpush3.bf16.msra.mxu0 %v6985_v25  ;;  %6624 = vmatpush3.bf16.msra.mxu1 %v6984_v22  ;;  %v619_v22 = vrot.slane %v617_v19, 1  ;;  %v7696_v25 = vld [vmem:[%s7582_s24 + $0x5c] ss:$0 sps:$4 sm:$0x11]  }
  0x6f   : > { %6657 = vmatprep.subr.bf16.mxu0 %v6990_v34  ;;  %5929 = vmatprep.subr.bf16.mxu1 %v6991_v39  ;;  %v797_v30 = vrot.slane %v7696_v25, 1  ;;  %v7011_v39 = vld [vmem:[%s9597_s2 + $0x20] sm:$0xff]   ;;  %v7785_v19 = vld [vmem:[%s7582_s24 + $0x98] ss:$0 sps:$4 sm:$0x11]   ;;  %v658_v36 = vshll.u32 %v7696_v25, 16 }
  0x70   : > { %v620_v29 = vor.u32 %v619_v22, %v615_v8  ;;  %v7771_v8 = vld [vmem:[%s7582_s24 + $0x84] sm:$0xff]   ;;  %v7024_v22 = vld [vmem:[%s9597_s2 + $0x10] sm:$0xff]   ;;  %v812_v42 = vrot.slane %v7785_v19, 1 }
  0x71   : > { %1139 = vmatmul.mubr.bf16.vlgmr.msra.gmra.mxu0 %v7591_v23  ;;  %6626 = vmatmul.mubr.bf16.vlgmr.msra.gmra.mxu1 %v7621_v45  ;;  %v7718_v35 = vsel %vm774_vm1, %v796_v27, %v797_v30  ;;  %v808_v16 = vrot.slane %v7771_v8, 1  ;;  %v660_v43 = vrot.slane %v658_v36, 1  ;;  %v7036_v36 = vld [vmem:[%s9597_s2 + $0x40] sm:$0xff]  }
  0x72   : > { %6658 = vmatpush3.bf16.msra.mxu0 %v6990_v34  ;;  %5930 = vmatpush3.bf16.msra.mxu1 %v6992_v41  ;;  %v7715_v34 = vsel %vm565_vm0, %v620_v29, %v624_v24  ;;  %v627_v41 = vshrl.u32 %v7656_v1, 16  ;;  %v651_v24 = vshrl.u32 %v7693_v21, 16 }
  0x73   : > { %1146 = vmatprep.mubr.bf16.mxu0 %v7643_v58  ;;  %6629 = vmatprep.mubr.bf16.mxu1 %v7646_v59 }
  0x74   : > { %5931 = vmatprep.subr.bf16.mxu1 %v6997_v56  ;;  %6659 = vmatprep.subr.bf16.mxu0 %v7003_v13  ;;  %v632_v55 = vor.u32 %v631_v48, %v627_v41  ;;  %v803_v56 = vrot.slane %v7739_v51, 1  ;;  %v7809_v41 = vld [vmem:[%s7582_s24 + $0xa4] ss:$0 sps:$4 sm:$0x11]   ;;  %v814_v48 = vrot.slane %v7804_v38, 1 }
  0x75   : > { %v815_v25 = vrot.slane %v7809_v41, 1 }
  0x76   : > { %5932 = vmatpush3.bf16.msra.mxu1 %v6998_v62  ;;  %6660 = vmatpush3.bf16.msra.mxu0 %v7003_v13  ;;  %v7750_v60 = vsel %vm565_vm0, %v632_v55, %v636_v50  ;;  %v7753_v61 = vsel %vm774_vm1, %v802_v52, %v803_v56  ;;  %v805_v62 = vrot.slane %v7733_v44, 1  ;;  %v7777_v13 = vld [vmem:[%s7582_s24 + $0x90] sm:$0xff]   ;;  %v7817_v50 = vld [vmem:[%s7582_s24 + $0xa8] sm:$0xff]   ;;  %v7029_v55 = vld [vmem:[%s9597_s2 + $0xa0] sm:$0xff]  }
  0x77   : > { %5933 = vmatprep.subr.bf16.mxu1 %v7004_v17  ;;  %6661 = vmatprep.subr.bf16.mxu0 %v7016_v47  ;;  %v644_v17 = vor.u32 %v643_v9, %v639_v3  ;;  %v811_v30 = vrot.slane %v7777_v13, 1  ;;  %v7820_v52 = vld [vmem:[%s7582_s24 + $0xb0] ss:$0 sps:$4 sm:$0x11]   ;;  %v7030_v56 = vld [vmem:[%s9597_s2 + $0x48] sm:$0xff]   ;;  %v7838_v3 = vsel %vm774_vm1, %v814_v48, %v815_v25  ;;  %v7844_v9 = vld [vmem:[%s7582_s24 + $0xb4] sm:$0xff]  }
  0x78   : > { %v7788_v20 = vsel %vm774_vm1, %v805_v62, %v806_v6  ;;  %9630 = vst [vmem:[#allocation13_spill] sm:$0xff] %v7838_v3  ;;  %v670_v6 = vshll.u32 %v7707_v32, 16  ;;  %v818_v32 = vrot.slane %v7820_v52, 1  ;;  %v682_v25 = vshll.u32 %v7739_v51, 16  ;;  %v7041_v51 = vld [vmem:[%s9597_s2 + $0x238] sm:$0xff]  }
  0x79   : > { %1147 = vmatmul.mubr.bf16.gmra.mxu0 %v7598_v26  ;;  %6630 = vmatmul.mubr.bf16.gmra.mxu1 %v7659_v2  ;;  %v7795_v27 = vsel %vm565_vm0, %v644_v17, %v648_v10  ;;  %v7829_v62 = vsel %vm774_vm1, %v811_v30, %v812_v42  ;;  %v667_v10 = vrot.slane %v665_v5, 1  ;;  %v7858_v30 = vld [vmem:[%s7582_s24 + $0xc0] sm:$0xff]   ;;  %v675_v42 = vshrl.u32 %v7726_v40, 16  ;;  %v7039_v5 = vld [vmem:[%s7582_s24 + $0x8] ss:$0 sps:$4 sm:$0x11]  }
  0x7a   : > { %1154 = vmatprep.mubr.bf16.mxu0 %v7677_v14  ;;  %6633 = vmatprep.mubr.bf16.mxu1 %v7680_v15 }
  0x7b   : > { %5934 = vmatpush3.bf16.msra.mxu1 %v7005_v18  ;;  %6662 = vmatpush3.bf16.msra.mxu0 %v7016_v47  ;;  %v809_v18 = vrot.slane %v7774_v12, 1  ;;  %v668_v17 = vor.u32 %v667_v10, %v663_v4 }
  0x7c   : > { %5935 = vmatprep.subr.bf16.mxu1 %v7010_v33  ;;  %v653_v33 = vshll.u32 %v7693_v21, 16  ;;  %6663 = vmatprep.subr.bf16.mxu0 %v7029_v55 }
  0x7d   : > { %v7798_v29 = vsel %vm774_vm1, %v808_v16, %v809_v18  ;;  %v7849_v16 = vld [vmem:[%s7582_s24 + $0xbc] ss:$0 sps:$4 sm:$0x11]   ;;  %v672_v18 = vrot.slane %v670_v6, 1 }
  0x7f   : > { %5936 = vmatpush3.bf16.msra.mxu1 %v7011_v39  ;;  %v655_v39 = vrot.slane %v653_v33, 1  ;;  %6664 = vmatpush3.bf16.msra.mxu0 %v7029_v55  ;;  %v7861_v33 = vld [vmem:[%s7582_s24 + $0xc8] ss:$0 sps:$4 sm:$0x11]   ;;  %v7040_v55 = vld [vmem:[%s9597_s2 + $0x98] sm:$0xff]  }
  0x80   : > { %5937 = vmatprep.subr.bf16.mxu1 %v7017_v63  ;;  %6665 = vmatprep.subr.bf16.mxu0 %v7040_v55 }
  0x81   : > { %1155 = vmatmul.mubr.bf16.gmra.mxu0 %v7627_v49  ;;  %6634 = vmatmul.mubr.bf16.gmra.mxu1 %v7700_v28  ;;  %v656_v47 = vor.u32 %v655_v39, %v651_v24  ;;  %v821_v24 = vrot.slane %v7849_v16, 1  ;;  %v7037_v39 = vld [vmem:[%s9597_s2] sm:$0xff]  }
  0x82   : > { %1162 = vmatprep.mubr.bf16.mxu0 %v7715_v34  ;;  %6637 = vmatprep.mubr.bf16.mxu1 %v7718_v35 }
  0x83   : > { %5938 = vmatpush3.bf16.msra.mxu1 %v7018_v0  ;;  %v7832_v63 = vsel %vm565_vm0, %v656_v47, %v660_v43  ;;  %v7031_v0 = vld [vmem:[%s9597_s2 + $0x8] sm:$0xff]   ;;  %v677_v43 = vshll.u32 %v7726_v40, 16  ;;  %v7038_v47 = vld [vmem:[%s7582_s24] sm:$0xff]   ;;  %6666 = vmatpush3.bf16.msra.mxu0 %v7040_v55  ;;  %v694_v55 = vshll.u32 %v7747_v57, 16  ;;  %v701_v57 = vshll.u32 %v7771_v8, 16 }
  0x84   : > { %5939 = vmatprep.subr.bf16.mxu1 %v7023_v11  ;;  %v817_v11 = vrot.slane %v7817_v50, 1  ;;  %v567_v6 = vshrl.u32 %v7038_v47, 16  ;;  %v569_v10 = vshll.u32 %v7038_v47, 16 }
  0x85   : > { %v679_v4 = vrot.slane %v677_v43, 1  ;;  %v7042_v43 = vld [vmem:[%s9597_s2 + $0x90] sm:$0xff]  }
  0x86   : > { %v7873_v48 = vsel %vm774_vm1, %v817_v11, %v818_v32  ;;  %v574_v11 = vshll.u32 %v7039_v5, 16  ;;  %v909_v32 = vrot.slane %v7858_v30, 1  ;;  %6667 = vmatprep.subr.bf16.mxu0 %v7042_v43 }
  0x87   : > { %5940 = vmatpush3.bf16.msra.mxu1 %v7024_v22  ;;  %v820_v22 = vrot.slane %v7844_v9, 1  ;;  %9631 = vst [vmem:[#allocation14_spill] sm:$0xff] %v7873_v48  ;;  %6668 = vmatpush3.bf16.msra.mxu0 %v7042_v43  ;;  %v718_v43 = vshll.u32 %v7785_v19, 16 }
  0x88   : > { %5941 = vmatprep.subr.bf16.mxu1 %v7030_v56  ;;  %v7880_v56 = vsel %vm565_vm0, %v668_v17, %v672_v18  ;;  %v910_v17 = vrot.slane %v7861_v33, 1  ;;  %v571_v18 = vrot.slane %v569_v10, 1 }
  0x89   : > { %1163 = vmatmul.mubr.bf16.gmra.mxu0 %v7635_v54  ;;  %6638 = vmatmul.mubr.bf16.gmra.mxu1 %v7743_v53  ;;  %v720_v19 = vrot.slane %v718_v43, 1 }
  0x8a   : > { %1170 = vmatprep.mubr.bf16.mxu0 %v7750_v60  ;;  %6641 = vmatprep.mubr.bf16.mxu1 %v7753_v61 }
  0x8b   : > { %5942 = vmatpush3.bf16.msra.mxu1 %v7031_v0  ;;  %v7883_v0 = vsel %vm774_vm1, %v820_v22, %v821_v24  ;;  %v680_v22 = vor.u32 %v679_v4, %v675_v42  ;;  %v684_v24 = vrot.slane %v682_v25, 1  ;;  %v7044_v4 = vld [vmem:[%s9597_s2 + $0x88] sm:$0xff]  }
  0x8c   : > { %5943 = vmatprep.subr.bf16.mxu1 %v7036_v36  ;;  %9632 = vst [vmem:[#allocation15_spill] sm:$0xff] %v7883_v0  ;;  %v576_v36 = vrot.slane %v574_v11, 1  ;;  %v696_v11 = vrot.slane %v694_v55, 1  ;;  %6669 = vmatprep.subr.bf16.mxu0 %v7044_v4  ;;  %v7045_v55 = vld [vmem:[%s9597_s2 + $0x228] sm:$0xff]  }
  0x8d   : > { %v7904_v10 = vsel %vm565_vm0, %v680_v22, %v684_v24  ;;  %6670 = vmatpush3.bf16.msra.mxu0 %v7044_v4  ;;  %v703_v24 = vrot.slane %v701_v57, 1  ;;  %v737_v57 = vshll.u32 %v7817_v50, 16 }
  0x8f   : > { %5944 = vmatpush3.bf16.msra.mxu1 %v7037_v39  ;;  %v689_v39 = vshll.u32 %v7733_v44, 16 }
  0x90   : > { %6705 = vmatprep.subr.bf16.mxu1 %v7041_v51 }
  0x91   : > { %1171 = vmatmul.mubr.bf16.gmra.mxu0 %v7656_v1  ;;  %6642 = vmatmul.mubr.bf16.gmra.mxu1 %v7788_v20  ;;  %v691_v25 = vrot.slane %v689_v39, 1  ;;  %v713_v39 = vshll.u32 %v7777_v13, 16 }
  0x92   : > { %1178 = vmatprep.mubr.bf16.mxu0 %v7795_v27  ;;  %6645 = vmatprep.mubr.bf16.mxu1 %v7798_v29 }
  0x93   : > { %v715_v4 = vrot.slane %v713_v39, 1  ;;  %v897_v39 = vshrl.u32 %v7858_v30, 16 }
  0x99   : > { %1179 = vmatmul.mubr.bf16.gmra.mxu0 %v7664_v7  ;;  %6646 = vmatmul.mubr.bf16.gmra.mxu1 %v7829_v62 }
  0x9a   : > { %1186 = vmatprep.mubr.bf16.mxu0 %v7832_v63  ;;  %6649 = vmatprep.mubr.bf16.mxu1 %v7838_v3  ;;  %v687_v3 = vshrl.u32 %v7733_v44, 16 }
  0xa1   : > { %1187 = vmatmul.mubr.bf16.gmra.mxu0 %v7693_v21  ;;  %6650 = vmatmul.mubr.bf16.gmra.mxu1 %v7873_v48  ;;  %v572_v48 = vor.u32 %v571_v18, %v567_v6  ;;  %v7046_v6 = vld [vmem:[%s9597_s2 + $0x80] sm:$0xff]   ;;  %v776_v18 = vrot.slane %v7039_v5, 1 }
  0xa2   : > { %1194 = vmatprep.mubr.bf16.mxu0 %v7880_v56  ;;  %6653 = vmatprep.mubr.bf16.mxu1 %v7883_v0  ;;  %v7900_v0 = vsel %vm774_vm1, %v909_v32, %v910_v17  ;;  %v706_v32 = vshll.u32 %v7774_v12, 16  ;;  %v775_v17 = vrot.slane %v7038_v47, 1  ;;  %v7048_v12 = vld [vmem:[%s9597_s2 + $0x1f8] sm:$0xff]  }
  0xa3   : > { %v577_v42 = vsel %vm565_vm0, %v572_v48, %v576_v36  ;;  %v692_v48 = vor.u32 %v691_v25, %v687_v3  ;;  %6671 = vmatprep.subr.bf16.mxu0 %v7046_v6  ;;  %v7043_v3 = vld [vmem:[%s9597_s2 + $0x230] sm:$0xff]   ;;  %v725_v25 = vshll.u32 %v7804_v38, 16 }
  0xa4   : > { %6672 = vmatpush3.bf16.msra.mxu0 %v7046_v6  ;;  %v7927_v36 = vsel %vm774_vm1, %v775_v17, %v776_v18  ;;  %v708_v5 = vrot.slane %v706_v32, 1  ;;  %v742_v32 = vshll.u32 %v7820_v52, 16  ;;  %v749_v17 = vshll.u32 %v7844_v9, 16  ;;  %v7050_v52 = vld [vmem:[%s9597_s2 + $0x218] sm:$0xff]  }
  0xa5   : > { %v7921_v22 = vsel %vm565_vm0, %v692_v48, %v696_v11  ;;  %6065 = vmatprep.subr.bf16.mxu0 %v7048_v12  ;;  %v727_v6 = vrot.slane %v725_v25, 1  ;;  %v735_v48 = vshrl.u32 %v7817_v50, 16 }
  0xa6   : > { %v744_v12 = vrot.slane %v742_v32, 1  ;;  %v7059_v32 = vld [vmem:[%s9597_s2 + $0x198] sm:$0xff]  }
  0xa9   : > { %1195 = vmatmul.mubr.bf16.gmra.mxu0 %v7704_v31  ;;  %6654 = vmatmul.mubr.bf16.gmra.mxu1 %v7900_v0  ;;  %v699_v31 = vshrl.u32 %v7771_v8, 16 }
  0xaa   : > { %1202 = vmatprep.mubr.bf16.mxu0 %v7904_v10  ;;  %1604 = vmatprep.mubr.bf16.mxu1 %v577_v42 }
  0xab   : > { %v704_v42 = vor.u32 %v703_v24, %v699_v31  ;;  %v747_v31 = vshrl.u32 %v7844_v9, 16  ;;  %v754_v24 = vshll.u32 %v7849_v16, 16 }
  0xb1   : > { %1203 = vmatmul.mubr.bf16.gmra.mxu0 %v7726_v40  ;;  %1605 = vmatmul.mubr.bf16.vlgmr.msra.gmra.mxu1 %v7038_v47  ;;  %v730_v40 = vshll.u32 %v7809_v41, 16  ;;  %v711_v47 = vshrl.u32 %v7777_v13, 16  ;;  %v7047_v41 = vld [vmem:[%s9597_s2 + $0x220] sm:$0xff]  }
  0xb2   : > { %6706 = vmatpush3.bf16.msra.mxu1 %v7041_v51  ;;  %1210 = vmatprep.mubr.bf16.mxu0 %v7921_v22  ;;  %v723_v51 = vshrl.u32 %v7804_v38, 16 }
  0xb3   : > { %1612 = vmatprep.mubr.bf16.mxu1 %v7624_v46  ;;  %6707 = vmatprep.subr.bf16.mxu1 %v7043_v3  ;;  %v7945_v46 = vsel %vm565_vm0, %v704_v42, %v708_v5  ;;  %v732_v11 = vrot.slane %v730_v40, 1  ;;  %v716_v18 = vor.u32 %v715_v4, %v711_v47  ;;  %v751_v5 = vrot.slane %v749_v17, 1  ;;  %v7065_v47 = vld [vmem:[%s9597_s2 + $0x200] sm:$0xff]   ;;  %v8059_v17 = vld [vmem:[%s7582_s24 + $0x78] sm:$0xff]  }
  0xb4   : > { %v756_v42 = vrot.slane %v754_v24, 1  ;;  %v728_v40 = vor.u32 %v727_v6, %v723_v51  ;;  %v7063_v24 = vld [vmem:[%s9597_s2 + $0x1c8] sm:$0xff]  }
  0xb5   : > { %v7967_v43 = vsel %vm565_vm0, %v716_v18, %v720_v19  ;;  %v7062_v18 = vld [vmem:[%s9597_s2 + $0x190] sm:$0xff]  }
  0xb6   : > { %6708 = vmatpush3.bf16.msra.mxu1 %v7043_v3  ;;  %v739_v3 = vrot.slane %v737_v57, 1  ;;  %v7983_v4 = vsel %vm565_vm0, %v728_v40, %v732_v11  ;;  %v8040_v11 = vld [vmem:[%s7582_s24 + $0x6c] sm:$0xff]   ;;  %v7058_v57 = vld [vmem:[%s9597_s2 + $0x1d8] sm:$0xff]  }
  0xb7   : > { %6709 = vmatprep.subr.bf16.mxu1 %v7045_v55 }
  0xb9   : > { %1211 = vmatmul.mubr.bf16.gmra.mxu0 %v7733_v44  ;;  %1613 = vmatmul.mubr.bf16.gmra.mxu1 %v7591_v23  ;;  %v899_v44 = vshll.u32 %v7858_v30, 16  ;;  %v904_v23 = vshll.u32 %v7861_v33, 16  ;;  %v7055_v33 = vld [vmem:[%s9597_s2 + $0x210] sm:$0xff]  }
  0xba   : > { %1218 = vmatprep.mubr.bf16.mxu0 %v7945_v46  ;;  %1620 = vmatprep.mubr.bf16.mxu1 %v7643_v58 }
  0xbb   : > { %6710 = vmatpush3.bf16.msra.mxu1 %v7045_v55  ;;  %v901_v16 = vrot.slane %v899_v44, 1  ;;  %v906_v25 = vrot.slane %v904_v23, 1  ;;  %v7060_v55 = vld [vmem:[%s9597_s2 + $0x208] sm:$0xff]   ;;  %v7066_v23 = vld [vmem:[%s9597_s2 + $0x1c0] sm:$0xff]  }
  0xbc   : > { %6711 = vmatprep.subr.bf16.mxu1 %v7047_v41  ;;  %v7064_v44 = vld [vmem:[%s9597_s2 + $0x188] sm:$0xff]  }
  0xbd   : > { %v902_v6 = vor.u32 %v901_v16, %v897_v39 }
  0xbf   : > { %6712 = vmatpush3.bf16.msra.mxu1 %v7047_v41  ;;  %v7057_v41 = vld [vmem:[%s9597_s2 + $0x1a0] sm:$0xff]  }
  0xc0   : > { %6713 = vmatprep.subr.bf16.mxu1 %v7050_v52 }
  0xc1   : > { %1219 = vmatmul.mubr.bf16.gmra.mxu0 %v7771_v8  ;;  %1621 = vmatmul.mubr.bf16.gmra.mxu1 %v7598_v26  ;;  %v740_v26 = vor.u32 %v739_v3, %v735_v48  ;;  %v8021_v48 = vld [vmem:[%s7582_s24 + $0x60] sm:$0xff]   ;;  %v9635_v3 = vld [vmem:[#allocation15_spill] sm:$0xff] }
  0xc2   : > { %1226 = vmatprep.mubr.bf16.mxu0 %v7967_v43  ;;  %1628 = vmatprep.mubr.bf16.mxu1 %v7677_v14 }
  0xc3   : > { %6714 = vmatpush3.bf16.msra.mxu1 %v7050_v52  ;;  %v7990_v51 = vsel %vm565_vm0, %v740_v26, %v744_v12  ;;  %v7067_v52 = vld [vmem:[%s9597_s2 + $0x180] sm:$0xff]  }
  0xc4   : > { %6715 = vmatprep.subr.bf16.mxu1 %v7055_v33 }
  0xc7   : > { %6716 = vmatpush3.bf16.msra.mxu1 %v7055_v33 }
  0xc8   : > { %6717 = vmatprep.subr.bf16.mxu1 %v7060_v55 }
  0xc9   : > { %1227 = vmatmul.mubr.bf16.gmra.mxu0 %v7777_v13  ;;  %1629 = vmatmul.mubr.bf16.gmra.mxu1 %v7627_v49  ;;  %v752_v49 = vor.u32 %v751_v5, %v747_v31  ;;  %v7061_v31 = vld [vmem:[%s9597_s2 + $0x1d0] sm:$0xff]   ;;  %v7181_v5 = vld [vmem:[%s7582_s24 + $0x18] sm:$0xff]  }
  0xca   : > { %1234 = vmatprep.mubr.bf16.mxu0 %v7983_v4  ;;  %1636 = vmatprep.mubr.bf16.mxu1 %v7715_v34 }
  0xcb   : > { %6718 = vmatpush3.bf16.msra.mxu1 %v7060_v55  ;;  %v7997_v19 = vsel %vm565_vm0, %v752_v49, %v756_v42 }
  0xcc   : > { %6719 = vmatprep.subr.bf16.mxu1 %v7065_v47 }
  0xcf   : > { %6720 = vmatpush3.bf16.msra.mxu1 %v7065_v47  ;;  %v7182_v47 = vld [vmem:[%s7582_s24 + $0x24] sm:$0xff]  }
  0xd1   : > { %1235 = vmatmul.mubr.bf16.gmra.mxu0 %v7804_v38  ;;  %1637 = vmatmul.mubr.bf16.gmra.mxu1 %v7635_v54  ;;  %v8004_v54 = vsel %vm565_vm0, %v902_v6, %v906_v25 }
  0xd2   : > { %1242 = vmatprep.mubr.bf16.mxu0 %v7990_v51  ;;  %1644 = vmatprep.mubr.bf16.mxu1 %v7750_v60 }
  0xd9   : > { %1243 = vmatmul.mubr.bf16.gmra.mxu0 %v7817_v50  ;;  %1645 = vmatmul.mubr.bf16.gmra.mxu1 %v7656_v1  ;;  %v7049_v1 = vld [vmem:[%s9597_s2 + $0x1b8] sm:$0xff]  }
  0xda   : > { %1250 = vmatprep.mubr.bf16.mxu0 %v7997_v19  ;;  %1652 = vmatprep.mubr.bf16.mxu1 %v7795_v27 }
  0xe1   : > { %1251 = vmatmul.mubr.bf16.gmra.mxu0 %v7844_v9  ;;  %1653 = vmatmul.mubr.bf16.gmra.mxu1 %v7664_v7  ;;  %v7051_v7 = vld [vmem:[%s9597_s2 + $0x1f0] sm:$0xff]  }
  0xe2   : > { %1258 = vmatprep.mubr.bf16.mxu0 %v8004_v54  ;;  %1660 = vmatprep.mubr.bf16.mxu1 %v7832_v63 }
  0xe9   : > { %1259 = vmatmul.mubr.bf16.gmra.mxu0 %v7858_v30  ;;  %1661 = vmatmul.mubr.bf16.gmra.mxu1 %v7693_v21  ;;  %v7052_v21 = vld [vmem:[%s9597_s2 + $0x1b0] sm:$0xff]   ;;  %v7053_v30 = vld [vmem:[%s9597_s2 + $0x1e8] sm:$0xff]  }
  0xea   : > { %1668 = vmatprep.mubr.bf16.mxu1 %v7880_v56  ;;  %6673 = vmatprep.mubr.bf16.mxu0 %v7927_v36  ;;  %v7056_v36 = vld [vmem:[%s9597_s2 + $0x1e0] sm:$0xff]  }
  0xf1   : > { %1669 = vmatmul.mubr.bf16.gmra.mxu1 %v8021_v48  ;;  %6674 = vmatmul.mubr.bf16.vlgmr.msra.gmra.mxu0 %v7609_v37  ;;  %v7054_v37 = vld [vmem:[%s9597_s2 + $0x1a8] sm:$0xff]  }
  0xf2   : > { %6066 = vmatpush3.bf16.msra.mxu0 %v7049_v1  ;;  %1676 = vmatprep.mubr.bf16.mxu1 %v7904_v10 }
  0xf3   : > { %6677 = vmatprep.mubr.bf16.mxu0 %v7621_v45  ;;  %6067 = vmatprep.subr.bf16.mxu0 %v7051_v7 }
  0xf6   : > { %6068 = vmatpush3.bf16.msra.mxu0 %v7052_v21 }
  0xf7   : > { %6069 = vmatprep.subr.bf16.mxu0 %v7053_v30 }
  0xf9   : > { %1677 = vmatmul.mubr.bf16.gmra.mxu1 %v8040_v11  ;;  %6678 = vmatmul.mubr.bf16.gmra.mxu0 %v7646_v59 }
  0xfa   : > { %1684 = vmatprep.mubr.bf16.mxu1 %v7921_v22  ;;  %6681 = vmatprep.mubr.bf16.mxu0 %v7659_v2 }
  0xfb   : > { %6070 = vmatpush3.bf16.msra.mxu0 %v7054_v37 }
  0xfc   : > { %6071 = vmatprep.subr.bf16.mxu0 %v7056_v36 }
  0xff   : > { %6072 = vmatpush3.bf16.msra.mxu0 %v7057_v41 }
 0x100   : > { %6073 = vmatprep.subr.bf16.mxu0 %v7058_v57 }
 0x101   : > { %1685 = vmatmul.mubr.bf16.gmra.mxu1 %v8059_v17  ;;  %6682 = vmatmul.mubr.bf16.gmra.mxu0 %v7680_v15 }
 0x102   : > { %1692 = vmatprep.mubr.bf16.mxu1 %v7945_v46  ;;  %6685 = vmatprep.mubr.bf16.mxu0 %v7700_v28 }
 0x103   : > { %6074 = vmatpush3.bf16.msra.mxu0 %v7059_v32 }
 0x104   : > { %6075 = vmatprep.subr.bf16.mxu0 %v7061_v31 }
 0x107   : > { %6076 = vmatpush3.bf16.msra.mxu0 %v7062_v18 }
 0x108   : > { %6077 = vmatprep.subr.bf16.mxu0 %v7063_v24 }
 0x109   : > { %1693 = vmatmul.mubr.bf16.gmra.mxu1 %v7771_v8  ;;  %6686 = vmatmul.mubr.bf16.gmra.mxu0 %v7718_v35  ;;  %v9633_v8 = vld [vmem:[#allocation13_spill] sm:$0xff] }
 0x10a   : > { %1700 = vmatprep.mubr.bf16.mxu1 %v7967_v43  ;;  %6689 = vmatprep.mubr.bf16.mxu0 %v7743_v53 }
 0x10b   : > { %6078 = vmatpush3.bf16.msra.mxu0 %v7064_v44 }
 0x10c   : > { %6079 = vmatprep.subr.bf16.mxu0 %v7066_v23 }
 0x10f   : > { %6080 = vmatpush3.bf16.msra.mxu0 %v7067_v52 }
 0x111   : > { %1701 = vmatmul.mubr.bf16.gmra.mxu1 %v7777_v13  ;;  %6690 = vmatmul.mubr.bf16.gmra.mxu0 %v7753_v61  ;;  %v9634_v13 = vld [vmem:[#allocation14_spill] sm:$0xff] }
 0x112   : > { %1708 = vmatprep.mubr.bf16.mxu1 %v7983_v4  ;;  %6693 = vmatprep.mubr.bf16.mxu0 %v7788_v20 }
 0x119   : > { %1709 = vmatmul.mubr.bf16.gmra.mxu1 %v7804_v38  ;;  %6694 = vmatmul.mubr.bf16.gmra.mxu0 %v7798_v29 }
 0x11a   : > { %1716 = vmatprep.mubr.bf16.mxu1 %v7990_v51  ;;  %6697 = vmatprep.mubr.bf16.mxu0 %v7829_v62 }
 0x121   : > { %1717 = vmatmul.mubr.bf16.gmra.mxu1 %v7817_v50  ;;  %6698 = vmatmul.mubr.bf16.gmra.mxu0 %v9633_v8 }
 0x122   : > { %1724 = vmatprep.mubr.bf16.mxu1 %v7997_v19  ;;  %6701 = vmatprep.mubr.bf16.mxu0 %v9634_v13 }
 0x129   : > { %1725 = vmatmul.mubr.bf16.gmra.mxu1 %v7844_v9  ;;  %6702 = vmatmul.mubr.bf16.gmra.mxu0 %v9635_v3 }
 0x12a   : > { %2145 = vmatprep.mubr.bf16.mxu0 %v7643_v58  ;;  %6721 = vmatprep.mubr.bf16.mxu1 %v7621_v45 }
 0x131   : > { %v5809_v38 = vpop.f32.mrf.mxu0  ;;  %v6627_v12 = vpop.f32.mrf.mxu1  ;;  %2146 = vmatmul.mubr.bf16.vlgmr.msra.gmra.mxu0 %v7181_v5  ;;  %6722 = vmatmul.mubr.bf16.vlgmr.msra.gmra.mxu1 %v7646_v59 }
 0x132   : > { %2153 = vmatprep.mubr.bf16.mxu0 %v7677_v14  ;;  %6725 = vmatprep.mubr.bf16.mxu1 %v7659_v2 }
 0x133   : > { %v5810_v50 = vpop.f32.mrf.mxu0  ;;  %v1301_v39 = vpop.f32.mrf.mxu1 }
 0x134   : > { %v5811_v9 = vadd.f32 %v5810_v50, %v5809_v38 }
 0x135   : > { %v5812_v42 = vpop.f32.mrf.mxu0  ;;  %v6628_v16 = vpop.f32.mrf.mxu1 }
 0x136   : > { %v8104_v25 = vadd.f32 %v5811_v9, %v1301_v39 }
 0x137   : > { %v5813_v58 = vpop.f32.mrf.mxu0  ;;  %v1304_v45 = vpop.f32.mrf.mxu1 }
 0x138   : > { %v5814_v33 = vadd.f32 %v5813_v58, %v5812_v42 }
 0x139   : > { %v5815_v55 = vpop.f32.mrf.mxu0  ;;  %v6631_v40 = vpop.f32.mrf.mxu1  ;;  %2154 = vmatmul.mubr.bf16.gmra.mxu0 %v7182_v47  ;;  %6726 = vmatmul.mubr.bf16.gmra.mxu1 %v7680_v15  ;;  %v7183_v15 = vld [vmem:[%s7582_s24 + $0x30] sm:$0xff]  }
 0x13a   : > { %v8108_v59 = vadd.f32 %v5814_v33, %v1304_v45  ;;  %2161 = vmatprep.mubr.bf16.mxu0 %v7715_v34  ;;  %6729 = vmatprep.mubr.bf16.mxu1 %v7700_v28  ;;  %v7185_v33 = vld [vmem:[%s7582_s24 + $0x48] sm:$0xff]  }
 0x13b   : > { %v5816_v2 = vpop.f32.mrf.mxu0  ;;  %v1317_v14 = vpop.f32.mrf.mxu1 }
 0x13c   : > { %v5817_v26 = vadd.f32 %v5816_v2, %v5815_v55 }
 0x13d   : > { %v5818_v49 = vpop.f32.mrf.mxu0  ;;  %v6632_v6 = vpop.f32.mrf.mxu1 }
 0x13e   : > { %v8112_v1 = vadd.f32 %v6627_v12, %v5817_v26 }
 0x13f   : > { %v5819_v7 = vpop.f32.mrf.mxu0  ;;  %v1320_v21 = vpop.f32.mrf.mxu1 }
 0x140   : > { %v5820_v30 = vadd.f32 %v5819_v7, %v5818_v49 }
 0x141   : > { %v5821_v37 = vpop.f32.mrf.mxu0  ;;  %v8114_v36 = vpop.f32.mrf.mxu1  ;;  %2162 = vmatmul.mubr.bf16.gmra.mxu0 %v7183_v15  ;;  %6730 = vmatmul.mubr.bf16.gmra.mxu1 %v7718_v35  ;;  %v7184_v35 = vld [vmem:[%s7582_s24 + $0x3c] sm:$0xff]  }
 0x142   : > { %v8118_v34 = vadd.f32 %v6628_v16, %v5820_v30  ;;  %2169 = vmatprep.mubr.bf16.mxu0 %v7750_v60  ;;  %6733 = vmatprep.mubr.bf16.mxu1 %v7743_v53 }
 0x143   : > { %v5822_v28 = vpop.f32.mrf.mxu0  ;;  %v1333_v41 = vpop.f32.mrf.mxu1 }
 0x144   : > { %v5823_v57 = vadd.f32 %v5822_v28, %v5821_v37 }
 0x145   : > { %v5824_v32 = vpop.f32.mrf.mxu0  ;;  %v6636_v31 = vpop.f32.mrf.mxu1 }
 0x146   : > { %v8122_v18 = vadd.f32 %v5823_v57, %v1317_v14  ;;  %v8172_v57 = vld [vmem:[%s7582_s24 + $0xcc] sm:$0xff]  }
 0x147   : > { %v5825_v24 = vpop.f32.mrf.mxu0  ;;  %v1336_v44 = vpop.f32.mrf.mxu1 }
 0x148   : > { %v5826_v23 = vadd.f32 %v5825_v24, %v5824_v32  ;;  %v8175_v32 = vld [vmem:[%s7582_s24 + $0xd4] ss:$0 sps:$4 sm:$0x11]  }
 0x149   : > { %v5827_v52 = vpop.f32.mrf.mxu0  ;;  %v8124_v38 = vpop.f32.mrf.mxu1  ;;  %2170 = vmatmul.mubr.bf16.gmra.mxu0 %v7184_v35  ;;  %6734 = vmatmul.mubr.bf16.gmra.mxu1 %v7753_v61  ;;  %v7070_v35 = vld [vmem:[#allocation6 + $0x138] sm:$0xff]  }
 0x14a   : > { %v8128_v60 = vadd.f32 %v5826_v23, %v1320_v21  ;;  %2177 = vmatprep.mubr.bf16.mxu0 %v7795_v27  ;;  %6737 = vmatprep.mubr.bf16.mxu1 %v7788_v20 }
 0x14b   : > { %v5828_v53 = vpop.f32.mrf.mxu0  ;;  %v8132_v12 = vpop.f32.mrf.mxu1  ;;  %6201 = vmatprep.subr.bf16.mxu1 %v7070_v35 }
 0x14c   : > { %v5829_v5 = vadd.f32 %v5828_v53, %v5827_v52  ;;  %v1917_v52 = vrot.slane %v8175_v32, 1  ;;  %v7071_v53 = vld [vmem:[#allocation6 + $0xf8] sm:$0xff]  }
 0x14d   : > { %v5830_v50 = vpop.f32.mrf.mxu0  ;;  %v8134_v39 = vpop.f32.mrf.mxu1  ;;  %6202 = vmatpush3.bf16.msra.mxu1 %v7071_v53 }
 0x14e   : > { %v8136_v9 = vadd.f32 %v6631_v40, %v5829_v5 }
 0x14f   : > { %v5831_v42 = vpop.f32.mrf.mxu0  ;;  %v8138_v16 = vpop.f32.mrf.mxu1 }
 0x150   : > { %v5832_v58 = vadd.f32 %v5831_v42, %v5830_v50 }
 0x151   : > { %v5833_v61 = vpop.f32.mrf.mxu0  ;;  %v8140_v45 = vpop.f32.mrf.mxu1  ;;  %2178 = vmatmul.mubr.bf16.gmra.mxu0 %v7185_v33  ;;  %6738 = vmatmul.mubr.bf16.gmra.mxu1 %v7798_v29 }
 0x152   : > { %v8144_v20 = vadd.f32 %v6632_v6, %v5832_v58  ;;  %2185 = vmatprep.mubr.bf16.mxu0 %v7832_v63  ;;  %6741 = vmatprep.mubr.bf16.mxu1 %v7829_v62  ;;  %v7186_v63 = vld [vmem:[%s7582_s24 + $0x54] sm:$0xff]  }
 0x153   : > { %v5834_v27 = vpop.f32.mrf.mxu0  ;;  %v8148_v55 = vpop.f32.mrf.mxu1 }
 0x154   : > { %v5835_v40 = vadd.f32 %v5834_v27, %v5833_v61 }
 0x155   : > { %v5836_v47 = vpop.f32.mrf.mxu0  ;;  %v8150_v2 = vpop.f32.mrf.mxu1 }
 0x156   : > { %v8152_v14 = vadd.f32 %v5835_v40, %v1333_v41 }
 0x157   : > { %v5837_v26 = vpop.f32.mrf.mxu0  ;;  %v8154_v49 = vpop.f32.mrf.mxu1 }
 0x158   : > { %v5838_v29 = vadd.f32 %v5837_v26, %v5836_v47  ;;  %v7073_v47 = vld [vmem:[#allocation6 + $0x130] sm:$0xff]  }
 0x159   : > { %v5839_v6 = vpop.f32.mrf.mxu0  ;;  %v8156_v7 = vpop.f32.mrf.mxu1  ;;  %2186 = vmatmul.mubr.bf16.gmra.mxu0 %v7186_v63  ;;  %6742 = vmatmul.mubr.bf16.gmra.mxu1 %v9633_v8  ;;  %v7074_v26 = vld [vmem:[#allocation6 + $0xf0] sm:$0xff]  }
 0x15a   : > { %v8160_v62 = vadd.f32 %v5838_v29, %v1336_v44  ;;  %2193 = vmatprep.mubr.bf16.mxu0 %v7880_v56  ;;  %6745 = vmatprep.mubr.bf16.mxu1 %v9634_v13 }
 0x15b   : > { %v5840_v21 = vpop.f32.mrf.mxu0  ;;  %v8164_v30 = vpop.f32.mrf.mxu1  ;;  %6203 = vmatprep.subr.bf16.mxu1 %v7073_v47  ;;  %v7187_v47 = vld [vmem:[%s7582_s24 + $0x84] sm:$0xff]  }
 0x15c   : > { %v5841_v37 = vadd.f32 %v5840_v21, %v5839_v6  ;;  %6204 = vmatpush3.bf16.msra.mxu1 %v7074_v26 }
 0x15d   : > { %v5842_v15 = vpop.f32.mrf.mxu0  ;;  %v8166_v28 = vpop.f32.mrf.mxu1 }
 0x15e   : > { %v8169_v41 = vadd.f32 %v8114_v36, %v5841_v37  ;;  %v1916_v36 = vrot.slane %v8172_v57, 1 }
 0x15f   : > { %v5843_v8 = vpop.f32.mrf.mxu0  ;;  %v8177_v24 = vpop.f32.mrf.mxu1 }
 0x160   : > { %v5844_v56 = vadd.f32 %v5843_v8, %v5842_v15 }
 0x161   : > { %v5845_v44 = vpop.f32.mrf.mxu0  ;;  %v8179_v13 = vpop.f32.mrf.mxu1  ;;  %2194 = vmatmul.mubr.bf16.gmra.mxu0 %v8021_v48  ;;  %6746 = vmatmul.mubr.bf16.gmra.mxu1 %v9635_v3  ;;  %v7072_v48 = vld [vmem:[#allocation6 + $0x178] sm:$0xff]  }
 0x162   : > { %v8183_v23 = vadd.f32 %v6636_v31, %v5844_v56  ;;  %2201 = vmatprep.mubr.bf16.mxu0 %v7904_v10  ;;  %6749 = vmatprep.mubr.bf16.mxu1 %v7900_v0  ;;  %v1918_v0 = vsel %vm774_vm1, %v1916_v36, %v1917_v52 }
 0x163   : > { %v5846_v5 = vpop.f32.mrf.mxu0  ;;  %v8189_v50 = vpop.f32.mrf.mxu1  ;;  %6753 = vmatprep.subr.bf16.mxu0 %v7072_v48 }
 0x164   : > { %v5847_v42 = vadd.f32 %v5846_v5, %v5845_v44  ;;  %6754 = vmatpush3.bf16.msra.mxu0 %v7072_v48  ;;  %v7076_v5 = vld [vmem:[#allocation6 + $0xe8] sm:$0xff]  }
 0x165   : > { %v5848_v58 = vpop.f32.mrf.mxu0  ;;  %v8191_v3 = vpop.f32.mrf.mxu1 }
 0x166   : > { %v8194_v10 = vadd.f32 %v5847_v42, %v8132_v12 }
 0x167   : > { %v5849_v31 = vpop.f32.mrf.mxu0  ;;  %v8197_v61 = vpop.f32.mrf.mxu1 }
 0x168   : > { %v5850_v33 = vadd.f32 %v5849_v31, %v5848_v58 }
 0x169   : > { %v5851_v27 = vpop.f32.mrf.mxu0  ;;  %v8199_v40 = vpop.f32.mrf.mxu1  ;;  %2202 = vmatmul.mubr.bf16.gmra.mxu0 %v8040_v11  ;;  %6750 = vmatmul.mubr.bf16.gmra.mxu1 %v1918_v0 }
 0x16a   : > { %v8203_v29 = vadd.f32 %v5850_v33, %v8138_v16  ;;  %2209 = vmatprep.mubr.bf16.mxu0 %v7921_v22 }
 0x16b   : > { %v5852_v12 = vpop.f32.mrf.mxu0  ;;  %v8206_v6 = vpop.f32.mrf.mxu1 }
 0x16c   : > { %v5853_v63 = vadd.f32 %v5852_v12, %v5851_v27 }
 0x16d   : > { %v5854_v21 = vpop.f32.mrf.mxu0  ;;  %v8208_v37 = vpop.f32.mrf.mxu1 }
 0x16e   : > { %v8211_v15 = vadd.f32 %v8124_v38, %v5853_v63  ;;  %v7075_v38 = vld [vmem:[#allocation6 + $0x128] sm:$0xff]  }
 0x16f   : > { %v5855_v11 = vpop.f32.mrf.mxu0  ;;  %v8213_v8 = vpop.f32.mrf.mxu1  ;;  %6205 = vmatprep.subr.bf16.mxu1 %v7075_v38  ;;  %v7188_v38 = vld [vmem:[%s7582_s24 + $0x90] sm:$0xff]  }
 0x170   : > { %v5856_v56 = vadd.f32 %v5855_v11, %v5854_v21  ;;  %6206 = vmatpush3.bf16.msra.mxu1 %v7076_v5 }
 0x171   : > { %v5857_v16 = vpop.f32.mrf.mxu0  ;;  %v5945_v44 = vpop.f32.mrf.mxu1  ;;  %2210 = vmatmul.mubr.bf16.gmra.mxu0 %v8059_v17 }
 0x172   : > { %v8217_v22 = vadd.f32 %v8134_v39, %v5856_v56  ;;  %2217 = vmatprep.mubr.bf16.mxu0 %v7945_v46 }
 0x173   : > { %v5858_v36 = vpop.f32.mrf.mxu0  ;;  %v5946_v52 = vpop.f32.mrf.mxu1 }
 0x174   : > { %v5859_v35 = vadd.f32 %v5858_v36, %v5857_v16  ;;  %v5947_v53 = vadd.f32 %v5946_v52, %v5945_v44  ;;  %v7077_v44 = vld [vmem:[#allocation6 + $0x170] sm:$0xff]  }
 0x175   : > { %v5860_v42 = vpop.f32.mrf.mxu0  ;;  %v5948_v48 = vpop.f32.mrf.mxu1  ;;  %6755 = vmatprep.subr.bf16.mxu0 %v7077_v44 }
 0x176   : > { %v8221_v58 = vadd.f32 %v5859_v35, %v8148_v55  ;;  %v8224_v0 = vadd.f32 %v5947_v53, %v8104_v25  ;;  %6756 = vmatpush3.bf16.msra.mxu0 %v7077_v44 }
 0x177   : > { %v5861_v17 = vpop.f32.mrf.mxu0  ;;  %v5949_v39 = vpop.f32.mrf.mxu1 }
 0x178   : > { %v8226_v46 = vadd.f32 %v5861_v17, %v5860_v42  ;;  %v5950_v31 = vadd.f32 %v5949_v39, %v5948_v48 }
 0x179   : > { %v5863_v33 = vpop.f32.mrf.mxu0  ;;  %v5951_v27 = vpop.f32.mrf.mxu1  ;;  %2218 = vmatmul.mubr.bf16.gmra.mxu0 %v7187_v47 }
 0x17a   : > { %2225 = vmatprep.mubr.bf16.mxu0 %v7967_v43  ;;  %v8231_v26 = vadd.f32 %v5950_v31, %v8108_v59 }
 0x17b   : > { %v5864_v55 = vpop.f32.mrf.mxu0  ;;  %v5952_v25 = vpop.f32.mrf.mxu1 }
 0x17c   : > { %v5865_v12 = vadd.f32 %v5864_v55, %v5863_v33  ;;  %v5953_v63 = vadd.f32 %v5952_v25, %v5951_v27 }
 0x17d   : > { %v5866_v21 = vpop.f32.mrf.mxu0  ;;  %v5954_v11 = vpop.f32.mrf.mxu1 }
 0x17e   : > { %v8234_v56 = vadd.f32 %v8140_v45, %v5865_v12  ;;  %v8237_v16 = vadd.f32 %v5953_v63, %v8112_v1  ;;  %v7189_v12 = vld [vmem:[%s7582_s24 + $0x9c] sm:$0xff]  }
 0x17f   : > { %v5867_v36 = vpop.f32.mrf.mxu0  ;;  %v5955_v52 = vpop.f32.mrf.mxu1 }
 0x180   : > { %v5868_v43 = vadd.f32 %v5867_v36, %v5866_v21  ;;  %v5956_v35 = vadd.f32 %v5955_v52, %v5954_v11  ;;  %v7078_v21 = vld [vmem:[#allocation6 + $0x120] sm:$0xff]  }
 0x181   : > { %v5869_v59 = vpop.f32.mrf.mxu0  ;;  %v5957_v53 = vpop.f32.mrf.mxu1  ;;  %2226 = vmatmul.mubr.bf16.gmra.mxu0 %v7188_v38  ;;  %6207 = vmatprep.subr.bf16.mxu1 %v7078_v21 }
 0x182   : > { %v8241_v5 = vadd.f32 %v8150_v2, %v5868_v43  ;;  %2233 = vmatprep.mubr.bf16.mxu0 %v7983_v4  ;;  %v8245_v45 = vadd.f32 %v5956_v35, %v8118_v34 }
 0x183   : > { %v5870_v1 = vpop.f32.mrf.mxu0  ;;  %v5958_v42 = vpop.f32.mrf.mxu1 }
 0x184   : > { %v5871_v48 = vadd.f32 %v5870_v1, %v5869_v59  ;;  %v5959_v17 = vadd.f32 %v5958_v42, %v5957_v53  ;;  %v7085_v53 = vld [vmem:[#allocation6 + $0x160] sm:$0xff]   ;;  %v7081_v42 = vld [vmem:[#allocation6 + $0xd8] sm:$0xff]  }
 0x185   : > { %v5872_v39 = vpop.f32.mrf.mxu0  ;;  %v5960_v31 = vpop.f32.mrf.mxu1 }
 0x186   : > { %v8248_v33 = vadd.f32 %v5871_v48, %v8164_v30  ;;  %v8251_v27 = vadd.f32 %v5959_v17, %v8122_v18  ;;  %v7082_v30 = vld [vmem:[#allocation6 + $0x168] sm:$0xff]   ;;  %v7079_v18 = vld [vmem:[#allocation6 + $0xe0] sm:$0xff]  }
 0x187   : > { %v5873_v2 = vpop.f32.mrf.mxu0  ;;  %v5961_v47 = vpop.f32.mrf.mxu1  ;;  %6757 = vmatprep.subr.bf16.mxu0 %v7082_v30  ;;  %6208 = vmatpush3.bf16.msra.mxu1 %v7079_v18  ;;  %v7089_v18 = vld [vmem:[#allocation6 + $0x150] sm:$0xff]  }
 0x188   : > { %v8253_v4 = vadd.f32 %v5873_v2, %v5872_v39  ;;  %v5962_v34 = vadd.f32 %v5961_v47, %v5960_v31  ;;  %6758 = vmatpush3.bf16.msra.mxu0 %v7082_v30  ;;  %v7190_v2 = vld [vmem:[%s7582_s24 + $0xa8] sm:$0xff]   ;;  %v7088_v47 = vld [vmem:[#allocation6 + $0x158] sm:$0xff]  }
 0x189   : > { %v5875_v55 = vpop.f32.mrf.mxu0  ;;  %v5963_v25 = vpop.f32.mrf.mxu1  ;;  %2234 = vmatmul.mubr.bf16.gmra.mxu0 %v7189_v12  ;;  %6759 = vmatprep.subr.bf16.mxu0 %v7085_v53  ;;  %v7083_v12 = vld [vmem:[#allocation6 + $0x110] sm:$0xff]  }
 0x18a   : > { %2241 = vmatprep.mubr.bf16.mxu0 %v7990_v51  ;;  %v8258_v63 = vadd.f32 %v5962_v34, %v8128_v60  ;;  %v7080_v60 = vld [vmem:[#allocation6 + $0x118] sm:$0xff]  }
 0x18b   : > { %v5876_v11 = vpop.f32.mrf.mxu0  ;;  %v5964_v44 = vpop.f32.mrf.mxu1  ;;  %6209 = vmatprep.subr.bf16.mxu1 %v7080_v60  ;;  %v1911_v60 = vshll.u32 %v8175_v32, 16 }
 0x18c   : > { %v5877_v36 = vadd.f32 %v5876_v11, %v5875_v55  ;;  %v5965_v52 = vadd.f32 %v5964_v44, %v5963_v25  ;;  %6210 = vmatpush3.bf16.msra.mxu1 %v7081_v42  ;;  %6760 = vmatpush3.bf16.msra.mxu0 %v7085_v53  ;;  %v1906_v25 = vshll.u32 %v8172_v57, 16  ;;  %v7084_v11 = vld [vmem:[#allocation6 + $0xd0] sm:$0xff]   ;;  %v7086_v53 = vld [vmem:[#allocation6 + $0x108] sm:$0xff]  }
 0x18d   : > { %v5878_v43 = vpop.f32.mrf.mxu0  ;;  %v5966_v35 = vpop.f32.mrf.mxu1  ;;  %6761 = vmatprep.subr.bf16.mxu0 %v7088_v47  ;;  %6211 = vmatprep.subr.bf16.mxu1 %v7083_v12  ;;  %v1913_v32 = vrot.slane %v1911_v60, 1 }
 0x18e   : > { %v8261_v59 = vadd.f32 %v8156_v7, %v5877_v36  ;;  %v8264_v51 = vadd.f32 %v5965_v52, %v8136_v9 }
 0x18f   : > { %v5879_v38 = vpop.f32.mrf.mxu0  ;;  %v5967_v1 = vpop.f32.mrf.mxu1 }
 0x190   : > { %v5880_v48 = vadd.f32 %v5879_v38, %v5878_v43  ;;  %v5968_v17 = vadd.f32 %v5967_v1, %v5966_v35  ;;  %6212 = vmatpush3.bf16.msra.mxu1 %v7084_v11  ;;  %6762 = vmatpush3.bf16.msra.mxu0 %v7088_v47  ;;  %v1904_v43 = vshrl.u32 %v8172_v57, 16  ;;  %v1908_v35 = vrot.slane %v1906_v25, 1  ;;  %v7087_v1 = vld [vmem:[#allocation6 + $0xc8] sm:$0xff]   ;;  %v7090_v47 = vld [vmem:[#allocation6 + $0x100] sm:$0xff]  }
 0x191   : > { %v5881_v39 = vpop.f32.mrf.mxu0  ;;  %v5969_v31 = vpop.f32.mrf.mxu1  ;;  %2242 = vmatmul.mubr.bf16.gmra.mxu0 %v7190_v2  ;;  %6763 = vmatprep.subr.bf16.mxu0 %v7089_v18  ;;  %v7091_v25 = vld [vmem:[#allocation6 + $0xc0] sm:$0xff]  }
 0x192   : > { %v8268_v7 = vadd.f32 %v8166_v28, %v5880_v48  ;;  %2249 = vmatprep.mubr.bf16.mxu0 %v7997_v19  ;;  %v8272_v9 = vadd.f32 %v5968_v17, %v8144_v20  ;;  %v7191_v48 = vld [vmem:[%s7582_s24 + $0xb4] sm:$0xff]   ;;  %6213 = vmatprep.subr.bf16.mxu1 %v7086_v53  ;;  %v7092_v17 = vld [vmem:[#allocation6 + $0x148] sm:$0xff]   ;;  %v1909_v2 = vor.u32 %v1908_v35, %v1904_v43 }
 0x193   : > { %v5882_v34 = vpop.f32.mrf.mxu0  ;;  %v5970_v55 = vpop.f32.mrf.mxu1  ;;  %v7192_v53 = vld [vmem:[%s7582_s24 + $0xc0] sm:$0xff]   ;;  %s9361_s24 = scalar_lea.vmem [#allocation8], %s5418_s5  ;;  %s5792_s5 = sshll.u32 %s7403_s9, 12 }
 0x194   : > { %v5883_v21 = vadd.f32 %v5882_v34, %v5881_v39  ;;  %v5971_v30 = vadd.f32 %v5970_v55, %v5969_v31  ;;  %6214 = vmatpush3.bf16.msra.mxu1 %v7087_v1  ;;  %6764 = vmatpush3.bf16.msra.mxu0 %v7089_v18  ;;  %v1914_v18 = vsel %vm565_vm0, %v1909_v2, %v1913_v32  ;;  %s5315_s19 = sshll.u32 %s9361_s24, 4  ;;  %s9549_s11 = scalar_lea.hbm %s9603_s8, %s5792_s5  ;;  %s9551_s19 = int_to_ptr.vmem [resolvable:$true] %s5315_s19 }
 0x195   : > { %v8275_v44 = vpop.f32.mrf.mxu0  ;;  %v5972_v28 = vpop.f32.mrf.mxu1  ;;  %6765 = vmatprep.subr.bf16.mxu0 %v7092_v17  ;;  %6215 = vmatprep.subr.bf16.mxu1 %v7090_v47  ;;  %s7257_s15 = scalar_lea.vmem %s9551_s19, 4096  ;;  %s7334_s9 = smov [#allocation8]  }
 0x196   : > { %v8278_v19 = vadd.f32 %v5883_v21, %v8189_v50  ;;  %v8281_v20 = vadd.f32 %v5971_v30, %v8152_v14  ;;  %v7095_v30 = vld [vmem:[#allocation6 + $0x140] sm:$0xff]   ;;  %p7258_p11 = scmp.ne.s32.totalorder %s9551_s19, %s7257_s15  ;;  %s7261_s17 = sshll.u32 %s7334_s9, 4  ;;  %s7262_s17 = int_to_ptr.vmem [resolvable:$false] %s7261_s17 }
 0x197   : > { %v8283_v36 = vpop.f32.mrf.mxu0  ;;  %v5973_v52 = vpop.f32.mrf.mxu1  ;;  %s7263_s21 = scalar_lea.vmem %s7262_s17, 8192  ;;  %p7264_p2 = scmp.lt.s32.totalorder %s9551_s19, %s7262_s17 }
 0x198   : > { %v5974_v38 = vadd.f32 %v5973_v52, %v5972_v28  ;;  %6216 = vmatpush3.bf16.msra.mxu1 %v7091_v25  ;;  %6766 = vmatpush3.bf16.msra.mxu0 %v7092_v17  ;;  %p7259_p12 = pnand %p7258_p11, %p9656_p7  ;;  %p7265_p13 = scmp.lt.s32.totalorder %s7263_s21, %s7257_s15 }
 0x199   : > { %v5887_v50 = vpop.f32.mrf.mxu0  ;;  %v5975_v42 = vpop.f32.mrf.mxu1  ;;  %2250 = vmatmul.mubr.bf16.gmra.mxu0 %v7191_v48  ;;  %6767 = vmatprep.subr.bf16.mxu0 %v7095_v30 }
 0x19a   : > { %2257 = vmatprep.mubr.bf16.mxu0 %v8004_v54  ;;  %v8290_v14 = vadd.f32 %v5974_v38, %v8160_v62  ;;  %p7260_p10 = pneg %p7259_p12  ;;  %p7266_p0 = por %p7265_p13, %p7264_p2 }
 0x19b   : > { %v5888_v39 = vpop.f32.mrf.mxu0  ;;  %v5976_v31 = vpop.f32.mrf.mxu1 }
 0x19c   : > { %v5889_v34 = vadd.f32 %v5888_v39, %v5887_v50  ;;  %v5977_v55 = vadd.f32 %v5976_v31, %v5975_v42  ;;  %6768 = vmatpush3.bf16.msra.mxu0 %v7095_v30  ;;  %p7267_p5 = pnand %p7266_p0, %p7260_p10 }
 0x19d   : > { %v5890_v12 = vpop.f32.mrf.mxu0  ;;  %v5978_v21 = vpop.f32.mrf.mxu1 }
 0x19e   : > { %v8293_v54 = vadd.f32 %v8179_v13, %v5889_v34  ;;  %v8296_v62 = vadd.f32 %v5977_v55, %v8169_v41 }
 0x19f   : > { %v5891_v11 = vpop.f32.mrf.mxu0  ;;  %v5979_v28 = vpop.f32.mrf.mxu1 }
 0x1a0   : > { %v5892_v52 = vadd.f32 %v5891_v11, %v5890_v12  ;;  %v5980_v43 = vadd.f32 %v5979_v28, %v5978_v21 }
 0x1a1   : > { %v5893_v35 = vpop.f32.mrf.mxu0  ;;  %v5981_v60 = vpop.f32.mrf.mxu1  ;;  %2258 = vmatmul.mubr.bf16.gmra.mxu0 %v7192_v53 }
 0x1a2   : > { %v8301_v13 = vadd.f32 %v8191_v3, %v5892_v52  ;;  %2265 = vmatprep.mubr.bf16.mxu0 %v1914_v18  ;;  %v8304_v41 = vadd.f32 %v5980_v43, %v8183_v23 }
 0x1a3   : > { %v5894_v38 = vpop.f32.mrf.mxu0  ;;  %v5982_v1 = vpop.f32.mrf.mxu1 }
 0x1a4   : > { %v5895_v50 = vadd.f32 %v5894_v38, %v5893_v35  ;;  %v5983_v42 = vadd.f32 %v5982_v1, %v5981_v60 }
 0x1a5   : > { %v8306_v48 = vpop.f32.mrf.mxu0  ;;  %v5984_v17 = vpop.f32.mrf.mxu1 }
 0x1a6   : > { %v8309_v39 = vadd.f32 %v5895_v50, %v8206_v6  ;;  %v8312_v31 = vadd.f32 %v5983_v42, %v8194_v10 }
 0x1a7   : > { %v8314_v3 = vpop.f32.mrf.mxu0  ;;  %v5985_v2 = vpop.f32.mrf.mxu1 }
 0x1a8   : > { %v5986_v32 = vadd.f32 %v5985_v2, %v5984_v17 }
 0x1a9   : > { %v5899_v23 = vpop.f32.mrf.mxu0  ;;  %v5987_v47 = vpop.f32.mrf.mxu1  ;;  %2266 = vmatmul.mubr.bf16.gmra.mxu0 %v8172_v57 }
 0x1aa   : > { %v8318_v34 = vadd.f32 %v5986_v32, %v8203_v29  ;;  %v8342_v32 = vld [vmem:[#allocation6 + $0xb8] sm:$0xff]  }
 0x1ab   : > { %v5900_v55 = vpop.f32.mrf.mxu0  ;;  %v5988_v25 = vpop.f32.mrf.mxu1  ;;  %6801 = vmatprep.subr.bf16.mxu1 %v8342_v32 }
 0x1ac   : > { %v8320_v12 = vadd.f32 %v5900_v55, %v5899_v23  ;;  %v5989_v6 = vadd.f32 %v5988_v25, %v5987_v47 }
 0x1ad   : > { %v8322_v21 = vpop.f32.mrf.mxu0  ;;  %v5990_v10 = vpop.f32.mrf.mxu1 }
 0x1ae   : > { %v1663_v30 = vadd.f32 %v5989_v6, %v8211_v15 }
 0x1af   : > { %v8325_v11 = vpop.f32.mrf.mxu0  ;;  %v5991_v28 = vpop.f32.mrf.mxu1 }
 0x1b0   : > { %v5992_v18 = vadd.f32 %v5991_v28, %v5990_v10 }
 0x1b1   : > { %v5993_v52 = vpop.f32.mrf.mxu1  ;;  %v6675_v43 = vpop.f32.mrf.mxu0 }
 0x1b2   : > { %v8328_v57 = vadd.f32 %v6675_v43, %v8237_v16  ;;  %v1666_v29 = vadd.f32 %v5992_v18, %v8217_v22  ;;  %v1369_v16 = vadd.f32 %v8226_v46, %v8154_v49 }
 0x1b3   : > { %v5994_v35 = vpop.f32.mrf.mxu1  ;;  %v1767_v60 = vpop.f32.mrf.mxu0 }
 0x1b4   : > { %v5995_v53 = vadd.f32 %v5994_v35, %v5993_v52  ;;  %v8332_v38 = vadd.f32 %v1767_v60, %v8224_v0 }
 0x1b5   : > { %v5996_v1 = vpop.f32.mrf.mxu1  ;;  %v6676_v50 = vpop.f32.mrf.mxu0 }
 0x1b6   : > { %v8335_v15 = vadd.f32 %v6676_v50, %v8245_v45  ;;  %v1671_v42 = vadd.f32 %v5995_v53, %v8221_v58 }
 0x1b7   : > { %v5997_v17 = vpop.f32.mrf.mxu1  ;;  %v8338_v2 = vpop.f32.mrf.mxu0 }
 0x1b8   : > { %v5998_v22 = vadd.f32 %v5997_v17, %v5996_v1 }
 0x1b9   : > { %v5999_v23 = vpop.f32.mrf.mxu1  ;;  %v6679_v47 = vpop.f32.mrf.mxu0 }
 0x1ba   : > { %v8345_v0 = vadd.f32 %v6679_v47, %v8264_v51  ;;  %v8347_v55 = vadd.f32 %v5998_v22, %v1369_v16 }
 0x1bb   : > { %v6000_v45 = vpop.f32.mrf.mxu1  ;;  %v1783_v58 = vpop.f32.mrf.mxu0 }
 0x1bc   : > { %v6001_v25 = vadd.f32 %v6000_v45, %v5999_v23  ;;  %v8351_v6 = vadd.f32 %v1783_v58, %v8251_v27 }
 0x1bd   : > { %v6002_v10 = vpop.f32.mrf.mxu1  ;;  %v6680_v49 = vpop.f32.mrf.mxu0 }
 0x1be   : > { %v8354_v46 = vadd.f32 %v6680_v49, %v8272_v9  ;;  %v1679_v28 = vadd.f32 %v6001_v25, %v8234_v56 }
 0x1bf   : > { %v6003_v18 = vpop.f32.mrf.mxu1  ;;  %v8357_v51 = vpop.f32.mrf.mxu0 }
 0x1c0   : > { %v6004_v52 = vadd.f32 %v6003_v18, %v6002_v10 }
 0x1c1   : > { %v6005_v43 = vpop.f32.mrf.mxu1  ;;  %v6683_v35 = vpop.f32.mrf.mxu0 }
 0x1c2   : > { %v8360_v60 = vadd.f32 %v6683_v35, %v8296_v62  ;;  %v1682_v53 = vadd.f32 %v6004_v52, %v8241_v5  ;;  %v1385_v62 = vadd.f32 %v8253_v4, %v8177_v24 }
 0x1c3   : > { %v6006_v27 = vpop.f32.mrf.mxu1  ;;  %v1799_v1 = vpop.f32.mrf.mxu0 }
 0x1c4   : > { %v6007_v50 = vadd.f32 %v6006_v27, %v6005_v43  ;;  %v8364_v17 = vadd.f32 %v1799_v1, %v8281_v20 }
 0x1c5   : > { %v6008_v9 = vpop.f32.mrf.mxu1  ;;  %v6684_v16 = vpop.f32.mrf.mxu0 }
 0x1c6   : > { %v8367_v56 = vadd.f32 %v6684_v16, %v8304_v41  ;;  %v1687_v22 = vadd.f32 %v6007_v50, %v8248_v33 }
 0x1c7   : > { %v6009_v23 = vpop.f32.mrf.mxu1  ;;  %v8370_v47 = vpop.f32.mrf.mxu0 }
 0x1c8   : > { %v6010_v5 = vadd.f32 %v6009_v23, %v6008_v9 }
 0x1c9   : > { %v6011_v45 = vpop.f32.mrf.mxu1  ;;  %v6687_v58 = vpop.f32.mrf.mxu0 }
 0x1ca   : > { %v8374_v25 = vadd.f32 %v6687_v58, %v1663_v30  ;;  %v8376_v20 = vadd.f32 %v6010_v5, %v1385_v62 }
 0x1cb   : > { %v6012_v10 = vpop.f32.mrf.mxu1  ;;  %v1815_v49 = vpop.f32.mrf.mxu0 }
 0x1cc   : > { %v6013_v18 = vadd.f32 %v6012_v10, %v6011_v45  ;;  %v8379_v41 = vadd.f32 %v1815_v49, %v8312_v31  ;;  %v5886_v31 = vadd.f32 %v8283_v36, %v8275_v44 }
 0x1cd   : > { %v6014_v33 = vpop.f32.mrf.mxu1  ;;  %v6688_v52 = vpop.f32.mrf.mxu0 }
 0x1ce   : > { %v8381_v43 = vadd.f32 %v6688_v52, %v1666_v29  ;;  %v1695_v35 = vadd.f32 %v6013_v18, %v8261_v59 }
 0x1cf   : > { %v6015_v24 = vpop.f32.mrf.mxu1  ;;  %v8384_v4 = vpop.f32.mrf.mxu0 }
 0x1d0   : > { %v6016_v27 = vadd.f32 %v6015_v24, %v6014_v33 }
 0x1d1   : > { %v6017_v30 = vpop.f32.mrf.mxu1  ;;  %v6691_v1 = vpop.f32.mrf.mxu0 }
 0x1d2   : > { %v8386_v50 = vadd.f32 %v6691_v1, %v1679_v28  ;;  %v1698_v9 = vadd.f32 %v6016_v27, %v8268_v7  ;;  %v1401_v28 = vadd.f32 %v5886_v31, %v8197_v61 }
 0x1d3   : > { %v6018_v16 = vpop.f32.mrf.mxu1  ;;  %v1831_v23 = vpop.f32.mrf.mxu0 }
 0x1d4   : > { %v6019_v62 = vadd.f32 %v6018_v16, %v6017_v30  ;;  %v8391_v29 = vadd.f32 %v1831_v23, %v1671_v42 }
 0x1d5   : > { %v6020_v5 = vpop.f32.mrf.mxu1  ;;  %v6692_v59 = vpop.f32.mrf.mxu0 }
 0x1d6   : > { %v8393_v45 = vadd.f32 %v6692_v59, %v1682_v53  ;;  %v1703_v58 = vadd.f32 %v6019_v62, %v8278_v19 }
 0x1d7   : > { %v6021_v10 = vpop.f32.mrf.mxu1  ;;  %v8396_v49 = vpop.f32.mrf.mxu0 }
 0x1d8   : > { %v6022_v7 = vadd.f32 %v6021_v10, %v6020_v5 }
 0x1d9   : > { %v6023_v18 = vpop.f32.mrf.mxu1  ;;  %v6695_v33 = vpop.f32.mrf.mxu0 }
 0x1da   : > { %v8399_v52 = vadd.f32 %v6695_v33, %v1695_v35  ;;  %v8401_v44 = vadd.f32 %v6022_v7, %v1401_v28 }
 0x1db   : > { %v6024_v36 = vpop.f32.mrf.mxu1  ;;  %v1847_v42 = vpop.f32.mrf.mxu0 }
 0x1dc   : > { %v6025_v24 = vadd.f32 %v6024_v36, %v6023_v18  ;;  %v8403_v27 = vadd.f32 %v1847_v42, %v1687_v22  ;;  %v5898_v22 = vadd.f32 %v8314_v3, %v8306_v48 }
 0x1dd   : > { %v6026_v53 = vpop.f32.mrf.mxu1  ;;  %v6696_v30 = vpop.f32.mrf.mxu0 }
 0x1de   : > { %v8405_v19 = vadd.f32 %v6696_v30, %v1698_v9  ;;  %v1711_v1 = vadd.f32 %v6025_v24, %v8293_v54  ;;  %v1417_v24 = vadd.f32 %v5898_v22, %v8213_v8 }
 0x1df   : > { %v6027_v16 = vpop.f32.mrf.mxu1  ;;  %v8408_v61 = vpop.f32.mrf.mxu0 }
 0x1e0   : > { %v6028_v23 = vadd.f32 %v6027_v16, %v6026_v53  ;;  %v5904_v16 = vadd.f32 %v8325_v11, %v8322_v21 }
 0x1e1   : > { %v6029_v31 = vpop.f32.mrf.mxu1  ;;  %v6699_v35 = vpop.f32.mrf.mxu0 }
 0x1e2   : > { %v8410_v62 = vadd.f32 %v6699_v35, %v1711_v1  ;;  %v1714_v5 = vadd.f32 %v6028_v23, %v8301_v13 }
 0x1e3   : > { %v6030_v59 = vpop.f32.mrf.mxu1  ;;  %v1863_v10 = vpop.f32.mrf.mxu0 }
 0x1e4   : > { %v6031_v28 = vadd.f32 %v6030_v59, %v6029_v31  ;;  %v8415_v9 = vadd.f32 %v1863_v10, %v1703_v58  ;;  %v1422_v58 = vadd.f32 %v8199_v40, %v8320_v12  ;;  %v1425_v10 = vadd.f32 %v8208_v37, %v5904_v16 }
 0x1e5   : > { %v6032_v7 = vpop.f32.mrf.mxu1  ;;  %v6700_v54 = vpop.f32.mrf.mxu0 }
 0x1e6   : > { %v8417_v18 = vadd.f32 %v6700_v54, %v1714_v5  ;;  %v1719_v33 = vadd.f32 %v6031_v28, %v8309_v39 }
 0x1e7   : > { %v6033_v36 = vpop.f32.mrf.mxu1  ;;  %v8420_v42 = vpop.f32.mrf.mxu0 }
 0x1e8   : > { %v6034_v13 = vadd.f32 %v6033_v36, %v6032_v7 }
 0x1e9   : > { %v6035_v53 = vpop.f32.mrf.mxu1  ;;  %v6703_v30 = vpop.f32.mrf.mxu0 }
 0x1ea   : > { %v8423_v1 = vadd.f32 %v6034_v13, %v1417_v24 }
 0x1eb   : > { %v6036_v48 = vpop.f32.mrf.mxu1  ;;  %v1879_v3 = vpop.f32.mrf.mxu0 }
 0x1ec   : > { %v6037_v23 = vadd.f32 %v6036_v48, %v6035_v53  ;;  %v8429_v39 = vadd.f32 %v1879_v3, %v1719_v33  ;;  %v8441_v53 = vld [vmem:[%s9598_s3] ss:$0 sm:$0xff]  ;;  %v7117_v3 = vld [vmem:[#allocation6 + $0x78] sm:$0xff]  }
 0x1ed   : > { %v6038_v31 = vpop.f32.mrf.mxu1  ;;  %v6704_v35 = vpop.f32.mrf.mxu0  ;;  %6337 = vmatprep.subr.bf16.mxu0 %v7117_v3 }
 0x1ee   : > { %v1727_v5 = vadd.f32 %v6037_v23, %v1422_v58  ;;  %v1771_v23 = vadd.f32 %v8338_v2, %v8231_v26 }
 0x1ef   : > { %v6039_v8 = vpop.f32.mrf.mxu1  ;;  %v8431_v59 = vpop.f32.mrf.mxu0 }
 0x1f0   : > { %v8434_v22 = vadd.f32 %v6703_v30, %v1727_v5  ;;  %v6040_v28 = vadd.f32 %v6039_v8, %v6038_v31  ;;  %v8450_v5 = vld [vmem:[%s9599_s4] ss:$0 sm:$0xff] }
 0x1f1   : > { %v6081_v7 = vpop.f32.mrf.mxu0  ;;  %v6723_v54 = vpop.f32.mrf.mxu1 }
 0x1f2   : > { %v1730_v40 = vadd.f32 %v6040_v28, %v1425_v10 }
 0x1f3   : > { %v6082_v12 = vpop.f32.mrf.mxu0  ;;  %v2308_v36 = vpop.f32.mrf.mxu1 }
 0x1f4   : > { %v8436_v21 = vadd.f32 %v6704_v35, %v1730_v40  ;;  %v6083_v11 = vadd.f32 %v6082_v12, %v6081_v7 }
 0x1f5   : > { %v6084_v33 = vpop.f32.mrf.mxu0  ;;  %v6724_v24 = vpop.f32.mrf.mxu1 }
 0x1f6   : > { %v2309_v13 = vadd.f32 %v6083_v11, %v2308_v36 }
 0x1f7   : > { %v6085_v37 = vpop.f32.mrf.mxu0  ;;  %v2311_v58 = vpop.f32.mrf.mxu1 }
 0x1f8   : > { %v2435_v30 = vadd.f32 %v2309_v13, %v8332_v38  ;;  %v6086_v48 = vadd.f32 %v6085_v37, %v6084_v33 }
 0x1f9   : > { %v6087_v16 = vpop.f32.mrf.mxu0  ;;  %v6727_v7 = vpop.f32.mrf.mxu1 }
 0x1fa   : > { %v2474_v31 = vmul.f32 %v8441_v53, %v2435_v30  ;;  %v2312_v35 = vadd.f32 %v6086_v48, %v2311_v58 }
 0x1fb   : > { %v6088_v8 = vpop.f32.mrf.mxu0  ;;  %v2324_v13 = vpop.f32.mrf.mxu1 }
 0x1fc   : > { %v2436_v10 = vadd.f32 %v2312_v35, %v1771_v23  ;;  %v6089_v28 = vadd.f32 %v6088_v8, %v6087_v16  ;;  %v2513_v40 = vadd.f32 %v8450_v5, %v2474_v31 }
 0x1fd   : > { %v6090_v38 = vpop.f32.mrf.mxu0  ;;  %v6728_v8 = vpop.f32.mrf.mxu1 }
 0x1fe   : > { %v2475_v12 = vmul.f32 %v8441_v53, %v2436_v10  ;;  %v2317_v36 = vadd.f32 %v6723_v54, %v6089_v28  ;;  %v2545_v30 = vmax.f32 %v2513_v40, 0.0 }
 0x1ff   : > { %v6091_v26 = vpop.f32.mrf.mxu0 }
 0x200   : > { %v2514_v2 = vadd.f32 %v8450_v5, %v2475_v12  ;;  %v2437_v11 = vadd.f32 %v2317_v36, %v8328_v57  ;;  %v6092_v33 = vadd.f32 %v6091_v26, %v6090_v38 }
 0x201   : > { %v6093_v37 = vpop.f32.mrf.mxu0 }
 0x202   : > { %v2546_v48 = vmax.f32 %v2514_v2, 0.0  ;;  %v2476_v3 = vmul.f32 %v8441_v53, %v2437_v11  ;;  %v2320_v58 = vadd.f32 %v6724_v24, %v6092_v33 }
 0x203   : > { %v6094_v16 = vpop.f32.mrf.mxu0 }
 0x204   : > { %v2577_v23 = vpack.c.bf16 %v2546_v48, %v2545_v30  ;;  %v2438_v31 = vadd.f32 %v2320_v58, %v8335_v15  ;;  %v6095_v54 = vadd.f32 %v6094_v16, %v6093_v37  ;;  %v2515_v35 = vadd.f32 %v8450_v5, %v2476_v3  ;;  %v2327_v37 = vpop.f32.mrf.mxu1 }
 0x205   : > { %v6096_v10 = vpop.f32.mrf.mxu0  ;;  %v1787_v15 = vadd.f32 %v8357_v51, %v8258_v63 }
 0x206   : > { %v2594_v57 = vshrl.u32 %v2577_v23, 16  ;;  %v2477_v28 = vmul.f32 %v8441_v53, %v2438_v31  ;;  %v2325_v40 = vadd.f32 %v6095_v54, %v2324_v13  ;;  %v2597_v36 = vshll.u32 %v2577_v23, 16 }
 0x207   : > { %v6097_v24 = vpop.f32.mrf.mxu0  ;;  %v2547_v11 = vmax.f32 %v2515_v35, 0.0 }
 0x208   : > { %v2596_v12 = vrot.slane %v2594_v57, 7  ;;  %v2516_v26 = vadd.f32 %v8450_v5, %v2477_v28  ;;  %v6098_v2 = vadd.f32 %v6097_v24, %v6096_v10  ;;  %v2439_v33 = vadd.f32 %v2325_v40, %v8351_v6  ;;  %v8474_v40 = vpop.f32.mrf.mxu1 }
 0x209   : > { %v6099_v30 = vpop.f32.mrf.mxu0 }
 0x20a   : > { %v2599_v48 = vor.u32 %v2597_v36, %v2596_v12  ;;  %v2756_v3 = vsel %vm8460_vm4, %v2596_v12, 0  ;;  %v2548_v58 = vmax.f32 %v2516_v26, 0.0  ;;  %v2328_v13 = vadd.f32 %v6098_v2, %v2327_v37 }
 0x20b   : > { %v5630_v16 = vcombine.low %v2756_v3, %v2756_v3  ;;  %v2478_v23 = vmul.f32 %v8441_v53, %v2439_v33  ;;  %v6100_v31 = vpop.f32.mrf.mxu0 }
 0x20c   : > { %v2740_v54 = vsel %vm8460_vm4, 0, %v2599_v48  ;;  %v2578_v10 = vpack.c.bf16 %v2548_v58, %v2547_v11  ;;  %v2440_v63 = vadd.f32 %v2328_v13, %v1787_v15  ;;  %v6101_v51 = vadd.f32 %v6100_v31, %v6099_v30  ;;  %v2340_v48 = vpop.f32.mrf.mxu1 }
 0x20d   : > { %v5628_v35 = vcombine.low %v2740_v54, %v2740_v54  ;;  %v5629_v6 = vcombine.high %v2740_v54, %v2740_v54  ;;  %2951 = vst [vmem:[#allocation2 + $0x14] sm:$0x1] %v5630_v16  ;;  %v2517_v57 = vadd.f32 %v8450_v5, %v2478_v23  ;;  %v6102_v28 = vpop.f32.mrf.mxu0 }
 0x20e   : > { %v2601_v24 = vshrl.u32 %v2578_v10, 16  ;;  %v2479_v12 = vmul.f32 %v8441_v53, %v2440_v63  ;;  %v2333_v36 = vadd.f32 %v6727_v7, %v6101_v51  ;;  %v2604_v26 = vshll.u32 %v2578_v10, 16 }
 0x20f   : > { %2949 = vst [vmem:[#allocation2 + $0xc] sm:$0xf] %v5628_v35  ;;  %2950 = vst [vmem:[#allocation2 + $0x10] sm:$0xf] %v5629_v6  ;;  %v6103_v2 = vpop.f32.mrf.mxu0  ;;  %v2549_v30 = vmax.f32 %v2517_v57, 0.0  ;;  %v7333_v6 = vmov 0  }
 0x210   : > { %v2603_v33 = vrot.slane %v2601_v24, 7  ;;  %v2518_v15 = vadd.f32 %v8450_v5, %v2479_v12  ;;  %v2441_v11 = vadd.f32 %v2333_v36, %v8345_v0  ;;  %v6104_v37 = vadd.f32 %v6103_v2, %v6102_v28  ;;  %360 = vst [vmem:[#allocation2] sm:$0xf] %v7333_v6  ;;  %361 = vst [vmem:[#allocation2 + $0x4] sm:$0xf] %v7333_v6  ;;  %v8486_v24 = vpop.f32.mrf.mxu1 }
 0x211   : > { %v6105_v3 = vpop.f32.mrf.mxu0  ;;  %362 = vst [vmem:[#allocation2 + $0x8] sm:$0x1] %v7333_v6  ;;  %364 = vst [vmem:[#allocation2 + $0xcc] sm:$0xf] %v7333_v6  ;;  %v1803_v36 = vadd.f32 %v8370_v47, %v8290_v14 }
 0x212   : > { %v2606_v58 = vor.u32 %v2604_v26, %v2603_v33  ;;  %v2757_v13 = vsel %vm8460_vm4, %v2603_v33, 0  ;;  %v2550_v16 = vmax.f32 %v2518_v15, 0.0  ;;  %v2480_v7 = vmul.f32 %v8441_v53, %v2441_v11  ;;  %365 = vst [vmem:[#allocation2 + $0xd0] sm:$0xf] %v7333_v6  ;;  %366 = vst [vmem:[#allocation2 + $0xd4] sm:$0x1] %v7333_v6  ;;  %v2343_v14 = vpop.f32.mrf.mxu1 }
 0x213   : > { %v5633_v23 = vcombine.low %v2757_v13, %v2757_v13  ;;  %v2336_v31 = vadd.f32 %v6728_v8, %v6104_v37  ;;  %v6106_v54 = vpop.f32.mrf.mxu0 }
 0x214   : > { %v2741_v10 = vsel %vm8460_vm4, 0, %v2606_v58  ;;  %v2579_v63 = vpack.c.bf16 %v2550_v16, %v2549_v30  ;;  %v2519_v0 = vadd.f32 %v8450_v5, %v2480_v7  ;;  %v6107_v51 = vadd.f32 %v6106_v54, %v6105_v3  ;;  %v7094_v35 = vld [vmem:[#allocation2 + $0x14] ss:$0 sps:$4 sm:$0x11]  }
 0x215   : > { %v5631_v57 = vcombine.low %v2741_v10, %v2741_v10  ;;  %v5632_v28 = vcombine.high %v2741_v10, %v2741_v10  ;;  %2954 = vst [vmem:[#allocation2 + $0x20] sm:$0x1] %v5633_v23  ;;  %v2442_v8 = vadd.f32 %v2336_v31, %v8354_v46  ;;  %v6108_v12 = vpop.f32.mrf.mxu0  ;;  %v3407_v3 = vrot.slane %v7094_v35, 1 }
 0x216   : > { %v2608_v26 = vshrl.u32 %v2579_v63, 16  ;;  %v2611_v2 = vshll.u32 %v2579_v63, 16  ;;  %v2341_v33 = vadd.f32 %v6107_v51, %v2340_v48  ;;  %v7093_v15 = vld [vmem:[#allocation2 + $0xc] sm:$0xff]   ;;  %v2551_v11 = vmax.f32 %v2519_v0, 0.0 }
 0x217   : > { %2952 = vst [vmem:[#allocation2 + $0x18] sm:$0xf] %v5631_v57  ;;  %2953 = vst [vmem:[#allocation2 + $0x1c] sm:$0xf] %v5632_v28  ;;  %v2481_v37 = vmul.f32 %v8441_v53, %v2442_v8  ;;  %v6109_v30 = vpop.f32.mrf.mxu0  ;;  %v3215_v58 = vshll.u32 %v7094_v35, 16  ;;  %v3406_v7 = vrot.slane %v7093_v15, 1 }
 0x218   : > { %v2610_v13 = vrot.slane %v2608_v26, 7  ;;  %v2443_v46 = vadd.f32 %v2341_v33, %v8364_v17  ;;  %v6110_v16 = vadd.f32 %v6109_v30, %v6108_v12  ;;  %v3208_v31 = vshrl.u32 %v7093_v15, 16 }
 0x219   : > { %v2520_v23 = vadd.f32 %v8450_v5, %v2481_v37  ;;  %v6111_v47 = vpop.f32.mrf.mxu0  ;;  %v3210_v48 = vshll.u32 %v7093_v15, 16  ;;  %v3217_v54 = vrot.slane %v3215_v58, 1  ;;  %v8497_v17 = vsel %vm774_vm1, %v3406_v7, %v3407_v3 }
 0x21a   : > { %v2613_v10 = vor.u32 %v2611_v2, %v2610_v13  ;;  %v2758_v63 = vsel %vm8460_vm4, %v2610_v13, 0  ;;  %v2482_v0 = vmul.f32 %v8441_v53, %v2443_v46  ;;  %v2344_v51 = vadd.f32 %v6110_v16, %v2343_v14  ;;  %6769 = vmatprep.mubr.bf16.mxu0 %v8497_v17  ;;  %v8503_v46 = vpop.f32.mrf.mxu1 }
 0x21b   : > { %v5636_v35 = vcombine.low %v2758_v63, %v2758_v63  ;;  %v2552_v6 = vmax.f32 %v2520_v23, 0.0  ;;  %v6112_v57 = vpop.f32.mrf.mxu0  ;;  %v3212_v28 = vrot.slane %v3210_v48, 1  ;;  %v8507_v16 = vadd.f32 %v8384_v4, %v8318_v34 }
 0x21c   : > { %v2742_v8 = vsel %vm8460_vm4, 0, %v2613_v10  ;;  %v2521_v12 = vadd.f32 %v8450_v5, %v2482_v0  ;;  %v2444_v26 = vadd.f32 %v2344_v51, %v1803_v36  ;;  %v6113_v2 = vadd.f32 %v6112_v57, %v6111_v47  ;;  %v7098_v33 = vld [vmem:[#allocation2 + $0x20] ss:$0 sps:$4 sm:$0x11]   ;;  %v7120_v0 = vld [vmem:[#allocation6 + $0x38] sm:$0xff]  }
 0x21d   : > { %v5634_v37 = vcombine.low %v2742_v8, %v2742_v8  ;;  %v5635_v30 = vcombine.high %v2742_v8, %v2742_v8  ;;  %2957 = vst [vmem:[#allocation2 + $0x2c] sm:$0x1] %v5636_v35  ;;  %v2580_v58 = vpack.c.bf16 %v2552_v6, %v2551_v11  ;;  %v6114_v13 = vpop.f32.mrf.mxu0  ;;  %v3213_v3 = vor.u32 %v3212_v28, %v3208_v31  ;;  %v7101_v31 = vld [vmem:[#allocation6 + $0xb0] sm:$0xff]   ;;  %v2356_v6 = vpop.f32.mrf.mxu1 }
 0x21e   : > { %v2483_v7 = vmul.f32 %v8441_v53, %v2444_v26  ;;  %v2349_v36 = vadd.f32 %v8474_v40, %v6113_v2  ;;  %v8511_v23 = vld [vmem:[#allocation2 + $0x18] sm:$0xff]   ;;  %v2553_v47 = vmax.f32 %v2521_v12, 0.0  ;;  %v3410_v10 = vrot.slane %v7098_v33, 1  ;;  %v7121_v8 = vld [vmem:[#allocation6 + $0x70] sm:$0xff]  }
 0x21f   : > { %2955 = vst [vmem:[#allocation2 + $0x24] sm:$0xf] %v5634_v37  ;;  %2956 = vst [vmem:[#allocation2 + $0x28] sm:$0xf] %v5635_v30  ;;  %v2615_v14 = vshrl.u32 %v2580_v58, 16  ;;  %v6115_v48 = vpop.f32.mrf.mxu0  ;;  %v8514_v11 = vsel %vm565_vm0, %v3213_v3, %v3217_v54  ;;  %v3409_v40 = vrot.slane %v8511_v23, 1 }
 0x220   : > { %v2522_v63 = vadd.f32 %v8450_v5, %v2483_v7  ;;  %v2445_v34 = vadd.f32 %v2349_v36, %v8360_v60  ;;  %v6116_v4 = vadd.f32 %v6115_v48, %v6114_v13  ;;  %3766 = vmatprep.mubr.bf16.mxu1 %v8514_v11  ;;  %v2618_v35 = vshll.u32 %v2580_v58, 16  ;;  %v7106_v13 = vld [vmem:[#allocation6 + $0xa8] sm:$0xff]  }
 0x221   : > { %v2617_v51 = vrot.slane %v2615_v14, 7  ;;  %v6117_v57 = vpop.f32.mrf.mxu0  ;;  %3767 = vmatmul.mubr.bf16.vlgmr.msra.gmra.mxu1 %v7093_v15  ;;  %v3222_v54 = vshll.u32 %v8511_v23, 16  ;;  %v3227_v28 = vshll.u32 %v7098_v33, 16  ;;  %v8525_v2 = vsel %vm774_vm1, %v3409_v40, %v3410_v10  ;;  %v7124_v14 = vld [vmem:[#allocation6 + $0x30] sm:$0xff]   ;;  %v8539_v10 = vpop.f32.mrf.mxu1 }
 0x222   : > { %v2554_v12 = vmax.f32 %v2522_v63, 0.0  ;;  %v2484_v26 = vmul.f32 %v8441_v53, %v2445_v34  ;;  %v2352_v60 = vadd.f32 %v8486_v24, %v6116_v4  ;;  %6802 = vmatpush3.bf16.msra.mxu1 %v8342_v32  ;;  %6770 = vmatmul.mubr.bf16.vlgmr.msra.gmra.mxu0 %v8525_v2  ;;  %v3220_v15 = vshrl.u32 %v8511_v23, 16 }
 0x223   : > { %v2620_v37 = vor.u32 %v2618_v35, %v2617_v51  ;;  %v2759_v30 = vsel %vm8460_vm4, %v2617_v51, 0  ;;  %v6118_v58 = vpop.f32.mrf.mxu0  ;;  %v3224_v33 = vrot.slane %v3222_v54, 1  ;;  %6803 = vmatprep.subr.bf16.mxu1 %v7101_v31  ;;  %6338 = vmatpush3.bf16.msra.mxu0 %v7120_v0  ;;  %v3229_v40 = vrot.slane %v3227_v28, 1  ;;  %v7111_v28 = vld [vmem:[#allocation6 + $0xa0] sm:$0xff]  }
 0x224   : > { %v5639_v3 = vcombine.low %v2759_v30, %v2759_v30  ;;  %v2581_v7 = vpack.c.bf16 %v2554_v12, %v2553_v47  ;;  %v8532_v24 = vadd.f32 %v8450_v5, %v2484_v26  ;;  %v2446_v32 = vadd.f32 %v2352_v60, %v8367_v56  ;;  %v8535_v36 = vld [vmem:[#allocation2 + $0x2c] ss:$0 sps:$4 sm:$0x11]   ;;  %6339 = vmatprep.subr.bf16.mxu0 %v7121_v8  ;;  %v7126_v47 = vld [vmem:[#allocation6 + $0x68] sm:$0xff]  }
 0x225   : > { %v2743_v48 = vsel %vm8460_vm4, 0, %v2620_v37  ;;  %v6119_v63 = vadd.f32 %v6118_v58, %v6117_v57  ;;  %v6120_v34 = vpop.f32.mrf.mxu0  ;;  %v3225_v4 = vor.u32 %v3224_v33, %v3220_v15  ;;  %v3239_v58 = vshll.u32 %v8535_v36, 16 }
 0x226   : > { %v5637_v51 = vcombine.low %v2743_v48, %v2743_v48  ;;  %v5638_v35 = vcombine.high %v2743_v48, %v2743_v48  ;;  %2960 = vst [vmem:[#allocation2 + $0x38] sm:$0x1] %v5639_v3  ;;  %v2622_v54 = vshrl.u32 %v2581_v7, 16  ;;  %v2625_v56 = vshll.u32 %v2581_v7, 16  ;;  %6804 = vmatpush3.bf16.msra.mxu1 %v7101_v31  ;;  %v8546_v57 = vld [vmem:[#allocation2 + $0x24] sm:$0xff]   ;;  %v2359_v3 = vpop.f32.mrf.mxu1  ;;  %v7130_v48 = vld [vmem:[#allocation6 + $0x60] sm:$0xff]  }
 0x227   : > { %v2555_v0 = vmax.f32 %v8532_v24, 0.0  ;;  %v2485_v12 = vmul.f32 %v8441_v53, %v2446_v32  ;;  %v2357_v26 = vadd.f32 %v6119_v63, %v2356_v6  ;;  %v6121_v60 = vpop.f32.mrf.mxu0  ;;  %v8544_v37 = vsel %vm565_vm0, %v3225_v4, %v3229_v40  ;;  %6805 = vmatprep.subr.bf16.mxu1 %v7106_v13  ;;  %6340 = vmatpush3.bf16.msra.mxu0 %v7124_v14  ;;  %v7129_v6 = vld [vmem:[#allocation6 + $0x28] sm:$0xff]  }
 0x228   : > { %2958 = vst [vmem:[#allocation2 + $0x30] sm:$0xf] %v5637_v51  ;;  %2959 = vst [vmem:[#allocation2 + $0x34] sm:$0xf] %v5638_v35  ;;  %v2624_v8 = vrot.slane %v2622_v54, 7  ;;  %v6122_v30 = vadd.f32 %v6121_v60, %v6120_v34  ;;  %3774 = vmatprep.mubr.bf16.mxu1 %v8544_v37  ;;  %v3413_v31 = vrot.slane %v8535_v36, 1  ;;  %6341 = vmatprep.subr.bf16.mxu0 %v7126_v47 }
 0x229   : > { %v2524_v15 = vadd.f32 %v8450_v5, %v2485_v12  ;;  %v2447_v33 = vadd.f32 %v2357_v26, %v8379_v41  ;;  %v6123_v7 = vpop.f32.mrf.mxu0  ;;  %3775 = vmatmul.mubr.bf16.gmra.mxu1 %v8511_v23  ;;  %v3412_v24 = vrot.slane %v8546_v57, 1  ;;  %v3232_v32 = vshrl.u32 %v8546_v57, 16  ;;  %v7116_v35 = vld [vmem:[#allocation6 + $0x98] sm:$0xff]  }
 0x22a   : > { %v2627_v63 = vor.u32 %v2625_v56, %v2624_v8  ;;  %v2760_v36 = vsel %vm8460_vm4, %v2624_v8, 0  ;;  %v2360_v14 = vadd.f32 %v6122_v30, %v2359_v3  ;;  %v3234_v34 = vshll.u32 %v8546_v57, 16  ;;  %6806 = vmatpush3.bf16.msra.mxu1 %v7106_v13  ;;  %v7133_v13 = vld [vmem:[#allocation6 + $0x20] sm:$0xff]   ;;  %v7135_v3 = vld [vmem:[#allocation6 + $0x58] sm:$0xff]  }
 0x22b   : > { %v5642_v4 = vcombine.low %v2760_v36, %v2760_v36  ;;  %v2556_v41 = vmax.f32 %v2524_v15, 0.0  ;;  %v2486_v40 = vmul.f32 %v8441_v53, %v2447_v33  ;;  %v6124_v51 = vpop.f32.mrf.mxu0  ;;  %v8561_v23 = vsel %vm774_vm1, %v3412_v24, %v3413_v31  ;;  %6807 = vmatprep.subr.bf16.mxu1 %v7111_v28  ;;  %6342 = vmatpush3.bf16.msra.mxu0 %v7129_v6  ;;  %v8568_v15 = vpop.f32.mrf.mxu1 }
 0x22c   : > { %v2744_v47 = vsel %vm8460_vm4, 0, %v2627_v63  ;;  %v2448_v54 = vadd.f32 %v2360_v14, %v8507_v16  ;;  %v6125_v56 = vadd.f32 %v6124_v51, %v6123_v7  ;;  %6773 = vmatprep.mubr.bf16.mxu0 %v8561_v23  ;;  %v3236_v12 = vrot.slane %v3234_v34, 1  ;;  %6343 = vmatprep.subr.bf16.mxu0 %v7130_v48 }
 0x22d   : > { %v5640_v26 = vcombine.low %v2744_v47, %v2744_v47  ;;  %v5641_v60 = vcombine.high %v2744_v47, %v2744_v47  ;;  %2963 = vst [vmem:[#allocation2 + $0x44] sm:$0x1] %v5642_v4  ;;  %v2582_v8 = vpack.c.bf16 %v2556_v41, %v2555_v0  ;;  %v2525_v30 = vadd.f32 %v8450_v5, %v2486_v40  ;;  %v6126_v31 = vpop.f32.mrf.mxu0  ;;  %v7103_v33 = vld [vmem:[#allocation2 + $0x38] ss:$0 sps:$4 sm:$0x11]   ;;  %v7125_v47 = vld [vmem:[#allocation6 + $0x90] sm:$0xff]  }
 0x22e   : > { %v2487_v16 = vmul.f32 %v8441_v53, %v2448_v54  ;;  %v2365_v7 = vadd.f32 %v8503_v46, %v6125_v56  ;;  %v3237_v24 = vor.u32 %v3236_v12, %v3232_v32  ;;  %v3241_v63 = vrot.slane %v3239_v58, 1  ;;  %6808 = vmatpush3.bf16.msra.mxu1 %v7111_v28  ;;  %v7138_v54 = vld [vmem:[#allocation6 + $0x18] sm:$0xff]  }
 0x22f   : > { %v8574_v6 = vadd.f32 %v8396_v49, %v8347_v55  ;;  %2961 = vst [vmem:[#allocation2 + $0x3c] sm:$0xf] %v5640_v26  ;;  %2962 = vst [vmem:[#allocation2 + $0x40] sm:$0xf] %v5641_v60  ;;  %v2629_v0 = vshrl.u32 %v2582_v8, 16  ;;  %v2632_v36 = vshll.u32 %v2582_v8, 16  ;;  %v6127_v34 = vpop.f32.mrf.mxu0  ;;  %6809 = vmatprep.subr.bf16.mxu1 %v7116_v35  ;;  %6344 = vmatpush3.bf16.msra.mxu0 %v7133_v13  ;;  %v2372_v49 = vpop.f32.mrf.mxu1 }
 0x230   : > { %v2557_v14 = vmax.f32 %v2525_v30, 0.0  ;;  %v8576_v4 = vld [vmem:[#allocation2 + $0x30] sm:$0xff]   ;;  %v2526_v48 = vadd.f32 %v8450_v5, %v2487_v16  ;;  %v2449_v46 = vadd.f32 %v2365_v7, %v8374_v25  ;;  %v6128_v32 = vadd.f32 %v6127_v34, %v6126_v31  ;;  %6345 = vmatprep.subr.bf16.mxu0 %v7135_v3  ;;  %v7139_v26 = vld [vmem:[#allocation6 + $0x50] sm:$0xff]  }
 0x231   : > { %v8581_v28 = vsel %vm565_vm0, %v3237_v24, %v3241_v63  ;;  %v2631_v55 = vrot.slane %v2629_v0, 7  ;;  %v6129_v58 = vpop.f32.mrf.mxu0  ;;  %v3415_v41 = vrot.slane %v8576_v4, 1  ;;  %v3416_v40 = vrot.slane %v7103_v33, 1  ;;  %v7134_v63 = vld [vmem:[#allocation6 + $0x88] sm:$0xff]  }
 0x232   : > { %3782 = vmatprep.mubr.bf16.mxu1 %v8581_v28  ;;  %v3244_v51 = vshrl.u32 %v8576_v4, 16  ;;  %v2558_v56 = vmax.f32 %v2526_v48, 0.0  ;;  %v2488_v25 = vmul.f32 %v8441_v53, %v2449_v46  ;;  %v2368_v12 = vadd.f32 %v8539_v10, %v6128_v32  ;;  %6810 = vmatpush3.bf16.msra.mxu1 %v7116_v35  ;;  %v7144_v46 = vld [vmem:[#allocation6 + $0x48] sm:$0xff]  }
 0x233   : > { %3783 = vmatmul.mubr.bf16.gmra.mxu1 %v8546_v57  ;;  %v3246_v13 = vshll.u32 %v8576_v4, 16  ;;  %v2634_v60 = vor.u32 %v2632_v36, %v2631_v55  ;;  %v2761_v8 = vsel %vm8460_vm4, %v2631_v55, 0  ;;  %v6130_v30 = vpop.f32.mrf.mxu0  ;;  %v8593_v31 = vsel %vm774_vm1, %v3415_v41, %v3416_v40  ;;  %v8604_v36 = vpop.f32.mrf.mxu1  ;;  %6811 = vmatprep.subr.bf16.mxu1 %v7125_v47 }
 0x234   : > { %v3251_v3 = vshll.u32 %v7103_v33, 16  ;;  %v5645_v16 = vcombine.low %v2761_v8, %v2761_v8  ;;  %v2583_v7 = vpack.c.bf16 %v2558_v56, %v2557_v14  ;;  %v8596_v24 = vadd.f32 %v8450_v5, %v2488_v25  ;;  %6774 = vmatmul.mubr.bf16.gmra.mxu0 %v8593_v31  ;;  %v8600_v57 = vld [vmem:[#allocation2 + $0x44] ss:$0 sps:$4 sm:$0x11]   ;;  %v7142_v14 = vld [vmem:[#allocation6 + $0x10] sm:$0xff]  }
 0x235   : > { %v2450_v10 = vadd.f32 %v2368_v12, %v8381_v43  ;;  %v2745_v0 = vsel %vm8460_vm4, 0, %v2634_v60  ;;  %v6131_v34 = vadd.f32 %v6130_v30, %v6129_v58  ;;  %v6132_v33 = vpop.f32.mrf.mxu0  ;;  %v3248_v35 = vrot.slane %v3246_v13, 1  ;;  %6346 = vmatpush3.bf16.msra.mxu0 %v7138_v54 }
 0x236   : > { %v3253_v48 = vrot.slane %v3251_v3, 1  ;;  %v5643_v32 = vcombine.low %v2745_v0, %v2745_v0  ;;  %v5644_v43 = vcombine.high %v2745_v0, %v2745_v0  ;;  %2966 = vst [vmem:[#allocation2 + $0x50] sm:$0x1] %v5645_v16  ;;  %v2636_v55 = vshrl.u32 %v2583_v7, 16  ;;  %6347 = vmatprep.subr.bf16.mxu0 %v7139_v26  ;;  %v8608_v60 = vld [vmem:[#allocation2 + $0x3c] sm:$0xff]   ;;  %6812 = vmatpush3.bf16.msra.mxu1 %v7125_v47  ;;  %v2375_v16 = vpop.f32.mrf.mxu1 }
 0x237   : > { %v2639_v41 = vshll.u32 %v2583_v7, 16  ;;  %v2559_v40 = vmax.f32 %v8596_v24, 0.0  ;;  %v2489_v56 = vmul.f32 %v8441_v53, %v2450_v10  ;;  %v2373_v25 = vadd.f32 %v6131_v34, %v2372_v49  ;;  %v6133_v12 = vpop.f32.mrf.mxu0  ;;  %6813 = vmatprep.subr.bf16.mxu1 %v7134_v63  ;;  %v7143_v7 = vld [vmem:[#allocation6 + $0x80] sm:$0xff]  }
 0x238   : > { %v3249_v58 = vor.u32 %v3248_v35, %v3244_v51  ;;  %2964 = vst [vmem:[#allocation2 + $0x48] sm:$0xf] %v5643_v32  ;;  %2965 = vst [vmem:[#allocation2 + $0x4c] sm:$0xf] %v5644_v43  ;;  %v2638_v54 = vrot.slane %v2636_v55, 7  ;;  %v6134_v13 = vadd.f32 %v6133_v12, %v6132_v33  ;;  %v3419_v8 = vrot.slane %v8600_v57, 1 }
 0x239   : > { %v3263_v30 = vshll.u32 %v8600_v57, 16  ;;  %v2528_v26 = vadd.f32 %v8450_v5, %v2489_v56  ;;  %v2451_v3 = vadd.f32 %v2373_v25, %v8391_v29  ;;  %v6135_v51 = vpop.f32.mrf.mxu0  ;;  %v3418_v47 = vrot.slane %v8608_v60, 1  ;;  %6348 = vmatpush3.bf16.msra.mxu0 %v7142_v14  ;;  %v7147_v29 = vld [vmem:[#allocation6 + $0x8] sm:$0xff]   ;;  %v7148_v32 = vld [vmem:[#allocation6 + $0x40] sm:$0xff]  }
 0x23a   : > { %v8615_v49 = vsel %vm565_vm0, %v3249_v58, %v3253_v48  ;;  %v2641_v24 = vor.u32 %v2639_v41, %v2638_v54  ;;  %v2762_v10 = vsel %vm8460_vm4, %v2638_v54, 0  ;;  %v2376_v0 = vadd.f32 %v6134_v13, %v2375_v16  ;;  %6349 = vmatprep.subr.bf16.mxu0 %v7144_v46  ;;  %6814 = vmatpush3.bf16.msra.mxu1 %v7134_v63  ;;  %v8633_v54 = vpop.f32.mrf.mxu1  ;;  %v7149_v63 = vld [vmem:[#allocation6] sm:$0xff]  }
 0x23b   : > { %3790 = vmatprep.mubr.bf16.mxu1 %v8615_v49  ;;  %v3256_v57 = vshrl.u32 %v8608_v60, 16  ;;  %v5648_v34 = vcombine.low %v2762_v10, %v2762_v10  ;;  %v2560_v33 = vmax.f32 %v2528_v26, 0.0  ;;  %v2490_v35 = vmul.f32 %v8441_v53, %v2451_v3  ;;  %v6136_v48 = vpop.f32.mrf.mxu0  ;;  %6815 = vmatprep.subr.bf16.mxu1 %v7143_v7 }
 0x23c   : > { %3791 = vmatmul.mubr.bf16.gmra.mxu1 %v8576_v4  ;;  %v8625_v14 = vsel %vm774_vm1, %v3418_v47, %v3419_v8  ;;  %v2746_v43 = vsel %vm8460_vm4, 0, %v2641_v24  ;;  %v2452_v55 = vadd.f32 %v2376_v0, %v8574_v6  ;;  %v6137_v41 = vadd.f32 %v6136_v48, %v6135_v51  ;;  %v7152_v8 = vld [vmem:[#allocation6 + $0x1f8] sm:$0xff]   ;;  %v2388_v48 = vpop.f32.mrf.mxu1 }
 0x23d   : > { %6777 = vmatprep.mubr.bf16.mxu0 %v8625_v14  ;;  %v3258_v46 = vshll.u32 %v8608_v60, 16  ;;  %v5646_v56 = vcombine.low %v2746_v43, %v2746_v43  ;;  %v5647_v25 = vcombine.high %v2746_v43, %v2746_v43  ;;  %2969 = vst [vmem:[#allocation2 + $0x5c] sm:$0x1] %v5648_v34  ;;  %v2584_v4 = vpack.c.bf16 %v2560_v33, %v2559_v40  ;;  %v6138_v58 = vpop.f32.mrf.mxu0  ;;  %v8635_v13 = vld [vmem:[#allocation2 + $0x50] ss:$0 sps:$4 sm:$0x11]  }
 0x23e   : > { %v2529_v12 = vadd.f32 %v8450_v5, %v2490_v35  ;;  %v2491_v6 = vmul.f32 %v8441_v53, %v2452_v55  ;;  %v2381_v26 = vadd.f32 %v8568_v15, %v6137_v41  ;;  %v3265_v16 = vrot.slane %v3263_v30, 1  ;;  %6350 = vmatpush3.bf16.msra.mxu0 %v7147_v29  ;;  %v8639_v51 = vld [vmem:[#allocation6 + $0x238] sm:$0xff]   ;;  %6816 = vmatpush3.bf16.msra.mxu1 %v7143_v7 }
 0x23f   : > { %v3260_v3 = vrot.slane %v3258_v46, 1  ;;  %v8643_v40 = vadd.f32 %v8408_v61, %v8376_v20  ;;  %2967 = vst [vmem:[#allocation2 + $0x54] sm:$0xf] %v5646_v56  ;;  %2968 = vst [vmem:[#allocation2 + $0x58] sm:$0xf] %v5647_v25  ;;  %v2643_v47 = vshrl.u32 %v2584_v4, 16  ;;  %v6139_v0 = vpop.f32.mrf.mxu0  ;;  %6351 = vmatprep.subr.bf16.mxu0 %v7148_v32  ;;  %6473 = vmatprep.subr.bf16.mxu1 %v7152_v8 }
 0x240   : > { %v2646_v24 = vshll.u32 %v2584_v4, 16  ;;  %v2561_v10 = vmax.f32 %v2529_v12, 0.0  ;;  %v8645_v34 = vld [vmem:[#allocation2 + $0x48] sm:$0xff]   ;;  %v2530_v15 = vadd.f32 %v8450_v5, %v2491_v6  ;;  %v2453_v30 = vadd.f32 %v2381_v26, %v8386_v50 }
 0x241   : > { %v6140_v29 = vadd.f32 %v6139_v0, %v6138_v58  ;;  %v3261_v33 = vor.u32 %v3260_v3, %v3256_v57  ;;  %v2645_v35 = vrot.slane %v2643_v47, 7  ;;  %v6141_v20 = vpop.f32.mrf.mxu0  ;;  %v3421_v61 = vrot.slane %v8645_v34, 1  ;;  %v8672_v3 = vpop.f32.mrf.mxu1 }
 0x242   : > { %v3422_v43 = vrot.slane %v8635_v13, 1  ;;  %v3268_v55 = vshrl.u32 %v8645_v34, 16  ;;  %v2562_v41 = vmax.f32 %v2530_v15, 0.0  ;;  %v2492_v32 = vmul.f32 %v8441_v53, %v2453_v30  ;;  %6352 = vmatpush3.bf16.msra.mxu0 %v7149_v63 }
 0x243   : > { %v2384_v46 = vadd.f32 %v8604_v36, %v6140_v29  ;;  %v8655_v50 = vsel %vm565_vm0, %v3261_v33, %v3265_v16  ;;  %v2648_v7 = vor.u32 %v2646_v24, %v2645_v35  ;;  %v2763_v57 = vsel %vm8460_vm4, %v2645_v35, 0  ;;  %v6142_v56 = vpop.f32.mrf.mxu0  ;;  %6849 = vmatprep.subr.bf16.mxu0 %v8639_v51 }
 0x244   : > { %3798 = vmatprep.mubr.bf16.mxu1 %v8655_v50  ;;  %v8661_v25 = vsel %vm774_vm1, %v3421_v61, %v3422_v43  ;;  %v3270_v4 = vshll.u32 %v8645_v34, 16  ;;  %v5651_v12 = vcombine.low %v2763_v57, %v2763_v57  ;;  %v2585_v36 = vpack.c.bf16 %v2562_v41, %v2561_v10  ;;  %v8668_v6 = vld [vmem:[#allocation2 + $0x5c] ss:$0 sps:$4 sm:$0x11]  }
 0x245   : > { %v2531_v58 = vadd.f32 %v8450_v5, %v2492_v32  ;;  %v2454_v8 = vadd.f32 %v2384_v46, %v8393_v45  ;;  %3799 = vmatmul.mubr.bf16.gmra.mxu1 %v8608_v60  ;;  %v2747_v26 = vsel %vm8460_vm4, 0, %v2648_v7  ;;  %v6143_v16 = vadd.f32 %v6142_v56, %v6141_v20  ;;  %6778 = vmatmul.mubr.bf16.gmra.mxu0 %v8661_v25  ;;  %v6144_v63 = vpop.f32.mrf.mxu0  ;;  %v2391_v7 = vpop.f32.mrf.mxu1 }
 0x246   : > { %v3272_v47 = vrot.slane %v3270_v4, 1  ;;  %v3275_v24 = vshll.u32 %v8635_v13, 16  ;;  %v5649_v10 = vcombine.low %v2747_v26, %v2747_v26  ;;  %v5650_v0 = vcombine.high %v2747_v26, %v2747_v26  ;;  %2972 = vst [vmem:[#allocation2 + $0x68] sm:$0x1] %v5651_v12  ;;  %v8677_v61 = vld [vmem:[#allocation2 + $0x54] sm:$0xff]  }
 0x247   : > { %v2650_v45 = vshrl.u32 %v2585_v36, 16  ;;  %v2653_v15 = vshll.u32 %v2585_v36, 16  ;;  %v2563_v60 = vmax.f32 %v2531_v58, 0.0  ;;  %v2493_v30 = vmul.f32 %v8441_v53, %v2454_v8  ;;  %v6145_v33 = vpop.f32.mrf.mxu0 }
 0x248   : > { %v2389_v29 = vadd.f32 %v6143_v16, %v2388_v48  ;;  %v3273_v35 = vor.u32 %v3272_v47, %v3268_v55  ;;  %2970 = vst [vmem:[#allocation2 + $0x60] sm:$0xf] %v5649_v10  ;;  %2971 = vst [vmem:[#allocation2 + $0x64] sm:$0xf] %v5650_v0  ;;  %v6146_v43 = vadd.f32 %v6145_v33, %v6144_v63  ;;  %v3277_v41 = vrot.slane %v3275_v24, 1 }
 0x249   : > { %v2652_v20 = vrot.slane %v2650_v45, 7  ;;  %v3425_v13 = vrot.slane %v8668_v6, 1  ;;  %v2532_v32 = vadd.f32 %v8450_v5, %v2493_v30  ;;  %v6147_v57 = vpop.f32.mrf.mxu0  ;;  %v3424_v56 = vrot.slane %v8677_v61, 1 }
 0x24a   : > { %v2455_v46 = vadd.f32 %v2389_v29, %v8403_v27  ;;  %v3280_v48 = vshrl.u32 %v8677_v61, 16  ;;  %v2392_v12 = vadd.f32 %v6146_v43, %v2391_v7  ;;  %v8687_v36 = vsel %vm565_vm0, %v3273_v35, %v3277_v41  ;;  %v8701_v29 = vpop.f32.mrf.mxu1  ;;  %v8722_v7 = vld [vmem:[%s9599_s4] ss:$0 sm:$0xff] }
 0x24b   : > { %v2655_v55 = vor.u32 %v2653_v15, %v2652_v20  ;;  %v2764_v4 = vsel %vm8460_vm4, %v2652_v20, 0  ;;  %v2564_v8 = vmax.f32 %v2532_v32, 0.0  ;;  %3806 = vmatprep.mubr.bf16.mxu1 %v8687_v36  ;;  %v6148_v27 = vpop.f32.mrf.mxu0  ;;  %v8692_v16 = vsel %vm774_vm1, %v3424_v56, %v3425_v13 }
 0x24c   : > { %v5654_v58 = vcombine.low %v2764_v4, %v2764_v4  ;;  %v2494_v26 = vmul.f32 %v8441_v53, %v2455_v46  ;;  %v2456_v47 = vadd.f32 %v2392_v12, %v8643_v40  ;;  %v6149_v24 = vadd.f32 %v6148_v27, %v6147_v57  ;;  %6781 = vmatprep.mubr.bf16.mxu0 %v8692_v16  ;;  %v8708_v40 = vld [vmem:[%s9598_s3] ss:$0 sm:$0xff]  ;;  %v2404_v56 = vpop.f32.mrf.mxu1 }
 0x24d   : > { %v2748_v63 = vsel %vm8460_vm4, 0, %v2655_v55  ;;  %3807 = vmatmul.mubr.bf16.gmra.mxu1 %v8645_v34  ;;  %v3282_v10 = vshll.u32 %v8677_v61, 16  ;;  %v2586_v45 = vpack.c.bf16 %v2564_v8, %v2563_v60  ;;  %v6150_v30 = vpop.f32.mrf.mxu0  ;;  %v8703_v33 = vld [vmem:[#allocation2 + $0x68] ss:$0 sps:$4 sm:$0x11]   ;;  %v3287_v43 = vshll.u32 %v8668_v6, 16 }
 0x24e   : > { %v5652_v0 = vcombine.low %v2748_v63, %v2748_v63  ;;  %v5653_v53 = vcombine.high %v2748_v63, %v2748_v63  ;;  %2975 = vst [vmem:[#allocation2 + $0x74] sm:$0x1] %v5654_v58  ;;  %v2533_v15 = vadd.f32 %v8450_v5, %v2494_v26  ;;  %v2495_v34 = vmul.f32 %v8708_v40, %v2456_v47 }
 0x24f   : > { %v2397_v35 = vadd.f32 %v8633_v54, %v6149_v24  ;;  %v3284_v20 = vrot.slane %v3282_v10, 1  ;;  %v8715_v5 = vadd.f32 %v8420_v42, %v8401_v44  ;;  %v2657_v60 = vshrl.u32 %v2586_v45, 16  ;;  %v6151_v32 = vpop.f32.mrf.mxu0  ;;  %v8717_v46 = vld [vmem:[#allocation2 + $0x60] sm:$0xff]  }
 0x250   : > { %2973 = vst [vmem:[#allocation2 + $0x6c] sm:$0xf] %v5652_v0  ;;  %2974 = vst [vmem:[#allocation2 + $0x70] sm:$0xf] %v5653_v53  ;;  %v2660_v41 = vshll.u32 %v2586_v45, 16  ;;  %v2565_v13 = vmax.f32 %v2533_v15, 0.0  ;;  %v2534_v54 = vadd.f32 %v8722_v7, %v2495_v34  ;;  %v6152_v57 = vadd.f32 %v6151_v32, %v6150_v30  ;;  %v8747_v34 = vpop.f32.mrf.mxu1 }
 0x251   : > { %v2457_v6 = vadd.f32 %v2397_v35, %v8399_v52  ;;  %v3285_v44 = vor.u32 %v3284_v20, %v3280_v48  ;;  %v2659_v42 = vrot.slane %v2657_v60, 7  ;;  %v3289_v55 = vrot.slane %v3287_v43, 1  ;;  %v6153_v4 = vpop.f32.mrf.mxu0 }
 0x252   : > { %v3427_v12 = vrot.slane %v8717_v46, 1  ;;  %v3428_v58 = vrot.slane %v8703_v33, 1  ;;  %v2566_v8 = vmax.f32 %v2534_v54, 0.0  ;;  %v2400_v27 = vadd.f32 %v8672_v3, %v6152_v57 }
 0x253   : > { %v2496_v26 = vmul.f32 %v8708_v40, %v2457_v6  ;;  %v3292_v63 = vshrl.u32 %v8717_v46, 16  ;;  %v2662_v47 = vor.u32 %v2660_v41, %v2659_v42  ;;  %v2765_v52 = vsel %vm8460_vm4, %v2659_v42, 0  ;;  %v6154_v24 = vpop.f32.mrf.mxu0 }
 0x254   : > { %v8734_v48 = vsel %vm565_vm0, %v3285_v44, %v3289_v55  ;;  %v8737_v10 = vsel %vm774_vm1, %v3427_v12, %v3428_v58  ;;  %v5657_v0 = vcombine.low %v2765_v52, %v2765_v52  ;;  %v2587_v53 = vpack.c.bf16 %v2566_v8, %v2565_v13 }
 0x255   : > { %v2535_v45 = vadd.f32 %v8722_v7, %v2496_v26  ;;  %v2458_v15 = vadd.f32 %v2400_v27, %v8405_v19  ;;  %3814 = vmatprep.mubr.bf16.mxu1 %v8734_v48  ;;  %v8742_v3 = vld [vmem:[#allocation2 + $0x74] ss:$0 sps:$4 sm:$0x11]   ;;  %v2749_v30 = vsel %vm8460_vm4, 0, %v2662_v47  ;;  %v6155_v35 = vadd.f32 %v6154_v24, %v6153_v4  ;;  %6782 = vmatmul.mubr.bf16.gmra.mxu0 %v8737_v10  ;;  %v6156_v20 = vpop.f32.mrf.mxu0  ;;  %v2407_v27 = vpop.f32.mrf.mxu1 }
 0x256   : > { %3815 = vmatmul.mubr.bf16.gmra.mxu1 %v8677_v61  ;;  %v3294_v43 = vshll.u32 %v8717_v46, 16  ;;  %v3299_v60 = vshll.u32 %v8703_v33, 16  ;;  %v5655_v19 = vcombine.low %v2749_v30, %v2749_v30  ;;  %v5656_v41 = vcombine.high %v2749_v30, %v2749_v30  ;;  %2978 = vst [vmem:[#allocation2 + $0x80] sm:$0x1] %v5657_v0 }
 0x257   : > { %v2664_v13 = vshrl.u32 %v2587_v53, 16  ;;  %v2667_v32 = vshll.u32 %v2587_v53, 16  ;;  %v2567_v54 = vmax.f32 %v2535_v45, 0.0  ;;  %v2497_v6 = vmul.f32 %v8708_v40, %v2458_v15  ;;  %v6157_v44 = vpop.f32.mrf.mxu0  ;;  %v8753_v55 = vld [vmem:[#allocation2 + $0x6c] sm:$0xff]  }
 0x258   : > { %v2405_v57 = vadd.f32 %v6155_v35, %v2404_v56  ;;  %v3296_v42 = vrot.slane %v3294_v43, 1  ;;  %2976 = vst [vmem:[#allocation2 + $0x78] sm:$0xf] %v5655_v19  ;;  %2977 = vst [vmem:[#allocation2 + $0x7c] sm:$0xf] %v5656_v41  ;;  %v6158_v12 = vadd.f32 %v6157_v44, %v6156_v20  ;;  %v3301_v58 = vrot.slane %v3299_v60, 1  ;;  %v8775_v44 = vpop.f32.mrf.mxu1 }
 0x259   : > { %v2666_v4 = vrot.slane %v2664_v13, 7  ;;  %v3431_v33 = vrot.slane %v8742_v3, 1  ;;  %v2536_v8 = vadd.f32 %v8722_v7, %v2497_v6  ;;  %v6159_v52 = vpop.f32.mrf.mxu0  ;;  %v3430_v56 = vrot.slane %v8753_v55, 1 }
 0x25a   : > { %v2459_v26 = vadd.f32 %v2405_v57, %v8415_v9  ;;  %v3297_v47 = vor.u32 %v3296_v42, %v3292_v63  ;;  %v2408_v53 = vadd.f32 %v6158_v12, %v2407_v27  ;;  %v3304_v45 = vshrl.u32 %v8753_v55, 16 }
 0x25b   : > { %v2669_v24 = vor.u32 %v2667_v32, %v2666_v4  ;;  %v2766_v0 = vsel %vm8460_vm4, %v2666_v4, 0  ;;  %v2568_v30 = vmax.f32 %v2536_v8, 0.0  ;;  %v6160_v9 = vpop.f32.mrf.mxu0  ;;  %v8771_v19 = vsel %vm774_vm1, %v3430_v56, %v3431_v33 }
 0x25c   : > { %v5660_v15 = vcombine.low %v2766_v0, %v2766_v0  ;;  %v2498_v35 = vmul.f32 %v8708_v40, %v2459_v26  ;;  %v8764_v20 = vsel %vm565_vm0, %v3297_v47, %v3301_v58  ;;  %v2460_v43 = vadd.f32 %v2408_v53, %v8715_v5  ;;  %6785 = vmatprep.mubr.bf16.mxu0 %v8771_v19 }
 0x25d   : > { %v2750_v63 = vsel %vm8460_vm4, 0, %v2669_v24  ;;  %3822 = vmatprep.mubr.bf16.mxu1 %v8764_v20  ;;  %v6161_v60 = vadd.f32 %v6160_v9, %v6159_v52  ;;  %v2588_v32 = vpack.c.bf16 %v2568_v30, %v2567_v54  ;;  %v6162_v57 = vpop.f32.mrf.mxu0  ;;  %v8777_v42 = vld [vmem:[#allocation2 + $0x80] ss:$0 sps:$4 sm:$0x11]   ;;  %v3306_v12 = vshll.u32 %v8753_v55, 16 }
 0x25e   : > { %v5658_v41 = vcombine.low %v2750_v63, %v2750_v63  ;;  %v5659_v13 = vcombine.high %v2750_v63, %v2750_v63  ;;  %2981 = vst [vmem:[#allocation2 + $0x8c] sm:$0x1] %v5660_v15  ;;  %v2537_v6 = vadd.f32 %v8722_v7, %v2498_v35  ;;  %3823 = vmatmul.mubr.bf16.gmra.mxu1 %v8717_v46  ;;  %v3311_v58 = vshll.u32 %v8742_v3, 16  ;;  %v2420_v3 = vpop.f32.mrf.mxu1 }
 0x25f   : > { %v2499_v5 = vmul.f32 %v8708_v40, %v2460_v43  ;;  %v2413_v4 = vadd.f32 %v8701_v29, %v6161_v60  ;;  %v8786_v54 = vadd.f32 %v8431_v59, %v8423_v1  ;;  %v2671_v33 = vshrl.u32 %v2588_v32, 16  ;;  %v6163_v27 = vpop.f32.mrf.mxu0  ;;  %v8788_v47 = vld [vmem:[#allocation2 + $0x78] sm:$0xff]  }
 0x260   : > { %2979 = vst [vmem:[#allocation2 + $0x84] sm:$0xf] %v5658_v41  ;;  %2980 = vst [vmem:[#allocation2 + $0x88] sm:$0xf] %v5659_v13  ;;  %v2674_v8 = vshll.u32 %v2588_v32, 16  ;;  %v2569_v26 = vmax.f32 %v2537_v6, 0.0  ;;  %v6164_v56 = vadd.f32 %v6163_v27, %v6162_v57 }
 0x261   : > { %v2538_v29 = vadd.f32 %v8722_v7, %v2499_v5  ;;  %v2461_v52 = vadd.f32 %v2413_v4, %v8410_v62  ;;  %v3308_v24 = vrot.slane %v3306_v12, 1  ;;  %v2673_v0 = vrot.slane %v2671_v33, 7  ;;  %v6165_v15 = vpop.f32.mrf.mxu0  ;;  %v8812_v12 = vpop.f32.mrf.mxu1 }
 0x262   : > { %v3313_v53 = vrot.slane %v3311_v58, 1  ;;  %v3433_v1 = vrot.slane %v8788_v47, 1  ;;  %v3434_v59 = vrot.slane %v8777_v42, 1  ;;  %v2416_v9 = vadd.f32 %v8747_v34, %v6164_v56 }
 0x263   : > { %v2570_v30 = vmax.f32 %v2538_v29, 0.0  ;;  %v2500_v35 = vmul.f32 %v8708_v40, %v2461_v52  ;;  %v3309_v63 = vor.u32 %v3308_v24, %v3304_v45  ;;  %v2676_v43 = vor.u32 %v2674_v8, %v2673_v0  ;;  %v6166_v60 = vpop.f32.mrf.mxu0 }
 0x264   : > { %v2767_v62 = vsel %vm8460_vm4, %v2673_v0, 0  ;;  %v8799_v41 = vsel %vm774_vm1, %v3433_v1, %v3434_v59  ;;  %v3316_v13 = vshrl.u32 %v8788_v47, 16  ;;  %v2462_v5 = vadd.f32 %v2416_v9, %v8417_v18 }
 0x265   : > { %v5663_v32 = vcombine.low %v2767_v62, %v2767_v62  ;;  %v2589_v6 = vpack.c.bf16 %v2570_v30, %v2569_v26  ;;  %v2539_v57 = vadd.f32 %v8722_v7, %v2500_v35  ;;  %6786 = vmatmul.mubr.bf16.gmra.mxu0 %v8799_v41  ;;  %v8805_v34 = vld [vmem:[#allocation2 + $0x8c] ss:$0 sps:$4 sm:$0x11]   ;;  %v2751_v45 = vsel %vm8460_vm4, 0, %v2676_v43  ;;  %v6168_v33 = vpop.f32.mrf.mxu0  ;;  %v2423_v43 = vpop.f32.mrf.mxu1 }
 0x266   : > { %v8810_v4 = vsel %vm565_vm0, %v3309_v63, %v3313_v53  ;;  %v6167_v58 = vadd.f32 %v6166_v60, %v6165_v15  ;;  %v3318_v8 = vshll.u32 %v8788_v47, 16  ;;  %v5661_v26 = vcombine.low %v2751_v45, %v2751_v45 }
 0x267   : > { %v5662_v27 = vcombine.high %v2751_v45, %v2751_v45  ;;  %2984 = vst [vmem:[#allocation2 + $0x98] sm:$0x1] %v5663_v32  ;;  %v2678_v18 = vshrl.u32 %v2589_v6, 16  ;;  %v2681_v29 = vshll.u32 %v2589_v6, 16  ;;  %3830 = vmatprep.mubr.bf16.mxu1 %v8810_v4  ;;  %v2571_v52 = vmax.f32 %v2539_v57, 0.0  ;;  %v6169_v0 = vpop.f32.mrf.mxu0  ;;  %v8818_v1 = vld [vmem:[#allocation2 + $0x84] sm:$0xff]  }
 0x268   : > { %v2501_v56 = vmul.f32 %v8708_v40, %v2462_v5  ;;  %3831 = vmatmul.mubr.bf16.gmra.mxu1 %v8753_v55  ;;  %v2421_v24 = vadd.f32 %v6167_v58, %v2420_v3  ;;  %v3320_v53 = vrot.slane %v3318_v8, 1  ;;  %2982 = vst [vmem:[#allocation2 + $0x90] sm:$0xf] %v5661_v26  ;;  %v6170_v59 = vadd.f32 %v6169_v0, %v6168_v33 }
 0x269   : > { %2983 = vst [vmem:[#allocation2 + $0x94] sm:$0xf] %v5662_v27  ;;  %v2680_v15 = vrot.slane %v2678_v18, 7  ;;  %v3323_v30 = vshll.u32 %v8777_v42, 16  ;;  %v3437_v35 = vrot.slane %v8805_v34, 1  ;;  %v6171_v60 = vpop.f32.mrf.mxu0  ;;  %v3436_v3 = vrot.slane %v8818_v1, 1 }
 0x26a   : > { %v2540_v9 = vadd.f32 %v8722_v7, %v2501_v56  ;;  %v2463_v63 = vadd.f32 %v2421_v24, %v8429_v39  ;;  %v3321_v62 = vor.u32 %v3320_v53, %v3316_v13  ;;  %v2424_v57 = vadd.f32 %v6170_v59, %v2423_v43 }
 0x26b   : > { %v2683_v32 = vor.u32 %v2681_v29, %v2680_v15  ;;  %v2768_v6 = vsel %vm8460_vm4, %v2680_v15, 0  ;;  %v3325_v5 = vrot.slane %v3323_v30, 1  ;;  %v6172_v33 = vpop.f32.mrf.mxu0  ;;  %v8829_v8 = vsel %vm774_vm1, %v3436_v3, %v3437_v35 }
 0x26c   : > { %v5666_v45 = vcombine.low %v2768_v6, %v2768_v6  ;;  %v2572_v58 = vmax.f32 %v2540_v9, 0.0  ;;  %v2502_v42 = vmul.f32 %v8708_v40, %v2463_v63  ;;  %v2464_v13 = vadd.f32 %v2424_v57, %v8786_v54  ;;  %6789 = vmatprep.mubr.bf16.mxu0 %v8829_v8 }
 0x26d   : > { %v2752_v39 = vsel %vm8460_vm4, 0, %v2683_v32  ;;  %v8835_v26 = vsel %vm565_vm0, %v3321_v62, %v3325_v5  ;;  %v6173_v27 = vadd.f32 %v6172_v33, %v6171_v60  ;;  %v6174_v0 = vpop.f32.mrf.mxu0  ;;  %v3330_v59 = vshll.u32 %v8818_v1, 16 }
 0x26e   : > { %v5664_v18 = vcombine.low %v2752_v39, %v2752_v39  ;;  %v5665_v29 = vcombine.high %v2752_v39, %v2752_v39  ;;  %2987 = vst [vmem:[#allocation2 + $0xa4] sm:$0x1] %v5666_v45  ;;  %v2590_v56 = vpack.c.bf16 %v2572_v58, %v2571_v52  ;;  %v2541_v24 = vadd.f32 %v8722_v7, %v2502_v42  ;;  %v7128_v53 = vld [vmem:[#allocation2 + $0x98] ss:$0 sps:$4 sm:$0x11]  }
 0x26f   : > { %3838 = vmatprep.mubr.bf16.mxu1 %v8835_v26  ;;  %v2503_v15 = vmul.f32 %v8708_v40, %v2464_v13  ;;  %v2429_v54 = vadd.f32 %v8775_v44, %v6173_v27  ;;  %v6175_v9 = vpop.f32.mrf.mxu0  ;;  %v3328_v52 = vshrl.u32 %v8818_v1, 16  ;;  %v3335_v63 = vshll.u32 %v8805_v34, 16 }
 0x270   : > { %2985 = vst [vmem:[#allocation2 + $0x9c] sm:$0xf] %v5664_v18  ;;  %2986 = vst [vmem:[#allocation2 + $0xa0] sm:$0xf] %v5665_v29  ;;  %v2685_v30 = vshrl.u32 %v2590_v56, 16  ;;  %v2688_v35 = vshll.u32 %v2590_v56, 16  ;;  %3839 = vmatmul.mubr.bf16.gmra.mxu1 %v8788_v47  ;;  %v6176_v60 = vadd.f32 %v6175_v9, %v6174_v0 }
 0x271   : > { %v2542_v43 = vadd.f32 %v8722_v7, %v2503_v15  ;;  %v2465_v62 = vadd.f32 %v2429_v54, %v8434_v22  ;;  %v3332_v3 = vrot.slane %v3330_v59, 1  ;;  %v8848_v44 = vld [vmem:[#allocation2 + $0x90] sm:$0xff]   ;;  %v2573_v6 = vmax.f32 %v2541_v24, 0.0 }
 0x272   : > { %v2687_v32 = vrot.slane %v2685_v30, 7  ;;  %v3337_v57 = vrot.slane %v3335_v63, 1  ;;  %v3440_v5 = vrot.slane %v7128_v53, 1  ;;  %v2432_v42 = vadd.f32 %v8812_v12, %v6176_v60 }
 0x273   : > { %v2574_v45 = vmax.f32 %v2542_v43, 0.0  ;;  %v2504_v58 = vmul.f32 %v8708_v40, %v2465_v62  ;;  %v3333_v33 = vor.u32 %v3332_v3, %v3328_v52  ;;  %v3439_v22 = vrot.slane %v8848_v44, 1 }
 0x274   : > { %v2690_v39 = vor.u32 %v2688_v35, %v2687_v32  ;;  %v2769_v34 = vsel %vm8460_vm4, %v2687_v32, 0  ;;  %v3347_v13 = vshll.u32 %v7128_v53, 16  ;;  %v2466_v56 = vadd.f32 %v2432_v42, %v8436_v21 }
 0x275   : > { %v5669_v27 = vcombine.low %v2769_v34, %v2769_v34  ;;  %v2591_v18 = vpack.c.bf16 %v2574_v45, %v2573_v6  ;;  %v2543_v29 = vadd.f32 %v8722_v7, %v2504_v58  ;;  %v8860_v0 = vsel %vm565_vm0, %v3333_v33, %v3337_v57  ;;  %v7132_v54 = vld [vmem:[#allocation2 + $0xa4] ss:$0 sps:$4 sm:$0x11]  }
 0x276   : > { %v2753_v24 = vsel %vm8460_vm4, 0, %v2690_v39  ;;  %v8863_v12 = vsel %vm774_vm1, %v3439_v22, %v3440_v5  ;;  %v3342_v15 = vshll.u32 %v8848_v44, 16  ;;  %3846 = vmatprep.mubr.bf16.mxu1 %v8860_v0  ;;  %v2505_v21 = vmul.f32 %v8708_v40, %v2466_v56 }
 0x277   : > { %v5667_v59 = vcombine.low %v2753_v24, %v2753_v24  ;;  %v5668_v53 = vcombine.high %v2753_v24, %v2753_v24  ;;  %2990 = vst [vmem:[#allocation2 + $0xb0] sm:$0x1] %v5669_v27  ;;  %v2692_v30 = vshrl.u32 %v2591_v18, 16  ;;  %6790 = vmatmul.mubr.bf16.gmra.mxu0 %v8863_v12  ;;  %v3340_v35 = vshrl.u32 %v8848_v44, 16  ;;  %v8871_v52 = vld [vmem:[#allocation2 + $0x9c] sm:$0xff]  }
 0x278   : > { %3847 = vmatmul.mubr.bf16.gmra.mxu1 %v8818_v1  ;;  %v3344_v9 = vrot.slane %v3342_v15, 1  ;;  %v2695_v43 = vshll.u32 %v2591_v18, 16  ;;  %v2575_v62 = vmax.f32 %v2543_v29, 0.0  ;;  %v3349_v60 = vrot.slane %v3347_v13, 1 }
 0x279   : > { %2988 = vst [vmem:[#allocation2 + $0xa8] sm:$0xf] %v5667_v59  ;;  %2989 = vst [vmem:[#allocation2 + $0xac] sm:$0xf] %v5668_v53  ;;  %v2694_v63 = vrot.slane %v2692_v30, 7  ;;  %v2544_v3 = vadd.f32 %v8722_v7, %v2505_v21  ;;  %v3442_v6 = vrot.slane %v8871_v52, 1 }
 0x27a   : > { %v3345_v32 = vor.u32 %v3344_v9, %v3340_v35  ;;  %v3443_v57 = vrot.slane %v7132_v54, 1  ;;  %v3354_v45 = vshll.u32 %v8871_v52, 16  ;;  %v3359_v58 = vshll.u32 %v7132_v54, 16  ;;  %v8896_v35 = vld [vmem:[#allocation2] sm:$0xff]  }
 0x27b   : > { %v2697_v40 = vor.u32 %v2695_v43, %v2694_v63  ;;  %v2770_v5 = vsel %vm8460_vm4, %v2694_v63, 0  ;;  %v2576_v33 = vmax.f32 %v2544_v3, 0.0  ;;  %v3352_v22 = vshrl.u32 %v8871_v52, 16 }
 0x27c   : > { %v5672_v42 = vcombine.low %v2770_v5, %v2770_v5  ;;  %v8879_v39 = vsel %vm565_vm0, %v3345_v32, %v3349_v60  ;;  %v8882_v34 = vsel %vm774_vm1, %v3442_v6, %v3443_v57  ;;  %v3356_v13 = vrot.slane %v3354_v45, 1 }
 0x27d   : > { %v2754_v7 = vsel %vm8460_vm4, 0, %v2697_v40  ;;  %3854 = vmatprep.mubr.bf16.mxu1 %v8879_v39  ;;  %6793 = vmatprep.mubr.bf16.mxu0 %v8882_v34  ;;  %v2592_v29 = vpack.c.bf16 %v2576_v33, %v2575_v62  ;;  %v3361_v24 = vrot.slane %v3359_v58, 1  ;;  %v7151_v58 = vld [vmem:[#allocation2 + $0x8] ss:$0 sps:$4 sm:$0x11]  }
 0x27e   : > { %v5670_v27 = vcombine.low %v2754_v7, %v2754_v7  ;;  %v5671_v18 = vcombine.high %v2754_v7, %v2754_v7  ;;  %2993 = vst [vmem:[#allocation2 + $0xbc] sm:$0x1] %v5672_v42  ;;  %v3357_v56 = vor.u32 %v3356_v13, %v3352_v22  ;;  %v7137_v15 = vld [vmem:[#allocation2 + $0xb0] ss:$0 sps:$4 sm:$0x11]   ;;  %v3198_v42 = vshll.u32 %v8896_v35, 16 }
 0x27f   : > { %v2699_v54 = vshrl.u32 %v2592_v29, 16  ;;  %v2702_v21 = vshll.u32 %v2592_v29, 16  ;;  %v3446_v63 = vrot.slane %v7137_v15, 1  ;;  %v3371_v62 = vshll.u32 %v7137_v15, 16 }
 0x280   : > { %2991 = vst [vmem:[#allocation2 + $0xb4] sm:$0xf] %v5670_v27  ;;  %2992 = vst [vmem:[#allocation2 + $0xb8] sm:$0xf] %v5671_v18  ;;  %3855 = vmatmul.mubr.bf16.gmra.mxu1 %v8848_v44  ;;  %v8891_v59 = vsel %vm565_vm0, %v3357_v56, %v3361_v24  ;;  %v8893_v53 = vld [vmem:[#allocation2 + $0xa8] sm:$0xff]   ;;  %v3196_v15 = vshrl.u32 %v8896_v35, 16 }
 0x281   : > { %v2701_v30 = vrot.slane %v2699_v54, 7  ;;  %3862 = vmatprep.mubr.bf16.mxu1 %v8891_v59  ;;  %v3445_v9 = vrot.slane %v8893_v53, 1  ;;  %v3366_v43 = vshll.u32 %v8893_v53, 16  ;;  %v3364_v32 = vshrl.u32 %v8893_v53, 16 }
 0x282   : > { %v3373_v13 = vrot.slane %v3371_v62, 1  ;;  %v3200_v54 = vrot.slane %v3198_v42, 1 }
 0x283   : > { %v2704_v60 = vor.u32 %v2702_v21, %v2701_v30  ;;  %v2771_v3 = vsel %vm8460_vm4, %v2701_v30, 0  ;;  %v8904_v57 = vsel %vm774_vm1, %v3445_v9, %v3446_v63  ;;  %v3368_v40 = vrot.slane %v3366_v43, 1 }
 0x284   : > { %v5675_v6 = vcombine.low %v2771_v3, %v2771_v3  ;;  %6794 = vmatmul.mubr.bf16.gmra.mxu0 %v8904_v57  ;;  %v3203_v63 = vshll.u32 %v7151_v58, 16 }
 0x285   : > { %v7141_v5 = vld [vmem:[#allocation2 + $0xbc] ss:$0 sps:$4 sm:$0x11]   ;;  %v2755_v45 = vsel %vm8460_vm4, 0, %v2704_v60  ;;  %v3369_v22 = vor.u32 %v3368_v40, %v3364_v32  ;;  %v3201_v32 = vor.u32 %v3200_v54, %v3196_v15  ;;  %v3403_v15 = vrot.slane %v8896_v35, 1 }
 0x286   : > { %v5673_v33 = vcombine.low %v2755_v45, %v2755_v45  ;;  %v5674_v7 = vcombine.high %v2755_v45, %v2755_v45  ;;  %2996 = vst [vmem:[#allocation2 + $0xc8] sm:$0x1] %v5675_v6  ;;  %v3449_v18 = vrot.slane %v7141_v5, 1  ;;  %v3383_v24 = vshll.u32 %v7141_v5, 16 }
 0x287   : > { %v8910_v27 = vld [vmem:[#allocation2 + $0xb4] sm:$0xff]   ;;  %v8914_v38 = vsel %vm565_vm0, %v3369_v22, %v3373_v13  ;;  %v3205_v6 = vrot.slane %v3203_v63, 1  ;;  %v3404_v54 = vrot.slane %v7151_v58, 1  ;;  %v7164_v63 = vld [vmem:[#allocation6 + $0x228] sm:$0xff]  }
 0x288   : > { %3863 = vmatmul.mubr.bf16.gmra.mxu1 %v8871_v52  ;;  %2994 = vst [vmem:[#allocation2 + $0xc0] sm:$0xf] %v5673_v33  ;;  %2995 = vst [vmem:[#allocation2 + $0xc4] sm:$0xf] %v5674_v7  ;;  %v3448_v29 = vrot.slane %v8910_v27, 1  ;;  %v3378_v56 = vshll.u32 %v8910_v27, 16 }
 0x289   : > { %3870 = vmatprep.mubr.bf16.mxu1 %v8914_v38  ;;  %v3376_v21 = vshrl.u32 %v8910_v27, 16  ;;  %v3385_v62 = vrot.slane %v3383_v24, 1  ;;  %v3206_v7 = vsel %vm565_vm0, %v3201_v32, %v3205_v6  ;;  %v7157_v58 = vld [vmem:[#allocation6 + $0x1e8] sm:$0xff]   ;;  %v7173_v32 = vld [vmem:[#allocation6 + $0x210] sm:$0xff]   ;;  %v8954_v6 = vld [vmem:[#allocation2 + $0x18] sm:$0xff]  }
 0x28a   : > { %v8921_v30 = vsel %vm774_vm1, %v3448_v29, %v3449_v18  ;;  %v3380_v9 = vrot.slane %v3378_v56, 1 }
 0x28b   : > { %6797 = vmatprep.mubr.bf16.mxu0 %v8921_v30 }
 0x28c   : > { %v3381_v43 = vor.u32 %v3380_v9, %v3376_v21  ;;  %v7159_v21 = vld [vmem:[#allocation6 + $0x230] sm:$0xff]   ;;  %v3405_v9 = vsel %vm774_vm1, %v3403_v15, %v3404_v54  ;;  %v7167_v15 = vld [vmem:[#allocation6 + $0x1c8] sm:$0xff]   ;;  %v8966_v54 = vld [vmem:[#allocation2 + $0x30] sm:$0xff]  }
 0x28d   : > { %v7146_v60 = vld [vmem:[#allocation2 + $0xc8] ss:$0 sps:$4 sm:$0x11]  }
 0x28e   : > { %v8926_v3 = vsel %vm565_vm0, %v3381_v43, %v3385_v62  ;;  %v3538_v45 = vrot.slane %v7146_v60, 1  ;;  %v3532_v33 = vshll.u32 %v7146_v60, 16  ;;  %v7169_v43 = vld [vmem:[#allocation6 + $0x220] sm:$0xff]   ;;  %v7153_v62 = vld [vmem:[#allocation6 + $0x1b8] sm:$0xff]  }
 0x28f   : > { %v8929_v40 = vld [vmem:[#allocation2 + $0xc0] sm:$0xff]   ;;  %v7195_v60 = vld [vmem:[#allocation2 + $0xc] sm:$0xff]  }
 0x290   : > { %3871 = vmatmul.mubr.bf16.gmra.mxu1 %v8893_v53  ;;  %v3537_v5 = vrot.slane %v8929_v40, 1  ;;  %v3527_v42 = vshll.u32 %v8929_v40, 16  ;;  %v3525_v13 = vshrl.u32 %v8929_v40, 16  ;;  %v3534_v56 = vrot.slane %v3532_v33, 1  ;;  %v7162_v33 = vld [vmem:[#allocation6 + $0x1d8] sm:$0xff]  }
 0x291   : > { %3878 = vmatprep.mubr.bf16.mxu1 %v8926_v3 }
 0x292   : > { %v8936_v22 = vsel %vm774_vm1, %v3537_v5, %v3538_v45  ;;  %v3529_v18 = vrot.slane %v3527_v42, 1  ;;  %v7158_v5 = vld [vmem:[#allocation6 + $0x1a8] sm:$0xff]   ;;  %v7160_v45 = vld [vmem:[#allocation6 + $0x1e0] sm:$0xff]  }
 0x293   : > { %6798 = vmatmul.mubr.bf16.gmra.mxu0 %v8936_v22  ;;  %v7161_v42 = vld [vmem:[#allocation6 + $0x1a0] sm:$0xff]  }
 0x294   : > { %v3530_v29 = vor.u32 %v3529_v18, %v3525_v13  ;;  %4232 = vmatprep.mubr.bf16.mxu0 %v3206_v7  ;;  %v7175_v7 = vld [vmem:[#allocation6 + $0x200] sm:$0xff]   ;;  %v8960_v13 = vld [vmem:[#allocation2 + $0x24] sm:$0xff]   ;;  %v7163_v18 = vld [vmem:[#allocation6 + $0x198] sm:$0xff]  }
 0x296   : > { %v8942_v24 = vsel %vm565_vm0, %v3530_v29, %v3534_v56  ;;  %v7165_v29 = vld [vmem:[#allocation6 + $0x1d0] sm:$0xff]  }
 0x297   : > { %v7166_v56 = vld [vmem:[#allocation6 + $0x190] sm:$0xff]  }
 0x298   : > { %3879 = vmatmul.mubr.bf16.gmra.mxu1 %v8910_v27 }
 0x299   : > { %3886 = vmatprep.mubr.bf16.mxu1 %v8942_v24 }
 0x29b   : > { %4233 = vmatmul.mubr.bf16.vlgmr.msra.gmra.mxu0 %v8896_v35  ;;  %v7155_v35 = vld [vmem:[#allocation6 + $0x1f0] sm:$0xff]  }
 0x29c   : > { %4240 = vmatprep.mubr.bf16.mxu0 %v8514_v11  ;;  %6850 = vmatpush3.bf16.msra.mxu0 %v8639_v51  ;;  %v7172_v11 = vld [vmem:[#allocation6 + $0x218] sm:$0xff]   ;;  %v7156_v51 = vld [vmem:[#allocation6 + $0x1b0] sm:$0xff]  }
 0x29d   : > { %6851 = vmatprep.subr.bf16.mxu0 %v7159_v21 }
 0x2a0   : > { %3887 = vmatmul.mubr.bf16.gmra.mxu1 %v8929_v40  ;;  %6852 = vmatpush3.bf16.msra.mxu0 %v7159_v21  ;;  %v7168_v21 = vld [vmem:[#allocation6 + $0x188] sm:$0xff]  }
 0x2a1   : > { %6817 = vmatprep.mubr.bf16.mxu1 %v3405_v9  ;;  %6853 = vmatprep.subr.bf16.mxu0 %v7164_v63  ;;  %v7170_v9 = vld [vmem:[#allocation6 + $0x1c0] sm:$0xff]  }
 0x2a3   : > { %4241 = vmatmul.mubr.bf16.gmra.mxu0 %v7195_v60 }
 0x2a4   : > { %4248 = vmatprep.mubr.bf16.mxu0 %v8544_v37  ;;  %6854 = vmatpush3.bf16.msra.mxu0 %v7164_v63  ;;  %v7171_v63 = vld [vmem:[#allocation6 + $0x180] sm:$0xff]  }
 0x2a5   : > { %6855 = vmatprep.subr.bf16.mxu0 %v7169_v43 }
 0x2a8   : > { %6818 = vmatmul.mubr.bf16.vlgmr.msra.gmra.mxu1 %v8497_v17  ;;  %6856 = vmatpush3.bf16.msra.mxu0 %v7169_v43  ;;  %v7174_v17 = vld [vmem:[#allocation6 + $0x208] sm:$0xff]  }
 0x2a9   : > { %6821 = vmatprep.mubr.bf16.mxu1 %v8525_v2  ;;  %6474 = vmatpush3.bf16.msra.mxu1 %v7153_v62  ;;  %v8972_v43 = vld [vmem:[#allocation2 + $0x3c] sm:$0xff]   ;;  %v8978_v62 = vld [vmem:[#allocation2 + $0x48] sm:$0xff]  }
 0x2aa   : > { %6475 = vmatprep.subr.bf16.mxu1 %v7155_v35  ;;  %6857 = vmatprep.subr.bf16.mxu0 %v7172_v11 }
 0x2ab   : > { %4249 = vmatmul.mubr.bf16.gmra.mxu0 %v8954_v6 }
 0x2ac   : > { %4256 = vmatprep.mubr.bf16.mxu0 %v8581_v28  ;;  %6858 = vmatpush3.bf16.msra.mxu0 %v7172_v11 }
 0x2ad   : > { %6476 = vmatpush3.bf16.msra.mxu1 %v7156_v51  ;;  %6859 = vmatprep.subr.bf16.mxu0 %v7173_v32 }
 0x2ae   : > { %6477 = vmatprep.subr.bf16.mxu1 %v7157_v58 }
 0x2b0   : > { %6822 = vmatmul.mubr.bf16.gmra.mxu1 %v8561_v23  ;;  %6860 = vmatpush3.bf16.msra.mxu0 %v7173_v32 }
 0x2b1   : > { %6825 = vmatprep.mubr.bf16.mxu1 %v8593_v31  ;;  %6478 = vmatpush3.bf16.msra.mxu1 %v7158_v5 }
 0x2b2   : > { %6479 = vmatprep.subr.bf16.mxu1 %v7160_v45  ;;  %6861 = vmatprep.subr.bf16.mxu0 %v7174_v17 }
 0x2b3   : > { %4257 = vmatmul.mubr.bf16.gmra.mxu0 %v8960_v13 }
 0x2b4   : > { %4264 = vmatprep.mubr.bf16.mxu0 %v8615_v49  ;;  %6862 = vmatpush3.bf16.msra.mxu0 %v7174_v17 }
 0x2b5   : > { %6480 = vmatpush3.bf16.msra.mxu1 %v7161_v42  ;;  %6863 = vmatprep.subr.bf16.mxu0 %v7175_v7 }
 0x2b6   : > { %6481 = vmatprep.subr.bf16.mxu1 %v7162_v33 }
 0x2b8   : > { %6826 = vmatmul.mubr.bf16.gmra.mxu1 %v8625_v14  ;;  %6864 = vmatpush3.bf16.msra.mxu0 %v7175_v7 }
 0x2b9   : > { %6829 = vmatprep.mubr.bf16.mxu1 %v8661_v25  ;;  %6482 = vmatpush3.bf16.msra.mxu1 %v7163_v18 }
 0x2ba   : > { %6483 = vmatprep.subr.bf16.mxu1 %v7165_v29 }
 0x2bb   : > { %4265 = vmatmul.mubr.bf16.gmra.mxu0 %v8966_v54 }
 0x2bc   : > { %4272 = vmatprep.mubr.bf16.mxu0 %v8655_v50 }
 0x2bd   : > { %6484 = vmatpush3.bf16.msra.mxu1 %v7166_v56 }
 0x2be   : > { %6485 = vmatprep.subr.bf16.mxu1 %v7167_v15 }
 0x2c0   : > { %6830 = vmatmul.mubr.bf16.gmra.mxu1 %v8692_v16 }
 0x2c1   : > { %6833 = vmatprep.mubr.bf16.mxu1 %v8737_v10  ;;  %6486 = vmatpush3.bf16.msra.mxu1 %v7168_v21 }
 0x2c2   : > { %6487 = vmatprep.subr.bf16.mxu1 %v7170_v9 }
 0x2c3   : > { %4273 = vmatmul.mubr.bf16.gmra.mxu0 %v8972_v43 }
 0x2c4   : > { %4280 = vmatprep.mubr.bf16.mxu0 %v8687_v36 }
 0x2c5   : > { %6488 = vmatpush3.bf16.msra.mxu1 %v7171_v63 }
 0x2c8   : > { %6834 = vmatmul.mubr.bf16.gmra.mxu1 %v8771_v19 }
 0x2c9   : > { %6837 = vmatprep.mubr.bf16.mxu1 %v8799_v41 }
 0x2cb   : > { %4281 = vmatmul.mubr.bf16.gmra.mxu0 %v8978_v62 }
 0x2cc   : > { %4288 = vmatprep.mubr.bf16.mxu0 %v8734_v48 }
 0x2d0   : > { %6838 = vmatmul.mubr.bf16.gmra.mxu1 %v8829_v8 }
 0x2d1   : > { %6841 = vmatprep.mubr.bf16.mxu1 %v8863_v12 }
 0x2d3   : > { %4289 = vmatmul.mubr.bf16.gmra.mxu0 %v8677_v61 }
 0x2d4   : > { %4296 = vmatprep.mubr.bf16.mxu0 %v8764_v20 }
 0x2d8   : > { %6842 = vmatmul.mubr.bf16.gmra.mxu1 %v8882_v34 }
 0x2d9   : > { %6845 = vmatprep.mubr.bf16.mxu1 %v8904_v57 }
 0x2db   : > { %4297 = vmatmul.mubr.bf16.gmra.mxu0 %v8717_v46 }
 0x2dc   : > { %4304 = vmatprep.mubr.bf16.mxu0 %v8810_v4 }
 0x2e0   : > { %6846 = vmatmul.mubr.bf16.gmra.mxu1 %v8921_v30 }
 0x2e1   : > { %4773 = vmatprep.mubr.bf16.mxu1 %v8544_v37  ;;  %v6217_v60 = vpop.f32.mrf.mxu1 }
 0x2e2   : > { %v6771_v11 = vpop.f32.mrf.mxu0 }
 0x2e3   : > { %v6218_v35 = vpop.f32.mrf.mxu1  ;;  %4305 = vmatmul.mubr.bf16.gmra.mxu0 %v8753_v55 }
 0x2e4   : > { %v6219_v51 = vadd.f32 %v6218_v35, %v6217_v60  ;;  %4312 = vmatprep.mubr.bf16.mxu0 %v8835_v26  ;;  %v3929_v58 = vpop.f32.mrf.mxu0 }
 0x2e5   : > { %v6220_v61 = vpop.f32.mrf.mxu1 }
 0x2e6   : > { %v8994_v32 = vadd.f32 %v6219_v51, %v3929_v58  ;;  %v6772_v33 = vpop.f32.mrf.mxu0 }
 0x2e7   : > { %v6221_v46 = vpop.f32.mrf.mxu1 }
 0x2e8   : > { %4774 = vmatmul.mubr.bf16.vlgmr.msra.gmra.mxu1 %v8954_v6  ;;  %v8998_v5 = vadd.f32 %v6221_v46, %v6220_v61 }
 0x2e9   : > { %4781 = vmatprep.mubr.bf16.mxu1 %v8581_v28  ;;  %v6223_v37 = vpop.f32.mrf.mxu1  ;;  %v9006_v28 = vpop.f32.mrf.mxu0 }
 0x2eb   : > { %v6224_v45 = vpop.f32.mrf.mxu1  ;;  %4313 = vmatmul.mubr.bf16.gmra.mxu0 %v8788_v47 }
 0x2ec   : > { %v6225_v17 = vadd.f32 %v6224_v45, %v6223_v37  ;;  %4320 = vmatprep.mubr.bf16.mxu0 %v8860_v0 }
 0x2ed   : > { %v6226_v42 = vpop.f32.mrf.mxu1 }
 0x2ee   : > { %v9002_v7 = vadd.f32 %v6771_v11, %v6225_v17 }
 0x2ef   : > { %v6227_v18 = vpop.f32.mrf.mxu1 }
 0x2f0   : > { %4782 = vmatmul.mubr.bf16.gmra.mxu1 %v8960_v13  ;;  %v6228_v6 = vadd.f32 %v6227_v18, %v6226_v42 }
 0x2f1   : > { %4789 = vmatprep.mubr.bf16.mxu1 %v8615_v49 }
 0x2f2   : > { %v9008_v29 = vadd.f32 %v6772_v33, %v6228_v6 }
 0x2f3   : > { %v6229_v56 = vpop.f32.mrf.mxu1  ;;  %4321 = vmatmul.mubr.bf16.gmra.mxu0 %v8818_v1 }
 0x2f4   : > { %v6775_v21 = vpop.f32.mrf.mxu0  ;;  %4328 = vmatprep.mubr.bf16.mxu0 %v8879_v39 }
 0x2f5   : > { %v6230_v15 = vpop.f32.mrf.mxu1 }
 0x2f6   : > { %v6231_v9 = vadd.f32 %v6230_v15, %v6229_v56  ;;  %v3945_v60 = vpop.f32.mrf.mxu0 }
 0x2f7   : > { %v6232_v63 = vpop.f32.mrf.mxu1 }
 0x2f8   : > { %4790 = vmatmul.mubr.bf16.gmra.mxu1 %v8966_v54  ;;  %v9013_v13 = vadd.f32 %v6231_v9, %v3945_v60  ;;  %v6776_v58 = vpop.f32.mrf.mxu0 }
 0x2f9   : > { %4797 = vmatprep.mubr.bf16.mxu1 %v8655_v50  ;;  %v6233_v49 = vpop.f32.mrf.mxu1 }
 0x2fa   : > { %v9016_v35 = vadd.f32 %v6233_v49, %v6232_v63  ;;  %v9024_v45 = vpop.f32.mrf.mxu0 }
 0x2fb   : > { %4329 = vmatmul.mubr.bf16.gmra.mxu0 %v8848_v44 }
 0x2fc   : > { %v6235_v11 = vpop.f32.mrf.mxu1  ;;  %4336 = vmatprep.mubr.bf16.mxu0 %v8891_v59 }
 0x2fe   : > { %v6236_v51 = vpop.f32.mrf.mxu1 }
 0x2ff   : > { %v6237_v61 = vadd.f32 %v6236_v51, %v6235_v11 }
 0x300   : > { %4798 = vmatmul.mubr.bf16.gmra.mxu1 %v8972_v43  ;;  %v6238_v46 = vpop.f32.mrf.mxu1 }
 0x301   : > { %4805 = vmatprep.mubr.bf16.mxu1 %v8687_v36  ;;  %v9022_v54 = vadd.f32 %v6775_v21, %v6237_v61 }
 0x302   : > { %v6239_v37 = vpop.f32.mrf.mxu1 }
 0x303   : > { %v6240_v50 = vadd.f32 %v6239_v37, %v6238_v46  ;;  %4337 = vmatmul.mubr.bf16.gmra.mxu0 %v8871_v52 }
 0x304   : > { %4344 = vmatprep.mubr.bf16.mxu0 %v8914_v38 }
 0x305   : > { %v9026_v17 = vadd.f32 %v6776_v58, %v6240_v50  ;;  %v6241_v42 = vpop.f32.mrf.mxu1  ;;  %v6779_v33 = vpop.f32.mrf.mxu0 }
 0x307   : > { %v6242_v18 = vpop.f32.mrf.mxu1  ;;  %v3961_v6 = vpop.f32.mrf.mxu0 }
 0x308   : > { %4806 = vmatmul.mubr.bf16.gmra.mxu1 %v8978_v62  ;;  %v6243_v43 = vadd.f32 %v6242_v18, %v6241_v42  ;;  %v7201_v62 = vld [vmem:[#allocation2 + $0x54] sm:$0xff]   ;;  %v7202_v18 = vld [vmem:[#allocation2 + $0x60] sm:$0xff]  }
 0x309   : > { %4813 = vmatprep.mubr.bf16.mxu1 %v8734_v48  ;;  %v6244_v36 = vpop.f32.mrf.mxu1  ;;  %v6780_v15 = vpop.f32.mrf.mxu0 }
 0x30a   : > { %v9032_v56 = vadd.f32 %v6243_v43, %v3961_v6 }
 0x30b   : > { %v6245_v21 = vpop.f32.mrf.mxu1  ;;  %v3964_v63 = vpop.f32.mrf.mxu0  ;;  %4345 = vmatmul.mubr.bf16.gmra.mxu0 %v8893_v53 }
 0x30c   : > { %v6246_v9 = vadd.f32 %v6245_v21, %v6244_v36  ;;  %4352 = vmatprep.mubr.bf16.mxu0 %v8926_v3 }
 0x30d   : > { %v6247_v60 = vpop.f32.mrf.mxu1 }
 0x30e   : > { %v9035_v49 = vadd.f32 %v6246_v9, %v3964_v63 }
 0x30f   : > { %v6248_v11 = vpop.f32.mrf.mxu1 }
 0x310   : > { %4814 = vmatmul.mubr.bf16.gmra.mxu1 %v7201_v62  ;;  %v6249_v51 = vadd.f32 %v6248_v11, %v6247_v60 }
 0x311   : > { %4821 = vmatprep.mubr.bf16.mxu1 %v8764_v20  ;;  %v6250_v48 = vpop.f32.mrf.mxu1 }
 0x312   : > { %v9039_v61 = vadd.f32 %v6779_v33, %v6249_v51 }
 0x313   : > { %v6251_v58 = vpop.f32.mrf.mxu1  ;;  %4353 = vmatmul.mubr.bf16.gmra.mxu0 %v8910_v27 }
 0x314   : > { %v6252_v46 = vadd.f32 %v6251_v58, %v6250_v48  ;;  %6865 = vmatprep.mubr.bf16.mxu0 %v8525_v2 }
 0x315   : > { %v6783_v42 = vpop.f32.mrf.mxu0 }
 0x316   : > { %v9042_v37 = vadd.f32 %v6780_v15, %v6252_v46  ;;  %v6253_v50 = vpop.f32.mrf.mxu1 }
 0x317   : > { %v3977_v6 = vpop.f32.mrf.mxu0 }
 0x318   : > { %4822 = vmatmul.mubr.bf16.gmra.mxu1 %v7202_v18  ;;  %v6254_v43 = vpop.f32.mrf.mxu1 }
 0x319   : > { %4829 = vmatprep.mubr.bf16.mxu1 %v8810_v4  ;;  %v6255_v20 = vadd.f32 %v6254_v43, %v6253_v50  ;;  %v6784_v33 = vpop.f32.mrf.mxu0 }
 0x31a   : > { %v6256_v36 = vpop.f32.mrf.mxu1 }
 0x31b   : > { %v9046_v21 = vadd.f32 %v6255_v20, %v3977_v6  ;;  %v3980_v63 = vpop.f32.mrf.mxu0  ;;  %6866 = vmatmul.mubr.bf16.vlgmr.msra.gmra.mxu0 %v8561_v23 }
 0x31c   : > { %v6257_v9 = vpop.f32.mrf.mxu1  ;;  %6869 = vmatprep.mubr.bf16.mxu0 %v8593_v31 }
 0x31d   : > { %v6258_v60 = vadd.f32 %v6257_v9, %v6256_v36 }
 0x31e   : > { %v6259_v15 = vpop.f32.mrf.mxu1 }
 0x31f   : > { %v9050_v2 = vadd.f32 %v6258_v60, %v3980_v63 }
 0x320   : > { %4830 = vmatmul.mubr.bf16.gmra.mxu1 %v8753_v55  ;;  %v6260_v11 = vpop.f32.mrf.mxu1 }
 0x321   : > { %4837 = vmatprep.mubr.bf16.mxu1 %v8835_v26  ;;  %v6261_v4 = vadd.f32 %v6260_v11, %v6259_v15 }
 0x322   : > { %v6262_v62 = vpop.f32.mrf.mxu1 }
 0x323   : > { %v9054_v51 = vadd.f32 %v6783_v42, %v6261_v4  ;;  %6870 = vmatmul.mubr.bf16.gmra.mxu0 %v8625_v14 }
 0x324   : > { %v6263_v48 = vpop.f32.mrf.mxu1  ;;  %6873 = vmatprep.mubr.bf16.mxu0 %v8661_v25 }
 0x325   : > { %v6264_v58 = vadd.f32 %v6263_v48, %v6262_v62  ;;  %v6787_v46 = vpop.f32.mrf.mxu0 }
 0x327   : > { %v9058_v23 = vadd.f32 %v6784_v33, %v6264_v58  ;;  %v3993_v31 = vpop.f32.mrf.mxu0 }
 0x328   : > { %v6265_v50 = vpop.f32.mrf.mxu1  ;;  %4838 = vmatmul.mubr.bf16.gmra.mxu1 %v8788_v47 }
 0x329   : > { %4845 = vmatprep.mubr.bf16.mxu1 %v8860_v0  ;;  %v6788_v26 = vpop.f32.mrf.mxu0 }
 0x32a   : > { %v6266_v55 = vpop.f32.mrf.mxu1 }
 0x32b   : > { %v6267_v18 = vadd.f32 %v6266_v55, %v6265_v50  ;;  %6874 = vmatmul.mubr.bf16.gmra.mxu0 %v8692_v16  ;;  %v3996_v14 = vpop.f32.mrf.mxu0 }
 0x32c   : > { %v6268_v42 = vpop.f32.mrf.mxu1  ;;  %6877 = vmatprep.mubr.bf16.mxu0 %v8737_v10 }
 0x32d   : > { %v9062_v43 = vadd.f32 %v6267_v18, %v3993_v31 }
 0x32e   : > { %v6269_v6 = vpop.f32.mrf.mxu1 }
 0x32f   : > { %v6270_v25 = vadd.f32 %v6269_v6, %v6268_v42 }
 0x330   : > { %v6271_v20 = vpop.f32.mrf.mxu1  ;;  %4846 = vmatmul.mubr.bf16.gmra.mxu1 %v8818_v1 }
 0x331   : > { %v9067_v36 = vadd.f32 %v6270_v25, %v3996_v14  ;;  %4853 = vmatprep.mubr.bf16.mxu1 %v8879_v39  ;;  %v7177_v25 = vld [vmem:[#allocation2 + $0xd4] ss:$0 sps:$4 sm:$0x11]  }
 0x332   : > { %v6272_v47 = vpop.f32.mrf.mxu1 }
 0x333   : > { %v6273_v0 = vadd.f32 %v6272_v47, %v6271_v20  ;;  %6878 = vmatmul.mubr.bf16.gmra.mxu0 %v8771_v19 }
 0x334   : > { %v6274_v33 = vpop.f32.mrf.mxu1  ;;  %6881 = vmatprep.mubr.bf16.mxu0 %v8799_v41 }
 0x335   : > { %v9070_v9 = vadd.f32 %v6787_v46, %v6273_v0 }
 0x336   : > { %v6275_v16 = vpop.f32.mrf.mxu1 }
 0x337   : > { %v6276_v63 = vadd.f32 %v6275_v16, %v6274_v33  ;;  %v6791_v10 = vpop.f32.mrf.mxu0 }
 0x338   : > { %v6277_v60 = vpop.f32.mrf.mxu1  ;;  %4854 = vmatmul.mubr.bf16.gmra.mxu1 %v8848_v44 }
 0x339   : > { %v9075_v1 = vadd.f32 %v6788_v26, %v6276_v63  ;;  %4861 = vmatprep.mubr.bf16.mxu1 %v8891_v59  ;;  %v4009_v39 = vpop.f32.mrf.mxu0 }
 0x33a   : > { %v6278_v15 = vpop.f32.mrf.mxu1 }
 0x33b   : > { %v6279_v11 = vadd.f32 %v6278_v15, %v6277_v60  ;;  %v6792_v4 = vpop.f32.mrf.mxu0  ;;  %6882 = vmatmul.mubr.bf16.gmra.mxu0 %v8829_v8  ;;  %v4539_v60 = vshll.u32 %v7177_v25, 16 }
 0x33c   : > { %v6280_v62 = vpop.f32.mrf.mxu1  ;;  %6885 = vmatprep.mubr.bf16.mxu0 %v8863_v12  ;;  %v7176_v12 = vld [vmem:[#allocation2 + $0xcc] sm:$0xff]  }
 0x33d   : > { %v9078_v48 = vadd.f32 %v6279_v11, %v4009_v39  ;;  %v4012_v41 = vpop.f32.mrf.mxu0  ;;  %v4534_v20 = vshll.u32 %v7176_v12, 16  ;;  %v4532_v63 = vshrl.u32 %v7176_v12, 16 }
 0x33e   : > { %v6281_v19 = vpop.f32.mrf.mxu1 }
 0x33f   : > { %v6282_v58 = vadd.f32 %v6281_v19, %v6280_v62  ;;  %v4541_v62 = vrot.slane %v4539_v60, 1  ;;  %v3933_v60 = vadd.f32 %v8998_v5, %v9006_v28 }
 0x340   : > { %v6283_v46 = vpop.f32.mrf.mxu1  ;;  %4862 = vmatmul.mubr.bf16.gmra.mxu1 %v8871_v52 }
 0x341   : > { %v9083_v44 = vadd.f32 %v6282_v58, %v4012_v41  ;;  %4869 = vmatprep.mubr.bf16.mxu1 %v8914_v38 }
 0x342   : > { %v6284_v59 = vpop.f32.mrf.mxu1 }
 0x343   : > { %v6285_v31 = vadd.f32 %v6284_v59, %v6283_v46  ;;  %6886 = vmatmul.mubr.bf16.gmra.mxu0 %v8882_v34 }
 0x344   : > { %v6286_v50 = vpop.f32.mrf.mxu1  ;;  %v6795_v26 = vpop.f32.mrf.mxu0  ;;  %6889 = vmatprep.mubr.bf16.mxu0 %v8904_v57  ;;  %v4544_v57 = vrot.slane %v7176_v12, 1 }
 0x345   : > { %v9086_v55 = vadd.f32 %v6791_v10, %v6285_v31  ;;  %v4536_v10 = vrot.slane %v4534_v20, 1 }
 0x346   : > { %v6287_v8 = vpop.f32.mrf.mxu1  ;;  %v4025_v52 = vpop.f32.mrf.mxu0 }
 0x347   : > { %v6288_v18 = vadd.f32 %v6287_v8, %v6286_v50 }
 0x348   : > { %v6289_v42 = vpop.f32.mrf.mxu1  ;;  %4870 = vmatmul.mubr.bf16.gmra.mxu1 %v8893_v53  ;;  %v6796_v14 = vpop.f32.mrf.mxu0  ;;  %v4545_v53 = vrot.slane %v7177_v25, 1 }
 0x349   : > { %v9091_v6 = vadd.f32 %v6792_v4, %v6288_v18  ;;  %4877 = vmatprep.mubr.bf16.mxu1 %v8926_v3  ;;  %v4537_v4 = vor.u32 %v4536_v10, %v4532_v63 }
 0x34a   : > { %v6290_v38 = vpop.f32.mrf.mxu1  ;;  %v4028_v16 = vpop.f32.mrf.mxu0 }
 0x34b   : > { %v6291_v47 = vadd.f32 %v6290_v38, %v6289_v42  ;;  %6890 = vmatmul.mubr.bf16.gmra.mxu0 %v8921_v30  ;;  %v4546_v30 = vsel %vm774_vm1, %v4544_v57, %v4545_v53  ;;  %v4542_v59 = vsel %vm565_vm0, %v4537_v4, %v4541_v62 }
 0x34c   : > { %v6292_v34 = vpop.f32.mrf.mxu1  ;;  %6893 = vmatprep.mubr.bf16.mxu0 %v8936_v22 }
 0x34d   : > { %v9094_v0 = vadd.f32 %v6291_v47, %v4025_v52 }
 0x34e   : > { %v6293_v33 = vpop.f32.mrf.mxu1 }
 0x34f   : > { %v6294_v3 = vadd.f32 %v6293_v33, %v6292_v34 }
 0x350   : > { %v6295_v39 = vpop.f32.mrf.mxu1  ;;  %4878 = vmatmul.mubr.bf16.gmra.mxu1 %v8910_v27 }
 0x351   : > { %v9099_v15 = vadd.f32 %v6294_v3, %v4028_v16  ;;  %4885 = vmatprep.mubr.bf16.mxu1 %v8942_v24 }
 0x352   : > { %v6296_v11 = vpop.f32.mrf.mxu1 }
 0x353   : > { %v6297_v19 = vadd.f32 %v6296_v11, %v6295_v39  ;;  %v6799_v58 = vpop.f32.mrf.mxu0  ;;  %6894 = vmatmul.mubr.bf16.gmra.mxu0 %v4546_v30 }
 0x354   : > { %v6298_v41 = vpop.f32.mrf.mxu1 }
 0x355   : > { %v9103_v22 = vadd.f32 %v6795_v26, %v6297_v19  ;;  %v4041_v27 = vpop.f32.mrf.mxu0 }
 0x356   : > { %v6299_v46 = vpop.f32.mrf.mxu1 }
 0x357   : > { %v6300_v31 = vadd.f32 %v6299_v46, %v6298_v41  ;;  %v6800_v8 = vpop.f32.mrf.mxu0 }
 0x358   : > { %v6301_v50 = vpop.f32.mrf.mxu1  ;;  %4886 = vmatmul.mubr.bf16.gmra.mxu1 %v8929_v40 }
 0x359   : > { %v9107_v24 = vadd.f32 %v6796_v14, %v6300_v31  ;;  %4893 = vmatprep.mubr.bf16.mxu1 %v4542_v59  ;;  %v4044_v52 = vpop.f32.mrf.mxu0 }
 0x35a   : > { %v6302_v18 = vpop.f32.mrf.mxu1 }
 0x35b   : > { %v6303_v42 = vadd.f32 %v6302_v18, %v6301_v50  ;;  %v6353_v25 = vpop.f32.mrf.mxu0 }
 0x35c   : > { %v6304_v38 = vpop.f32.mrf.mxu1 }
 0x35d   : > { %v9109_v26 = vadd.f32 %v6303_v42, %v4041_v27  ;;  %v6354_v34 = vpop.f32.mrf.mxu0 }
 0x35e   : > { %v6305_v20 = vpop.f32.mrf.mxu1  ;;  %v6355_v33 = vadd.f32 %v6354_v34, %v6353_v25 }
 0x35f   : > { %v6306_v47 = vadd.f32 %v6305_v20, %v6304_v38  ;;  %v6356_v40 = vpop.f32.mrf.mxu0 }
 0x360   : > { %v6307_v57 = vpop.f32.mrf.mxu1  ;;  %4894 = vmatmul.mubr.bf16.gmra.mxu1 %v7176_v12  ;;  %v4235_v53 = vadd.f32 %v6355_v33, %v8994_v32 }
 0x361   : > { %v9111_v16 = vadd.f32 %v6306_v47, %v4044_v52  ;;  %v6357_v10 = vpop.f32.mrf.mxu0 }
 0x362   : > { %v6308_v14 = vpop.f32.mrf.mxu1  ;;  %v6358_v39 = vadd.f32 %v6357_v10, %v6356_v40 }
 0x363   : > { %v6309_v63 = vadd.f32 %v6308_v14, %v6307_v57  ;;  %v6359_v30 = vpop.f32.mrf.mxu0  ;;  %v3949_v14 = vadd.f32 %v9016_v35, %v9024_v45 }
 0x364   : > { %v6310_v3 = vpop.f32.mrf.mxu1  ;;  %v4238_v62 = vadd.f32 %v6358_v39, %v3933_v60 }
 0x365   : > { %v9116_v11 = vadd.f32 %v6799_v58, %v6309_v63  ;;  %v6360_v19 = vpop.f32.mrf.mxu0 }
 0x366   : > { %v6311_v4 = vpop.f32.mrf.mxu1  ;;  %v6361_v46 = vadd.f32 %v6360_v19, %v6359_v30 }
 0x367   : > { %v6312_v12 = vadd.f32 %v6311_v4, %v6310_v3  ;;  %v6362_v31 = vpop.f32.mrf.mxu0 }
 0x368   : > { %v6819_v41 = vpop.f32.mrf.mxu1  ;;  %v4243_v27 = vadd.f32 %v6361_v46, %v9002_v7 }
 0x369   : > { %v9118_v59 = vadd.f32 %v6800_v8, %v6312_v12  ;;  %v6363_v5 = vpop.f32.mrf.mxu0 }
 0x36a   : > { %v4395_v32 = vpop.f32.mrf.mxu1  ;;  %v6364_v18 = vadd.f32 %v6363_v5, %v6362_v31  ;;  %v9123_v58 = vadd.f32 %v6819_v41, %v4243_v27 }
 0x36b   : > { %v9121_v50 = vadd.f32 %v4395_v32, %v4235_v53  ;;  %v6365_v42 = vpop.f32.mrf.mxu0 }
 0x36c   : > { %v6820_v28 = vpop.f32.mrf.mxu1  ;;  %v4246_v38 = vadd.f32 %v6364_v18, %v9008_v29 }
 0x36d   : > { %v6366_v20 = vpop.f32.mrf.mxu0 }
 0x36e   : > { %v4398_v52 = vpop.f32.mrf.mxu1  ;;  %v6367_v47 = vadd.f32 %v6366_v20, %v6365_v42  ;;  %v9128_v34 = vadd.f32 %v6820_v28, %v4246_v38 }
 0x36f   : > { %v9126_v25 = vadd.f32 %v4398_v52, %v4238_v62  ;;  %v6368_v57 = vpop.f32.mrf.mxu0 }
 0x370   : > { %v6823_v8 = vpop.f32.mrf.mxu1  ;;  %v4251_v33 = vadd.f32 %v6367_v47, %v9013_v13 }
 0x371   : > { %v6369_v40 = vpop.f32.mrf.mxu0 }
 0x372   : > { %v4411_v7 = vpop.f32.mrf.mxu1  ;;  %v6370_v63 = vadd.f32 %v6369_v40, %v6368_v57 }
 0x373   : > { %v9133_v10 = vadd.f32 %v4411_v7, %v4251_v33  ;;  %v6371_v29 = vpop.f32.mrf.mxu0 }
 0x374   : > { %v6824_v53 = vpop.f32.mrf.mxu1  ;;  %v4254_v3 = vadd.f32 %v6370_v63, %v3949_v14 }
 0x375   : > { %v6372_v39 = vpop.f32.mrf.mxu0 }
 0x376   : > { %v4414_v60 = vpop.f32.mrf.mxu1  ;;  %v6373_v4 = vadd.f32 %v6372_v39, %v6371_v29 }
 0x377   : > { %v9135_v62 = vadd.f32 %v4414_v60, %v4254_v3  ;;  %v6374_v12 = vpop.f32.mrf.mxu0 }
 0x378   : > { %v6827_v30 = vpop.f32.mrf.mxu1  ;;  %v4259_v13 = vadd.f32 %v6373_v4, %v9022_v54 }
 0x379   : > { %v6375_v41 = vpop.f32.mrf.mxu0 }
 0x37a   : > { %v4427_v19 = vpop.f32.mrf.mxu1  ;;  %v6376_v31 = vadd.f32 %v6375_v41, %v6374_v12  ;;  %v9138_v35 = vadd.f32 %v6823_v8, %v4259_v13 }
 0x37b   : > { %v6377_v45 = vpop.f32.mrf.mxu0 }
 0x37c   : > { %v6828_v46 = vpop.f32.mrf.mxu1  ;;  %v4262_v27 = vadd.f32 %v6376_v31, %v9026_v17 }
 0x37d   : > { %v6378_v5 = vpop.f32.mrf.mxu0 }
 0x37e   : > { %v4430_v32 = vpop.f32.mrf.mxu1  ;;  %v6379_v18 = vadd.f32 %v6378_v5, %v6377_v45  ;;  %v9141_v42 = vadd.f32 %v6824_v53, %v4262_v27 }
 0x37f   : > { %v6380_v52 = vpop.f32.mrf.mxu0 }
 0x380   : > { %v6831_v28 = vpop.f32.mrf.mxu1  ;;  %v4267_v20 = vadd.f32 %v6379_v18, %v9032_v56 }
 0x381   : > { %v6381_v47 = vpop.f32.mrf.mxu0 }
 0x382   : > { %v4443_v38 = vpop.f32.mrf.mxu1  ;;  %v6382_v57 = vadd.f32 %v6381_v47, %v6380_v52  ;;  %v9144_v7 = vadd.f32 %v4427_v19, %v4267_v20 }
 0x383   : > { %v6383_v8 = vpop.f32.mrf.mxu0 }
 0x384   : > { %v6832_v54 = vpop.f32.mrf.mxu1  ;;  %v4270_v40 = vadd.f32 %v6382_v57, %v9035_v49 }
 0x385   : > { %v6384_v14 = vpop.f32.mrf.mxu0 }
 0x386   : > { %v4446_v33 = vpop.f32.mrf.mxu1  ;;  %v6385_v63 = vadd.f32 %v6384_v14, %v6383_v8  ;;  %v9149_v29 = vadd.f32 %v4430_v32, %v4270_v40 }
 0x387   : > { %v6386_v53 = vpop.f32.mrf.mxu0 }
 0x388   : > { %v9147_v17 = vpop.f32.mrf.mxu1  ;;  %v4275_v3 = vadd.f32 %v6385_v63, %v9039_v61 }
 0x389   : > { %v6387_v56 = vpop.f32.mrf.mxu0 }
 0x38a   : > { %v4459_v60 = vpop.f32.mrf.mxu1  ;;  %v6388_v4 = vadd.f32 %v6387_v56, %v6386_v53  ;;  %v9154_v12 = vadd.f32 %v6827_v30, %v4275_v3 }
 0x38b   : > { %v6389_v19 = vpop.f32.mrf.mxu0 }
 0x38c   : > { %v9152_v39 = vpop.f32.mrf.mxu1  ;;  %v4278_v49 = vadd.f32 %v6388_v4, %v9042_v37 }
 0x38d   : > { %v6390_v41 = vpop.f32.mrf.mxu0 }
 0x38e   : > { %v4462_v13 = vpop.f32.mrf.mxu1  ;;  %v6391_v45 = vadd.f32 %v6390_v41, %v6389_v19  ;;  %v9159_v32 = vadd.f32 %v6828_v46, %v4278_v49 }
 0x38f   : > { %v6392_v27 = vpop.f32.mrf.mxu0 }
 0x390   : > { %v9157_v31 = vpop.f32.mrf.mxu1  ;;  %v4283_v61 = vadd.f32 %v6391_v45, %v9046_v21 }
 0x391   : > { %v6393_v18 = vpop.f32.mrf.mxu0 }
 0x392   : > { %v4475_v5 = vpop.f32.mrf.mxu1  ;;  %v6394_v20 = vadd.f32 %v6393_v18, %v6392_v27  ;;  %v9164_v30 = vadd.f32 %v4443_v38, %v4283_v61 }
 0x393   : > { %v6395_v47 = vpop.f32.mrf.mxu0 }
 0x394   : > { %v9162_v52 = vpop.f32.mrf.mxu1  ;;  %v4286_v37 = vadd.f32 %v6394_v20, %v9050_v2 }
 0x395   : > { %v6396_v8 = vpop.f32.mrf.mxu0 }
 0x396   : > { %v4478_v57 = vpop.f32.mrf.mxu1  ;;  %v6397_v14 = vadd.f32 %v6396_v8, %v6395_v47  ;;  %v9169_v46 = vadd.f32 %v4446_v33, %v4286_v37 }
 0x397   : > { %v6398_v63 = vpop.f32.mrf.mxu0 }
 0x398   : > { %v9167_v40 = vpop.f32.mrf.mxu1  ;;  %v4291_v21 = vadd.f32 %v6397_v14, %v9054_v51 }
 0x399   : > { %v6399_v3 = vpop.f32.mrf.mxu0 }
 0x39a   : > { %v9171_v53 = vpop.f32.mrf.mxu1  ;;  %v6400_v38 = vadd.f32 %v6399_v3, %v6398_v63  ;;  %v9176_v4 = vadd.f32 %v6831_v28, %v4291_v21 }
 0x39b   : > { %v6401_v19 = vpop.f32.mrf.mxu0 }
 0x39c   : > { %v9174_v56 = vpop.f32.mrf.mxu1  ;;  %v4294_v2 = vadd.f32 %v6400_v38, %v9058_v23 }
 0x39d   : > { %v6402_v41 = vpop.f32.mrf.mxu0 }
 0x39e   : > { %v9178_v49 = vpop.f32.mrf.mxu1  ;;  %v6403_v33 = vadd.f32 %v6402_v41, %v6401_v19  ;;  %v9183_v27 = vadd.f32 %v6832_v54, %v4294_v2 }
 0x39f   : > { %v6404_v61 = vpop.f32.mrf.mxu0 }
 0x3a0   : > { %v9181_v45 = vpop.f32.mrf.mxu1  ;;  %v4299_v51 = vadd.f32 %v6403_v33, %v9062_v43 }
 0x3a1   : > { %v6405_v20 = vpop.f32.mrf.mxu0 }
 0x3a2   : > { %v9185_v18 = vpop.f32.mrf.mxu1  ;;  %v6406_v28 = vadd.f32 %v6405_v20, %v6404_v61  ;;  %v9190_v37 = vadd.f32 %v4459_v60, %v4299_v51 }
 0x3a3   : > { %v6407_v8 = vpop.f32.mrf.mxu0 }
 0x3a4   : > { %v9188_v47 = vpop.f32.mrf.mxu1  ;;  %v4302_v23 = vadd.f32 %v6406_v28, %v9067_v36 }
 0x3a5   : > { %v6408_v63 = vpop.f32.mrf.mxu0 }
 0x3a6   : > { %v9192_v14 = vpop.f32.mrf.mxu1  ;;  %v6409_v54 = vadd.f32 %v6408_v63, %v6407_v8  ;;  %v9197_v3 = vadd.f32 %v4462_v13, %v4302_v23 }
 0x3a7   : > { %v6410_v38 = vpop.f32.mrf.mxu0 }
 0x3a8   : > { %v9195_v21 = vpop.f32.mrf.mxu1  ;;  %9638 = vst [vmem:[#allocation13_spill] sm:$0xff] %v9197_v3  ;;  %v4307_v43 = vadd.f32 %v6409_v54, %v9070_v9 }
 0x3a9   : > { %v6411_v2 = vpop.f32.mrf.mxu0 }
 0x3aa   : > { %v9199_v19 = vpop.f32.mrf.mxu1  ;;  %v6412_v60 = vadd.f32 %v6411_v2, %v6410_v38  ;;  %v9205_v33 = vadd.f32 %v9147_v17, %v4307_v43 }
 0x3ab   : > { %v6413_v61 = vpop.f32.mrf.mxu0 }
 0x3ac   : > { %v9202_v41 = vpop.f32.mrf.mxu1  ;;  %v4310_v51 = vadd.f32 %v6412_v60, %v9075_v1 }
 0x3ad   : > { %v6414_v20 = vpop.f32.mrf.mxu0 }
 0x3ae   : > { %v9207_v36 = vpop.f32.mrf.mxu1  ;;  %v6415_v28 = vadd.f32 %v6414_v20, %v6413_v61  ;;  %v9213_v8 = vadd.f32 %v9152_v39, %v4310_v51 }
 0x3af   : > { %v6416_v9 = vpop.f32.mrf.mxu0 }
 0x3b0   : > { %v9210_v13 = vpop.f32.mrf.mxu1  ;;  %9639 = vst [vmem:[#allocation14_spill] sm:$0xff] %v9213_v8  ;;  %v4315_v63 = vadd.f32 %v6415_v28, %v9078_v48 }
 0x3b1   : > { %v6417_v54 = vpop.f32.mrf.mxu0 }
 0x3b2   : > { %v9215_v23 = vpop.f32.mrf.mxu1  ;;  %v6418_v38 = vadd.f32 %v6417_v54, %v6416_v9  ;;  %v9220_v43 = vadd.f32 %v4475_v5, %v4315_v63 }
 0x3b3   : > { %v6419_v2 = vpop.f32.mrf.mxu0 }
 0x3b4   : > { %v9218_v17 = vpop.f32.mrf.mxu1  ;;  %v4318_v60 = vadd.f32 %v6418_v38, %v9083_v44 }
 0x3b5   : > { %v6420_v61 = vpop.f32.mrf.mxu0 }
 0x3b6   : > { %v9222_v1 = vpop.f32.mrf.mxu1  ;;  %v6421_v39 = vadd.f32 %v6420_v61, %v6419_v2  ;;  %v9227_v51 = vadd.f32 %v4478_v57, %v4318_v60 }
 0x3b7   : > { %v6422_v3 = vpop.f32.mrf.mxu0 }
 0x3b8   : > { %v9225_v20 = vpop.f32.mrf.mxu1  ;;  %9640 = vst [vmem:[#allocation15_spill] sm:$0xff] %v9227_v51  ;;  %v4323_v48 = vadd.f32 %v6421_v39, %v9086_v55 }
 0x3b9   : > { %v6423_v28 = vpop.f32.mrf.mxu0 }
 0x3ba   : > { %v9229_v8 = vpop.f32.mrf.mxu1  ;;  %v6424_v5 = vadd.f32 %v6423_v28, %v6422_v3  ;;  %v9235_v63 = vadd.f32 %v9157_v31, %v4323_v48 }
 0x3bb   : > { %v6425_v54 = vpop.f32.mrf.mxu0 }
 0x3bc   : > { %v9232_v9 = vpop.f32.mrf.mxu1  ;;  %v4326_v38 = vadd.f32 %v6424_v5, %v9091_v6 }
 0x3bd   : > { %v6426_v2 = vpop.f32.mrf.mxu0 }
 0x3be   : > { %v9237_v44 = vpop.f32.mrf.mxu1  ;;  %v6427_v60 = vadd.f32 %v6426_v2, %v6425_v54  ;;  %v9243_v61 = vadd.f32 %v9162_v52, %v4326_v38 }
 0x3bf   : > { %v6428_v55 = vpop.f32.mrf.mxu0 }
 0x3c0   : > { %v9240_v57 = vpop.f32.mrf.mxu1  ;;  %9641 = vst [vmem:[#allocation16_spill] sm:$0xff] %v9243_v61  ;;  %v4331_v3 = vadd.f32 %v6427_v60, %v9094_v0 }
 0x3c1   : > { %v6429_v28 = vpop.f32.mrf.mxu0 }
 0x3c2   : > { %v9245_v39 = vpop.f32.mrf.mxu1  ;;  %v6430_v48 = vadd.f32 %v6429_v28, %v6428_v55  ;;  %v9251_v51 = vadd.f32 %v9171_v53, %v4331_v3 }
 0x3c3   : > { %v6431_v6 = vpop.f32.mrf.mxu0 }
 0x3c4   : > { %v9248_v31 = vpop.f32.mrf.mxu1  ;;  %9642 = vst [vmem:[#allocation17_spill] sm:$0xff] %v9251_v51  ;;  %v4334_v54 = vadd.f32 %v6430_v48, %v9099_v15 }
 0x3c5   : > { %v6432_v2 = vpop.f32.mrf.mxu0 }
 0x3c6   : > { %v9253_v5 = vpop.f32.mrf.mxu1  ;;  %v6433_v38 = vadd.f32 %v6432_v2, %v6431_v6  ;;  %v9259_v61 = vadd.f32 %v9178_v49, %v4334_v54 }
 0x3c7   : > { %v6434_v0 = vpop.f32.mrf.mxu0 }
 0x3c8   : > { %v9256_v52 = vpop.f32.mrf.mxu1  ;;  %9643 = vst [vmem:[#allocation18_spill] sm:$0xff] %v9259_v61  ;;  %v4339_v55 = vadd.f32 %v6433_v38, %v9103_v22 }
 0x3c9   : > { %v6435_v28 = vpop.f32.mrf.mxu0 }
 0x3ca   : > { %v9261_v60 = vpop.f32.mrf.mxu1  ;;  %v6436_v3 = vadd.f32 %v6435_v28, %v6434_v0  ;;  %v9267_v51 = vadd.f32 %v9167_v40, %v4339_v55 }
 0x3cb   : > { %v6437_v15 = vpop.f32.mrf.mxu0 }
 0x3cc   : > { %v9264_v53 = vpop.f32.mrf.mxu1  ;;  %9644 = vst [vmem:[#allocation19_spill] sm:$0xff] %v9267_v51  ;;  %v4342_v6 = vadd.f32 %v6436_v3, %v9107_v24 }
 0x3cd   : > { %v6438_v2 = vpop.f32.mrf.mxu0 }
 0x3ce   : > { %v9269_v48 = vpop.f32.mrf.mxu1  ;;  %v6439_v54 = vadd.f32 %v6438_v2, %v6437_v15  ;;  %v9275_v61 = vadd.f32 %v9174_v56, %v4342_v6 }
 0x3cf   : > { %v6440_v22 = vpop.f32.mrf.mxu0 }
 0x3d0   : > { %v9272_v49 = vpop.f32.mrf.mxu1  ;;  %9645 = vst [vmem:[#allocation20_spill] sm:$0xff] %v9275_v61  ;;  %v4347_v0 = vadd.f32 %v6439_v54, %v9109_v26 }
 0x3d1   : > { %v6441_v28 = vpop.f32.mrf.mxu0 }
 0x3d2   : > { %v9277_v38 = vpop.f32.mrf.mxu1  ;;  %v6442_v55 = vadd.f32 %v6441_v28, %v6440_v22  ;;  %v9283_v51 = vadd.f32 %v9185_v18, %v4347_v0  ;;  %v6497_v18 = vadd.f32 %v9215_v23, %v9210_v13  ;;  %v9311_v13 = vld [vmem:[%s9601_s6] ss:$0 sm:$0xff] }
 0x3d3   : > { %v6443_v24 = vpop.f32.mrf.mxu0 }
 0x3d4   : > { %v9280_v40 = vpop.f32.mrf.mxu1  ;;  %9646 = vst [vmem:[#allocation21_spill] sm:$0xff] %v9283_v51  ;;  %v4350_v15 = vadd.f32 %v6442_v55, %v9111_v16 }
 0x3d5   : > { %v6444_v2 = vpop.f32.mrf.mxu0 }
 0x3d6   : > { %v9285_v3 = vpop.f32.mrf.mxu1  ;;  %v6445_v6 = vadd.f32 %v6444_v2, %v6443_v24  ;;  %v9291_v61 = vadd.f32 %v9192_v14, %v4350_v15  ;;  %v6491_v14 = vadd.f32 %v9199_v19, %v9195_v21 }
 0x3d7   : > { %v6446_v26 = vpop.f32.mrf.mxu0 }
 0x3d8   : > { %v9288_v56 = vpop.f32.mrf.mxu1  ;;  %v4355_v22 = vadd.f32 %v6445_v6, %v9116_v11 }
 0x3d9   : > { %v6447_v28 = vpop.f32.mrf.mxu0 }
 0x3da   : > { %v9293_v54 = vpop.f32.mrf.mxu1  ;;  %v9301_v16 = vadd.f32 %v9181_v45, %v4355_v22  ;;  %v6448_v55 = vadd.f32 %v6447_v28, %v6446_v26  ;;  %v6500_v45 = vadd.f32 %v9222_v1, %v9218_v17  ;;  %v6494_v26 = vadd.f32 %v9207_v36, %v9202_v41  ;;  %v5175_v28 = vld [vmem:[%s7504_s16 + $0x10] sm:$0xff]  ;;  %v5173_v36 = vld [vmem:[%s7504_s16] sm:$0xff] }
 0x3db   : > { %v6867_v51 = vpop.f32.mrf.mxu0  ;;  %v6509_v41 = vadd.f32 %v9245_v39, %v9240_v57  ;;  %v5176_v57 = vld [vmem:[%s7504_s16 + $0x18] sm:$0xff] }
 0x3dc   : > { %v9298_v0 = vpop.f32.mrf.mxu1  ;;  %v4358_v15 = vadd.f32 %v6448_v55, %v9118_v59  ;;  %v4945_v11 = vadd.f32 %v6867_v51, %v6497_v18  ;;  %v9324_v59 = vld [vmem:[%s9602_s7] ss:$0 sm:$0xff] }
 0x3dd   : > { %v4936_v23 = vpop.f32.mrf.mxu0 }
 0x3de   : > { %v9305_v24 = vpop.f32.mrf.mxu1  ;;  %v9318_v6 = vadd.f32 %v9188_v47, %v4358_v15  ;;  %v5065_v21 = vadd.f32 %v4945_v11, %v9123_v58  ;;  %v4937_v19 = vadd.f32 %v6491_v14, %v4936_v23 }
 0x3df   : > { %v6868_v51 = vpop.f32.mrf.mxu0 }
 0x3e0   : > { %v9315_v2 = vpop.f32.mrf.mxu1  ;;  %v5104_v17 = vmul.f32 %v9311_v13, %v5065_v21  ;;  %v5063_v47 = vadd.f32 %v4937_v19, %v9121_v50  ;;  %v4948_v1 = vadd.f32 %v6868_v51, %v6500_v45 }
 0x3e1   : > { %v4939_v58 = vpop.f32.mrf.mxu0 }
 0x3e2   : > { %v9328_v22 = vpop.f32.mrf.mxu1  ;;  %v5143_v18 = vadd.f32 %v9324_v59, %v5104_v17  ;;  %v5102_v14 = vmul.f32 %v9311_v13, %v5063_v47  ;;  %v5066_v15 = vadd.f32 %v4948_v1, %v9128_v34  ;;  %v4940_v11 = vadd.f32 %v6494_v26, %v4939_v58 }
 0x3e3   : > { %v6871_v23 = vpop.f32.mrf.mxu0  ;;  %v6503_v34 = vadd.f32 %v9229_v8, %v9225_v20  ;;  %v6512_v26 = vadd.f32 %v9253_v5, %v9248_v31 }
 0x3e4   : > { %v9334_v55 = vpop.f32.mrf.mxu1  ;;  %v5207_v21 = vadd.f32 %v5175_v28, %v5143_v18  ;;  %v5141_v50 = vadd.f32 %v9324_v59, %v5102_v14  ;;  %v5105_v19 = vmul.f32 %v9311_v13, %v5066_v15  ;;  %v5064_v51 = vadd.f32 %v4940_v11, %v9126_v25  ;;  %v5174_v14 = vld [vmem:[%s7504_s16 + $0x8] sm:$0xff] }
 0x3e5   : > { %v4961_v39 = vadd.f32 %v6871_v23, %v6509_v41  ;;  %v4952_v17 = vpop.f32.mrf.mxu0  ;;  %v6506_v25 = vadd.f32 %v9237_v44, %v9232_v9 }
 0x3e6   : > { %v9342_v45 = vpop.f32.mrf.mxu1  ;;  %v5239_v47 = vmax.f32 %v5207_v21, 0.0  ;;  %v5205_v1 = vadd.f32 %v5173_v36, %v5141_v50  ;;  %v5144_v28 = vadd.f32 %v9324_v59, %v5105_v19  ;;  %v5103_v18 = vmul.f32 %v9311_v13, %v5064_v51  ;;  %v5179_v19 = vld [vmem:[%s7504_s16 + $0x30] sm:$0xff] }
 0x3e7   : > { %v5069_v8 = vadd.f32 %v4961_v39, %v9138_v35  ;;  %v4953_v20 = vadd.f32 %v6503_v34, %v4952_v17  ;;  %v6872_v31 = vpop.f32.mrf.mxu0  ;;  %v6521_v35 = vadd.f32 %v9277_v38, %v9272_v49  ;;  %v6515_v49 = vadd.f32 %v9261_v60, %v9256_v52  ;;  %v5177_v17 = vld [vmem:[%s7504_s16 + $0x20] sm:$0xff]  ;;  %v5180_v52 = vld [vmem:[%s7504_s16 + $0x38] sm:$0xff] }
 0x3e8   : > { %v9352_v58 = vpop.f32.mrf.mxu1  ;;  %5271 = vst [vmem:[%s9361_s24 + $0x10] sm:$0xff] %v5239_v47  ;;  %v5237_v5 = vmax.f32 %v5205_v1, 0.0  ;;  %v5208_v15 = vadd.f32 %v5176_v57, %v5144_v28  ;;  %v5142_v11 = vadd.f32 %v9324_v59, %v5103_v18  ;;  %v4964_v36 = vadd.f32 %v6872_v31, %v6512_v26 }
 0x3e9   : > { %v5108_v9 = vmul.f32 %v9311_v13, %v5069_v8  ;;  %v5067_v44 = vadd.f32 %v4953_v20, %v9133_v10  ;;  %v4955_v23 = vpop.f32.mrf.mxu0 }
 0x3ea   : > { %v9365_v41 = vpop.f32.mrf.mxu1  ;;  %5269 = vst [vmem:[%s9361_s24] sm:$0xff] %v5237_v5  ;;  %v5240_v21 = vmax.f32 %v5208_v15, 0.0  ;;  %v5206_v50 = vadd.f32 %v5174_v14, %v5142_v11  ;;  %v5070_v34 = vadd.f32 %v4964_v36, %v9141_v42  ;;  %v4956_v26 = vadd.f32 %v6506_v25, %v4955_v23  ;;  %v5178_v36 = vld [vmem:[%s7504_s16 + $0x28] sm:$0xff] }
 0x3eb   : > { %v5147_v38 = vadd.f32 %v9324_v59, %v5108_v9  ;;  %v5106_v57 = vmul.f32 %v9311_v13, %v5067_v44  ;;  %v6875_v10 = vpop.f32.mrf.mxu0 }
 0x3ec   : > { %v9373_v51 = vpop.f32.mrf.mxu1  ;;  %5272 = vst [vmem:[%s9361_s24 + $0x18] sm:$0xff] %v5240_v21  ;;  %v5238_v39 = vmax.f32 %v5206_v50, 0.0  ;;  %v5109_v1 = vmul.f32 %v9311_v13, %v5070_v34  ;;  %v5068_v42 = vadd.f32 %v4956_v26, %v9135_v62  ;;  %v4977_v28 = vadd.f32 %v6875_v10, %v6521_v35 }
 0x3ed   : > { %v5211_v18 = vadd.f32 %v5179_v19, %v5147_v38  ;;  %v5145_v25 = vadd.f32 %v9324_v59, %v5106_v57  ;;  %v4968_v60 = vpop.f32.mrf.mxu0  ;;  %v6524_v62 = vadd.f32 %v9285_v3, %v9280_v40  ;;  %v6533_v40 = vadd.f32 %v9328_v22, %v9315_v2  ;;  %v5183_v19 = vld [vmem:[%s7504_s16 + $0x50] sm:$0xff] }
 0x3ee   : > { %v9382_v47 = vpop.f32.mrf.mxu1  ;;  %5270 = vst [vmem:[%s9361_s24 + $0x8] sm:$0xff] %v5238_v39  ;;  %v5148_v14 = vadd.f32 %v9324_v59, %v5109_v1  ;;  %v5107_v20 = vmul.f32 %v9311_v13, %v5068_v42  ;;  %v5073_v31 = vadd.f32 %v4977_v28, %v9154_v12  ;;  %v4969_v5 = vadd.f32 %v6515_v49, %v4968_v60 }
 0x3ef   : > { %v5243_v15 = vmax.f32 %v5211_v18, 0.0  ;;  %v5209_v11 = vadd.f32 %v5177_v17, %v5145_v25  ;;  %v6876_v35 = vpop.f32.mrf.mxu0  ;;  %v6518_v12 = vadd.f32 %v9269_v48, %v9264_v53  ;;  %v5181_v53 = vld [vmem:[%s7504_s16 + $0x40] sm:$0xff]  ;;  %v6536_v25 = vadd.f32 %v9342_v45, %v9334_v55 }
 0x3f0   : > { %v9390_v8 = vpop.f32.mrf.mxu1  ;;  %v5212_v9 = vadd.f32 %v5180_v52, %v5148_v14  ;;  %v5146_v44 = vadd.f32 %v9324_v59, %v5107_v20  ;;  %v5112_v21 = vmul.f32 %v9311_v13, %v5073_v31  ;;  %v5071_v50 = vadd.f32 %v4969_v5, %v9144_v7  ;;  %v5184_v14 = vld [vmem:[%s7504_s16 + $0x58] sm:$0xff] }
 0x3f1   : > { %5275 = vst [vmem:[%s9361_s24 + $0x30] sm:$0xff] %v5243_v15  ;;  %v5241_v3 = vmax.f32 %v5209_v11, 0.0  ;;  %v4980_v34 = vadd.f32 %v6876_v35, %v6524_v62  ;;  %v4971_v26 = vpop.f32.mrf.mxu0  ;;  %v6527_v7 = vadd.f32 %v9293_v54, %v9288_v56  ;;  %v6530_v55 = vadd.f32 %v9305_v24, %v9298_v0  ;;  %v5182_v11 = vld [vmem:[%s7504_s16 + $0x48] sm:$0xff] }
 0x3f2   : > { %v6544_v23 = vpop.f32.mrf.mxu1  ;;  %v5244_v49 = vmax.f32 %v5212_v9, 0.0  ;;  %v5210_v38 = vadd.f32 %v5178_v36, %v5146_v44  ;;  %v5151_v57 = vadd.f32 %v9324_v59, %v5112_v21  ;;  %v5110_v39 = vmul.f32 %v9311_v13, %v5071_v50  ;;  %v5187_v50 = vld [vmem:[%s7504_s16 + $0x70] sm:$0xff] }
 0x3f3   : > { %5273 = vst [vmem:[%s9361_s24 + $0x20] sm:$0xff] %v5241_v3  ;;  %v5074_v48 = vadd.f32 %v4980_v34, %v9159_v32  ;;  %v4972_v2 = vadd.f32 %v6518_v12, %v4971_v26  ;;  %v6879_v22 = vpop.f32.mrf.mxu0 }
 0x3f4   : > { %v6546_v10 = vpop.f32.mrf.mxu1  ;;  %5276 = vst [vmem:[%s9361_s24 + $0x38] sm:$0xff] %v5244_v49  ;;  %v5242_v17 = vmax.f32 %v5210_v38, 0.0  ;;  %v5215_v1 = vadd.f32 %v5183_v19, %v5151_v57  ;;  %v5149_v42 = vadd.f32 %v9324_v59, %v5110_v39  ;;  %v4993_v18 = vadd.f32 %v6879_v22, %v6533_v40  ;;  %v5185_v49 = vld [vmem:[%s7504_s16 + $0x60] sm:$0xff] }
 0x3f5   : > { %v5113_v56 = vmul.f32 %v9311_v13, %v5074_v48  ;;  %v5072_v54 = vadd.f32 %v4972_v2, %v9149_v29  ;;  %v4984_v32 = vpop.f32.mrf.mxu0 }
 0x3f6   : > { %v6547_v28 = vpop.f32.mrf.mxu1  ;;  %5274 = vst [vmem:[%s9361_s24 + $0x28] sm:$0xff] %v5242_v17  ;;  %v5247_v52 = vmax.f32 %v5215_v1, 0.0  ;;  %v5213_v60 = vadd.f32 %v5181_v53, %v5149_v42  ;;  %v5077_v31 = vadd.f32 %v4993_v18, %v9176_v4  ;;  %v4985_v5 = vadd.f32 %v6527_v7, %v4984_v32 }
 0x3f7   : > { %v5152_v45 = vadd.f32 %v9324_v59, %v5113_v56  ;;  %v5111_v62 = vmul.f32 %v9311_v13, %v5072_v54  ;;  %v6880_v29 = vpop.f32.mrf.mxu0  ;;  %v6548_v2 = vadd.f32 %v6547_v28, %v6546_v10 }
 0x3f8   : > { %v9421_v20 = vpop.f32.mrf.mxu1  ;;  %5279 = vst [vmem:[%s9361_s24 + $0x50] sm:$0xff] %v5247_v52  ;;  %v5245_v15 = vmax.f32 %v5213_v60, 0.0  ;;  %v5116_v35 = vmul.f32 %v9311_v13, %v5077_v31  ;;  %v5075_v9 = vadd.f32 %v4985_v5, %v9164_v30  ;;  %v4996_v4 = vadd.f32 %v6880_v29, %v6536_v25  ;;  %v9647_v29 = vld [vmem:[#allocation14_spill] sm:$0xff] }
 0x3f9   : > { %v5216_v44 = vadd.f32 %v5184_v14, %v5152_v45  ;;  %v5150_v21 = vadd.f32 %v9324_v59, %v5111_v62  ;;  %v4987_v0 = vpop.f32.mrf.mxu0  ;;  %v6545_v30 = vadd.f32 %v6544_v23, %v9390_v8  ;;  %v5188_v23 = vld [vmem:[%s7504_s16 + $0x78] sm:$0xff]  ;;  %v5191_v45 = vld [vmem:[%s7504_s16 + $0x90] sm:$0xff] }
 0x3fa   : > { %v6550_v36 = vpop.f32.mrf.mxu1  ;;  %5277 = vst [vmem:[%s9361_s24 + $0x40] sm:$0xff] %v5245_v15  ;;  %v5155_v24 = vadd.f32 %v9324_v59, %v5116_v35  ;;  %v5114_v40 = vmul.f32 %v9311_v13, %v5075_v9  ;;  %v5078_v3 = vadd.f32 %v4996_v4, %v9183_v27  ;;  %v4988_v19 = vadd.f32 %v6530_v55, %v4987_v0 }
 0x3fb   : > { %v5248_v34 = vmax.f32 %v5216_v44, 0.0  ;;  %v5214_v26 = vadd.f32 %v5182_v11, %v5150_v21  ;;  %v6883_v38 = vpop.f32.mrf.mxu0  ;;  %v6539_v27 = vadd.f32 %v9365_v41, %v9352_v58  ;;  %v5186_v58 = vld [vmem:[%s7504_s16 + $0x68] sm:$0xff]  ;;  %v6551_v35 = vadd.f32 %v6550_v36, %v9421_v20  ;;  %v5189_v21 = vld [vmem:[%s7504_s16 + $0x80] sm:$0xff] }
 0x3fc   : > { %v9436_v12 = vpop.f32.mrf.mxu1  ;;  %v5219_v57 = vadd.f32 %v5187_v50, %v5155_v24  ;;  %v5153_v39 = vadd.f32 %v9324_v59, %v5114_v40  ;;  %v5117_v53 = vmul.f32 %v9311_v13, %v5078_v3  ;;  %v5076_v48 = vadd.f32 %v4988_v19, %v9169_v46  ;;  %v9648_v24 = vld [vmem:[#allocation13_spill] sm:$0xff] }
 0x3fd   : > { %5280 = vst [vmem:[%s9361_s24 + $0x58] sm:$0xff] %v5248_v34  ;;  %v5246_v8 = vmax.f32 %v5214_v26, 0.0  ;;  %v5009_v22 = vadd.f32 %v6883_v38, %v6545_v30  ;;  %v5000_v17 = vpop.f32.mrf.mxu0  ;;  %v6542_v46 = vadd.f32 %v9382_v47, %v9373_v51  ;;  %v5192_v34 = vld [vmem:[%s7504_s16 + $0x98] sm:$0xff] }
 0x3fe   : > { %v9443_v7 = vpop.f32.mrf.mxu1  ;;  %v5251_v1 = vmax.f32 %v5219_v57, 0.0  ;;  %v5217_v42 = vadd.f32 %v5185_v49, %v5153_v39  ;;  %v5156_v18 = vadd.f32 %v9324_v59, %v5117_v53  ;;  %v5115_v56 = vmul.f32 %v9311_v13, %v5076_v48 }
 0x3ff   : > { %5278 = vst [vmem:[%s9361_s24 + $0x48] sm:$0xff] %v5246_v8  ;;  %v5081_v41 = vadd.f32 %v5009_v22, %v9205_v33  ;;  %v5001_v10 = vadd.f32 %v6539_v27, %v5000_v17  ;;  %v6884_v28 = vpop.f32.mrf.mxu0  ;;  %v5190_v27 = vld [vmem:[%s7504_s16 + $0x88] sm:$0xff] }
 0x400   : > { %v6555_v25 = vpop.f32.mrf.mxu1  ;;  %5283 = vst [vmem:[%s9361_s24 + $0x70] sm:$0xff] %v5251_v1  ;;  %v5249_v54 = vmax.f32 %v5217_v42, 0.0  ;;  %v5220_v32 = vadd.f32 %v5188_v23, %v5156_v18  ;;  %v5154_v52 = vadd.f32 %v9324_v59, %v5115_v56  ;;  %v5012_v14 = vadd.f32 %v6884_v28, %v6548_v2  ;;  %v5195_v18 = vld [vmem:[%s7504_s16 + $0xb0] sm:$0xff] }
 0x401   : > { %v5120_v5 = vmul.f32 %v9311_v13, %v5081_v41  ;;  %v5079_v51 = vadd.f32 %v5001_v10, %v9190_v37  ;;  %v5003_v47 = vpop.f32.mrf.mxu0  ;;  %v6554_v42 = vadd.f32 %v9443_v7, %v9436_v12 }
 0x402   : > { %v6556_v60 = vpop.f32.mrf.mxu1  ;;  %5281 = vst [vmem:[%s9361_s24 + $0x60] sm:$0xff] %v5249_v54  ;;  %v5252_v33 = vmax.f32 %v5220_v32, 0.0  ;;  %v5218_v55 = vadd.f32 %v5186_v58, %v5154_v52  ;;  %v5082_v15 = vadd.f32 %v5012_v14, %v9647_v29  ;;  %v5004_v11 = vadd.f32 %v6542_v46, %v5003_v47  ;;  %v5193_v54 = vld [vmem:[%s7504_s16 + $0xa0] sm:$0xff]  ;;  %v9650_v47 = vld [vmem:[#allocation15_spill] sm:$0xff]  ;;  %v5196_v29 = vld [vmem:[%s7504_s16 + $0xb8] sm:$0xff] }
 0x403   : > { %v6557_v31 = vadd.f32 %v6556_v60, %v6555_v25  ;;  %v5159_v9 = vadd.f32 %v9324_v59, %v5120_v5  ;;  %v5118_v4 = vmul.f32 %v9311_v13, %v5079_v51  ;;  %v6887_v44 = vpop.f32.mrf.mxu0 }
 0x404   : > { %v6558_v62 = vpop.f32.mrf.mxu1  ;;  %5284 = vst [vmem:[%s9361_s24 + $0x78] sm:$0xff] %v5252_v33  ;;  %v5250_v37 = vmax.f32 %v5218_v55, 0.0  ;;  %v5121_v0 = vmul.f32 %v9311_v13, %v5082_v15  ;;  %v5080_v40 = vadd.f32 %v5004_v11, %v9648_v24 }
 0x405   : > { %v5025_v3 = vadd.f32 %v6887_v44, %v6557_v31  ;;  %v5223_v19 = vadd.f32 %v5191_v45, %v5159_v9  ;;  %v5157_v30 = vadd.f32 %v9324_v59, %v5118_v4  ;;  %v5016_v20 = vpop.f32.mrf.mxu0 }
 0x406   : > { %v6559_v50 = vpop.f32.mrf.mxu1  ;;  %5282 = vst [vmem:[%s9361_s24 + $0x68] sm:$0xff] %v5250_v37  ;;  %v5160_v36 = vadd.f32 %v9324_v59, %v5121_v0  ;;  %v5119_v49 = vmul.f32 %v9311_v13, %v5080_v40  ;;  %v5017_v57 = vadd.f32 %v6551_v35, %v5016_v20  ;;  %v9651_v0 = vld [vmem:[#allocation17_spill] sm:$0xff] }
 0x407   : > { %v5085_v38 = vadd.f32 %v5025_v3, %v9235_v63  ;;  %v5255_v39 = vmax.f32 %v5223_v19, 0.0  ;;  %v5221_v53 = vadd.f32 %v5189_v21, %v5157_v30  ;;  %v6560_v48 = vadd.f32 %v6559_v50, %v6558_v62  ;;  %v6888_v2 = vpop.f32.mrf.mxu0  ;;  %v5194_v21 = vld [vmem:[%s7504_s16 + $0xa8] sm:$0xff] }
 0x408   : > { %v6561_v26 = vpop.f32.mrf.mxu1  ;;  %v5224_v8 = vadd.f32 %v5192_v34, %v5160_v36  ;;  %v5158_v23 = vadd.f32 %v9324_v59, %v5119_v49  ;;  %v5083_v1 = vadd.f32 %v5017_v57, %v9220_v43  ;;  %v9649_v43 = vld [vmem:[#allocation16_spill] sm:$0xff]  ;;  %v5197_v57 = vld [vmem:[%s7504_s16 + $0xc0] sm:$0xff] }
 0x409   : > { %v5124_v17 = vmul.f32 %v9311_v13, %v5085_v38  ;;  %5287 = vst [vmem:[%s9361_s24 + $0x90] sm:$0xff] %v5255_v39  ;;  %v5253_v63 = vmax.f32 %v5221_v53, 0.0  ;;  %v5028_v25 = vadd.f32 %v6888_v2, %v6560_v48  ;;  %v5019_v56 = vpop.f32.mrf.mxu0 }
 0x40a   : > { %v6562_v22 = vpop.f32.mrf.mxu1  ;;  %v5256_v46 = vmax.f32 %v5224_v8, 0.0  ;;  %v5222_v58 = vadd.f32 %v5190_v27, %v5158_v23  ;;  %v5122_v28 = vmul.f32 %v9311_v13, %v5083_v1  ;;  %v5020_v12 = vadd.f32 %v6554_v42, %v5019_v56  ;;  %v9652_v27 = vld [vmem:[#allocation18_spill] sm:$0xff]  ;;  %v9653_v23 = vld [vmem:[#allocation19_spill] sm:$0xff] }
 0x40b   : > { %v5163_v41 = vadd.f32 %v9324_v59, %v5124_v17  ;;  %5285 = vst [vmem:[%s9361_s24 + $0x80] sm:$0xff] %v5253_v63  ;;  %v5086_v32 = vadd.f32 %v5028_v25, %v9649_v43  ;;  %v6891_v7 = vpop.f32.mrf.mxu0  ;;  %v6563_v60 = vadd.f32 %v6562_v22, %v6561_v26 }
 0x40c   : > { %v6564_v10 = vpop.f32.mrf.mxu1  ;;  %5288 = vst [vmem:[%s9361_s24 + $0x98] sm:$0xff] %v5256_v46  ;;  %v5254_v52 = vmax.f32 %v5222_v58, 0.0  ;;  %v5161_v31 = vadd.f32 %v9324_v59, %v5122_v28  ;;  %v5084_v33 = vadd.f32 %v5020_v12, %v9650_v47  ;;  %v5198_v46 = vld [vmem:[%s7504_s16 + $0xc8] sm:$0xff]  ;;  %v5199_v58 = vld [vmem:[%s7504_s16 + $0xd0] sm:$0xff] }
 0x40d   : > { %v5227_v14 = vadd.f32 %v5195_v18, %v5163_v41  ;;  %v5125_v51 = vmul.f32 %v9311_v13, %v5086_v32  ;;  %v5032_v55 = vpop.f32.mrf.mxu0  ;;  %v9654_v32 = vld [vmem:[#allocation20_spill] sm:$0xff] }
 0x40e   : > { %v6565_v5 = vpop.f32.mrf.mxu1  ;;  %5286 = vst [vmem:[%s9361_s24 + $0x88] sm:$0xff] %v5254_v52  ;;  %v5225_v62 = vadd.f32 %v5193_v54, %v5161_v31  ;;  %v5033_v11 = vadd.f32 %v6563_v60, %v5032_v55  ;;  %v5123_v9 = vmul.f32 %v9311_v13, %v5084_v33 }
 0x40f   : > { %v5259_v45 = vmax.f32 %v5227_v14, 0.0  ;;  %v5164_v35 = vadd.f32 %v9324_v59, %v5125_v51  ;;  %v6892_v4 = vpop.f32.mrf.mxu0  ;;  %v6566_v37 = vadd.f32 %v6565_v5, %v6564_v10  ;;  %v5200_v51 = vld [vmem:[%s7504_s16 + $0xd8] sm:$0xff] }
 0x410   : > { %v6567_v15 = vpop.f32.mrf.mxu1  ;;  %v5257_v44 = vmax.f32 %v5225_v62, 0.0  ;;  %v5087_v24 = vadd.f32 %v5033_v11, %v9651_v0  ;;  %v5162_v3 = vadd.f32 %v9324_v59, %v5123_v9 }
 0x411   : > { %5291 = vst [vmem:[%s9361_s24 + $0xb0] sm:$0xff] %v5259_v45  ;;  %v5228_v40 = vadd.f32 %v5196_v29, %v5164_v35  ;;  %v5035_v30 = vpop.f32.mrf.mxu0  ;;  %v9655_v29 = vld [vmem:[#allocation21_spill] sm:$0xff] }
 0x412   : > { %v6568_v50 = vpop.f32.mrf.mxu1  ;;  %5289 = vst [vmem:[%s9361_s24 + $0xa0] sm:$0xff] %v5257_v44  ;;  %v5126_v20 = vmul.f32 %v9311_v13, %v5087_v24  ;;  %v5036_v36 = vadd.f32 %v6566_v37, %v5035_v30  ;;  %v5226_v49 = vadd.f32 %v5194_v21, %v5162_v3  ;;  %v5201_v37 = vld [vmem:[%s7504_s16 + $0xe0] sm:$0xff] }
 0x413   : > { %v6569_v19 = vadd.f32 %v6568_v50, %v6567_v15  ;;  %v5260_v26 = vmax.f32 %v5228_v40, 0.0  ;;  %v6895_v39 = vpop.f32.mrf.mxu0 }
 0x414   : > { %v6570_v34 = vpop.f32.mrf.mxu1  ;;  %v5165_v53 = vadd.f32 %v9324_v59, %v5126_v20  ;;  %v5088_v2 = vadd.f32 %v5036_v36, %v9652_v27  ;;  %v5258_v8 = vmax.f32 %v5226_v49, 0.0  ;;  %v5202_v20 = vld [vmem:[%s7504_s16 + $0xe8] sm:$0xff]  ;;  %v5203_v27 = vld [vmem:[%s7504_s16 + $0xf0] sm:$0xff] }
 0x415   : > { %v5041_v38 = vadd.f32 %v6891_v7, %v6569_v19  ;;  %5292 = vst [vmem:[%s9361_s24 + $0xb8] sm:$0xff] %v5260_v26  ;;  %v5048_v1 = vpop.f32.mrf.mxu0 }
 0x416   : > { %v6571_v48 = vpop.f32.mrf.mxu1  ;;  %v5229_v42 = vadd.f32 %v5197_v57, %v5165_v53  ;;  %v5127_v18 = vmul.f32 %v9311_v13, %v5088_v2  ;;  %5290 = vst [vmem:[%s9361_s24 + $0xa8] sm:$0xff] %v5258_v8 }
 0x417   : > { %v5089_v22 = vadd.f32 %v5041_v38, %v9653_v23  ;;  %v6572_v17 = vadd.f32 %v6571_v48, %v6570_v34  ;;  %v6896_v54 = vpop.f32.mrf.mxu0 }
 0x418   : > { %v6573_v63 = vpop.f32.mrf.mxu1  ;;  %v5261_v41 = vmax.f32 %v5229_v42, 0.0  ;;  %v5166_v10 = vadd.f32 %v9324_v59, %v5127_v18 }
 0x419   : > { %v5128_v25 = vmul.f32 %v9311_v13, %v5089_v22  ;;  %v5044_v56 = vadd.f32 %v6892_v4, %v6572_v17  ;;  %v5051_v55 = vpop.f32.mrf.mxu0  ;;  %v5204_v22 = vld [vmem:[%s7504_s16 + $0xf8] sm:$0xff]  ;;  %s5302_s16 = scalar_lea.sflag [#allocation5], %s7498_s14 }
 0x41a   : > { %v6574_v28 = vpop.f32.mrf.mxu1  ;;  %5293 = vst [vmem:[%s9361_s24 + $0xc0] sm:$0xff] %v5261_v41  ;;  %v5230_v52 = vadd.f32 %v5198_v46, %v5166_v10 }
 0x41b   : > { %v5167_v43 = vadd.f32 %v9324_v59, %v5128_v25  ;;  %v5090_v12 = vadd.f32 %v5044_v56, %v9654_v32  ;;  %v6575_v7 = vadd.f32 %v6574_v28, %v6573_v63 }
 0x41c   : > { %v6576_v60 = vpop.f32.mrf.mxu1  ;;  %v5262_v47 = vmax.f32 %v5230_v52, 0.0 }
 0x41d   : > { %v5231_v14 = vadd.f32 %v5199_v58, %v5167_v43  ;;  %v5129_v31 = vmul.f32 %v9311_v13, %v5090_v12  ;;  %v5049_v5 = vadd.f32 %v6575_v7, %v5048_v1 }
 0x41e   : > { %v6577_v33 = vpop.f32.mrf.mxu1  ;;  %5294 = vst [vmem:[%s9361_s24 + $0xc8] sm:$0xff] %v5262_v47 }
 0x41f   : > { %v5263_v45 = vmax.f32 %v5231_v14, 0.0  ;;  %v5168_v62 = vadd.f32 %v9324_v59, %v5129_v31  ;;  %v5091_v15 = vadd.f32 %v5049_v5, %v9655_v29  ;;  %v6578_v11 = vadd.f32 %v6577_v33, %v6576_v60 }
 0x420   : > { %v6579_v35 = vpop.f32.mrf.mxu1 }
 0x421   : > { %5295 = vst [vmem:[%s9361_s24 + $0xd0] sm:$0xff] %v5263_v45  ;;  %v5232_v9 = vadd.f32 %v5200_v51, %v5168_v62  ;;  %v5130_v4 = vmul.f32 %v9311_v13, %v5091_v15  ;;  %v5052_v44 = vadd.f32 %v6578_v11, %v5051_v55 }
 0x422   : > { %v6580_v21 = vpop.f32.mrf.mxu1 }
 0x423   : > { %v5264_v50 = vmax.f32 %v5232_v9, 0.0  ;;  %v5169_v0 = vadd.f32 %v9324_v59, %v5130_v4  ;;  %v5092_v24 = vadd.f32 %v5052_v44, %v9291_v61  ;;  %v6581_v40 = vadd.f32 %v6580_v21, %v6579_v35 }
 0x424   : > { %v6582_v3 = vpop.f32.mrf.mxu1 }
 0x425   : > { %5296 = vst [vmem:[%s9361_s24 + $0xd8] sm:$0xff] %v5264_v50  ;;  %v5233_v19 = vadd.f32 %v5201_v37, %v5169_v0  ;;  %v5131_v30 = vmul.f32 %v9311_v13, %v5092_v24  ;;  %v5057_v34 = vadd.f32 %v6895_v39, %v6581_v40 }
 0x426   : > { %v6583_v36 = vpop.f32.mrf.mxu1 }
 0x427   : > { %v5265_v26 = vmax.f32 %v5233_v19, 0.0  ;;  %v5170_v49 = vadd.f32 %v9324_v59, %v5131_v30  ;;  %v5093_v38 = vadd.f32 %v5057_v34, %v9301_v16  ;;  %v6584_v57 = vadd.f32 %v6583_v36, %v6582_v3 }
 0x429   : > { %5297 = vst [vmem:[%s9361_s24 + $0xe0] sm:$0xff] %v5265_v26  ;;  %v5234_v61 = vadd.f32 %v5202_v20, %v5170_v49  ;;  %v5132_v53 = vmul.f32 %v9311_v13, %v5093_v38  ;;  %v5060_v48 = vadd.f32 %v6896_v54, %v6584_v57 }
 0x42b   : > { %v5266_v2 = vmax.f32 %v5234_v61, 0.0  ;;  %v5171_v39 = vadd.f32 %v9324_v59, %v5132_v53  ;;  %v5094_v8 = vadd.f32 %v5060_v48, %v9318_v6 }
 0x42d   : > { %5298 = vst [vmem:[%s9361_s24 + $0xe8] sm:$0xff] %v5266_v2  ;;  %v5235_v23 = vadd.f32 %v5203_v27, %v5171_v39  ;;  %v5133_v16 = vmul.f32 %v9311_v13, %v5094_v8 }
 0x42f   : > { %v5267_v17 = vmax.f32 %v5235_v23, 0.0  ;;  %v5172_v1 = vadd.f32 %v9324_v59, %v5133_v16 }
 0x431   : > { %5299 = vst [vmem:[%s9361_s24 + $0xf0] sm:$0xff] %v5267_v17  ;;  %v5236_v42 = vadd.f32 %v5204_v22, %v5172_v1 }
 0x433   : > { %v5268_v6 = vmax.f32 %v5236_v42, 0.0 }
 0x435   : > { %5300 = vst [vmem:[%s9361_s24 + $0xf8] sm:$0xff] %v5268_v6 }
 0x436   : > { %7270 = shalt.err (!%p7267_p5)
}
 0x437   : > { %s7271_s22 = scalar_lea.hbm %s9549_s11, 4096  ;;  %s7275_s18 = scalar_lea.hbm %s9603_s8, 8192 }
 0x438   : > { %p7272_p9 = scmp.ne.s32.totalorder %s9549_s11, %s7271_s22  ;;  %p7276_p6 = scmp.lt.s32.totalorder %s9549_s11, %s9603_s8 }
 0x439   : > { %p7277_p8 = scmp.lt.s32.totalorder %s7275_s18, %s7271_s22 }
 0x43a   : > { %p7273_p1 = pnand %p7272_p9, %p9656_p7 }
 0x43b   : > { %p7278_p3 = por %p7277_p8, %p7276_p6 }
 0x43c   : > { %p7274_p4 = pneg %p7273_p1 }
 0x43e   : > { %p7279_p11 = pnand %p7278_p3, %p7274_p4 }
 0x440   : > { %7282 = shalt.err (!%p7279_p11)
}
 0x441   : > { %s7335_s20 = smov 128   ;;  %s7336_s10 = smov 8  }
 0x442   : > { %6904 = dma.vmem_to_hbm [thread:$0]  (%p9656_p7), %s9551_s19, 4096, %s9549_s11, %s5302_s16, %s7335_s20, %s7335_s20, %s7336_s10  }
 0x443 PF: > { %s5330_s15 = sand.u32 1, %s7313_s27   ;;  %p9657_p12 = scmp.ne.s32.totalorder %s9618_s12, 0 }
 0x444   : > { %p9658_p10 = scmp.ge.s32.totalorder %s7325_s30, 2  ;;  %s5331_s9 = scalar_lea.sflag [#allocation5], %s5330_s15 }
 0x446   : > { %p6915_p2 = pnand %p9658_p10, %p9657_p12 }
 0x448   : > { %p6916_p13 = pneg %p6915_p2 }
 0x44a   : > { %7308 = dma.done.wait (%p6916_p13), %s5331_s9, 4096  }
 0x44b   : > { %7310 = vsyncadd (%p6916_p13), %s5331_s9, 4294963200  ;;  %s9659_s30 = sld [smem:[#allocation12_spill]]  ;;  %s9660_s27 = smov %s7317_s28 }
 0x44c   : > { %s9661_s28 = smov %s7321_s29  ;;  %s9662_s29 = smov %s7453_s25 }
 0x451   : > { %p22_p0 = scmp.ge.s32.totalorder %s9659_s30, 4  }
 0x453   :  { %24 = sbr.rel (!%p22_p0) target bundleno = 8 (0x8), region = 110 }
 0x458   :  { %5336 = vsyncpa [#allocation4], 1 }
 0x459   :  { %5338 = vsyncpa [#allocation4 + $0x1], 1 }
 0x45a   :  { %5339 = vsyncpa [#allocation7], 1 }
 0x45b   :  { %5340 = vsyncpa [#allocation5], 1 }
 0x45c   :  { %5342 = vsyncpa [#allocation5 + $0x1], 1 }

// kernel: tpu_custom_call.1
= control target key start
LH: loop header
LB: loop body
LE: loop exit
PB: predicated region body
PF: predicated region fallthrough
CT: control target
= control target key end

     0   :  { %s9595_s0 = inlined_call_operand.vmem [shape: bf16[2,18,18,128], index: 0, kind: input, shape index: {}]   ;;  %s9596_s1 = inlined_call_operand.hbm [shape: f32[2,16,16,128], index: 1, kind: input, shape index: {}]   ;;  %s9597_s2 = inlined_call_operand.vmem [shape: bf16[3,384,128], index: 2, kind: input, shape index: {}]   ;;  %s9598_s3 = inlined_call_operand.vmem [shape: f32[1,128], index: 3, kind: input, shape index: {}]   ;;  %s9599_s4 = inlined_call_operand.vmem [shape: f32[1,128], index: 4, kind: input, shape index: {}]   ;;  %s9600_s5 = inlined_call_operand.hbm [shape: bf16[3,384,128], index: 5, kind: input, shape index: {}]   ;;  %s9601_s6 = inlined_call_operand.vmem [shape: f32[1,128], index: 6, kind: input, shape index: {}]   ;;  %s9602_s7 = inlined_call_operand.vmem [shape: f32[1,128], index: 7, kind: input, shape index: {}]   ;;  %s9603_s8 = inlined_call_operand.hbm [shape: f32[2,16,16,128], index: 8, kind: output, shape index: {}]  }
   0x1   :  { %9616 = sst [smem:[#allocation22_spill]] %s9600_s5 }
   0x2   :  { %13 = vsyncpa [#allocation4], 0 }
   0x3   :  { %15 = vsyncpa [#allocation4 + $0x1], 0 }
   0x4   :  { %16 = vsyncpa [#allocation7], 0 }
   0x5   :  { %17 = vsyncpa [#allocation5], 0 }
   0x6   :  { %19 = vsyncpa [#allocation5 + $0x1], 0  ;;  %s7382_s27 = smov 0   ;;  %s7384_s28 = smov 0  }
   0x7   :  { %s7386_s29 = smov 0   ;;  %s7388_s30 = smov 0  }
   0x8 LB: > { %s7403_s9 = sadd.s32 4294967295, %s7325_s30   ;;  %s5410_s10 = sadd.s32 4294967294, %s7325_s30   ;;  %s7325_s30 = sphi %s7388_s30, %s9659_s30   ;;  %s7321_s29 = sphi %s7386_s29, %s9662_s29   ;;  %s7317_s28 = sphi %s7384_s28, %s9661_s28   ;;  %s7313_s27 = sphi %s7382_s27, %s9660_s27  }
   0x9   : > { %p71_p0 = scmp.ne.s32.totalorder %s7317_s28, %s7313_s27  ;;  %p9606_p1 = scmp.eq.s32.totalorder %s7403_s9, 0 }
   0xa   : > { %p227_p3 = scmp.eq.s32.totalorder %s5410_s10, 1  ;;  %p5411_p5 = scmp.ge.s32.totalorder %s7325_s30, 1 }
   0xb   : > { %p7412_p4 = por %p9606_p1, %p71_p0  ;;  %p234_p7 = scmp.lt.s32.totalorder %s7325_s30, 3 }
   0xc   : > { %p7417_p6 = por %p227_p3, %p71_p0  ;;  %s7327_s14 = smov [#allocation6]  }
   0xd   : > { %s9617_s11 = scalar_select %p7412_p4, 1, 0 }
   0xe   : > { %s9618_s12 = scalar_select %p7417_p6, 1, 0 }
   0xf   : > { %p7422_p8 = pnand %p5411_p5, %p234_p7  ;;  %s255_s15 = sshll.u32 %s7327_s14, 4  ;;  %s256_s15 = int_to_ptr.vmem [resolvable:$true] %s255_s15 }
  0x10   : > { %s7436_s17 = sadd.s32 1, %s7325_s30   ;;  %s58_s18 = sadd.s32 1, %s7321_s29 }
  0x11   : > { %s9619_s13 = scalar_select %p7422_p8, 1, 0 }
  0x12   : > { %p6906_p9 = pneg %p7422_p8  ;;  %9621 = sst [smem:[#allocation12_spill]] %s7436_s17 }
  0x13   : > { %s55_s19 = ssub.s32 %s7325_s30, %s7436_s17  ;;  %s7214_s20 = scalar_lea.vmem %s256_s15, 9216 }
  0x14   : > { %p7431_p11 = pnand %p6906_p9, %p9606_p1  ;;  %p7215_p13 = scmp.ne.s32.totalorder %s256_s15, %s7214_s20 }
  0x15   : > { %p7222_p5 = scmp.lt.s32.totalorder %s256_s15, %s256_s15  ;;  %p7223_p7 = scmp.lt.s32.totalorder %s7214_s20, %s7214_s20 }
  0x16   : > { %p7205_p12 = pneg %p7431_p11 }
  0x17   : > { %p7224_p10 = por %p7223_p7, %p7222_p5 }
  0x18   : > { %p7217_p0 = pnand %p7215_p13, %p7205_p12 }
  0x1a   : > { %p7218_p3 = pneg %p7217_p0 }
  0x1c   : > { %p7225_p2 = pnand %p7224_p10, %p7218_p3 }
  0x1e   : > { %7228 = shalt.err (!%p7225_p2)
}
  0x1f   : > { %s7328_s21 = smov 64   ;;  %s7329_s22 = smov 4  }
  0x20   : > { %s9622_s5 = sld [smem:[#allocation22_spill]]  ;;  %p56_p9 = scmp.eq.s32.totalorder %s55_s19, 0 }
  0x21   : > { %p65_p12 = scmp.ne.s32.totalorder %s7321_s29, %s7317_s28  ;;  %p66_p10 = scmp.eq.s32.totalorder %s7325_s30, 0 }
  0x22   : > { %p6919_p2 = scmp.lt.s32.totalorder %s7325_s30, 2  ;;  %p9623_p0 = scmp.eq.s32.totalorder %s7403_s9, 1 }
  0x23   : > { %s7453_s25 = scalar_select %p56_p9, %s7321_s29, %s58_s18  }
  0x24   : > { %p67_p13 = por %p66_p10, %p65_p12  ;;  %p7457_p3 = por %p9623_p0, %p65_p12 }
  0x25   : > { %s283_s10 = sand.u32 1, %s7321_s29   ;;  %s5791_s14 = sshll.u32 %s7325_s30, 12 }
  0x26   : > { %6909 = dma.hbm_to_vmem [thread:$0]  (!%p7431_p11), %s9622_s5, 9216, %s256_s15, [#allocation7], %s7328_s21, %s7328_s21, %s7329_s22  }
  0x27   : > { %s9624_s26 = scalar_select %p7457_p3, 1, 0 }
  0x28   : > { %s5414_s20 = sshll.u32 %s283_s10, 8  ;;  %s7466_s23 = scalar_lea.hbm %s9596_s1, %s5791_s14 }
  0x29   : > { %s287_s15 = scalar_lea.vmem [#allocation3], %s5414_s20  ;;  %p7468_p11 = pnand %p6919_p2, %p67_p13 }
  0x2a   : > { %s294_s18 = sshll.u32 %s287_s15, 4  ;;  %s7474_s21 = scalar_lea.sflag [#allocation4], %s283_s10  ;;  %s7472_s18 = int_to_ptr.vmem [resolvable:$true] %s294_s18 }
  0x2b   : > { %s7229_s22 = scalar_lea.hbm %s7466_s23, 4096  ;;  %p7231_p7 = pneg %p7468_p11 }
  0x2c   : > { %p7230_p5 = scmp.ne.s32.totalorder %s7466_s23, %s7229_s22  ;;  %s7234_s14 = scalar_lea.hbm %s9596_s1, 8192 }
  0x2d   : > { %p7235_p10 = scmp.lt.s32.totalorder %s7466_s23, %s9596_s1  ;;  %p7236_p2 = scmp.lt.s32.totalorder %s7234_s14, %s7229_s22 }
  0x2e   : > { %p7232_p9 = pnand %p7231_p7, %p7230_p5 }
  0x2f   : > { %p7237_p13 = por %p7236_p2, %p7235_p10 }
  0x30   : > { %p7233_p12 = pneg %p7232_p9 }
  0x32   : > { %p7238_p0 = pnand %p7237_p13, %p7233_p12 }
  0x34   : > { %7241 = shalt.err (!%p7238_p0)
}
  0x35   : > { %s7242_s10 = scalar_lea.vmem %s7472_s18, 4096  ;;  %s7330_s15 = smov [#allocation3]  }
  0x36   : > { %p7243_p1 = scmp.ne.s32.totalorder %s7472_s18, %s7242_s10  ;;  %s7247_s5 = sshll.u32 %s7330_s15, 4  ;;  %s7248_s5 = int_to_ptr.vmem [resolvable:$false] %s7247_s5 }
  0x37   : > { %s7249_s17 = scalar_lea.vmem %s7248_s5, 8192  ;;  %p7250_p9 = scmp.lt.s32.totalorder %s7472_s18, %s7248_s5 }
  0x38   : > { %p7245_p6 = pnand %p7243_p1, %p7231_p7  ;;  %p7251_p3 = scmp.lt.s32.totalorder %s7249_s17, %s7242_s10 }
  0x3a   : > { %p7246_p5 = pneg %p7245_p6  ;;  %p7252_p4 = por %p7251_p3, %p7250_p9 }
  0x3c   : > { %p7253_p8 = pnand %p7252_p4, %p7246_p5 }
  0x3e   : > { %7256 = shalt.err (!%p7253_p8)
}
  0x3f   : > { %s7331_s22 = smov 128   ;;  %s7332_s24 = smov 8  }
  0x40   : > { %6913 = dma.hbm_to_vmem [thread:$0]  (!%p7468_p11), %s7466_s23, 4096, %s7472_s18, %s7474_s21, %s7331_s22, %s7331_s22, %s7332_s24  }
  0x41   : > { %p9626_p1 = scmp.ne.s32.totalorder %s9619_s13, 0 }
  0x43   : > { %306 = sbr.rel (%p9626_p1) target bundleno = 1091 (0x443), region = 52 }
  0x48   : > { %s7498_s14 = sand.u32 1, %s7317_s28   ;;  %p9627_p4 = scmp.ne.s32.totalorder %s9617_s11, 0 }
  0x49   : > { %s5418_s5 = sshll.u32 %s7498_s14, 8  ;;  %s309_s20 = scalar_lea.sflag [#allocation4], %s7498_s14 }
  0x4a   : > { %s7504_s16 = scalar_lea.vmem [#allocation3], %s5418_s5 }
  0x4b   : > { %7300 = dma.done.wait (%p9627_p4), %s309_s20, 4096  }
  0x4c   : > { %7302 = vsyncadd (%p9627_p4), %s309_s20, 4294963200  ;;  %p9628_p6 = scmp.eq.s32.totalorder %s7403_s9, 0 }
  0x4e   : > { %7304 = dma.done.wait (%p9628_p6), [#allocation7], 9216   ;;  %p9629_p8 = pmov %p9628_p6 }
  0x4f   : > { %v6962_v0 = vld [vmem:[%s9597_s2 + $0x138] sm:$0xff]   ;;  %v6965_v3 = vld [vmem:[%s9597_s2 + $0x130] sm:$0xff]   ;;  %v6968_v6 = vld [vmem:[%s9597_s2 + $0x128] sm:$0xff]   ;;  %p354_p3 = scmp.lt.s32.totalorder %s7403_s9, 1  ;;  %vm565_vm0 = vsmask.f32 7424 }
  0x50   : > { %7306 = vsyncadd (%p9629_p8), [#allocation7], 4294958080  ;;  %v6963_v1 = vld [vmem:[%s9597_s2 + $0x178] sm:$0xff]   ;;  %5793 = vmatprep.subr.bf16.mxu0 %v6962_v0  ;;  %v6966_v4 = vld [vmem:[%s9597_s2 + $0x170] sm:$0xff]   ;;  %vm774_vm1 = vcmask 1046528   ;;  %vm2737_vm2 = vcmask 1040384  }
  0x51   : > { %v6964_v2 = vld [vmem:[%s9597_s2 + $0xf8] sm:$0xff]   ;;  %6609 = vmatprep.subr.bf16.mxu1 %v6963_v1  ;;  %v6967_v5 = vld [vmem:[%s9597_s2 + $0xf0] sm:$0xff]   ;;  %v6969_v7 = vld [vmem:[%s9597_s2 + $0x168] sm:$0xff]   ;;  %s355_s21 = scalar_select %p354_p3, %s7403_s9, 1  ;;  %vm2738_vm3 = vsmask.f32 256 }
  0x52   : > { %5794 = vmatpush3.bf16.msra.mxu0 %v6964_v2  ;;  %6610 = vmatpush3.bf16.msra.mxu1 %v6963_v1  ;;  %v6970_v8 = vld [vmem:[%s9597_s2 + $0xe8] sm:$0xff]   ;;  %v6971_v9 = vld [vmem:[%s9597_s2 + $0x120] sm:$0xff]   ;;  %v6974_v12 = vld [vmem:[%s9597_s2 + $0x118] sm:$0xff]   ;;  %p9656_p7 = scmp.ne.s32.totalorder %s9624_s26, 0 }
  0x53   : > { %5795 = vmatprep.subr.bf16.mxu0 %v6965_v3  ;;  %6611 = vmatprep.subr.bf16.mxu1 %v6966_v4  ;;  %v6972_v10 = vld [vmem:[%s9597_s2 + $0x160] sm:$0xff]   ;;  %v6975_v13 = vld [vmem:[%s9597_s2 + $0x158] sm:$0xff]   ;;  %v6977_v15 = vld [vmem:[%s9597_s2 + $0x110] sm:$0xff]   ;;  %s6897_s20 = smul.u32 216, %s355_s21 }
  0x54   : > { %v6973_v11 = vld [vmem:[%s9597_s2 + $0xe0] sm:$0xff]   ;;  %v6976_v14 = vld [vmem:[%s9597_s2 + $0xd8] sm:$0xff]   ;;  %v6978_v16 = vld [vmem:[%s9597_s2 + $0x150] sm:$0xff]  }
  0x55   : > { %v6979_v17 = vld [vmem:[%s9597_s2 + $0xd0] sm:$0xff]   ;;  %v6980_v18 = vld [vmem:[%s9597_s2 + $0x108] sm:$0xff]   ;;  %s7582_s24 = scalar_lea.vmem %s9595_s0, %s6897_s20  ;;  %v6983_v21 = vld [vmem:[%s9597_s2 + $0x100] sm:$0xff]  }
  0x56   : > { %5796 = vmatpush3.bf16.msra.mxu0 %v6967_v5  ;;  %6612 = vmatpush3.bf16.msra.mxu1 %v6966_v4  ;;  %v6981_v19 = vld [vmem:[%s9597_s2 + $0x148] sm:$0xff]   ;;  %v6984_v22 = vld [vmem:[%s9597_s2 + $0x140] sm:$0xff]   ;;  %v6987_v24 = vld [vmem:[%s7582_s24 + $0x14] ss:$0 sps:$4 sm:$0x11]  }
  0x57   : > { %5797 = vmatprep.subr.bf16.mxu0 %v6968_v6  ;;  %6613 = vmatprep.subr.bf16.mxu1 %v6969_v7  ;;  %v6982_v20 = vld [vmem:[%s9597_s2 + $0xc8] sm:$0xff]   ;;  %v6985_v25 = vld [vmem:[%s9597_s2 + $0xc0] sm:$0xff]   ;;  %v7598_v26 = vld [vmem:[%s7582_s24 + $0x18] sm:$0xff]   ;;  %v586_v29 = vshll.u32 %v6987_v24, 16  ;;  %v779_v31 = vrot.slane %v6987_v24, 1 }
  0x58   : > { %v7591_v23 = vld [vmem:[%s7582_s24 + $0xc] sm:$0xff]   ;;  %v6989_v32 = vld [vmem:[%s7582_s24 + $0x20] ss:$0 sps:$4 sm:$0x11]   ;;  %v781_v33 = vrot.slane %v7598_v26, 1  ;;  %v6990_v34 = vld [vmem:[%s9597_s2 + $0xb8] sm:$0xff]  }
  0x59   : > { %v579_v27 = vshrl.u32 %v7591_v23, 16  ;;  %v581_v28 = vshll.u32 %v7591_v23, 16  ;;  %v778_v30 = vrot.slane %v7591_v23, 1  ;;  %v588_v36 = vrot.slane %v586_v29, 1  ;;  %v6991_v39 = vld [vmem:[%s9597_s2 + $0x78] sm:$0xff]   ;;  %v7627_v49 = vld [vmem:[%s7582_s24 + $0x24] sm:$0xff]   ;;  %vm8460_vm4 = vmand %vm2737_vm2, %vm2738_vm3 }
  0x5a   : > { %5798 = vmatpush3.bf16.msra.mxu0 %v6970_v8  ;;  %6614 = vmatpush3.bf16.msra.mxu1 %v6969_v7  ;;  %v782_v38 = vrot.slane %v6989_v32, 1  ;;  %v6992_v41 = vld [vmem:[%s9597_s2 + $0x38] sm:$0xff]   ;;  %v591_v42 = vshrl.u32 %v7598_v26, 16  ;;  %v593_v43 = vshll.u32 %v7598_v26, 16  ;;  %v598_v44 = vshll.u32 %v6989_v32, 16  ;;  %v7635_v54 = vld [vmem:[%s7582_s24 + $0x30] sm:$0xff]  }
  0x5b   : > { %5799 = vmatprep.subr.bf16.mxu0 %v6971_v9  ;;  %6615 = vmatprep.subr.bf16.mxu1 %v6972_v10  ;;  %v583_v35 = vrot.slane %v581_v28, 1  ;;  %v7609_v37 = vsel %vm774_vm1, %v778_v30, %v779_v31  ;;  %v6994_v50 = vld [vmem:[%s7582_s24 + $0x2c] ss:$0 sps:$4 sm:$0x11]   ;;  %v784_v52 = vrot.slane %v7627_v49, 1  ;;  %v6997_v56 = vld [vmem:[%s9597_s2 + $0x70] sm:$0xff]  }
  0x5c   : > { %6625 = vmatprep.mubr.bf16.mxu1 %v7609_v37  ;;  %v7621_v45 = vsel %vm774_vm1, %v781_v33, %v782_v38  ;;  %v595_v47 = vrot.slane %v593_v43, 1  ;;  %v600_v48 = vrot.slane %v598_v44, 1  ;;  %v785_v53 = vrot.slane %v6994_v50, 1  ;;  %v6996_v55 = vld [vmem:[%s7582_s24 + $0x38] ss:$0 sps:$4 sm:$0x11]  }
  0x5d   : > { %v584_v40 = vor.u32 %v583_v35, %v579_v27  ;;  %v603_v57 = vshrl.u32 %v7627_v49, 16  ;;  %v787_v60 = vrot.slane %v7635_v54, 1  ;;  %v788_v61 = vrot.slane %v6996_v55, 1  ;;  %v6998_v62 = vld [vmem:[%s9597_s2 + $0x30] sm:$0xff]   ;;  %v7656_v1 = vld [vmem:[%s7582_s24 + $0x3c] sm:$0xff]   ;;  %v7664_v7 = vld [vmem:[%s7582_s24 + $0x48] sm:$0xff]  }
  0x5e   : > { %5800 = vmatpush3.bf16.msra.mxu0 %v6973_v11  ;;  %6616 = vmatpush3.bf16.msra.mxu1 %v6972_v10  ;;  %v596_v51 = vor.u32 %v595_v47, %v591_v42  ;;  %v7646_v59 = vsel %vm774_vm1, %v784_v52, %v785_v53  ;;  %v605_v63 = vshll.u32 %v7627_v49, 16  ;;  %v610_v0 = vshll.u32 %v6994_v50, 16  ;;  %v7000_v5 = vld [vmem:[%s7582_s24 + $0x44] ss:$0 sps:$4 sm:$0x11]   ;;  %v7733_v44 = vld [vmem:[%s7582_s24 + $0x78] sm:$0xff]  }
  0x5f   : > { %5801 = vmatprep.subr.bf16.mxu0 %v6974_v12  ;;  %6617 = vmatprep.subr.bf16.mxu1 %v6975_v13  ;;  %v7624_v46 = vsel %vm565_vm0, %v584_v40, %v588_v36  ;;  %v7659_v2 = vsel %vm774_vm1, %v787_v60, %v788_v61  ;;  %v790_v6 = vrot.slane %v7656_v1, 1  ;;  %v615_v8 = vshrl.u32 %v7635_v54, 16  ;;  %v7668_v11 = vld [vmem:[%s7582_s24 + $0x50] ss:$0 sps:$4 sm:$0x11]   ;;  %v7704_v31 = vld [vmem:[%s7582_s24 + $0x60] sm:$0xff]  }
  0x60   : > { %1138 = vmatprep.mubr.bf16.mxu0 %v7624_v46  ;;  %v7643_v58 = vsel %vm565_vm0, %v596_v51, %v600_v48  ;;  %v607_v3 = vrot.slane %v605_v63, 1  ;;  %v612_v4 = vrot.slane %v610_v0, 1  ;;  %v791_v10 = vrot.slane %v7000_v5, 1  ;;  %v7707_v32 = vld [vmem:[%s7582_s24 + $0x68] ss:$0 sps:$4 sm:$0x11]  }
  0x61   : > { %v793_v12 = vrot.slane %v7664_v7, 1  ;;  %v7010_v33 = vld [vmem:[%s9597_s2 + $0x60] sm:$0xff]   ;;  %v799_v36 = vrot.slane %v7704_v31, 1  ;;  %v800_v38 = vrot.slane %v7707_v32, 1  ;;  %v7726_v40 = vld [vmem:[%s7582_s24 + $0x6c] sm:$0xff]   ;;  %v629_v42 = vshll.u32 %v7656_v1, 16 }
  0x62   : > { %5802 = vmatpush3.bf16.msra.mxu0 %v6976_v14  ;;  %6618 = vmatpush3.bf16.msra.mxu1 %v6975_v13  ;;  %v608_v9 = vor.u32 %v607_v3, %v603_v57  ;;  %v7003_v13 = vld [vmem:[%s9597_s2 + $0xb0] sm:$0xff]   ;;  %v634_v43 = vshll.u32 %v7000_v5, 16  ;;  %v7016_v47 = vld [vmem:[%s9597_s2 + $0xa8] sm:$0xff]   ;;  %v802_v52 = vrot.slane %v7726_v40, 1  ;;  %v7017_v63 = vld [vmem:[%s9597_s2 + $0x58] sm:$0xff]   ;;  %v639_v3 = vshrl.u32 %v7664_v7, 16 }
  0x63   : > { %5803 = vmatprep.subr.bf16.mxu0 %v6977_v15  ;;  %6619 = vmatprep.subr.bf16.mxu1 %v6978_v16  ;;  %v7680_v15 = vsel %vm774_vm1, %v790_v6, %v791_v10  ;;  %v631_v48 = vrot.slane %v629_v42, 1  ;;  %v7739_v51 = vld [vmem:[%s7582_s24 + $0x74] ss:$0 sps:$4 sm:$0x11]   ;;  %v7743_v53 = vsel %vm774_vm1, %v799_v36, %v800_v38  ;;  %v7018_v0 = vld [vmem:[%s9597_s2 + $0x18] sm:$0xff]   ;;  %v646_v5 = vshll.u32 %v7668_v11, 16 }
  0x64   : > { %v7677_v14 = vsel %vm565_vm0, %v608_v9, %v612_v4  ;;  %v636_v50 = vrot.slane %v634_v43, 1  ;;  %v7747_v57 = vld [vmem:[%s7582_s24 + $0x80] ss:$0 sps:$4 sm:$0x11]   ;;  %v641_v4 = vshll.u32 %v7664_v7, 16 }
  0x65   : > { %v806_v6 = vrot.slane %v7747_v57, 1  ;;  %v648_v10 = vrot.slane %v646_v5, 1  ;;  %v7804_v38 = vld [vmem:[%s7582_s24 + $0x9c] sm:$0xff]   ;;  %v665_v5 = vshll.u32 %v7704_v31, 16 }
  0x66   : > { %5804 = vmatpush3.bf16.msra.mxu0 %v6979_v17  ;;  %6620 = vmatpush3.bf16.msra.mxu1 %v6978_v16  ;;  %v794_v16 = vrot.slane %v7668_v11, 1  ;;  %v7004_v17 = vld [vmem:[%s9597_s2 + $0x68] sm:$0xff]   ;;  %v643_v9 = vrot.slane %v641_v4, 1  ;;  %v7023_v11 = vld [vmem:[%s9597_s2 + $0x50] sm:$0xff]   ;;  %v663_v4 = vshrl.u32 %v7704_v31, 16 }
  0x67   : > { %5805 = vmatprep.subr.bf16.mxu0 %v6980_v18  ;;  %6621 = vmatprep.subr.bf16.mxu1 %v6981_v19  ;;  %v7005_v18 = vld [vmem:[%s9597_s2 + $0x28] sm:$0xff]  }
  0x68   : > { %v7700_v28 = vsel %vm774_vm1, %v793_v12, %v794_v16  ;;  %v7774_v12 = vld [vmem:[%s7582_s24 + $0x8c] ss:$0 sps:$4 sm:$0x11]  }
  0x6a   : > { %5806 = vmatpush3.bf16.msra.mxu0 %v6982_v20  ;;  %6622 = vmatpush3.bf16.msra.mxu1 %v6981_v19  ;;  %v617_v19 = vshll.u32 %v7635_v54, 16  ;;  %v622_v20 = vshll.u32 %v6996_v55, 16 }
  0x6b   : > { %5807 = vmatprep.subr.bf16.mxu0 %v6983_v21  ;;  %6623 = vmatprep.subr.bf16.mxu1 %v6984_v22  ;;  %v7693_v21 = vld [vmem:[%s7582_s24 + $0x54] sm:$0xff]  }
  0x6c   : > { %v624_v24 = vrot.slane %v622_v20, 1  ;;  %v796_v27 = vrot.slane %v7693_v21, 1 }
  0x6e   : > { %5808 = vmatpush3.bf16.msra.mxu0 %v6985_v25  ;;  %6624 = vmatpush3.bf16.msra.mxu1 %v6984_v22  ;;  %v619_v22 = vrot.slane %v617_v19, 1  ;;  %v7696_v25 = vld [vmem:[%s7582_s24 + $0x5c] ss:$0 sps:$4 sm:$0x11]  }
  0x6f   : > { %6657 = vmatprep.subr.bf16.mxu0 %v6990_v34  ;;  %5929 = vmatprep.subr.bf16.mxu1 %v6991_v39  ;;  %v797_v30 = vrot.slane %v7696_v25, 1  ;;  %v7011_v39 = vld [vmem:[%s9597_s2 + $0x20] sm:$0xff]   ;;  %v7785_v19 = vld [vmem:[%s7582_s24 + $0x98] ss:$0 sps:$4 sm:$0x11]   ;;  %v658_v36 = vshll.u32 %v7696_v25, 16 }
  0x70   : > { %v620_v29 = vor.u32 %v619_v22, %v615_v8  ;;  %v7771_v8 = vld [vmem:[%s7582_s24 + $0x84] sm:$0xff]   ;;  %v7024_v22 = vld [vmem:[%s9597_s2 + $0x10] sm:$0xff]   ;;  %v812_v42 = vrot.slane %v7785_v19, 1 }
  0x71   : > { %1139 = vmatmul.mubr.bf16.vlgmr.msra.gmra.mxu0 %v7591_v23  ;;  %6626 = vmatmul.mubr.bf16.vlgmr.msra.gmra.mxu1 %v7621_v45  ;;  %v7718_v35 = vsel %vm774_vm1, %v796_v27, %v797_v30  ;;  %v808_v16 = vrot.slane %v7771_v8, 1  ;;  %v660_v43 = vrot.slane %v658_v36, 1  ;;  %v7036_v36 = vld [vmem:[%s9597_s2 + $0x40] sm:$0xff]  }
  0x72   : > { %6658 = vmatpush3.bf16.msra.mxu0 %v6990_v34  ;;  %5930 = vmatpush3.bf16.msra.mxu1 %v6992_v41  ;;  %v7715_v34 = vsel %vm565_vm0, %v620_v29, %v624_v24  ;;  %v627_v41 = vshrl.u32 %v7656_v1, 16  ;;  %v651_v24 = vshrl.u32 %v7693_v21, 16 }
  0x73   : > { %1146 = vmatprep.mubr.bf16.mxu0 %v7643_v58  ;;  %6629 = vmatprep.mubr.bf16.mxu1 %v7646_v59 }
  0x74   : > { %5931 = vmatprep.subr.bf16.mxu1 %v6997_v56  ;;  %6659 = vmatprep.subr.bf16.mxu0 %v7003_v13  ;;  %v632_v55 = vor.u32 %v631_v48, %v627_v41  ;;  %v803_v56 = vrot.slane %v7739_v51, 1  ;;  %v7809_v41 = vld [vmem:[%s7582_s24 + $0xa4] ss:$0 sps:$4 sm:$0x11]   ;;  %v814_v48 = vrot.slane %v7804_v38, 1 }
  0x75   : > { %v815_v25 = vrot.slane %v7809_v41, 1 }
  0x76   : > { %5932 = vmatpush3.bf16.msra.mxu1 %v6998_v62  ;;  %6660 = vmatpush3.bf16.msra.mxu0 %v7003_v13  ;;  %v7750_v60 = vsel %vm565_vm0, %v632_v55, %v636_v50  ;;  %v7753_v61 = vsel %vm774_vm1, %v802_v52, %v803_v56  ;;  %v805_v62 = vrot.slane %v7733_v44, 1  ;;  %v7777_v13 = vld [vmem:[%s7582_s24 + $0x90] sm:$0xff]   ;;  %v7817_v50 = vld [vmem:[%s7582_s24 + $0xa8] sm:$0xff]   ;;  %v7029_v55 = vld [vmem:[%s9597_s2 + $0xa0] sm:$0xff]  }
  0x77   : > { %5933 = vmatprep.subr.bf16.mxu1 %v7004_v17  ;;  %6661 = vmatprep.subr.bf16.mxu0 %v7016_v47  ;;  %v644_v17 = vor.u32 %v643_v9, %v639_v3  ;;  %v811_v30 = vrot.slane %v7777_v13, 1  ;;  %v7820_v52 = vld [vmem:[%s7582_s24 + $0xb0] ss:$0 sps:$4 sm:$0x11]   ;;  %v7030_v56 = vld [vmem:[%s9597_s2 + $0x48] sm:$0xff]   ;;  %v7838_v3 = vsel %vm774_vm1, %v814_v48, %v815_v25  ;;  %v7844_v9 = vld [vmem:[%s7582_s24 + $0xb4] sm:$0xff]  }
  0x78   : > { %v7788_v20 = vsel %vm774_vm1, %v805_v62, %v806_v6  ;;  %9630 = vst [vmem:[#allocation13_spill] sm:$0xff] %v7838_v3  ;;  %v670_v6 = vshll.u32 %v7707_v32, 16  ;;  %v818_v32 = vrot.slane %v7820_v52, 1  ;;  %v682_v25 = vshll.u32 %v7739_v51, 16  ;;  %v7041_v51 = vld [vmem:[%s9597_s2 + $0x238] sm:$0xff]  }
  0x79   : > { %1147 = vmatmul.mubr.bf16.gmra.mxu0 %v7598_v26  ;;  %6630 = vmatmul.mubr.bf16.gmra.mxu1 %v7659_v2  ;;  %v7795_v27 = vsel %vm565_vm0, %v644_v17, %v648_v10  ;;  %v7829_v62 = vsel %vm774_vm1, %v811_v30, %v812_v42  ;;  %v667_v10 = vrot.slane %v665_v5, 1  ;;  %v7858_v30 = vld [vmem:[%s7582_s24 + $0xc0] sm:$0xff]   ;;  %v675_v42 = vshrl.u32 %v7726_v40, 16  ;;  %v7039_v5 = vld [vmem:[%s7582_s24 + $0x8] ss:$0 sps:$4 sm:$0x11]  }
  0x7a   : > { %1154 = vmatprep.mubr.bf16.mxu0 %v7677_v14  ;;  %6633 = vmatprep.mubr.bf16.mxu1 %v7680_v15 }
  0x7b   : > { %5934 = vmatpush3.bf16.msra.mxu1 %v7005_v18  ;;  %6662 = vmatpush3.bf16.msra.mxu0 %v7016_v47  ;;  %v809_v18 = vrot.slane %v7774_v12, 1  ;;  %v668_v17 = vor.u32 %v667_v10, %v663_v4 }
  0x7c   : > { %5935 = vmatprep.subr.bf16.mxu1 %v7010_v33  ;;  %v653_v33 = vshll.u32 %v7693_v21, 16  ;;  %6663 = vmatprep.subr.bf16.mxu0 %v7029_v55 }
  0x7d   : > { %v7798_v29 = vsel %vm774_vm1, %v808_v16, %v809_v18  ;;  %v7849_v16 = vld [vmem:[%s7582_s24 + $0xbc] ss:$0 sps:$4 sm:$0x11]   ;;  %v672_v18 = vrot.slane %v670_v6, 1 }
  0x7f   : > { %5936 = vmatpush3.bf16.msra.mxu1 %v7011_v39  ;;  %v655_v39 = vrot.slane %v653_v33, 1  ;;  %6664 = vmatpush3.bf16.msra.mxu0 %v7029_v55  ;;  %v7861_v33 = vld [vmem:[%s7582_s24 + $0xc8] ss:$0 sps:$4 sm:$0x11]   ;;  %v7040_v55 = vld [vmem:[%s9597_s2 + $0x98] sm:$0xff]  }
  0x80   : > { %5937 = vmatprep.subr.bf16.mxu1 %v7017_v63  ;;  %6665 = vmatprep.subr.bf16.mxu0 %v7040_v55 }
  0x81   : > { %1155 = vmatmul.mubr.bf16.gmra.mxu0 %v7627_v49  ;;  %6634 = vmatmul.mubr.bf16.gmra.mxu1 %v7700_v28  ;;  %v656_v47 = vor.u32 %v655_v39, %v651_v24  ;;  %v821_v24 = vrot.slane %v7849_v16, 1  ;;  %v7037_v39 = vld [vmem:[%s9597_s2] sm:$0xff]  }
  0x82   : > { %1162 = vmatprep.mubr.bf16.mxu0 %v7715_v34  ;;  %6637 = vmatprep.mubr.bf16.mxu1 %v7718_v35 }
  0x83   : > { %5938 = vmatpush3.bf16.msra.mxu1 %v7018_v0  ;;  %v7832_v63 = vsel %vm565_vm0, %v656_v47, %v660_v43  ;;  %v7031_v0 = vld [vmem:[%s9597_s2 + $0x8] sm:$0xff]   ;;  %v677_v43 = vshll.u32 %v7726_v40, 16  ;;  %v7038_v47 = vld [vmem:[%s7582_s24] sm:$0xff]   ;;  %6666 = vmatpush3.bf16.msra.mxu0 %v7040_v55  ;;  %v694_v55 = vshll.u32 %v7747_v57, 16  ;;  %v701_v57 = vshll.u32 %v7771_v8, 16 }
  0x84   : > { %5939 = vmatprep.subr.bf16.mxu1 %v7023_v11  ;;  %v817_v11 = vrot.slane %v7817_v50, 1  ;;  %v567_v6 = vshrl.u32 %v7038_v47, 16  ;;  %v569_v10 = vshll.u32 %v7038_v47, 16 }
  0x85   : > { %v679_v4 = vrot.slane %v677_v43, 1  ;;  %v7042_v43 = vld [vmem:[%s9597_s2 + $0x90] sm:$0xff]  }
  0x86   : > { %v7873_v48 = vsel %vm774_vm1, %v817_v11, %v818_v32  ;;  %v574_v11 = vshll.u32 %v7039_v5, 16  ;;  %v909_v32 = vrot.slane %v7858_v30, 1  ;;  %6667 = vmatprep.subr.bf16.mxu0 %v7042_v43 }
  0x87   : > { %5940 = vmatpush3.bf16.msra.mxu1 %v7024_v22  ;;  %v820_v22 = vrot.slane %v7844_v9, 1  ;;  %9631 = vst [vmem:[#allocation14_spill] sm:$0xff] %v7873_v48  ;;  %6668 = vmatpush3.bf16.msra.mxu0 %v7042_v43  ;;  %v718_v43 = vshll.u32 %v7785_v19, 16 }
  0x88   : > { %5941 = vmatprep.subr.bf16.mxu1 %v7030_v56  ;;  %v7880_v56 = vsel %vm565_vm0, %v668_v17, %v672_v18  ;;  %v910_v17 = vrot.slane %v7861_v33, 1  ;;  %v571_v18 = vrot.slane %v569_v10, 1 }
  0x89   : > { %1163 = vmatmul.mubr.bf16.gmra.mxu0 %v7635_v54  ;;  %6638 = vmatmul.mubr.bf16.gmra.mxu1 %v7743_v53  ;;  %v720_v19 = vrot.slane %v718_v43, 1 }
  0x8a   : > { %1170 = vmatprep.mubr.bf16.mxu0 %v7750_v60  ;;  %6641 = vmatprep.mubr.bf16.mxu1 %v7753_v61 }
  0x8b   : > { %5942 = vmatpush3.bf16.msra.mxu1 %v7031_v0  ;;  %v7883_v0 = vsel %vm774_vm1, %v820_v22, %v821_v24  ;;  %v680_v22 = vor.u32 %v679_v4, %v675_v42  ;;  %v684_v24 = vrot.slane %v682_v25, 1  ;;  %v7044_v4 = vld [vmem:[%s9597_s2 + $0x88] sm:$0xff]  }
  0x8c   : > { %5943 = vmatprep.subr.bf16.mxu1 %v7036_v36  ;;  %9632 = vst [vmem:[#allocation15_spill] sm:$0xff] %v7883_v0  ;;  %v576_v36 = vrot.slane %v574_v11, 1  ;;  %v696_v11 = vrot.slane %v694_v55, 1  ;;  %6669 = vmatprep.subr.bf16.mxu0 %v7044_v4  ;;  %v7045_v55 = vld [vmem:[%s9597_s2 + $0x228] sm:$0xff]  }
  0x8d   : > { %v7904_v10 = vsel %vm565_vm0, %v680_v22, %v684_v24  ;;  %6670 = vmatpush3.bf16.msra.mxu0 %v7044_v4  ;;  %v703_v24 = vrot.slane %v701_v57, 1  ;;  %v737_v57 = vshll.u32 %v7817_v50, 16 }
  0x8f   : > { %5944 = vmatpush3.bf16.msra.mxu1 %v7037_v39  ;;  %v689_v39 = vshll.u32 %v7733_v44, 16 }
  0x90   : > { %6705 = vmatprep.subr.bf16.mxu1 %v7041_v51 }
  0x91   : > { %1171 = vmatmul.mubr.bf16.gmra.mxu0 %v7656_v1  ;;  %6642 = vmatmul.mubr.bf16.gmra.mxu1 %v7788_v20  ;;  %v691_v25 = vrot.slane %v689_v39, 1  ;;  %v713_v39 = vshll.u32 %v7777_v13, 16 }
  0x92   : > { %1178 = vmatprep.mubr.bf16.mxu0 %v7795_v27  ;;  %6645 = vmatprep.mubr.bf16.mxu1 %v7798_v29 }
  0x93   : > { %v715_v4 = vrot.slane %v713_v39, 1  ;;  %v897_v39 = vshrl.u32 %v7858_v30, 16 }
  0x99   : > { %1179 = vmatmul.mubr.bf16.gmra.mxu0 %v7664_v7  ;;  %6646 = vmatmul.mubr.bf16.gmra.mxu1 %v7829_v62 }
  0x9a   : > { %1186 = vmatprep.mubr.bf16.mxu0 %v7832_v63  ;;  %6649 = vmatprep.mubr.bf16.mxu1 %v7838_v3  ;;  %v687_v3 = vshrl.u32 %v7733_v44, 16 }
  0xa1   : > { %1187 = vmatmul.mubr.bf16.gmra.mxu0 %v7693_v21  ;;  %6650 = vmatmul.mubr.bf16.gmra.mxu1 %v7873_v48  ;;  %v572_v48 = vor.u32 %v571_v18, %v567_v6  ;;  %v7046_v6 = vld [vmem:[%s9597_s2 + $0x80] sm:$0xff]   ;;  %v776_v18 = vrot.slane %v7039_v5, 1 }
  0xa2   : > { %1194 = vmatprep.mubr.bf16.mxu0 %v7880_v56  ;;  %6653 = vmatprep.mubr.bf16.mxu1 %v7883_v0  ;;  %v7900_v0 = vsel %vm774_vm1, %v909_v32, %v910_v17  ;;  %v706_v32 = vshll.u32 %v7774_v12, 16  ;;  %v775_v17 = vrot.slane %v7038_v47, 1  ;;  %v7048_v12 = vld [vmem:[%s9597_s2 + $0x1f8] sm:$0xff]  }
  0xa3   : > { %v577_v42 = vsel %vm565_vm0, %v572_v48, %v576_v36  ;;  %v692_v48 = vor.u32 %v691_v25, %v687_v3  ;;  %6671 = vmatprep.subr.bf16.mxu0 %v7046_v6  ;;  %v7043_v3 = vld [vmem:[%s9597_s2 + $0x230] sm:$0xff]   ;;  %v725_v25 = vshll.u32 %v7804_v38, 16 }
  0xa4   : > { %6672 = vmatpush3.bf16.msra.mxu0 %v7046_v6  ;;  %v7927_v36 = vsel %vm774_vm1, %v775_v17, %v776_v18  ;;  %v708_v5 = vrot.slane %v706_v32, 1  ;;  %v742_v32 = vshll.u32 %v7820_v52, 16  ;;  %v749_v17 = vshll.u32 %v7844_v9, 16  ;;  %v7050_v52 = vld [vmem:[%s9597_s2 + $0x218] sm:$0xff]  }
  0xa5   : > { %v7921_v22 = vsel %vm565_vm0, %v692_v48, %v696_v11  ;;  %6065 = vmatprep.subr.bf16.mxu0 %v7048_v12  ;;  %v727_v6 = vrot.slane %v725_v25, 1  ;;  %v735_v48 = vshrl.u32 %v7817_v50, 16 }
  0xa6   : > { %v744_v12 = vrot.slane %v742_v32, 1  ;;  %v7059_v32 = vld [vmem:[%s9597_s2 + $0x198] sm:$0xff]  }
  0xa9   : > { %1195 = vmatmul.mubr.bf16.gmra.mxu0 %v7704_v31  ;;  %6654 = vmatmul.mubr.bf16.gmra.mxu1 %v7900_v0  ;;  %v699_v31 = vshrl.u32 %v7771_v8, 16 }
  0xaa   : > { %1202 = vmatprep.mubr.bf16.mxu0 %v7904_v10  ;;  %1604 = vmatprep.mubr.bf16.mxu1 %v577_v42 }
  0xab   : > { %v704_v42 = vor.u32 %v703_v24, %v699_v31  ;;  %v747_v31 = vshrl.u32 %v7844_v9, 16  ;;  %v754_v24 = vshll.u32 %v7849_v16, 16 }
  0xb1   : > { %1203 = vmatmul.mubr.bf16.gmra.mxu0 %v7726_v40  ;;  %1605 = vmatmul.mubr.bf16.vlgmr.msra.gmra.mxu1 %v7038_v47  ;;  %v730_v40 = vshll.u32 %v7809_v41, 16  ;;  %v711_v47 = vshrl.u32 %v7777_v13, 16  ;;  %v7047_v41 = vld [vmem:[%s9597_s2 + $0x220] sm:$0xff]  }
  0xb2   : > { %6706 = vmatpush3.bf16.msra.mxu1 %v7041_v51  ;;  %1210 = vmatprep.mubr.bf16.mxu0 %v7921_v22  ;;  %v723_v51 = vshrl.u32 %v7804_v38, 16 }
  0xb3   : > { %1612 = vmatprep.mubr.bf16.mxu1 %v7624_v46  ;;  %6707 = vmatprep.subr.bf16.mxu1 %v7043_v3  ;;  %v7945_v46 = vsel %vm565_vm0, %v704_v42, %v708_v5  ;;  %v732_v11 = vrot.slane %v730_v40, 1  ;;  %v716_v18 = vor.u32 %v715_v4, %v711_v47  ;;  %v751_v5 = vrot.slane %v749_v17, 1  ;;  %v7065_v47 = vld [vmem:[%s9597_s2 + $0x200] sm:$0xff]   ;;  %v8059_v17 = vld [vmem:[%s7582_s24 + $0x78] sm:$0xff]  }
  0xb4   : > { %v756_v42 = vrot.slane %v754_v24, 1  ;;  %v728_v40 = vor.u32 %v727_v6, %v723_v51  ;;  %v7063_v24 = vld [vmem:[%s9597_s2 + $0x1c8] sm:$0xff]  }
  0xb5   : > { %v7967_v43 = vsel %vm565_vm0, %v716_v18, %v720_v19  ;;  %v7062_v18 = vld [vmem:[%s9597_s2 + $0x190] sm:$0xff]  }
  0xb6   : > { %6708 = vmatpush3.bf16.msra.mxu1 %v7043_v3  ;;  %v739_v3 = vrot.slane %v737_v57, 1  ;;  %v7983_v4 = vsel %vm565_vm0, %v728_v40, %v732_v11  ;;  %v8040_v11 = vld [vmem:[%s7582_s24 + $0x6c] sm:$0xff]   ;;  %v7058_v57 = vld [vmem:[%s9597_s2 + $0x1d8] sm:$0xff]  }
  0xb7   : > { %6709 = vmatprep.subr.bf16.mxu1 %v7045_v55 }
  0xb9   : > { %1211 = vmatmul.mubr.bf16.gmra.mxu0 %v7733_v44  ;;  %1613 = vmatmul.mubr.bf16.gmra.mxu1 %v7591_v23  ;;  %v899_v44 = vshll.u32 %v7858_v30, 16  ;;  %v904_v23 = vshll.u32 %v7861_v33, 16  ;;  %v7055_v33 = vld [vmem:[%s9597_s2 + $0x210] sm:$0xff]  }
  0xba   : > { %1218 = vmatprep.mubr.bf16.mxu0 %v7945_v46  ;;  %1620 = vmatprep.mubr.bf16.mxu1 %v7643_v58 }
  0xbb   : > { %6710 = vmatpush3.bf16.msra.mxu1 %v7045_v55  ;;  %v901_v16 = vrot.slane %v899_v44, 1  ;;  %v906_v25 = vrot.slane %v904_v23, 1  ;;  %v7060_v55 = vld [vmem:[%s9597_s2 + $0x208] sm:$0xff]   ;;  %v7066_v23 = vld [vmem:[%s9597_s2 + $0x1c0] sm:$0xff]  }
  0xbc   : > { %6711 = vmatprep.subr.bf16.mxu1 %v7047_v41  ;;  %v7064_v44 = vld [vmem:[%s9597_s2 + $0x188] sm:$0xff]  }
  0xbd   : > { %v902_v6 = vor.u32 %v901_v16, %v897_v39 }
  0xbf   : > { %6712 = vmatpush3.bf16.msra.mxu1 %v7047_v41  ;;  %v7057_v41 = vld [vmem:[%s9597_s2 + $0x1a0] sm:$0xff]  }
  0xc0   : > { %6713 = vmatprep.subr.bf16.mxu1 %v7050_v52 }
  0xc1   : > { %1219 = vmatmul.mubr.bf16.gmra.mxu0 %v7771_v8  ;;  %1621 = vmatmul.mubr.bf16.gmra.mxu1 %v7598_v26  ;;  %v740_v26 = vor.u32 %v739_v3, %v735_v48  ;;  %v8021_v48 = vld [vmem:[%s7582_s24 + $0x60] sm:$0xff]   ;;  %v9635_v3 = vld [vmem:[#allocation15_spill] sm:$0xff] }
  0xc2   : > { %1226 = vmatprep.mubr.bf16.mxu0 %v7967_v43  ;;  %1628 = vmatprep.mubr.bf16.mxu1 %v7677_v14 }
  0xc3   : > { %6714 = vmatpush3.bf16.msra.mxu1 %v7050_v52  ;;  %v7990_v51 = vsel %vm565_vm0, %v740_v26, %v744_v12  ;;  %v7067_v52 = vld [vmem:[%s9597_s2 + $0x180] sm:$0xff]  }
  0xc4   : > { %6715 = vmatprep.subr.bf16.mxu1 %v7055_v33 }
  0xc7   : > { %6716 = vmatpush3.bf16.msra.mxu1 %v7055_v33 }
  0xc8   : > { %6717 = vmatprep.subr.bf16.mxu1 %v7060_v55 }
  0xc9   : > { %1227 = vmatmul.mubr.bf16.gmra.mxu0 %v7777_v13  ;;  %1629 = vmatmul.mubr.bf16.gmra.mxu1 %v7627_v49  ;;  %v752_v49 = vor.u32 %v751_v5, %v747_v31  ;;  %v7061_v31 = vld [vmem:[%s9597_s2 + $0x1d0] sm:$0xff]   ;;  %v7181_v5 = vld [vmem:[%s7582_s24 + $0x18] sm:$0xff]  }
  0xca   : > { %1234 = vmatprep.mubr.bf16.mxu0 %v7983_v4  ;;  %1636 = vmatprep.mubr.bf16.mxu1 %v7715_v34 }
  0xcb   : > { %6718 = vmatpush3.bf16.msra.mxu1 %v7060_v55  ;;  %v7997_v19 = vsel %vm565_vm0, %v752_v49, %v756_v42 }
  0xcc   : > { %6719 = vmatprep.subr.bf16.mxu1 %v7065_v47 }
  0xcf   : > { %6720 = vmatpush3.bf16.msra.mxu1 %v7065_v47  ;;  %v7182_v47 = vld [vmem:[%s7582_s24 + $0x24] sm:$0xff]  }
  0xd1   : > { %1235 = vmatmul.mubr.bf16.gmra.mxu0 %v7804_v38  ;;  %1637 = vmatmul.mubr.bf16.gmra.mxu1 %v7635_v54  ;;  %v8004_v54 = vsel %vm565_vm0, %v902_v6, %v906_v25 }
  0xd2   : > { %1242 = vmatprep.mubr.bf16.mxu0 %v7990_v51  ;;  %1644 = vmatprep.mubr.bf16.mxu1 %v7750_v60 }
  0xd9   : > { %1243 = vmatmul.mubr.bf16.gmra.mxu0 %v7817_v50  ;;  %1645 = vmatmul.mubr.bf16.gmra.mxu1 %v7656_v1  ;;  %v7049_v1 = vld [vmem:[%s9597_s2 + $0x1b8] sm:$0xff]  }
  0xda   : > { %1250 = vmatprep.mubr.bf16.mxu0 %v7997_v19  ;;  %1652 = vmatprep.mubr.bf16.mxu1 %v7795_v27 }
  0xe1   : > { %1251 = vmatmul.mubr.bf16.gmra.mxu0 %v7844_v9  ;;  %1653 = vmatmul.mubr.bf16.gmra.mxu1 %v7664_v7  ;;  %v7051_v7 = vld [vmem:[%s9597_s2 + $0x1f0] sm:$0xff]  }
  0xe2   : > { %1258 = vmatprep.mubr.bf16.mxu0 %v8004_v54  ;;  %1660 = vmatprep.mubr.bf16.mxu1 %v7832_v63 }
  0xe9   : > { %1259 = vmatmul.mubr.bf16.gmra.mxu0 %v7858_v30  ;;  %1661 = vmatmul.mubr.bf16.gmra.mxu1 %v7693_v21  ;;  %v7052_v21 = vld [vmem:[%s9597_s2 + $0x1b0] sm:$0xff]   ;;  %v7053_v30 = vld [vmem:[%s9597_s2 + $0x1e8] sm:$0xff]  }
  0xea   : > { %1668 = vmatprep.mubr.bf16.mxu1 %v7880_v56  ;;  %6673 = vmatprep.mubr.bf16.mxu0 %v7927_v36  ;;  %v7056_v36 = vld [vmem:[%s9597_s2 + $0x1e0] sm:$0xff]  }
  0xf1   : > { %1669 = vmatmul.mubr.bf16.gmra.mxu1 %v8021_v48  ;;  %6674 = vmatmul.mubr.bf16.vlgmr.msra.gmra.mxu0 %v7609_v37  ;;  %v7054_v37 = vld [vmem:[%s9597_s2 + $0x1a8] sm:$0xff]  }
  0xf2   : > { %6066 = vmatpush3.bf16.msra.mxu0 %v7049_v1  ;;  %1676 = vmatprep.mubr.bf16.mxu1 %v7904_v10 }
  0xf3   : > { %6677 = vmatprep.mubr.bf16.mxu0 %v7621_v45  ;;  %6067 = vmatprep.subr.bf16.mxu0 %v7051_v7 }
  0xf6   : > { %6068 = vmatpush3.bf16.msra.mxu0 %v7052_v21 }
  0xf7   : > { %6069 = vmatprep.subr.bf16.mxu0 %v7053_v30 }
  0xf9   : > { %1677 = vmatmul.mubr.bf16.gmra.mxu1 %v8040_v11  ;;  %6678 = vmatmul.mubr.bf16.gmra.mxu0 %v7646_v59 }
  0xfa   : > { %1684 = vmatprep.mubr.bf16.mxu1 %v7921_v22  ;;  %6681 = vmatprep.mubr.bf16.mxu0 %v7659_v2 }
  0xfb   : > { %6070 = vmatpush3.bf16.msra.mxu0 %v7054_v37 }
  0xfc   : > { %6071 = vmatprep.subr.bf16.mxu0 %v7056_v36 }
  0xff   : > { %6072 = vmatpush3.bf16.msra.mxu0 %v7057_v41 }
 0x100   : > { %6073 = vmatprep.subr.bf16.mxu0 %v7058_v57 }
 0x101   : > { %1685 = vmatmul.mubr.bf16.gmra.mxu1 %v8059_v17  ;;  %6682 = vmatmul.mubr.bf16.gmra.mxu0 %v7680_v15 }
 0x102   : > { %1692 = vmatprep.mubr.bf16.mxu1 %v7945_v46  ;;  %6685 = vmatprep.mubr.bf16.mxu0 %v7700_v28 }
 0x103   : > { %6074 = vmatpush3.bf16.msra.mxu0 %v7059_v32 }
 0x104   : > { %6075 = vmatprep.subr.bf16.mxu0 %v7061_v31 }
 0x107   : > { %6076 = vmatpush3.bf16.msra.mxu0 %v7062_v18 }
 0x108   : > { %6077 = vmatprep.subr.bf16.mxu0 %v7063_v24 }
 0x109   : > { %1693 = vmatmul.mubr.bf16.gmra.mxu1 %v7771_v8  ;;  %6686 = vmatmul.mubr.bf16.gmra.mxu0 %v7718_v35  ;;  %v9633_v8 = vld [vmem:[#allocation13_spill] sm:$0xff] }
 0x10a   : > { %1700 = vmatprep.mubr.bf16.mxu1 %v7967_v43  ;;  %6689 = vmatprep.mubr.bf16.mxu0 %v7743_v53 }
 0x10b   : > { %6078 = vmatpush3.bf16.msra.mxu0 %v7064_v44 }
 0x10c   : > { %6079 = vmatprep.subr.bf16.mxu0 %v7066_v23 }
 0x10f   : > { %6080 = vmatpush3.bf16.msra.mxu0 %v7067_v52 }
 0x111   : > { %1701 = vmatmul.mubr.bf16.gmra.mxu1 %v7777_v13  ;;  %6690 = vmatmul.mubr.bf16.gmra.mxu0 %v7753_v61  ;;  %v9634_v13 = vld [vmem:[#allocation14_spill] sm:$0xff] }
 0x112   : > { %1708 = vmatprep.mubr.bf16.mxu1 %v7983_v4  ;;  %6693 = vmatprep.mubr.bf16.mxu0 %v7788_v20 }
 0x119   : > { %1709 = vmatmul.mubr.bf16.gmra.mxu1 %v7804_v38  ;;  %6694 = vmatmul.mubr.bf16.gmra.mxu0 %v7798_v29 }
 0x11a   : > { %1716 = vmatprep.mubr.bf16.mxu1 %v7990_v51  ;;  %6697 = vmatprep.mubr.bf16.mxu0 %v7829_v62 }
 0x121   : > { %1717 = vmatmul.mubr.bf16.gmra.mxu1 %v7817_v50  ;;  %6698 = vmatmul.mubr.bf16.gmra.mxu0 %v9633_v8 }
 0x122   : > { %1724 = vmatprep.mubr.bf16.mxu1 %v7997_v19  ;;  %6701 = vmatprep.mubr.bf16.mxu0 %v9634_v13 }
 0x129   : > { %1725 = vmatmul.mubr.bf16.gmra.mxu1 %v7844_v9  ;;  %6702 = vmatmul.mubr.bf16.gmra.mxu0 %v9635_v3 }
 0x12a   : > { %2145 = vmatprep.mubr.bf16.mxu0 %v7643_v58  ;;  %6721 = vmatprep.mubr.bf16.mxu1 %v7621_v45 }
 0x131   : > { %v5809_v38 = vpop.f32.mrf.mxu0  ;;  %v6627_v12 = vpop.f32.mrf.mxu1  ;;  %2146 = vmatmul.mubr.bf16.vlgmr.msra.gmra.mxu0 %v7181_v5  ;;  %6722 = vmatmul.mubr.bf16.vlgmr.msra.gmra.mxu1 %v7646_v59 }
 0x132   : > { %2153 = vmatprep.mubr.bf16.mxu0 %v7677_v14  ;;  %6725 = vmatprep.mubr.bf16.mxu1 %v7659_v2 }
 0x133   : > { %v5810_v50 = vpop.f32.mrf.mxu0  ;;  %v1301_v39 = vpop.f32.mrf.mxu1 }
 0x134   : > { %v5811_v9 = vadd.f32 %v5810_v50, %v5809_v38 }
 0x135   : > { %v5812_v42 = vpop.f32.mrf.mxu0  ;;  %v6628_v16 = vpop.f32.mrf.mxu1 }
 0x136   : > { %v8104_v25 = vadd.f32 %v5811_v9, %v1301_v39 }
 0x137   : > { %v5813_v58 = vpop.f32.mrf.mxu0  ;;  %v1304_v45 = vpop.f32.mrf.mxu1 }
 0x138   : > { %v5814_v33 = vadd.f32 %v5813_v58, %v5812_v42 }
 0x139   : > { %v5815_v55 = vpop.f32.mrf.mxu0  ;;  %v6631_v40 = vpop.f32.mrf.mxu1  ;;  %2154 = vmatmul.mubr.bf16.gmra.mxu0 %v7182_v47  ;;  %6726 = vmatmul.mubr.bf16.gmra.mxu1 %v7680_v15  ;;  %v7183_v15 = vld [vmem:[%s7582_s24 + $0x30] sm:$0xff]  }
 0x13a   : > { %v8108_v59 = vadd.f32 %v5814_v33, %v1304_v45  ;;  %2161 = vmatprep.mubr.bf16.mxu0 %v7715_v34  ;;  %6729 = vmatprep.mubr.bf16.mxu1 %v7700_v28  ;;  %v7185_v33 = vld [vmem:[%s7582_s24 + $0x48] sm:$0xff]  }
 0x13b   : > { %v5816_v2 = vpop.f32.mrf.mxu0  ;;  %v1317_v14 = vpop.f32.mrf.mxu1 }
 0x13c   : > { %v5817_v26 = vadd.f32 %v5816_v2, %v5815_v55 }
 0x13d   : > { %v5818_v49 = vpop.f32.mrf.mxu0  ;;  %v6632_v6 = vpop.f32.mrf.mxu1 }
 0x13e   : > { %v8112_v1 = vadd.f32 %v6627_v12, %v5817_v26 }
 0x13f   : > { %v5819_v7 = vpop.f32.mrf.mxu0  ;;  %v1320_v21 = vpop.f32.mrf.mxu1 }
 0x140   : > { %v5820_v30 = vadd.f32 %v5819_v7, %v5818_v49 }
 0x141   : > { %v5821_v37 = vpop.f32.mrf.mxu0  ;;  %v8114_v36 = vpop.f32.mrf.mxu1  ;;  %2162 = vmatmul.mubr.bf16.gmra.mxu0 %v7183_v15  ;;  %6730 = vmatmul.mubr.bf16.gmra.mxu1 %v7718_v35  ;;  %v7184_v35 = vld [vmem:[%s7582_s24 + $0x3c] sm:$0xff]  }
 0x142   : > { %v8118_v34 = vadd.f32 %v6628_v16, %v5820_v30  ;;  %2169 = vmatprep.mubr.bf16.mxu0 %v7750_v60  ;;  %6733 = vmatprep.mubr.bf16.mxu1 %v7743_v53 }
 0x143   : > { %v5822_v28 = vpop.f32.mrf.mxu0  ;;  %v1333_v41 = vpop.f32.mrf.mxu1 }
 0x144   : > { %v5823_v57 = vadd.f32 %v5822_v28, %v5821_v37 }
 0x145   : > { %v5824_v32 = vpop.f32.mrf.mxu0  ;;  %v6636_v31 = vpop.f32.mrf.mxu1 }
 0x146   : > { %v8122_v18 = vadd.f32 %v5823_v57, %v1317_v14  ;;  %v8172_v57 = vld [vmem:[%s7582_s24 + $0xcc] sm:$0xff]  }
 0x147   : > { %v5825_v24 = vpop.f32.mrf.mxu0  ;;  %v1336_v44 = vpop.f32.mrf.mxu1 }
 0x148   : > { %v5826_v23 = vadd.f32 %v5825_v24, %v5824_v32  ;;  %v8175_v32 = vld [vmem:[%s7582_s24 + $0xd4] ss:$0 sps:$4 sm:$0x11]  }
 0x149   : > { %v5827_v52 = vpop.f32.mrf.mxu0  ;;  %v8124_v38 = vpop.f32.mrf.mxu1  ;;  %2170 = vmatmul.mubr.bf16.gmra.mxu0 %v7184_v35  ;;  %6734 = vmatmul.mubr.bf16.gmra.mxu1 %v7753_v61  ;;  %v7070_v35 = vld [vmem:[#allocation6 + $0x138] sm:$0xff]  }
 0x14a   : > { %v8128_v60 = vadd.f32 %v5826_v23, %v1320_v21  ;;  %2177 = vmatprep.mubr.bf16.mxu0 %v7795_v27  ;;  %6737 = vmatprep.mubr.bf16.mxu1 %v7788_v20 }
 0x14b   : > { %v5828_v53 = vpop.f32.mrf.mxu0  ;;  %v8132_v12 = vpop.f32.mrf.mxu1  ;;  %6201 = vmatprep.subr.bf16.mxu1 %v7070_v35 }
 0x14c   : > { %v5829_v5 = vadd.f32 %v5828_v53, %v5827_v52  ;;  %v1917_v52 = vrot.slane %v8175_v32, 1  ;;  %v7071_v53 = vld [vmem:[#allocation6 + $0xf8] sm:$0xff]  }
 0x14d   : > { %v5830_v50 = vpop.f32.mrf.mxu0  ;;  %v8134_v39 = vpop.f32.mrf.mxu1  ;;  %6202 = vmatpush3.bf16.msra.mxu1 %v7071_v53 }
 0x14e   : > { %v8136_v9 = vadd.f32 %v6631_v40, %v5829_v5 }
 0x14f   : > { %v5831_v42 = vpop.f32.mrf.mxu0  ;;  %v8138_v16 = vpop.f32.mrf.mxu1 }
 0x150   : > { %v5832_v58 = vadd.f32 %v5831_v42, %v5830_v50 }
 0x151   : > { %v5833_v61 = vpop.f32.mrf.mxu0  ;;  %v8140_v45 = vpop.f32.mrf.mxu1  ;;  %2178 = vmatmul.mubr.bf16.gmra.mxu0 %v7185_v33  ;;  %6738 = vmatmul.mubr.bf16.gmra.mxu1 %v7798_v29 }
 0x152   : > { %v8144_v20 = vadd.f32 %v6632_v6, %v5832_v58  ;;  %2185 = vmatprep.mubr.bf16.mxu0 %v7832_v63  ;;  %6741 = vmatprep.mubr.bf16.mxu1 %v7829_v62  ;;  %v7186_v63 = vld [vmem:[%s7582_s24 + $0x54] sm:$0xff]  }
 0x153   : > { %v5834_v27 = vpop.f32.mrf.mxu0  ;;  %v8148_v55 = vpop.f32.mrf.mxu1 }
 0x154   : > { %v5835_v40 = vadd.f32 %v5834_v27, %v5833_v61 }
 0x155   : > { %v5836_v47 = vpop.f32.mrf.mxu0  ;;  %v8150_v2 = vpop.f32.mrf.mxu1 }
 0x156   : > { %v8152_v14 = vadd.f32 %v5835_v40, %v1333_v41 }
 0x157   : > { %v5837_v26 = vpop.f32.mrf.mxu0  ;;  %v8154_v49 = vpop.f32.mrf.mxu1 }
 0x158   : > { %v5838_v29 = vadd.f32 %v5837_v26, %v5836_v47  ;;  %v7073_v47 = vld [vmem:[#allocation6 + $0x130] sm:$0xff]  }
 0x159   : > { %v5839_v6 = vpop.f32.mrf.mxu0  ;;  %v8156_v7 = vpop.f32.mrf.mxu1  ;;  %2186 = vmatmul.mubr.bf16.gmra.mxu0 %v7186_v63  ;;  %6742 = vmatmul.mubr.bf16.gmra.mxu1 %v9633_v8  ;;  %v7074_v26 = vld [vmem:[#allocation6 + $0xf0] sm:$0xff]  }
 0x15a   : > { %v8160_v62 = vadd.f32 %v5838_v29, %v1336_v44  ;;  %2193 = vmatprep.mubr.bf16.mxu0 %v7880_v56  ;;  %6745 = vmatprep.mubr.bf16.mxu1 %v9634_v13 }
 0x15b   : > { %v5840_v21 = vpop.f32.mrf.mxu0  ;;  %v8164_v30 = vpop.f32.mrf.mxu1  ;;  %6203 = vmatprep.subr.bf16.mxu1 %v7073_v47  ;;  %v7187_v47 = vld [vmem:[%s7582_s24 + $0x84] sm:$0xff]  }
 0x15c   : > { %v5841_v37 = vadd.f32 %v5840_v21, %v5839_v6  ;;  %6204 = vmatpush3.bf16.msra.mxu1 %v7074_v26 }
 0x15d   : > { %v5842_v15 = vpop.f32.mrf.mxu0  ;;  %v8166_v28 = vpop.f32.mrf.mxu1 }
 0x15e   : > { %v8169_v41 = vadd.f32 %v8114_v36, %v5841_v37  ;;  %v1916_v36 = vrot.slane %v8172_v57, 1 }
 0x15f   : > { %v5843_v8 = vpop.f32.mrf.mxu0  ;;  %v8177_v24 = vpop.f32.mrf.mxu1 }
 0x160   : > { %v5844_v56 = vadd.f32 %v5843_v8, %v5842_v15 }
 0x161   : > { %v5845_v44 = vpop.f32.mrf.mxu0  ;;  %v8179_v13 = vpop.f32.mrf.mxu1  ;;  %2194 = vmatmul.mubr.bf16.gmra.mxu0 %v8021_v48  ;;  %6746 = vmatmul.mubr.bf16.gmra.mxu1 %v9635_v3  ;;  %v7072_v48 = vld [vmem:[#allocation6 + $0x178] sm:$0xff]  }
 0x162   : > { %v8183_v23 = vadd.f32 %v6636_v31, %v5844_v56  ;;  %2201 = vmatprep.mubr.bf16.mxu0 %v7904_v10  ;;  %6749 = vmatprep.mubr.bf16.mxu1 %v7900_v0  ;;  %v1918_v0 = vsel %vm774_vm1, %v1916_v36, %v1917_v52 }
 0x163   : > { %v5846_v5 = vpop.f32.mrf.mxu0  ;;  %v8189_v50 = vpop.f32.mrf.mxu1  ;;  %6753 = vmatprep.subr.bf16.mxu0 %v7072_v48 }
 0x164   : > { %v5847_v42 = vadd.f32 %v5846_v5, %v5845_v44  ;;  %6754 = vmatpush3.bf16.msra.mxu0 %v7072_v48  ;;  %v7076_v5 = vld [vmem:[#allocation6 + $0xe8] sm:$0xff]  }
 0x165   : > { %v5848_v58 = vpop.f32.mrf.mxu0  ;;  %v8191_v3 = vpop.f32.mrf.mxu1 }
 0x166   : > { %v8194_v10 = vadd.f32 %v5847_v42, %v8132_v12 }
 0x167   : > { %v5849_v31 = vpop.f32.mrf.mxu0  ;;  %v8197_v61 = vpop.f32.mrf.mxu1 }
 0x168   : > { %v5850_v33 = vadd.f32 %v5849_v31, %v5848_v58 }
 0x169   : > { %v5851_v27 = vpop.f32.mrf.mxu0  ;;  %v8199_v40 = vpop.f32.mrf.mxu1  ;;  %2202 = vmatmul.mubr.bf16.gmra.mxu0 %v8040_v11  ;;  %6750 = vmatmul.mubr.bf16.gmra.mxu1 %v1918_v0 }
 0x16a   : > { %v8203_v29 = vadd.f32 %v5850_v33, %v8138_v16  ;;  %2209 = vmatprep.mubr.bf16.mxu0 %v7921_v22 }
 0x16b   : > { %v5852_v12 = vpop.f32.mrf.mxu0  ;;  %v8206_v6 = vpop.f32.mrf.mxu1 }
 0x16c   : > { %v5853_v63 = vadd.f32 %v5852_v12, %v5851_v27 }
 0x16d   : > { %v5854_v21 = vpop.f32.mrf.mxu0  ;;  %v8208_v37 = vpop.f32.mrf.mxu1 }
 0x16e   : > { %v8211_v15 = vadd.f32 %v8124_v38, %v5853_v63  ;;  %v7075_v38 = vld [vmem:[#allocation6 + $0x128] sm:$0xff]  }
 0x16f   : > { %v5855_v11 = vpop.f32.mrf.mxu0  ;;  %v8213_v8 = vpop.f32.mrf.mxu1  ;;  %6205 = vmatprep.subr.bf16.mxu1 %v7075_v38  ;;  %v7188_v38 = vld [vmem:[%s7582_s24 + $0x90] sm:$0xff]  }
 0x170   : > { %v5856_v56 = vadd.f32 %v5855_v11, %v5854_v21  ;;  %6206 = vmatpush3.bf16.msra.mxu1 %v7076_v5 }
 0x171   : > { %v5857_v16 = vpop.f32.mrf.mxu0  ;;  %v5945_v44 = vpop.f32.mrf.mxu1  ;;  %2210 = vmatmul.mubr.bf16.gmra.mxu0 %v8059_v17 }
 0x172   : > { %v8217_v22 = vadd.f32 %v8134_v39, %v5856_v56  ;;  %2217 = vmatprep.mubr.bf16.mxu0 %v7945_v46 }
 0x173   : > { %v5858_v36 = vpop.f32.mrf.mxu0  ;;  %v5946_v52 = vpop.f32.mrf.mxu1 }
 0x174   : > { %v5859_v35 = vadd.f32 %v5858_v36, %v5857_v16  ;;  %v5947_v53 = vadd.f32 %v5946_v52, %v5945_v44  ;;  %v7077_v44 = vld [vmem:[#allocation6 + $0x170] sm:$0xff]  }
 0x175   : > { %v5860_v42 = vpop.f32.mrf.mxu0  ;;  %v5948_v48 = vpop.f32.mrf.mxu1  ;;  %6755 = vmatprep.subr.bf16.mxu0 %v7077_v44 }
 0x176   : > { %v8221_v58 = vadd.f32 %v5859_v35, %v8148_v55  ;;  %v8224_v0 = vadd.f32 %v5947_v53, %v8104_v25  ;;  %6756 = vmatpush3.bf16.msra.mxu0 %v7077_v44 }
 0x177   : > { %v5861_v17 = vpop.f32.mrf.mxu0  ;;  %v5949_v39 = vpop.f32.mrf.mxu1 }
 0x178   : > { %v8226_v46 = vadd.f32 %v5861_v17, %v5860_v42  ;;  %v5950_v31 = vadd.f32 %v5949_v39, %v5948_v48 }
 0x179   : > { %v5863_v33 = vpop.f32.mrf.mxu0  ;;  %v5951_v27 = vpop.f32.mrf.mxu1  ;;  %2218 = vmatmul.mubr.bf16.gmra.mxu0 %v7187_v47 }
 0x17a   : > { %2225 = vmatprep.mubr.bf16.mxu0 %v7967_v43  ;;  %v8231_v26 = vadd.f32 %v5950_v31, %v8108_v59 }
 0x17b   : > { %v5864_v55 = vpop.f32.mrf.mxu0  ;;  %v5952_v25 = vpop.f32.mrf.mxu1 }
 0x17c   : > { %v5865_v12 = vadd.f32 %v5864_v55, %v5863_v33  ;;  %v5953_v63 = vadd.f32 %v5952_v25, %v5951_v27 }
 0x17d   : > { %v5866_v21 = vpop.f32.mrf.mxu0  ;;  %v5954_v11 = vpop.f32.mrf.mxu1 }
 0x17e   : > { %v8234_v56 = vadd.f32 %v8140_v45, %v5865_v12  ;;  %v8237_v16 = vadd.f32 %v5953_v63, %v8112_v1  ;;  %v7189_v12 = vld [vmem:[%s7582_s24 + $0x9c] sm:$0xff]  }
 0x17f   : > { %v5867_v36 = vpop.f32.mrf.mxu0  ;;  %v5955_v52 = vpop.f32.mrf.mxu1 }
 0x180   : > { %v5868_v43 = vadd.f32 %v5867_v36, %v5866_v21  ;;  %v5956_v35 = vadd.f32 %v5955_v52, %v5954_v11  ;;  %v7078_v21 = vld [vmem:[#allocation6 + $0x120] sm:$0xff]  }
 0x181   : > { %v5869_v59 = vpop.f32.mrf.mxu0  ;;  %v5957_v53 = vpop.f32.mrf.mxu1  ;;  %2226 = vmatmul.mubr.bf16.gmra.mxu0 %v7188_v38  ;;  %6207 = vmatprep.subr.bf16.mxu1 %v7078_v21 }
 0x182   : > { %v8241_v5 = vadd.f32 %v8150_v2, %v5868_v43  ;;  %2233 = vmatprep.mubr.bf16.mxu0 %v7983_v4  ;;  %v8245_v45 = vadd.f32 %v5956_v35, %v8118_v34 }
 0x183   : > { %v5870_v1 = vpop.f32.mrf.mxu0  ;;  %v5958_v42 = vpop.f32.mrf.mxu1 }
 0x184   : > { %v5871_v48 = vadd.f32 %v5870_v1, %v5869_v59  ;;  %v5959_v17 = vadd.f32 %v5958_v42, %v5957_v53  ;;  %v7085_v53 = vld [vmem:[#allocation6 + $0x160] sm:$0xff]   ;;  %v7081_v42 = vld [vmem:[#allocation6 + $0xd8] sm:$0xff]  }
 0x185   : > { %v5872_v39 = vpop.f32.mrf.mxu0  ;;  %v5960_v31 = vpop.f32.mrf.mxu1 }
 0x186   : > { %v8248_v33 = vadd.f32 %v5871_v48, %v8164_v30  ;;  %v8251_v27 = vadd.f32 %v5959_v17, %v8122_v18  ;;  %v7082_v30 = vld [vmem:[#allocation6 + $0x168] sm:$0xff]   ;;  %v7079_v18 = vld [vmem:[#allocation6 + $0xe0] sm:$0xff]  }
 0x187   : > { %v5873_v2 = vpop.f32.mrf.mxu0  ;;  %v5961_v47 = vpop.f32.mrf.mxu1  ;;  %6757 = vmatprep.subr.bf16.mxu0 %v7082_v30  ;;  %6208 = vmatpush3.bf16.msra.mxu1 %v7079_v18  ;;  %v7089_v18 = vld [vmem:[#allocation6 + $0x150] sm:$0xff]  }
 0x188   : > { %v8253_v4 = vadd.f32 %v5873_v2, %v5872_v39  ;;  %v5962_v34 = vadd.f32 %v5961_v47, %v5960_v31  ;;  %6758 = vmatpush3.bf16.msra.mxu0 %v7082_v30  ;;  %v7190_v2 = vld [vmem:[%s7582_s24 + $0xa8] sm:$0xff]   ;;  %v7088_v47 = vld [vmem:[#allocation6 + $0x158] sm:$0xff]  }
 0x189   : > { %v5875_v55 = vpop.f32.mrf.mxu0  ;;  %v5963_v25 = vpop.f32.mrf.mxu1  ;;  %2234 = vmatmul.mubr.bf16.gmra.mxu0 %v7189_v12  ;;  %6759 = vmatprep.subr.bf16.mxu0 %v7085_v53  ;;  %v7083_v12 = vld [vmem:[#allocation6 + $0x110] sm:$0xff]  }
 0x18a   : > { %2241 = vmatprep.mubr.bf16.mxu0 %v7990_v51  ;;  %v8258_v63 = vadd.f32 %v5962_v34, %v8128_v60  ;;  %v7080_v60 = vld [vmem:[#allocation6 + $0x118] sm:$0xff]  }
 0x18b   : > { %v5876_v11 = vpop.f32.mrf.mxu0  ;;  %v5964_v44 = vpop.f32.mrf.mxu1  ;;  %6209 = vmatprep.subr.bf16.mxu1 %v7080_v60  ;;  %v1911_v60 = vshll.u32 %v8175_v32, 16 }
 0x18c   : > { %v5877_v36 = vadd.f32 %v5876_v11, %v5875_v55  ;;  %v5965_v52 = vadd.f32 %v5964_v44, %v5963_v25  ;;  %6210 = vmatpush3.bf16.msra.mxu1 %v7081_v42  ;;  %6760 = vmatpush3.bf16.msra.mxu0 %v7085_v53  ;;  %v1906_v25 = vshll.u32 %v8172_v57, 16  ;;  %v7084_v11 = vld [vmem:[#allocation6 + $0xd0] sm:$0xff]   ;;  %v7086_v53 = vld [vmem:[#allocation6 + $0x108] sm:$0xff]  }
 0x18d   : > { %v5878_v43 = vpop.f32.mrf.mxu0  ;;  %v5966_v35 = vpop.f32.mrf.mxu1  ;;  %6761 = vmatprep.subr.bf16.mxu0 %v7088_v47  ;;  %6211 = vmatprep.subr.bf16.mxu1 %v7083_v12  ;;  %v1913_v32 = vrot.slane %v1911_v60, 1 }
 0x18e   : > { %v8261_v59 = vadd.f32 %v8156_v7, %v5877_v36  ;;  %v8264_v51 = vadd.f32 %v5965_v52, %v8136_v9 }
 0x18f   : > { %v5879_v38 = vpop.f32.mrf.mxu0  ;;  %v5967_v1 = vpop.f32.mrf.mxu1 }
 0x190   : > { %v5880_v48 = vadd.f32 %v5879_v38, %v5878_v43  ;;  %v5968_v17 = vadd.f32 %v5967_v1, %v5966_v35  ;;  %6212 = vmatpush3.bf16.msra.mxu1 %v7084_v11  ;;  %6762 = vmatpush3.bf16.msra.mxu0 %v7088_v47  ;;  %v1904_v43 = vshrl.u32 %v8172_v57, 16  ;;  %v1908_v35 = vrot.slane %v1906_v25, 1  ;;  %v7087_v1 = vld [vmem:[#allocation6 + $0xc8] sm:$0xff]   ;;  %v7090_v47 = vld [vmem:[#allocation6 + $0x100] sm:$0xff]  }
 0x191   : > { %v5881_v39 = vpop.f32.mrf.mxu0  ;;  %v5969_v31 = vpop.f32.mrf.mxu1  ;;  %2242 = vmatmul.mubr.bf16.gmra.mxu0 %v7190_v2  ;;  %6763 = vmatprep.subr.bf16.mxu0 %v7089_v18  ;;  %v7091_v25 = vld [vmem:[#allocation6 + $0xc0] sm:$0xff]  }
 0x192   : > { %v8268_v7 = vadd.f32 %v8166_v28, %v5880_v48  ;;  %2249 = vmatprep.mubr.bf16.mxu0 %v7997_v19  ;;  %v8272_v9 = vadd.f32 %v5968_v17, %v8144_v20  ;;  %v7191_v48 = vld [vmem:[%s7582_s24 + $0xb4] sm:$0xff]   ;;  %6213 = vmatprep.subr.bf16.mxu1 %v7086_v53  ;;  %v7092_v17 = vld [vmem:[#allocation6 + $0x148] sm:$0xff]   ;;  %v1909_v2 = vor.u32 %v1908_v35, %v1904_v43 }
 0x193   : > { %v5882_v34 = vpop.f32.mrf.mxu0  ;;  %v5970_v55 = vpop.f32.mrf.mxu1  ;;  %v7192_v53 = vld [vmem:[%s7582_s24 + $0xc0] sm:$0xff]   ;;  %s9361_s24 = scalar_lea.vmem [#allocation8], %s5418_s5  ;;  %s5792_s5 = sshll.u32 %s7403_s9, 12 }
 0x194   : > { %v5883_v21 = vadd.f32 %v5882_v34, %v5881_v39  ;;  %v5971_v30 = vadd.f32 %v5970_v55, %v5969_v31  ;;  %6214 = vmatpush3.bf16.msra.mxu1 %v7087_v1  ;;  %6764 = vmatpush3.bf16.msra.mxu0 %v7089_v18  ;;  %v1914_v18 = vsel %vm565_vm0, %v1909_v2, %v1913_v32  ;;  %s5315_s19 = sshll.u32 %s9361_s24, 4  ;;  %s9549_s11 = scalar_lea.hbm %s9603_s8, %s5792_s5  ;;  %s9551_s19 = int_to_ptr.vmem [resolvable:$true] %s5315_s19 }
 0x195   : > { %v8275_v44 = vpop.f32.mrf.mxu0  ;;  %v5972_v28 = vpop.f32.mrf.mxu1  ;;  %6765 = vmatprep.subr.bf16.mxu0 %v7092_v17  ;;  %6215 = vmatprep.subr.bf16.mxu1 %v7090_v47  ;;  %s7257_s15 = scalar_lea.vmem %s9551_s19, 4096  ;;  %s7334_s9 = smov [#allocation8]  }
 0x196   : > { %v8278_v19 = vadd.f32 %v5883_v21, %v8189_v50  ;;  %v8281_v20 = vadd.f32 %v5971_v30, %v8152_v14  ;;  %v7095_v30 = vld [vmem:[#allocation6 + $0x140] sm:$0xff]   ;;  %p7258_p11 = scmp.ne.s32.totalorder %s9551_s19, %s7257_s15  ;;  %s7261_s17 = sshll.u32 %s7334_s9, 4  ;;  %s7262_s17 = int_to_ptr.vmem [resolvable:$false] %s7261_s17 }
 0x197   : > { %v8283_v36 = vpop.f32.mrf.mxu0  ;;  %v5973_v52 = vpop.f32.mrf.mxu1  ;;  %s7263_s21 = scalar_lea.vmem %s7262_s17, 8192  ;;  %p7264_p2 = scmp.lt.s32.totalorder %s9551_s19, %s7262_s17 }
 0x198   : > { %v5974_v38 = vadd.f32 %v5973_v52, %v5972_v28  ;;  %6216 = vmatpush3.bf16.msra.mxu1 %v7091_v25  ;;  %6766 = vmatpush3.bf16.msra.mxu0 %v7092_v17  ;;  %p7259_p12 = pnand %p7258_p11, %p9656_p7  ;;  %p7265_p13 = scmp.lt.s32.totalorder %s7263_s21, %s7257_s15 }
 0x199   : > { %v5887_v50 = vpop.f32.mrf.mxu0  ;;  %v5975_v42 = vpop.f32.mrf.mxu1  ;;  %2250 = vmatmul.mubr.bf16.gmra.mxu0 %v7191_v48  ;;  %6767 = vmatprep.subr.bf16.mxu0 %v7095_v30 }
 0x19a   : > { %2257 = vmatprep.mubr.bf16.mxu0 %v8004_v54  ;;  %v8290_v14 = vadd.f32 %v5974_v38, %v8160_v62  ;;  %p7260_p10 = pneg %p7259_p12  ;;  %p7266_p0 = por %p7265_p13, %p7264_p2 }
 0x19b   : > { %v5888_v39 = vpop.f32.mrf.mxu0  ;;  %v5976_v31 = vpop.f32.mrf.mxu1 }
 0x19c   : > { %v5889_v34 = vadd.f32 %v5888_v39, %v5887_v50  ;;  %v5977_v55 = vadd.f32 %v5976_v31, %v5975_v42  ;;  %6768 = vmatpush3.bf16.msra.mxu0 %v7095_v30  ;;  %p7267_p5 = pnand %p7266_p0, %p7260_p10 }
 0x19d   : > { %v5890_v12 = vpop.f32.mrf.mxu0  ;;  %v5978_v21 = vpop.f32.mrf.mxu1 }
 0x19e   : > { %v8293_v54 = vadd.f32 %v8179_v13, %v5889_v34  ;;  %v8296_v62 = vadd.f32 %v5977_v55, %v8169_v41 }
 0x19f   : > { %v5891_v11 = vpop.f32.mrf.mxu0  ;;  %v5979_v28 = vpop.f32.mrf.mxu1 }
 0x1a0   : > { %v5892_v52 = vadd.f32 %v5891_v11, %v5890_v12  ;;  %v5980_v43 = vadd.f32 %v5979_v28, %v5978_v21 }
 0x1a1   : > { %v5893_v35 = vpop.f32.mrf.mxu0  ;;  %v5981_v60 = vpop.f32.mrf.mxu1  ;;  %2258 = vmatmul.mubr.bf16.gmra.mxu0 %v7192_v53 }
 0x1a2   : > { %v8301_v13 = vadd.f32 %v8191_v3, %v5892_v52  ;;  %2265 = vmatprep.mubr.bf16.mxu0 %v1914_v18  ;;  %v8304_v41 = vadd.f32 %v5980_v43, %v8183_v23 }
 0x1a3   : > { %v5894_v38 = vpop.f32.mrf.mxu0  ;;  %v5982_v1 = vpop.f32.mrf.mxu1 }
 0x1a4   : > { %v5895_v50 = vadd.f32 %v5894_v38, %v5893_v35  ;;  %v5983_v42 = vadd.f32 %v5982_v1, %v5981_v60 }
 0x1a5   : > { %v8306_v48 = vpop.f32.mrf.mxu0  ;;  %v5984_v17 = vpop.f32.mrf.mxu1 }
 0x1a6   : > { %v8309_v39 = vadd.f32 %v5895_v50, %v8206_v6  ;;  %v8312_v31 = vadd.f32 %v5983_v42, %v8194_v10 }
 0x1a7   : > { %v8314_v3 = vpop.f32.mrf.mxu0  ;;  %v5985_v2 = vpop.f32.mrf.mxu1 }
 0x1a8   : > { %v5986_v32 = vadd.f32 %v5985_v2, %v5984_v17 }
 0x1a9   : > { %v5899_v23 = vpop.f32.mrf.mxu0  ;;  %v5987_v47 = vpop.f32.mrf.mxu1  ;;  %2266 = vmatmul.mubr.bf16.gmra.mxu0 %v8172_v57 }
 0x1aa   : > { %v8318_v34 = vadd.f32 %v5986_v32, %v8203_v29  ;;  %v8342_v32 = vld [vmem:[#allocation6 + $0xb8] sm:$0xff]  }
 0x1ab   : > { %v5900_v55 = vpop.f32.mrf.mxu0  ;;  %v5988_v25 = vpop.f32.mrf.mxu1  ;;  %6801 = vmatprep.subr.bf16.mxu1 %v8342_v32 }
 0x1ac   : > { %v8320_v12 = vadd.f32 %v5900_v55, %v5899_v23  ;;  %v5989_v6 = vadd.f32 %v5988_v25, %v5987_v47 }
 0x1ad   : > { %v8322_v21 = vpop.f32.mrf.mxu0  ;;  %v5990_v10 = vpop.f32.mrf.mxu1 }
 0x1ae   : > { %v1663_v30 = vadd.f32 %v5989_v6, %v8211_v15 }
 0x1af   : > { %v8325_v11 = vpop.f32.mrf.mxu0  ;;  %v5991_v28 = vpop.f32.mrf.mxu1 }
 0x1b0   : > { %v5992_v18 = vadd.f32 %v5991_v28, %v5990_v10 }
 0x1b1   : > { %v5993_v52 = vpop.f32.mrf.mxu1  ;;  %v6675_v43 = vpop.f32.mrf.mxu0 }
 0x1b2   : > { %v8328_v57 = vadd.f32 %v6675_v43, %v8237_v16  ;;  %v1666_v29 = vadd.f32 %v5992_v18, %v8217_v22  ;;  %v1369_v16 = vadd.f32 %v8226_v46, %v8154_v49 }
 0x1b3   : > { %v5994_v35 = vpop.f32.mrf.mxu1  ;;  %v1767_v60 = vpop.f32.mrf.mxu0 }
 0x1b4   : > { %v5995_v53 = vadd.f32 %v5994_v35, %v5993_v52  ;;  %v8332_v38 = vadd.f32 %v1767_v60, %v8224_v0 }
 0x1b5   : > { %v5996_v1 = vpop.f32.mrf.mxu1  ;;  %v6676_v50 = vpop.f32.mrf.mxu0 }
 0x1b6   : > { %v8335_v15 = vadd.f32 %v6676_v50, %v8245_v45  ;;  %v1671_v42 = vadd.f32 %v5995_v53, %v8221_v58 }
 0x1b7   : > { %v5997_v17 = vpop.f32.mrf.mxu1  ;;  %v8338_v2 = vpop.f32.mrf.mxu0 }
 0x1b8   : > { %v5998_v22 = vadd.f32 %v5997_v17, %v5996_v1 }
 0x1b9   : > { %v5999_v23 = vpop.f32.mrf.mxu1  ;;  %v6679_v47 = vpop.f32.mrf.mxu0 }
 0x1ba   : > { %v8345_v0 = vadd.f32 %v6679_v47, %v8264_v51  ;;  %v8347_v55 = vadd.f32 %v5998_v22, %v1369_v16 }
 0x1bb   : > { %v6000_v45 = vpop.f32.mrf.mxu1  ;;  %v1783_v58 = vpop.f32.mrf.mxu0 }
 0x1bc   : > { %v6001_v25 = vadd.f32 %v6000_v45, %v5999_v23  ;;  %v8351_v6 = vadd.f32 %v1783_v58, %v8251_v27 }
 0x1bd   : > { %v6002_v10 = vpop.f32.mrf.mxu1  ;;  %v6680_v49 = vpop.f32.mrf.mxu0 }
 0x1be   : > { %v8354_v46 = vadd.f32 %v6680_v49, %v8272_v9  ;;  %v1679_v28 = vadd.f32 %v6001_v25, %v8234_v56 }
 0x1bf   : > { %v6003_v18 = vpop.f32.mrf.mxu1  ;;  %v8357_v51 = vpop.f32.mrf.mxu0 }
 0x1c0   : > { %v6004_v52 = vadd.f32 %v6003_v18, %v6002_v10 }
 0x1c1   : > { %v6005_v43 = vpop.f32.mrf.mxu1  ;;  %v6683_v35 = vpop.f32.mrf.mxu0 }
 0x1c2   : > { %v8360_v60 = vadd.f32 %v6683_v35, %v8296_v62  ;;  %v1682_v53 = vadd.f32 %v6004_v52, %v8241_v5  ;;  %v1385_v62 = vadd.f32 %v8253_v4, %v8177_v24 }
 0x1c3   : > { %v6006_v27 = vpop.f32.mrf.mxu1  ;;  %v1799_v1 = vpop.f32.mrf.mxu0 }
 0x1c4   : > { %v6007_v50 = vadd.f32 %v6006_v27, %v6005_v43  ;;  %v8364_v17 = vadd.f32 %v1799_v1, %v8281_v20 }
 0x1c5   : > { %v6008_v9 = vpop.f32.mrf.mxu1  ;;  %v6684_v16 = vpop.f32.mrf.mxu0 }
 0x1c6   : > { %v8367_v56 = vadd.f32 %v6684_v16, %v8304_v41  ;;  %v1687_v22 = vadd.f32 %v6007_v50, %v8248_v33 }
 0x1c7   : > { %v6009_v23 = vpop.f32.mrf.mxu1  ;;  %v8370_v47 = vpop.f32.mrf.mxu0 }
 0x1c8   : > { %v6010_v5 = vadd.f32 %v6009_v23, %v6008_v9 }
 0x1c9   : > { %v6011_v45 = vpop.f32.mrf.mxu1  ;;  %v6687_v58 = vpop.f32.mrf.mxu0 }
 0x1ca   : > { %v8374_v25 = vadd.f32 %v6687_v58, %v1663_v30  ;;  %v8376_v20 = vadd.f32 %v6010_v5, %v1385_v62 }
 0x1cb   : > { %v6012_v10 = vpop.f32.mrf.mxu1  ;;  %v1815_v49 = vpop.f32.mrf.mxu0 }
 0x1cc   : > { %v6013_v18 = vadd.f32 %v6012_v10, %v6011_v45  ;;  %v8379_v41 = vadd.f32 %v1815_v49, %v8312_v31  ;;  %v5886_v31 = vadd.f32 %v8283_v36, %v8275_v44 }
 0x1cd   : > { %v6014_v33 = vpop.f32.mrf.mxu1  ;;  %v6688_v52 = vpop.f32.mrf.mxu0 }
 0x1ce   : > { %v8381_v43 = vadd.f32 %v6688_v52, %v1666_v29  ;;  %v1695_v35 = vadd.f32 %v6013_v18, %v8261_v59 }
 0x1cf   : > { %v6015_v24 = vpop.f32.mrf.mxu1  ;;  %v8384_v4 = vpop.f32.mrf.mxu0 }
 0x1d0   : > { %v6016_v27 = vadd.f32 %v6015_v24, %v6014_v33 }
 0x1d1   : > { %v6017_v30 = vpop.f32.mrf.mxu1  ;;  %v6691_v1 = vpop.f32.mrf.mxu0 }
 0x1d2   : > { %v8386_v50 = vadd.f32 %v6691_v1, %v1679_v28  ;;  %v1698_v9 = vadd.f32 %v6016_v27, %v8268_v7  ;;  %v1401_v28 = vadd.f32 %v5886_v31, %v8197_v61 }
 0x1d3   : > { %v6018_v16 = vpop.f32.mrf.mxu1  ;;  %v1831_v23 = vpop.f32.mrf.mxu0 }
 0x1d4   : > { %v6019_v62 = vadd.f32 %v6018_v16, %v6017_v30  ;;  %v8391_v29 = vadd.f32 %v1831_v23, %v1671_v42 }
 0x1d5   : > { %v6020_v5 = vpop.f32.mrf.mxu1  ;;  %v6692_v59 = vpop.f32.mrf.mxu0 }
 0x1d6   : > { %v8393_v45 = vadd.f32 %v6692_v59, %v1682_v53  ;;  %v1703_v58 = vadd.f32 %v6019_v62, %v8278_v19 }
 0x1d7   : > { %v6021_v10 = vpop.f32.mrf.mxu1  ;;  %v8396_v49 = vpop.f32.mrf.mxu0 }
 0x1d8   : > { %v6022_v7 = vadd.f32 %v6021_v10, %v6020_v5 }
 0x1d9   : > { %v6023_v18 = vpop.f32.mrf.mxu1  ;;  %v6695_v33 = vpop.f32.mrf.mxu0 }
 0x1da   : > { %v8399_v52 = vadd.f32 %v6695_v33, %v1695_v35  ;;  %v8401_v44 = vadd.f32 %v6022_v7, %v1401_v28 }
 0x1db   : > { %v6024_v36 = vpop.f32.mrf.mxu1  ;;  %v1847_v42 = vpop.f32.mrf.mxu0 }
 0x1dc   : > { %v6025_v24 = vadd.f32 %v6024_v36, %v6023_v18  ;;  %v8403_v27 = vadd.f32 %v1847_v42, %v1687_v22  ;;  %v5898_v22 = vadd.f32 %v8314_v3, %v8306_v48 }
 0x1dd   : > { %v6026_v53 = vpop.f32.mrf.mxu1  ;;  %v6696_v30 = vpop.f32.mrf.mxu0 }
 0x1de   : > { %v8405_v19 = vadd.f32 %v6696_v30, %v1698_v9  ;;  %v1711_v1 = vadd.f32 %v6025_v24, %v8293_v54  ;;  %v1417_v24 = vadd.f32 %v5898_v22, %v8213_v8 }
 0x1df   : > { %v6027_v16 = vpop.f32.mrf.mxu1  ;;  %v8408_v61 = vpop.f32.mrf.mxu0 }
 0x1e0   : > { %v6028_v23 = vadd.f32 %v6027_v16, %v6026_v53  ;;  %v5904_v16 = vadd.f32 %v8325_v11, %v8322_v21 }
 0x1e1   : > { %v6029_v31 = vpop.f32.mrf.mxu1  ;;  %v6699_v35 = vpop.f32.mrf.mxu0 }
 0x1e2   : > { %v8410_v62 = vadd.f32 %v6699_v35, %v1711_v1  ;;  %v1714_v5 = vadd.f32 %v6028_v23, %v8301_v13 }
 0x1e3   : > { %v6030_v59 = vpop.f32.mrf.mxu1  ;;  %v1863_v10 = vpop.f32.mrf.mxu0 }
 0x1e4   : > { %v6031_v28 = vadd.f32 %v6030_v59, %v6029_v31  ;;  %v8415_v9 = vadd.f32 %v1863_v10, %v1703_v58  ;;  %v1422_v58 = vadd.f32 %v8199_v40, %v8320_v12  ;;  %v1425_v10 = vadd.f32 %v8208_v37, %v5904_v16 }
 0x1e5   : > { %v6032_v7 = vpop.f32.mrf.mxu1  ;;  %v6700_v54 = vpop.f32.mrf.mxu0 }
 0x1e6   : > { %v8417_v18 = vadd.f32 %v6700_v54, %v1714_v5  ;;  %v1719_v33 = vadd.f32 %v6031_v28, %v8309_v39 }
 0x1e7   : > { %v6033_v36 = vpop.f32.mrf.mxu1  ;;  %v8420_v42 = vpop.f32.mrf.mxu0 }
 0x1e8   : > { %v6034_v13 = vadd.f32 %v6033_v36, %v6032_v7 }
 0x1e9   : > { %v6035_v53 = vpop.f32.mrf.mxu1  ;;  %v6703_v30 = vpop.f32.mrf.mxu0 }
 0x1ea   : > { %v8423_v1 = vadd.f32 %v6034_v13, %v1417_v24 }
 0x1eb   : > { %v6036_v48 = vpop.f32.mrf.mxu1  ;;  %v1879_v3 = vpop.f32.mrf.mxu0 }
 0x1ec   : > { %v6037_v23 = vadd.f32 %v6036_v48, %v6035_v53  ;;  %v8429_v39 = vadd.f32 %v1879_v3, %v1719_v33  ;;  %v8441_v53 = vld [vmem:[%s9598_s3] ss:$0 sm:$0xff]  ;;  %v7117_v3 = vld [vmem:[#allocation6 + $0x78] sm:$0xff]  }
 0x1ed   : > { %v6038_v31 = vpop.f32.mrf.mxu1  ;;  %v6704_v35 = vpop.f32.mrf.mxu0  ;;  %6337 = vmatprep.subr.bf16.mxu0 %v7117_v3 }
 0x1ee   : > { %v1727_v5 = vadd.f32 %v6037_v23, %v1422_v58  ;;  %v1771_v23 = vadd.f32 %v8338_v2, %v8231_v26 }
 0x1ef   : > { %v6039_v8 = vpop.f32.mrf.mxu1  ;;  %v8431_v59 = vpop.f32.mrf.mxu0 }
 0x1f0   : > { %v8434_v22 = vadd.f32 %v6703_v30, %v1727_v5  ;;  %v6040_v28 = vadd.f32 %v6039_v8, %v6038_v31  ;;  %v8450_v5 = vld [vmem:[%s9599_s4] ss:$0 sm:$0xff] }
 0x1f1   : > { %v6081_v7 = vpop.f32.mrf.mxu0  ;;  %v6723_v54 = vpop.f32.mrf.mxu1 }
 0x1f2   : > { %v1730_v40 = vadd.f32 %v6040_v28, %v1425_v10 }
 0x1f3   : > { %v6082_v12 = vpop.f32.mrf.mxu0  ;;  %v2308_v36 = vpop.f32.mrf.mxu1 }
 0x1f4   : > { %v8436_v21 = vadd.f32 %v6704_v35, %v1730_v40  ;;  %v6083_v11 = vadd.f32 %v6082_v12, %v6081_v7 }
 0x1f5   : > { %v6084_v33 = vpop.f32.mrf.mxu0  ;;  %v6724_v24 = vpop.f32.mrf.mxu1 }
 0x1f6   : > { %v2309_v13 = vadd.f32 %v6083_v11, %v2308_v36 }
 0x1f7   : > { %v6085_v37 = vpop.f32.mrf.mxu0  ;;  %v2311_v58 = vpop.f32.mrf.mxu1 }
 0x1f8   : > { %v2435_v30 = vadd.f32 %v2309_v13, %v8332_v38  ;;  %v6086_v48 = vadd.f32 %v6085_v37, %v6084_v33 }
 0x1f9   : > { %v6087_v16 = vpop.f32.mrf.mxu0  ;;  %v6727_v7 = vpop.f32.mrf.mxu1 }
 0x1fa   : > { %v2474_v31 = vmul.f32 %v8441_v53, %v2435_v30  ;;  %v2312_v35 = vadd.f32 %v6086_v48, %v2311_v58 }
 0x1fb   : > { %v6088_v8 = vpop.f32.mrf.mxu0  ;;  %v2324_v13 = vpop.f32.mrf.mxu1 }
 0x1fc   : > { %v2436_v10 = vadd.f32 %v2312_v35, %v1771_v23  ;;  %v6089_v28 = vadd.f32 %v6088_v8, %v6087_v16  ;;  %v2513_v40 = vadd.f32 %v8450_v5, %v2474_v31 }
 0x1fd   : > { %v6090_v38 = vpop.f32.mrf.mxu0  ;;  %v6728_v8 = vpop.f32.mrf.mxu1 }
 0x1fe   : > { %v2475_v12 = vmul.f32 %v8441_v53, %v2436_v10  ;;  %v2317_v36 = vadd.f32 %v6723_v54, %v6089_v28  ;;  %v2545_v30 = vmax.f32 %v2513_v40, 0.0 }
 0x1ff   : > { %v6091_v26 = vpop.f32.mrf.mxu0 }
 0x200   : > { %v2514_v2 = vadd.f32 %v8450_v5, %v2475_v12  ;;  %v2437_v11 = vadd.f32 %v2317_v36, %v8328_v57  ;;  %v6092_v33 = vadd.f32 %v6091_v26, %v6090_v38 }
 0x201   : > { %v6093_v37 = vpop.f32.mrf.mxu0 }
 0x202   : > { %v2546_v48 = vmax.f32 %v2514_v2, 0.0  ;;  %v2476_v3 = vmul.f32 %v8441_v53, %v2437_v11  ;;  %v2320_v58 = vadd.f32 %v6724_v24, %v6092_v33 }
 0x203   : > { %v6094_v16 = vpop.f32.mrf.mxu0 }
 0x204   : > { %v2577_v23 = vpack.c.bf16 %v2546_v48, %v2545_v30  ;;  %v2438_v31 = vadd.f32 %v2320_v58, %v8335_v15  ;;  %v6095_v54 = vadd.f32 %v6094_v16, %v6093_v37  ;;  %v2515_v35 = vadd.f32 %v8450_v5, %v2476_v3  ;;  %v2327_v37 = vpop.f32.mrf.mxu1 }
 0x205   : > { %v6096_v10 = vpop.f32.mrf.mxu0  ;;  %v1787_v15 = vadd.f32 %v8357_v51, %v8258_v63 }
 0x206   : > { %v2594_v57 = vshrl.u32 %v2577_v23, 16  ;;  %v2477_v28 = vmul.f32 %v8441_v53, %v2438_v31  ;;  %v2325_v40 = vadd.f32 %v6095_v54, %v2324_v13  ;;  %v2597_v36 = vshll.u32 %v2577_v23, 16 }
 0x207   : > { %v6097_v24 = vpop.f32.mrf.mxu0  ;;  %v2547_v11 = vmax.f32 %v2515_v35, 0.0 }
 0x208   : > { %v2596_v12 = vrot.slane %v2594_v57, 7  ;;  %v2516_v26 = vadd.f32 %v8450_v5, %v2477_v28  ;;  %v6098_v2 = vadd.f32 %v6097_v24, %v6096_v10  ;;  %v2439_v33 = vadd.f32 %v2325_v40, %v8351_v6  ;;  %v8474_v40 = vpop.f32.mrf.mxu1 }
 0x209   : > { %v6099_v30 = vpop.f32.mrf.mxu0 }
 0x20a   : > { %v2599_v48 = vor.u32 %v2597_v36, %v2596_v12  ;;  %v2756_v3 = vsel %vm8460_vm4, %v2596_v12, 0  ;;  %v2548_v58 = vmax.f32 %v2516_v26, 0.0  ;;  %v2328_v13 = vadd.f32 %v6098_v2, %v2327_v37 }
 0x20b   : > { %v5630_v16 = vcombine.low %v2756_v3, %v2756_v3  ;;  %v2478_v23 = vmul.f32 %v8441_v53, %v2439_v33  ;;  %v6100_v31 = vpop.f32.mrf.mxu0 }
 0x20c   : > { %v2740_v54 = vsel %vm8460_vm4, 0, %v2599_v48  ;;  %v2578_v10 = vpack.c.bf16 %v2548_v58, %v2547_v11  ;;  %v2440_v63 = vadd.f32 %v2328_v13, %v1787_v15  ;;  %v6101_v51 = vadd.f32 %v6100_v31, %v6099_v30  ;;  %v2340_v48 = vpop.f32.mrf.mxu1 }
 0x20d   : > { %v5628_v35 = vcombine.low %v2740_v54, %v2740_v54  ;;  %v5629_v6 = vcombine.high %v2740_v54, %v2740_v54  ;;  %2951 = vst [vmem:[#allocation2 + $0x14] sm:$0x1] %v5630_v16  ;;  %v2517_v57 = vadd.f32 %v8450_v5, %v2478_v23  ;;  %v6102_v28 = vpop.f32.mrf.mxu0 }
 0x20e   : > { %v2601_v24 = vshrl.u32 %v2578_v10, 16  ;;  %v2479_v12 = vmul.f32 %v8441_v53, %v2440_v63  ;;  %v2333_v36 = vadd.f32 %v6727_v7, %v6101_v51  ;;  %v2604_v26 = vshll.u32 %v2578_v10, 16 }
 0x20f   : > { %2949 = vst [vmem:[#allocation2 + $0xc] sm:$0xf] %v5628_v35  ;;  %2950 = vst [vmem:[#allocation2 + $0x10] sm:$0xf] %v5629_v6  ;;  %v6103_v2 = vpop.f32.mrf.mxu0  ;;  %v2549_v30 = vmax.f32 %v2517_v57, 0.0  ;;  %v7333_v6 = vmov 0  }
 0x210   : > { %v2603_v33 = vrot.slane %v2601_v24, 7  ;;  %v2518_v15 = vadd.f32 %v8450_v5, %v2479_v12  ;;  %v2441_v11 = vadd.f32 %v2333_v36, %v8345_v0  ;;  %v6104_v37 = vadd.f32 %v6103_v2, %v6102_v28  ;;  %360 = vst [vmem:[#allocation2] sm:$0xf] %v7333_v6  ;;  %361 = vst [vmem:[#allocation2 + $0x4] sm:$0xf] %v7333_v6  ;;  %v8486_v24 = vpop.f32.mrf.mxu1 }
 0x211   : > { %v6105_v3 = vpop.f32.mrf.mxu0  ;;  %362 = vst [vmem:[#allocation2 + $0x8] sm:$0x1] %v7333_v6  ;;  %364 = vst [vmem:[#allocation2 + $0xcc] sm:$0xf] %v7333_v6  ;;  %v1803_v36 = vadd.f32 %v8370_v47, %v8290_v14 }
 0x212   : > { %v2606_v58 = vor.u32 %v2604_v26, %v2603_v33  ;;  %v2757_v13 = vsel %vm8460_vm4, %v2603_v33, 0  ;;  %v2550_v16 = vmax.f32 %v2518_v15, 0.0  ;;  %v2480_v7 = vmul.f32 %v8441_v53, %v2441_v11  ;;  %365 = vst [vmem:[#allocation2 + $0xd0] sm:$0xf] %v7333_v6  ;;  %366 = vst [vmem:[#allocation2 + $0xd4] sm:$0x1] %v7333_v6  ;;  %v2343_v14 = vpop.f32.mrf.mxu1 }
 0x213   : > { %v5633_v23 = vcombine.low %v2757_v13, %v2757_v13  ;;  %v2336_v31 = vadd.f32 %v6728_v8, %v6104_v37  ;;  %v6106_v54 = vpop.f32.mrf.mxu0 }
 0x214   : > { %v2741_v10 = vsel %vm8460_vm4, 0, %v2606_v58  ;;  %v2579_v63 = vpack.c.bf16 %v2550_v16, %v2549_v30  ;;  %v2519_v0 = vadd.f32 %v8450_v5, %v2480_v7  ;;  %v6107_v51 = vadd.f32 %v6106_v54, %v6105_v3  ;;  %v7094_v35 = vld [vmem:[#allocation2 + $0x14] ss:$0 sps:$4 sm:$0x11]  }
 0x215   : > { %v5631_v57 = vcombine.low %v2741_v10, %v2741_v10  ;;  %v5632_v28 = vcombine.high %v2741_v10, %v2741_v10  ;;  %2954 = vst [vmem:[#allocation2 + $0x20] sm:$0x1] %v5633_v23  ;;  %v2442_v8 = vadd.f32 %v2336_v31, %v8354_v46  ;;  %v6108_v12 = vpop.f32.mrf.mxu0  ;;  %v3407_v3 = vrot.slane %v7094_v35, 1 }
 0x216   : > { %v2608_v26 = vshrl.u32 %v2579_v63, 16  ;;  %v2611_v2 = vshll.u32 %v2579_v63, 16  ;;  %v2341_v33 = vadd.f32 %v6107_v51, %v2340_v48  ;;  %v7093_v15 = vld [vmem:[#allocation2 + $0xc] sm:$0xff]   ;;  %v2551_v11 = vmax.f32 %v2519_v0, 0.0 }
 0x217   : > { %2952 = vst [vmem:[#allocation2 + $0x18] sm:$0xf] %v5631_v57  ;;  %2953 = vst [vmem:[#allocation2 + $0x1c] sm:$0xf] %v5632_v28  ;;  %v2481_v37 = vmul.f32 %v8441_v53, %v2442_v8  ;;  %v6109_v30 = vpop.f32.mrf.mxu0  ;;  %v3215_v58 = vshll.u32 %v7094_v35, 16  ;;  %v3406_v7 = vrot.slane %v7093_v15, 1 }
 0x218   : > { %v2610_v13 = vrot.slane %v2608_v26, 7  ;;  %v2443_v46 = vadd.f32 %v2341_v33, %v8364_v17  ;;  %v6110_v16 = vadd.f32 %v6109_v30, %v6108_v12  ;;  %v3208_v31 = vshrl.u32 %v7093_v15, 16 }
 0x219   : > { %v2520_v23 = vadd.f32 %v8450_v5, %v2481_v37  ;;  %v6111_v47 = vpop.f32.mrf.mxu0  ;;  %v3210_v48 = vshll.u32 %v7093_v15, 16  ;;  %v3217_v54 = vrot.slane %v3215_v58, 1  ;;  %v8497_v17 = vsel %vm774_vm1, %v3406_v7, %v3407_v3 }
 0x21a   : > { %v2613_v10 = vor.u32 %v2611_v2, %v2610_v13  ;;  %v2758_v63 = vsel %vm8460_vm4, %v2610_v13, 0  ;;  %v2482_v0 = vmul.f32 %v8441_v53, %v2443_v46  ;;  %v2344_v51 = vadd.f32 %v6110_v16, %v2343_v14  ;;  %6769 = vmatprep.mubr.bf16.mxu0 %v8497_v17  ;;  %v8503_v46 = vpop.f32.mrf.mxu1 }
 0x21b   : > { %v5636_v35 = vcombine.low %v2758_v63, %v2758_v63  ;;  %v2552_v6 = vmax.f32 %v2520_v23, 0.0  ;;  %v6112_v57 = vpop.f32.mrf.mxu0  ;;  %v3212_v28 = vrot.slane %v3210_v48, 1  ;;  %v8507_v16 = vadd.f32 %v8384_v4, %v8318_v34 }
 0x21c   : > { %v2742_v8 = vsel %vm8460_vm4, 0, %v2613_v10  ;;  %v2521_v12 = vadd.f32 %v8450_v5, %v2482_v0  ;;  %v2444_v26 = vadd.f32 %v2344_v51, %v1803_v36  ;;  %v6113_v2 = vadd.f32 %v6112_v57, %v6111_v47  ;;  %v7098_v33 = vld [vmem:[#allocation2 + $0x20] ss:$0 sps:$4 sm:$0x11]   ;;  %v7120_v0 = vld [vmem:[#allocation6 + $0x38] sm:$0xff]  }
 0x21d   : > { %v5634_v37 = vcombine.low %v2742_v8, %v2742_v8  ;;  %v5635_v30 = vcombine.high %v2742_v8, %v2742_v8  ;;  %2957 = vst [vmem:[#allocation2 + $0x2c] sm:$0x1] %v5636_v35  ;;  %v2580_v58 = vpack.c.bf16 %v2552_v6, %v2551_v11  ;;  %v6114_v13 = vpop.f32.mrf.mxu0  ;;  %v3213_v3 = vor.u32 %v3212_v28, %v3208_v31  ;;  %v7101_v31 = vld [vmem:[#allocation6 + $0xb0] sm:$0xff]   ;;  %v2356_v6 = vpop.f32.mrf.mxu1 }
 0x21e   : > { %v2483_v7 = vmul.f32 %v8441_v53, %v2444_v26  ;;  %v2349_v36 = vadd.f32 %v8474_v40, %v6113_v2  ;;  %v8511_v23 = vld [vmem:[#allocation2 + $0x18] sm:$0xff]   ;;  %v2553_v47 = vmax.f32 %v2521_v12, 0.0  ;;  %v3410_v10 = vrot.slane %v7098_v33, 1  ;;  %v7121_v8 = vld [vmem:[#allocation6 + $0x70] sm:$0xff]  }
 0x21f   : > { %2955 = vst [vmem:[#allocation2 + $0x24] sm:$0xf] %v5634_v37  ;;  %2956 = vst [vmem:[#allocation2 + $0x28] sm:$0xf] %v5635_v30  ;;  %v2615_v14 = vshrl.u32 %v2580_v58, 16  ;;  %v6115_v48 = vpop.f32.mrf.mxu0  ;;  %v8514_v11 = vsel %vm565_vm0, %v3213_v3, %v3217_v54  ;;  %v3409_v40 = vrot.slane %v8511_v23, 1 }
 0x220   : > { %v2522_v63 = vadd.f32 %v8450_v5, %v2483_v7  ;;  %v2445_v34 = vadd.f32 %v2349_v36, %v8360_v60  ;;  %v6116_v4 = vadd.f32 %v6115_v48, %v6114_v13  ;;  %3766 = vmatprep.mubr.bf16.mxu1 %v8514_v11  ;;  %v2618_v35 = vshll.u32 %v2580_v58, 16  ;;  %v7106_v13 = vld [vmem:[#allocation6 + $0xa8] sm:$0xff]  }
 0x221   : > { %v2617_v51 = vrot.slane %v2615_v14, 7  ;;  %v6117_v57 = vpop.f32.mrf.mxu0  ;;  %3767 = vmatmul.mubr.bf16.vlgmr.msra.gmra.mxu1 %v7093_v15  ;;  %v3222_v54 = vshll.u32 %v8511_v23, 16  ;;  %v3227_v28 = vshll.u32 %v7098_v33, 16  ;;  %v8525_v2 = vsel %vm774_vm1, %v3409_v40, %v3410_v10  ;;  %v7124_v14 = vld [vmem:[#allocation6 + $0x30] sm:$0xff]   ;;  %v8539_v10 = vpop.f32.mrf.mxu1 }
 0x222   : > { %v2554_v12 = vmax.f32 %v2522_v63, 0.0  ;;  %v2484_v26 = vmul.f32 %v8441_v53, %v2445_v34  ;;  %v2352_v60 = vadd.f32 %v8486_v24, %v6116_v4  ;;  %6802 = vmatpush3.bf16.msra.mxu1 %v8342_v32  ;;  %6770 = vmatmul.mubr.bf16.vlgmr.msra.gmra.mxu0 %v8525_v2  ;;  %v3220_v15 = vshrl.u32 %v8511_v23, 16 }
 0x223   : > { %v2620_v37 = vor.u32 %v2618_v35, %v2617_v51  ;;  %v2759_v30 = vsel %vm8460_vm4, %v2617_v51, 0  ;;  %v6118_v58 = vpop.f32.mrf.mxu0  ;;  %v3224_v33 = vrot.slane %v3222_v54, 1  ;;  %6803 = vmatprep.subr.bf16.mxu1 %v7101_v31  ;;  %6338 = vmatpush3.bf16.msra.mxu0 %v7120_v0  ;;  %v3229_v40 = vrot.slane %v3227_v28, 1  ;;  %v7111_v28 = vld [vmem:[#allocation6 + $0xa0] sm:$0xff]  }
 0x224   : > { %v5639_v3 = vcombine.low %v2759_v30, %v2759_v30  ;;  %v2581_v7 = vpack.c.bf16 %v2554_v12, %v2553_v47  ;;  %v8532_v24 = vadd.f32 %v8450_v5, %v2484_v26  ;;  %v2446_v32 = vadd.f32 %v2352_v60, %v8367_v56  ;;  %v8535_v36 = vld [vmem:[#allocation2 + $0x2c] ss:$0 sps:$4 sm:$0x11]   ;;  %6339 = vmatprep.subr.bf16.mxu0 %v7121_v8  ;;  %v7126_v47 = vld [vmem:[#allocation6 + $0x68] sm:$0xff]  }
 0x225   : > { %v2743_v48 = vsel %vm8460_vm4, 0, %v2620_v37  ;;  %v6119_v63 = vadd.f32 %v6118_v58, %v6117_v57  ;;  %v6120_v34 = vpop.f32.mrf.mxu0  ;;  %v3225_v4 = vor.u32 %v3224_v33, %v3220_v15  ;;  %v3239_v58 = vshll.u32 %v8535_v36, 16 }
 0x226   : > { %v5637_v51 = vcombine.low %v2743_v48, %v2743_v48  ;;  %v5638_v35 = vcombine.high %v2743_v48, %v2743_v48  ;;  %2960 = vst [vmem:[#allocation2 + $0x38] sm:$0x1] %v5639_v3  ;;  %v2622_v54 = vshrl.u32 %v2581_v7, 16  ;;  %v2625_v56 = vshll.u32 %v2581_v7, 16  ;;  %6804 = vmatpush3.bf16.msra.mxu1 %v7101_v31  ;;  %v8546_v57 = vld [vmem:[#allocation2 + $0x24] sm:$0xff]   ;;  %v2359_v3 = vpop.f32.mrf.mxu1  ;;  %v7130_v48 = vld [vmem:[#allocation6 + $0x60] sm:$0xff]  }
 0x227   : > { %v2555_v0 = vmax.f32 %v8532_v24, 0.0  ;;  %v2485_v12 = vmul.f32 %v8441_v53, %v2446_v32  ;;  %v2357_v26 = vadd.f32 %v6119_v63, %v2356_v6  ;;  %v6121_v60 = vpop.f32.mrf.mxu0  ;;  %v8544_v37 = vsel %vm565_vm0, %v3225_v4, %v3229_v40  ;;  %6805 = vmatprep.subr.bf16.mxu1 %v7106_v13  ;;  %6340 = vmatpush3.bf16.msra.mxu0 %v7124_v14  ;;  %v7129_v6 = vld [vmem:[#allocation6 + $0x28] sm:$0xff]  }
 0x228   : > { %2958 = vst [vmem:[#allocation2 + $0x30] sm:$0xf] %v5637_v51  ;;  %2959 = vst [vmem:[#allocation2 + $0x34] sm:$0xf] %v5638_v35  ;;  %v2624_v8 = vrot.slane %v2622_v54, 7  ;;  %v6122_v30 = vadd.f32 %v6121_v60, %v6120_v34  ;;  %3774 = vmatprep.mubr.bf16.mxu1 %v8544_v37  ;;  %v3413_v31 = vrot.slane %v8535_v36, 1  ;;  %6341 = vmatprep.subr.bf16.mxu0 %v7126_v47 }
 0x229   : > { %v2524_v15 = vadd.f32 %v8450_v5, %v2485_v12  ;;  %v2447_v33 = vadd.f32 %v2357_v26, %v8379_v41  ;;  %v6123_v7 = vpop.f32.mrf.mxu0  ;;  %3775 = vmatmul.mubr.bf16.gmra.mxu1 %v8511_v23  ;;  %v3412_v24 = vrot.slane %v8546_v57, 1  ;;  %v3232_v32 = vshrl.u32 %v8546_v57, 16  ;;  %v7116_v35 = vld [vmem:[#allocation6 + $0x98] sm:$0xff]  }
 0x22a   : > { %v2627_v63 = vor.u32 %v2625_v56, %v2624_v8  ;;  %v2760_v36 = vsel %vm8460_vm4, %v2624_v8, 0  ;;  %v2360_v14 = vadd.f32 %v6122_v30, %v2359_v3  ;;  %v3234_v34 = vshll.u32 %v8546_v57, 16  ;;  %6806 = vmatpush3.bf16.msra.mxu1 %v7106_v13  ;;  %v7133_v13 = vld [vmem:[#allocation6 + $0x20] sm:$0xff]   ;;  %v7135_v3 = vld [vmem:[#allocation6 + $0x58] sm:$0xff]  }
 0x22b   : > { %v5642_v4 = vcombine.low %v2760_v36, %v2760_v36  ;;  %v2556_v41 = vmax.f32 %v2524_v15, 0.0  ;;  %v2486_v40 = vmul.f32 %v8441_v53, %v2447_v33  ;;  %v6124_v51 = vpop.f32.mrf.mxu0  ;;  %v8561_v23 = vsel %vm774_vm1, %v3412_v24, %v3413_v31  ;;  %6807 = vmatprep.subr.bf16.mxu1 %v7111_v28  ;;  %6342 = vmatpush3.bf16.msra.mxu0 %v7129_v6  ;;  %v8568_v15 = vpop.f32.mrf.mxu1 }
 0x22c   : > { %v2744_v47 = vsel %vm8460_vm4, 0, %v2627_v63  ;;  %v2448_v54 = vadd.f32 %v2360_v14, %v8507_v16  ;;  %v6125_v56 = vadd.f32 %v6124_v51, %v6123_v7  ;;  %6773 = vmatprep.mubr.bf16.mxu0 %v8561_v23  ;;  %v3236_v12 = vrot.slane %v3234_v34, 1  ;;  %6343 = vmatprep.subr.bf16.mxu0 %v7130_v48 }
 0x22d   : > { %v5640_v26 = vcombine.low %v2744_v47, %v2744_v47  ;;  %v5641_v60 = vcombine.high %v2744_v47, %v2744_v47  ;;  %2963 = vst [vmem:[#allocation2 + $0x44] sm:$0x1] %v5642_v4  ;;  %v2582_v8 = vpack.c.bf16 %v2556_v41, %v2555_v0  ;;  %v2525_v30 = vadd.f32 %v8450_v5, %v2486_v40  ;;  %v6126_v31 = vpop.f32.mrf.mxu0  ;;  %v7103_v33 = vld [vmem:[#allocation2 + $0x38] ss:$0 sps:$4 sm:$0x11]   ;;  %v7125_v47 = vld [vmem:[#allocation6 + $0x90] sm:$0xff]  }
 0x22e   : > { %v2487_v16 = vmul.f32 %v8441_v53, %v2448_v54  ;;  %v2365_v7 = vadd.f32 %v8503_v46, %v6125_v56  ;;  %v3237_v24 = vor.u32 %v3236_v12, %v3232_v32  ;;  %v3241_v63 = vrot.slane %v3239_v58, 1  ;;  %6808 = vmatpush3.bf16.msra.mxu1 %v7111_v28  ;;  %v7138_v54 = vld [vmem:[#allocation6 + $0x18] sm:$0xff]  }
 0x22f   : > { %v8574_v6 = vadd.f32 %v8396_v49, %v8347_v55  ;;  %2961 = vst [vmem:[#allocation2 + $0x3c] sm:$0xf] %v5640_v26  ;;  %2962 = vst [vmem:[#allocation2 + $0x40] sm:$0xf] %v5641_v60  ;;  %v2629_v0 = vshrl.u32 %v2582_v8, 16  ;;  %v2632_v36 = vshll.u32 %v2582_v8, 16  ;;  %v6127_v34 = vpop.f32.mrf.mxu0  ;;  %6809 = vmatprep.subr.bf16.mxu1 %v7116_v35  ;;  %6344 = vmatpush3.bf16.msra.mxu0 %v7133_v13  ;;  %v2372_v49 = vpop.f32.mrf.mxu1 }
 0x230   : > { %v2557_v14 = vmax.f32 %v2525_v30, 0.0  ;;  %v8576_v4 = vld [vmem:[#allocation2 + $0x30] sm:$0xff]   ;;  %v2526_v48 = vadd.f32 %v8450_v5, %v2487_v16  ;;  %v2449_v46 = vadd.f32 %v2365_v7, %v8374_v25  ;;  %v6128_v32 = vadd.f32 %v6127_v34, %v6126_v31  ;;  %6345 = vmatprep.subr.bf16.mxu0 %v7135_v3  ;;  %v7139_v26 = vld [vmem:[#allocation6 + $0x50] sm:$0xff]  }
 0x231   : > { %v8581_v28 = vsel %vm565_vm0, %v3237_v24, %v3241_v63  ;;  %v2631_v55 = vrot.slane %v2629_v0, 7  ;;  %v6129_v58 = vpop.f32.mrf.mxu0  ;;  %v3415_v41 = vrot.slane %v8576_v4, 1  ;;  %v3416_v40 = vrot.slane %v7103_v33, 1  ;;  %v7134_v63 = vld [vmem:[#allocation6 + $0x88] sm:$0xff]  }
 0x232   : > { %3782 = vmatprep.mubr.bf16.mxu1 %v8581_v28  ;;  %v3244_v51 = vshrl.u32 %v8576_v4, 16  ;;  %v2558_v56 = vmax.f32 %v2526_v48, 0.0  ;;  %v2488_v25 = vmul.f32 %v8441_v53, %v2449_v46  ;;  %v2368_v12 = vadd.f32 %v8539_v10, %v6128_v32  ;;  %6810 = vmatpush3.bf16.msra.mxu1 %v7116_v35  ;;  %v7144_v46 = vld [vmem:[#allocation6 + $0x48] sm:$0xff]  }
 0x233   : > { %3783 = vmatmul.mubr.bf16.gmra.mxu1 %v8546_v57  ;;  %v3246_v13 = vshll.u32 %v8576_v4, 16  ;;  %v2634_v60 = vor.u32 %v2632_v36, %v2631_v55  ;;  %v2761_v8 = vsel %vm8460_vm4, %v2631_v55, 0  ;;  %v6130_v30 = vpop.f32.mrf.mxu0  ;;  %v8593_v31 = vsel %vm774_vm1, %v3415_v41, %v3416_v40  ;;  %v8604_v36 = vpop.f32.mrf.mxu1  ;;  %6811 = vmatprep.subr.bf16.mxu1 %v7125_v47 }
 0x234   : > { %v3251_v3 = vshll.u32 %v7103_v33, 16  ;;  %v5645_v16 = vcombine.low %v2761_v8, %v2761_v8  ;;  %v2583_v7 = vpack.c.bf16 %v2558_v56, %v2557_v14  ;;  %v8596_v24 = vadd.f32 %v8450_v5, %v2488_v25  ;;  %6774 = vmatmul.mubr.bf16.gmra.mxu0 %v8593_v31  ;;  %v8600_v57 = vld [vmem:[#allocation2 + $0x44] ss:$0 sps:$4 sm:$0x11]   ;;  %v7142_v14 = vld [vmem:[#allocation6 + $0x10] sm:$0xff]  }
 0x235   : > { %v2450_v10 = vadd.f32 %v2368_v12, %v8381_v43  ;;  %v2745_v0 = vsel %vm8460_vm4, 0, %v2634_v60  ;;  %v6131_v34 = vadd.f32 %v6130_v30, %v6129_v58  ;;  %v6132_v33 = vpop.f32.mrf.mxu0  ;;  %v3248_v35 = vrot.slane %v3246_v13, 1  ;;  %6346 = vmatpush3.bf16.msra.mxu0 %v7138_v54 }
 0x236   : > { %v3253_v48 = vrot.slane %v3251_v3, 1  ;;  %v5643_v32 = vcombine.low %v2745_v0, %v2745_v0  ;;  %v5644_v43 = vcombine.high %v2745_v0, %v2745_v0  ;;  %2966 = vst [vmem:[#allocation2 + $0x50] sm:$0x1] %v5645_v16  ;;  %v2636_v55 = vshrl.u32 %v2583_v7, 16  ;;  %6347 = vmatprep.subr.bf16.mxu0 %v7139_v26  ;;  %v8608_v60 = vld [vmem:[#allocation2 + $0x3c] sm:$0xff]   ;;  %6812 = vmatpush3.bf16.msra.mxu1 %v7125_v47  ;;  %v2375_v16 = vpop.f32.mrf.mxu1 }
 0x237   : > { %v2639_v41 = vshll.u32 %v2583_v7, 16  ;;  %v2559_v40 = vmax.f32 %v8596_v24, 0.0  ;;  %v2489_v56 = vmul.f32 %v8441_v53, %v2450_v10  ;;  %v2373_v25 = vadd.f32 %v6131_v34, %v2372_v49  ;;  %v6133_v12 = vpop.f32.mrf.mxu0  ;;  %6813 = vmatprep.subr.bf16.mxu1 %v7134_v63  ;;  %v7143_v7 = vld [vmem:[#allocation6 + $0x80] sm:$0xff]  }
 0x238   : > { %v3249_v58 = vor.u32 %v3248_v35, %v3244_v51  ;;  %2964 = vst [vmem:[#allocation2 + $0x48] sm:$0xf] %v5643_v32  ;;  %2965 = vst [vmem:[#allocation2 + $0x4c] sm:$0xf] %v5644_v43  ;;  %v2638_v54 = vrot.slane %v2636_v55, 7  ;;  %v6134_v13 = vadd.f32 %v6133_v12, %v6132_v33  ;;  %v3419_v8 = vrot.slane %v8600_v57, 1 }
 0x239   : > { %v3263_v30 = vshll.u32 %v8600_v57, 16  ;;  %v2528_v26 = vadd.f32 %v8450_v5, %v2489_v56  ;;  %v2451_v3 = vadd.f32 %v2373_v25, %v8391_v29  ;;  %v6135_v51 = vpop.f32.mrf.mxu0  ;;  %v3418_v47 = vrot.slane %v8608_v60, 1  ;;  %6348 = vmatpush3.bf16.msra.mxu0 %v7142_v14  ;;  %v7147_v29 = vld [vmem:[#allocation6 + $0x8] sm:$0xff]   ;;  %v7148_v32 = vld [vmem:[#allocation6 + $0x40] sm:$0xff]  }
 0x23a   : > { %v8615_v49 = vsel %vm565_vm0, %v3249_v58, %v3253_v48  ;;  %v2641_v24 = vor.u32 %v2639_v41, %v2638_v54  ;;  %v2762_v10 = vsel %vm8460_vm4, %v2638_v54, 0  ;;  %v2376_v0 = vadd.f32 %v6134_v13, %v2375_v16  ;;  %6349 = vmatprep.subr.bf16.mxu0 %v7144_v46  ;;  %6814 = vmatpush3.bf16.msra.mxu1 %v7134_v63  ;;  %v8633_v54 = vpop.f32.mrf.mxu1  ;;  %v7149_v63 = vld [vmem:[#allocation6] sm:$0xff]  }
 0x23b   : > { %3790 = vmatprep.mubr.bf16.mxu1 %v8615_v49  ;;  %v3256_v57 = vshrl.u32 %v8608_v60, 16  ;;  %v5648_v34 = vcombine.low %v2762_v10, %v2762_v10  ;;  %v2560_v33 = vmax.f32 %v2528_v26, 0.0  ;;  %v2490_v35 = vmul.f32 %v8441_v53, %v2451_v3  ;;  %v6136_v48 = vpop.f32.mrf.mxu0  ;;  %6815 = vmatprep.subr.bf16.mxu1 %v7143_v7 }
 0x23c   : > { %3791 = vmatmul.mubr.bf16.gmra.mxu1 %v8576_v4  ;;  %v8625_v14 = vsel %vm774_vm1, %v3418_v47, %v3419_v8  ;;  %v2746_v43 = vsel %vm8460_vm4, 0, %v2641_v24  ;;  %v2452_v55 = vadd.f32 %v2376_v0, %v8574_v6  ;;  %v6137_v41 = vadd.f32 %v6136_v48, %v6135_v51  ;;  %v7152_v8 = vld [vmem:[#allocation6 + $0x1f8] sm:$0xff]   ;;  %v2388_v48 = vpop.f32.mrf.mxu1 }
 0x23d   : > { %6777 = vmatprep.mubr.bf16.mxu0 %v8625_v14  ;;  %v3258_v46 = vshll.u32 %v8608_v60, 16  ;;  %v5646_v56 = vcombine.low %v2746_v43, %v2746_v43  ;;  %v5647_v25 = vcombine.high %v2746_v43, %v2746_v43  ;;  %2969 = vst [vmem:[#allocation2 + $0x5c] sm:$0x1] %v5648_v34  ;;  %v2584_v4 = vpack.c.bf16 %v2560_v33, %v2559_v40  ;;  %v6138_v58 = vpop.f32.mrf.mxu0  ;;  %v8635_v13 = vld [vmem:[#allocation2 + $0x50] ss:$0 sps:$4 sm:$0x11]  }
 0x23e   : > { %v2529_v12 = vadd.f32 %v8450_v5, %v2490_v35  ;;  %v2491_v6 = vmul.f32 %v8441_v53, %v2452_v55  ;;  %v2381_v26 = vadd.f32 %v8568_v15, %v6137_v41  ;;  %v3265_v16 = vrot.slane %v3263_v30, 1  ;;  %6350 = vmatpush3.bf16.msra.mxu0 %v7147_v29  ;;  %v8639_v51 = vld [vmem:[#allocation6 + $0x238] sm:$0xff]   ;;  %6816 = vmatpush3.bf16.msra.mxu1 %v7143_v7 }
 0x23f   : > { %v3260_v3 = vrot.slane %v3258_v46, 1  ;;  %v8643_v40 = vadd.f32 %v8408_v61, %v8376_v20  ;;  %2967 = vst [vmem:[#allocation2 + $0x54] sm:$0xf] %v5646_v56  ;;  %2968 = vst [vmem:[#allocation2 + $0x58] sm:$0xf] %v5647_v25  ;;  %v2643_v47 = vshrl.u32 %v2584_v4, 16  ;;  %v6139_v0 = vpop.f32.mrf.mxu0  ;;  %6351 = vmatprep.subr.bf16.mxu0 %v7148_v32  ;;  %6473 = vmatprep.subr.bf16.mxu1 %v7152_v8 }
 0x240   : > { %v2646_v24 = vshll.u32 %v2584_v4, 16  ;;  %v2561_v10 = vmax.f32 %v2529_v12, 0.0  ;;  %v8645_v34 = vld [vmem:[#allocation2 + $0x48] sm:$0xff]   ;;  %v2530_v15 = vadd.f32 %v8450_v5, %v2491_v6  ;;  %v2453_v30 = vadd.f32 %v2381_v26, %v8386_v50 }
 0x241   : > { %v6140_v29 = vadd.f32 %v6139_v0, %v6138_v58  ;;  %v3261_v33 = vor.u32 %v3260_v3, %v3256_v57  ;;  %v2645_v35 = vrot.slane %v2643_v47, 7  ;;  %v6141_v20 = vpop.f32.mrf.mxu0  ;;  %v3421_v61 = vrot.slane %v8645_v34, 1  ;;  %v8672_v3 = vpop.f32.mrf.mxu1 }
 0x242   : > { %v3422_v43 = vrot.slane %v8635_v13, 1  ;;  %v3268_v55 = vshrl.u32 %v8645_v34, 16  ;;  %v2562_v41 = vmax.f32 %v2530_v15, 0.0  ;;  %v2492_v32 = vmul.f32 %v8441_v53, %v2453_v30  ;;  %6352 = vmatpush3.bf16.msra.mxu0 %v7149_v63 }
 0x243   : > { %v2384_v46 = vadd.f32 %v8604_v36, %v6140_v29  ;;  %v8655_v50 = vsel %vm565_vm0, %v3261_v33, %v3265_v16  ;;  %v2648_v7 = vor.u32 %v2646_v24, %v2645_v35  ;;  %v2763_v57 = vsel %vm8460_vm4, %v2645_v35, 0  ;;  %v6142_v56 = vpop.f32.mrf.mxu0  ;;  %6849 = vmatprep.subr.bf16.mxu0 %v8639_v51 }
 0x244   : > { %3798 = vmatprep.mubr.bf16.mxu1 %v8655_v50  ;;  %v8661_v25 = vsel %vm774_vm1, %v3421_v61, %v3422_v43  ;;  %v3270_v4 = vshll.u32 %v8645_v34, 16  ;;  %v5651_v12 = vcombine.low %v2763_v57, %v2763_v57  ;;  %v2585_v36 = vpack.c.bf16 %v2562_v41, %v2561_v10  ;;  %v8668_v6 = vld [vmem:[#allocation2 + $0x5c] ss:$0 sps:$4 sm:$0x11]  }
 0x245   : > { %v2531_v58 = vadd.f32 %v8450_v5, %v2492_v32  ;;  %v2454_v8 = vadd.f32 %v2384_v46, %v8393_v45  ;;  %3799 = vmatmul.mubr.bf16.gmra.mxu1 %v8608_v60  ;;  %v2747_v26 = vsel %vm8460_vm4, 0, %v2648_v7  ;;  %v6143_v16 = vadd.f32 %v6142_v56, %v6141_v20  ;;  %6778 = vmatmul.mubr.bf16.gmra.mxu0 %v8661_v25  ;;  %v6144_v63 = vpop.f32.mrf.mxu0  ;;  %v2391_v7 = vpop.f32.mrf.mxu1 }
 0x246   : > { %v3272_v47 = vrot.slane %v3270_v4, 1  ;;  %v3275_v24 = vshll.u32 %v8635_v13, 16  ;;  %v5649_v10 = vcombine.low %v2747_v26, %v2747_v26  ;;  %v5650_v0 = vcombine.high %v2747_v26, %v2747_v26  ;;  %2972 = vst [vmem:[#allocation2 + $0x68] sm:$0x1] %v5651_v12  ;;  %v8677_v61 = vld [vmem:[#allocation2 + $0x54] sm:$0xff]  }
 0x247   : > { %v2650_v45 = vshrl.u32 %v2585_v36, 16  ;;  %v2653_v15 = vshll.u32 %v2585_v36, 16  ;;  %v2563_v60 = vmax.f32 %v2531_v58, 0.0  ;;  %v2493_v30 = vmul.f32 %v8441_v53, %v2454_v8  ;;  %v6145_v33 = vpop.f32.mrf.mxu0 }
 0x248   : > { %v2389_v29 = vadd.f32 %v6143_v16, %v2388_v48  ;;  %v3273_v35 = vor.u32 %v3272_v47, %v3268_v55  ;;  %2970 = vst [vmem:[#allocation2 + $0x60] sm:$0xf] %v5649_v10  ;;  %2971 = vst [vmem:[#allocation2 + $0x64] sm:$0xf] %v5650_v0  ;;  %v6146_v43 = vadd.f32 %v6145_v33, %v6144_v63  ;;  %v3277_v41 = vrot.slane %v3275_v24, 1 }
 0x249   : > { %v2652_v20 = vrot.slane %v2650_v45, 7  ;;  %v3425_v13 = vrot.slane %v8668_v6, 1  ;;  %v2532_v32 = vadd.f32 %v8450_v5, %v2493_v30  ;;  %v6147_v57 = vpop.f32.mrf.mxu0  ;;  %v3424_v56 = vrot.slane %v8677_v61, 1 }
 0x24a   : > { %v2455_v46 = vadd.f32 %v2389_v29, %v8403_v27  ;;  %v3280_v48 = vshrl.u32 %v8677_v61, 16  ;;  %v2392_v12 = vadd.f32 %v6146_v43, %v2391_v7  ;;  %v8687_v36 = vsel %vm565_vm0, %v3273_v35, %v3277_v41  ;;  %v8701_v29 = vpop.f32.mrf.mxu1  ;;  %v8722_v7 = vld [vmem:[%s9599_s4] ss:$0 sm:$0xff] }
 0x24b   : > { %v2655_v55 = vor.u32 %v2653_v15, %v2652_v20  ;;  %v2764_v4 = vsel %vm8460_vm4, %v2652_v20, 0  ;;  %v2564_v8 = vmax.f32 %v2532_v32, 0.0  ;;  %3806 = vmatprep.mubr.bf16.mxu1 %v8687_v36  ;;  %v6148_v27 = vpop.f32.mrf.mxu0  ;;  %v8692_v16 = vsel %vm774_vm1, %v3424_v56, %v3425_v13 }
 0x24c   : > { %v5654_v58 = vcombine.low %v2764_v4, %v2764_v4  ;;  %v2494_v26 = vmul.f32 %v8441_v53, %v2455_v46  ;;  %v2456_v47 = vadd.f32 %v2392_v12, %v8643_v40  ;;  %v6149_v24 = vadd.f32 %v6148_v27, %v6147_v57  ;;  %6781 = vmatprep.mubr.bf16.mxu0 %v8692_v16  ;;  %v8708_v40 = vld [vmem:[%s9598_s3] ss:$0 sm:$0xff]  ;;  %v2404_v56 = vpop.f32.mrf.mxu1 }
 0x24d   : > { %v2748_v63 = vsel %vm8460_vm4, 0, %v2655_v55  ;;  %3807 = vmatmul.mubr.bf16.gmra.mxu1 %v8645_v34  ;;  %v3282_v10 = vshll.u32 %v8677_v61, 16  ;;  %v2586_v45 = vpack.c.bf16 %v2564_v8, %v2563_v60  ;;  %v6150_v30 = vpop.f32.mrf.mxu0  ;;  %v8703_v33 = vld [vmem:[#allocation2 + $0x68] ss:$0 sps:$4 sm:$0x11]   ;;  %v3287_v43 = vshll.u32 %v8668_v6, 16 }
 0x24e   : > { %v5652_v0 = vcombine.low %v2748_v63, %v2748_v63  ;;  %v5653_v53 = vcombine.high %v2748_v63, %v2748_v63  ;;  %2975 = vst [vmem:[#allocation2 + $0x74] sm:$0x1] %v5654_v58  ;;  %v2533_v15 = vadd.f32 %v8450_v5, %v2494_v26  ;;  %v2495_v34 = vmul.f32 %v8708_v40, %v2456_v47 }
 0x24f   : > { %v2397_v35 = vadd.f32 %v8633_v54, %v6149_v24  ;;  %v3284_v20 = vrot.slane %v3282_v10, 1  ;;  %v8715_v5 = vadd.f32 %v8420_v42, %v8401_v44  ;;  %v2657_v60 = vshrl.u32 %v2586_v45, 16  ;;  %v6151_v32 = vpop.f32.mrf.mxu0  ;;  %v8717_v46 = vld [vmem:[#allocation2 + $0x60] sm:$0xff]  }
 0x250   : > { %2973 = vst [vmem:[#allocation2 + $0x6c] sm:$0xf] %v5652_v0  ;;  %2974 = vst [vmem:[#allocation2 + $0x70] sm:$0xf] %v5653_v53  ;;  %v2660_v41 = vshll.u32 %v2586_v45, 16  ;;  %v2565_v13 = vmax.f32 %v2533_v15, 0.0  ;;  %v2534_v54 = vadd.f32 %v8722_v7, %v2495_v34  ;;  %v6152_v57 = vadd.f32 %v6151_v32, %v6150_v30  ;;  %v8747_v34 = vpop.f32.mrf.mxu1 }
 0x251   : > { %v2457_v6 = vadd.f32 %v2397_v35, %v8399_v52  ;;  %v3285_v44 = vor.u32 %v3284_v20, %v3280_v48  ;;  %v2659_v42 = vrot.slane %v2657_v60, 7  ;;  %v3289_v55 = vrot.slane %v3287_v43, 1  ;;  %v6153_v4 = vpop.f32.mrf.mxu0 }
 0x252   : > { %v3427_v12 = vrot.slane %v8717_v46, 1  ;;  %v3428_v58 = vrot.slane %v8703_v33, 1  ;;  %v2566_v8 = vmax.f32 %v2534_v54, 0.0  ;;  %v2400_v27 = vadd.f32 %v8672_v3, %v6152_v57 }
 0x253   : > { %v2496_v26 = vmul.f32 %v8708_v40, %v2457_v6  ;;  %v3292_v63 = vshrl.u32 %v8717_v46, 16  ;;  %v2662_v47 = vor.u32 %v2660_v41, %v2659_v42  ;;  %v2765_v52 = vsel %vm8460_vm4, %v2659_v42, 0  ;;  %v6154_v24 = vpop.f32.mrf.mxu0 }
 0x254   : > { %v8734_v48 = vsel %vm565_vm0, %v3285_v44, %v3289_v55  ;;  %v8737_v10 = vsel %vm774_vm1, %v3427_v12, %v3428_v58  ;;  %v5657_v0 = vcombine.low %v2765_v52, %v2765_v52  ;;  %v2587_v53 = vpack.c.bf16 %v2566_v8, %v2565_v13 }
 0x255   : > { %v2535_v45 = vadd.f32 %v8722_v7, %v2496_v26  ;;  %v2458_v15 = vadd.f32 %v2400_v27, %v8405_v19  ;;  %3814 = vmatprep.mubr.bf16.mxu1 %v8734_v48  ;;  %v8742_v3 = vld [vmem:[#allocation2 + $0x74] ss:$0 sps:$4 sm:$0x11]   ;;  %v2749_v30 = vsel %vm8460_vm4, 0, %v2662_v47  ;;  %v6155_v35 = vadd.f32 %v6154_v24, %v6153_v4  ;;  %6782 = vmatmul.mubr.bf16.gmra.mxu0 %v8737_v10  ;;  %v6156_v20 = vpop.f32.mrf.mxu0  ;;  %v2407_v27 = vpop.f32.mrf.mxu1 }
 0x256   : > { %3815 = vmatmul.mubr.bf16.gmra.mxu1 %v8677_v61  ;;  %v3294_v43 = vshll.u32 %v8717_v46, 16  ;;  %v3299_v60 = vshll.u32 %v8703_v33, 16  ;;  %v5655_v19 = vcombine.low %v2749_v30, %v2749_v30  ;;  %v5656_v41 = vcombine.high %v2749_v30, %v2749_v30  ;;  %2978 = vst [vmem:[#allocation2 + $0x80] sm:$0x1] %v5657_v0 }
 0x257   : > { %v2664_v13 = vshrl.u32 %v2587_v53, 16  ;;  %v2667_v32 = vshll.u32 %v2587_v53, 16  ;;  %v2567_v54 = vmax.f32 %v2535_v45, 0.0  ;;  %v2497_v6 = vmul.f32 %v8708_v40, %v2458_v15  ;;  %v6157_v44 = vpop.f32.mrf.mxu0  ;;  %v8753_v55 = vld [vmem:[#allocation2 + $0x6c] sm:$0xff]  }
 0x258   : > { %v2405_v57 = vadd.f32 %v6155_v35, %v2404_v56  ;;  %v3296_v42 = vrot.slane %v3294_v43, 1  ;;  %2976 = vst [vmem:[#allocation2 + $0x78] sm:$0xf] %v5655_v19  ;;  %2977 = vst [vmem:[#allocation2 + $0x7c] sm:$0xf] %v5656_v41  ;;  %v6158_v12 = vadd.f32 %v6157_v44, %v6156_v20  ;;  %v3301_v58 = vrot.slane %v3299_v60, 1  ;;  %v8775_v44 = vpop.f32.mrf.mxu1 }
 0x259   : > { %v2666_v4 = vrot.slane %v2664_v13, 7  ;;  %v3431_v33 = vrot.slane %v8742_v3, 1  ;;  %v2536_v8 = vadd.f32 %v8722_v7, %v2497_v6  ;;  %v6159_v52 = vpop.f32.mrf.mxu0  ;;  %v3430_v56 = vrot.slane %v8753_v55, 1 }
 0x25a   : > { %v2459_v26 = vadd.f32 %v2405_v57, %v8415_v9  ;;  %v3297_v47 = vor.u32 %v3296_v42, %v3292_v63  ;;  %v2408_v53 = vadd.f32 %v6158_v12, %v2407_v27  ;;  %v3304_v45 = vshrl.u32 %v8753_v55, 16 }
 0x25b   : > { %v2669_v24 = vor.u32 %v2667_v32, %v2666_v4  ;;  %v2766_v0 = vsel %vm8460_vm4, %v2666_v4, 0  ;;  %v2568_v30 = vmax.f32 %v2536_v8, 0.0  ;;  %v6160_v9 = vpop.f32.mrf.mxu0  ;;  %v8771_v19 = vsel %vm774_vm1, %v3430_v56, %v3431_v33 }
 0x25c   : > { %v5660_v15 = vcombine.low %v2766_v0, %v2766_v0  ;;  %v2498_v35 = vmul.f32 %v8708_v40, %v2459_v26  ;;  %v8764_v20 = vsel %vm565_vm0, %v3297_v47, %v3301_v58  ;;  %v2460_v43 = vadd.f32 %v2408_v53, %v8715_v5  ;;  %6785 = vmatprep.mubr.bf16.mxu0 %v8771_v19 }
 0x25d   : > { %v2750_v63 = vsel %vm8460_vm4, 0, %v2669_v24  ;;  %3822 = vmatprep.mubr.bf16.mxu1 %v8764_v20  ;;  %v6161_v60 = vadd.f32 %v6160_v9, %v6159_v52  ;;  %v2588_v32 = vpack.c.bf16 %v2568_v30, %v2567_v54  ;;  %v6162_v57 = vpop.f32.mrf.mxu0  ;;  %v8777_v42 = vld [vmem:[#allocation2 + $0x80] ss:$0 sps:$4 sm:$0x11]   ;;  %v3306_v12 = vshll.u32 %v8753_v55, 16 }
 0x25e   : > { %v5658_v41 = vcombine.low %v2750_v63, %v2750_v63  ;;  %v5659_v13 = vcombine.high %v2750_v63, %v2750_v63  ;;  %2981 = vst [vmem:[#allocation2 + $0x8c] sm:$0x1] %v5660_v15  ;;  %v2537_v6 = vadd.f32 %v8722_v7, %v2498_v35  ;;  %3823 = vmatmul.mubr.bf16.gmra.mxu1 %v8717_v46  ;;  %v3311_v58 = vshll.u32 %v8742_v3, 16  ;;  %v2420_v3 = vpop.f32.mrf.mxu1 }
 0x25f   : > { %v2499_v5 = vmul.f32 %v8708_v40, %v2460_v43  ;;  %v2413_v4 = vadd.f32 %v8701_v29, %v6161_v60  ;;  %v8786_v54 = vadd.f32 %v8431_v59, %v8423_v1  ;;  %v2671_v33 = vshrl.u32 %v2588_v32, 16  ;;  %v6163_v27 = vpop.f32.mrf.mxu0  ;;  %v8788_v47 = vld [vmem:[#allocation2 + $0x78] sm:$0xff]  }
 0x260   : > { %2979 = vst [vmem:[#allocation2 + $0x84] sm:$0xf] %v5658_v41  ;;  %2980 = vst [vmem:[#allocation2 + $0x88] sm:$0xf] %v5659_v13  ;;  %v2674_v8 = vshll.u32 %v2588_v32, 16  ;;  %v2569_v26 = vmax.f32 %v2537_v6, 0.0  ;;  %v6164_v56 = vadd.f32 %v6163_v27, %v6162_v57 }
 0x261   : > { %v2538_v29 = vadd.f32 %v8722_v7, %v2499_v5  ;;  %v2461_v52 = vadd.f32 %v2413_v4, %v8410_v62  ;;  %v3308_v24 = vrot.slane %v3306_v12, 1  ;;  %v2673_v0 = vrot.slane %v2671_v33, 7  ;;  %v6165_v15 = vpop.f32.mrf.mxu0  ;;  %v8812_v12 = vpop.f32.mrf.mxu1 }
 0x262   : > { %v3313_v53 = vrot.slane %v3311_v58, 1  ;;  %v3433_v1 = vrot.slane %v8788_v47, 1  ;;  %v3434_v59 = vrot.slane %v8777_v42, 1  ;;  %v2416_v9 = vadd.f32 %v8747_v34, %v6164_v56 }
 0x263   : > { %v2570_v30 = vmax.f32 %v2538_v29, 0.0  ;;  %v2500_v35 = vmul.f32 %v8708_v40, %v2461_v52  ;;  %v3309_v63 = vor.u32 %v3308_v24, %v3304_v45  ;;  %v2676_v43 = vor.u32 %v2674_v8, %v2673_v0  ;;  %v6166_v60 = vpop.f32.mrf.mxu0 }
 0x264   : > { %v2767_v62 = vsel %vm8460_vm4, %v2673_v0, 0  ;;  %v8799_v41 = vsel %vm774_vm1, %v3433_v1, %v3434_v59  ;;  %v3316_v13 = vshrl.u32 %v8788_v47, 16  ;;  %v2462_v5 = vadd.f32 %v2416_v9, %v8417_v18 }
 0x265   : > { %v5663_v32 = vcombine.low %v2767_v62, %v2767_v62  ;;  %v2589_v6 = vpack.c.bf16 %v2570_v30, %v2569_v26  ;;  %v2539_v57 = vadd.f32 %v8722_v7, %v2500_v35  ;;  %6786 = vmatmul.mubr.bf16.gmra.mxu0 %v8799_v41  ;;  %v8805_v34 = vld [vmem:[#allocation2 + $0x8c] ss:$0 sps:$4 sm:$0x11]   ;;  %v2751_v45 = vsel %vm8460_vm4, 0, %v2676_v43  ;;  %v6168_v33 = vpop.f32.mrf.mxu0  ;;  %v2423_v43 = vpop.f32.mrf.mxu1 }
 0x266   : > { %v8810_v4 = vsel %vm565_vm0, %v3309_v63, %v3313_v53  ;;  %v6167_v58 = vadd.f32 %v6166_v60, %v6165_v15  ;;  %v3318_v8 = vshll.u32 %v8788_v47, 16  ;;  %v5661_v26 = vcombine.low %v2751_v45, %v2751_v45 }
 0x267   : > { %v5662_v27 = vcombine.high %v2751_v45, %v2751_v45  ;;  %2984 = vst [vmem:[#allocation2 + $0x98] sm:$0x1] %v5663_v32  ;;  %v2678_v18 = vshrl.u32 %v2589_v6, 16  ;;  %v2681_v29 = vshll.u32 %v2589_v6, 16  ;;  %3830 = vmatprep.mubr.bf16.mxu1 %v8810_v4  ;;  %v2571_v52 = vmax.f32 %v2539_v57, 0.0  ;;  %v6169_v0 = vpop.f32.mrf.mxu0  ;;  %v8818_v1 = vld [vmem:[#allocation2 + $0x84] sm:$0xff]  }
 0x268   : > { %v2501_v56 = vmul.f32 %v8708_v40, %v2462_v5  ;;  %3831 = vmatmul.mubr.bf16.gmra.mxu1 %v8753_v55  ;;  %v2421_v24 = vadd.f32 %v6167_v58, %v2420_v3  ;;  %v3320_v53 = vrot.slane %v3318_v8, 1  ;;  %2982 = vst [vmem:[#allocation2 + $0x90] sm:$0xf] %v5661_v26  ;;  %v6170_v59 = vadd.f32 %v6169_v0, %v6168_v33 }
 0x269   : > { %2983 = vst [vmem:[#allocation2 + $0x94] sm:$0xf] %v5662_v27  ;;  %v2680_v15 = vrot.slane %v2678_v18, 7  ;;  %v3323_v30 = vshll.u32 %v8777_v42, 16  ;;  %v3437_v35 = vrot.slane %v8805_v34, 1  ;;  %v6171_v60 = vpop.f32.mrf.mxu0  ;;  %v3436_v3 = vrot.slane %v8818_v1, 1 }
 0x26a   : > { %v2540_v9 = vadd.f32 %v8722_v7, %v2501_v56  ;;  %v2463_v63 = vadd.f32 %v2421_v24, %v8429_v39  ;;  %v3321_v62 = vor.u32 %v3320_v53, %v3316_v13  ;;  %v2424_v57 = vadd.f32 %v6170_v59, %v2423_v43 }
 0x26b   : > { %v2683_v32 = vor.u32 %v2681_v29, %v2680_v15  ;;  %v2768_v6 = vsel %vm8460_vm4, %v2680_v15, 0  ;;  %v3325_v5 = vrot.slane %v3323_v30, 1  ;;  %v6172_v33 = vpop.f32.mrf.mxu0  ;;  %v8829_v8 = vsel %vm774_vm1, %v3436_v3, %v3437_v35 }
 0x26c   : > { %v5666_v45 = vcombine.low %v2768_v6, %v2768_v6  ;;  %v2572_v58 = vmax.f32 %v2540_v9, 0.0  ;;  %v2502_v42 = vmul.f32 %v8708_v40, %v2463_v63  ;;  %v2464_v13 = vadd.f32 %v2424_v57, %v8786_v54  ;;  %6789 = vmatprep.mubr.bf16.mxu0 %v8829_v8 }
 0x26d   : > { %v2752_v39 = vsel %vm8460_vm4, 0, %v2683_v32  ;;  %v8835_v26 = vsel %vm565_vm0, %v3321_v62, %v3325_v5  ;;  %v6173_v27 = vadd.f32 %v6172_v33, %v6171_v60  ;;  %v6174_v0 = vpop.f32.mrf.mxu0  ;;  %v3330_v59 = vshll.u32 %v8818_v1, 16 }
 0x26e   : > { %v5664_v18 = vcombine.low %v2752_v39, %v2752_v39  ;;  %v5665_v29 = vcombine.high %v2752_v39, %v2752_v39  ;;  %2987 = vst [vmem:[#allocation2 + $0xa4] sm:$0x1] %v5666_v45  ;;  %v2590_v56 = vpack.c.bf16 %v2572_v58, %v2571_v52  ;;  %v2541_v24 = vadd.f32 %v8722_v7, %v2502_v42  ;;  %v7128_v53 = vld [vmem:[#allocation2 + $0x98] ss:$0 sps:$4 sm:$0x11]  }
 0x26f   : > { %3838 = vmatprep.mubr.bf16.mxu1 %v8835_v26  ;;  %v2503_v15 = vmul.f32 %v8708_v40, %v2464_v13  ;;  %v2429_v54 = vadd.f32 %v8775_v44, %v6173_v27  ;;  %v6175_v9 = vpop.f32.mrf.mxu0  ;;  %v3328_v52 = vshrl.u32 %v8818_v1, 16  ;;  %v3335_v63 = vshll.u32 %v8805_v34, 16 }
 0x270   : > { %2985 = vst [vmem:[#allocation2 + $0x9c] sm:$0xf] %v5664_v18  ;;  %2986 = vst [vmem:[#allocation2 + $0xa0] sm:$0xf] %v5665_v29  ;;  %v2685_v30 = vshrl.u32 %v2590_v56, 16  ;;  %v2688_v35 = vshll.u32 %v2590_v56, 16  ;;  %3839 = vmatmul.mubr.bf16.gmra.mxu1 %v8788_v47  ;;  %v6176_v60 = vadd.f32 %v6175_v9, %v6174_v0 }
 0x271   : > { %v2542_v43 = vadd.f32 %v8722_v7, %v2503_v15  ;;  %v2465_v62 = vadd.f32 %v2429_v54, %v8434_v22  ;;  %v3332_v3 = vrot.slane %v3330_v59, 1  ;;  %v8848_v44 = vld [vmem:[#allocation2 + $0x90] sm:$0xff]   ;;  %v2573_v6 = vmax.f32 %v2541_v24, 0.0 }
 0x272   : > { %v2687_v32 = vrot.slane %v2685_v30, 7  ;;  %v3337_v57 = vrot.slane %v3335_v63, 1  ;;  %v3440_v5 = vrot.slane %v7128_v53, 1  ;;  %v2432_v42 = vadd.f32 %v8812_v12, %v6176_v60 }
 0x273   : > { %v2574_v45 = vmax.f32 %v2542_v43, 0.0  ;;  %v2504_v58 = vmul.f32 %v8708_v40, %v2465_v62  ;;  %v3333_v33 = vor.u32 %v3332_v3, %v3328_v52  ;;  %v3439_v22 = vrot.slane %v8848_v44, 1 }
 0x274   : > { %v2690_v39 = vor.u32 %v2688_v35, %v2687_v32  ;;  %v2769_v34 = vsel %vm8460_vm4, %v2687_v32, 0  ;;  %v3347_v13 = vshll.u32 %v7128_v53, 16  ;;  %v2466_v56 = vadd.f32 %v2432_v42, %v8436_v21 }
 0x275   : > { %v5669_v27 = vcombine.low %v2769_v34, %v2769_v34  ;;  %v2591_v18 = vpack.c.bf16 %v2574_v45, %v2573_v6  ;;  %v2543_v29 = vadd.f32 %v8722_v7, %v2504_v58  ;;  %v8860_v0 = vsel %vm565_vm0, %v3333_v33, %v3337_v57  ;;  %v7132_v54 = vld [vmem:[#allocation2 + $0xa4] ss:$0 sps:$4 sm:$0x11]  }
 0x276   : > { %v2753_v24 = vsel %vm8460_vm4, 0, %v2690_v39  ;;  %v8863_v12 = vsel %vm774_vm1, %v3439_v22, %v3440_v5  ;;  %v3342_v15 = vshll.u32 %v8848_v44, 16  ;;  %3846 = vmatprep.mubr.bf16.mxu1 %v8860_v0  ;;  %v2505_v21 = vmul.f32 %v8708_v40, %v2466_v56 }
 0x277   : > { %v5667_v59 = vcombine.low %v2753_v24, %v2753_v24  ;;  %v5668_v53 = vcombine.high %v2753_v24, %v2753_v24  ;;  %2990 = vst [vmem:[#allocation2 + $0xb0] sm:$0x1] %v5669_v27  ;;  %v2692_v30 = vshrl.u32 %v2591_v18, 16  ;;  %6790 = vmatmul.mubr.bf16.gmra.mxu0 %v8863_v12  ;;  %v3340_v35 = vshrl.u32 %v8848_v44, 16  ;;  %v8871_v52 = vld [vmem:[#allocation2 + $0x9c] sm:$0xff]  }
 0x278   : > { %3847 = vmatmul.mubr.bf16.gmra.mxu1 %v8818_v1  ;;  %v3344_v9 = vrot.slane %v3342_v15, 1  ;;  %v2695_v43 = vshll.u32 %v2591_v18, 16  ;;  %v2575_v62 = vmax.f32 %v2543_v29, 0.0  ;;  %v3349_v60 = vrot.slane %v3347_v13, 1 }
 0x279   : > { %2988 = vst [vmem:[#allocation2 + $0xa8] sm:$0xf] %v5667_v59  ;;  %2989 = vst [vmem:[#allocation2 + $0xac] sm:$0xf] %v5668_v53  ;;  %v2694_v63 = vrot.slane %v2692_v30, 7  ;;  %v2544_v3 = vadd.f32 %v8722_v7, %v2505_v21  ;;  %v3442_v6 = vrot.slane %v8871_v52, 1 }
 0x27a   : > { %v3345_v32 = vor.u32 %v3344_v9, %v3340_v35  ;;  %v3443_v57 = vrot.slane %v7132_v54, 1  ;;  %v3354_v45 = vshll.u32 %v8871_v52, 16  ;;  %v3359_v58 = vshll.u32 %v7132_v54, 16  ;;  %v8896_v35 = vld [vmem:[#allocation2] sm:$0xff]  }
 0x27b   : > { %v2697_v40 = vor.u32 %v2695_v43, %v2694_v63  ;;  %v2770_v5 = vsel %vm8460_vm4, %v2694_v63, 0  ;;  %v2576_v33 = vmax.f32 %v2544_v3, 0.0  ;;  %v3352_v22 = vshrl.u32 %v8871_v52, 16 }
 0x27c   : > { %v5672_v42 = vcombine.low %v2770_v5, %v2770_v5  ;;  %v8879_v39 = vsel %vm565_vm0, %v3345_v32, %v3349_v60  ;;  %v8882_v34 = vsel %vm774_vm1, %v3442_v6, %v3443_v57  ;;  %v3356_v13 = vrot.slane %v3354_v45, 1 }
 0x27d   : > { %v2754_v7 = vsel %vm8460_vm4, 0, %v2697_v40  ;;  %3854 = vmatprep.mubr.bf16.mxu1 %v8879_v39  ;;  %6793 = vmatprep.mubr.bf16.mxu0 %v8882_v34  ;;  %v2592_v29 = vpack.c.bf16 %v2576_v33, %v2575_v62  ;;  %v3361_v24 = vrot.slane %v3359_v58, 1  ;;  %v7151_v58 = vld [vmem:[#allocation2 + $0x8] ss:$0 sps:$4 sm:$0x11]  }
 0x27e   : > { %v5670_v27 = vcombine.low %v2754_v7, %v2754_v7  ;;  %v5671_v18 = vcombine.high %v2754_v7, %v2754_v7  ;;  %2993 = vst [vmem:[#allocation2 + $0xbc] sm:$0x1] %v5672_v42  ;;  %v3357_v56 = vor.u32 %v3356_v13, %v3352_v22  ;;  %v7137_v15 = vld [vmem:[#allocation2 + $0xb0] ss:$0 sps:$4 sm:$0x11]   ;;  %v3198_v42 = vshll.u32 %v8896_v35, 16 }
 0x27f   : > { %v2699_v54 = vshrl.u32 %v2592_v29, 16  ;;  %v2702_v21 = vshll.u32 %v2592_v29, 16  ;;  %v3446_v63 = vrot.slane %v7137_v15, 1  ;;  %v3371_v62 = vshll.u32 %v7137_v15, 16 }
 0x280   : > { %2991 = vst [vmem:[#allocation2 + $0xb4] sm:$0xf] %v5670_v27  ;;  %2992 = vst [vmem:[#allocation2 + $0xb8] sm:$0xf] %v5671_v18  ;;  %3855 = vmatmul.mubr.bf16.gmra.mxu1 %v8848_v44  ;;  %v8891_v59 = vsel %vm565_vm0, %v3357_v56, %v3361_v24  ;;  %v8893_v53 = vld [vmem:[#allocation2 + $0xa8] sm:$0xff]   ;;  %v3196_v15 = vshrl.u32 %v8896_v35, 16 }
 0x281   : > { %v2701_v30 = vrot.slane %v2699_v54, 7  ;;  %3862 = vmatprep.mubr.bf16.mxu1 %v8891_v59  ;;  %v3445_v9 = vrot.slane %v8893_v53, 1  ;;  %v3366_v43 = vshll.u32 %v8893_v53, 16  ;;  %v3364_v32 = vshrl.u32 %v8893_v53, 16 }
 0x282   : > { %v3373_v13 = vrot.slane %v3371_v62, 1  ;;  %v3200_v54 = vrot.slane %v3198_v42, 1 }
 0x283   : > { %v2704_v60 = vor.u32 %v2702_v21, %v2701_v30  ;;  %v2771_v3 = vsel %vm8460_vm4, %v2701_v30, 0  ;;  %v8904_v57 = vsel %vm774_vm1, %v3445_v9, %v3446_v63  ;;  %v3368_v40 = vrot.slane %v3366_v43, 1 }
 0x284   : > { %v5675_v6 = vcombine.low %v2771_v3, %v2771_v3  ;;  %6794 = vmatmul.mubr.bf16.gmra.mxu0 %v8904_v57  ;;  %v3203_v63 = vshll.u32 %v7151_v58, 16 }
 0x285   : > { %v7141_v5 = vld [vmem:[#allocation2 + $0xbc] ss:$0 sps:$4 sm:$0x11]   ;;  %v2755_v45 = vsel %vm8460_vm4, 0, %v2704_v60  ;;  %v3369_v22 = vor.u32 %v3368_v40, %v3364_v32  ;;  %v3201_v32 = vor.u32 %v3200_v54, %v3196_v15  ;;  %v3403_v15 = vrot.slane %v8896_v35, 1 }
 0x286   : > { %v5673_v33 = vcombine.low %v2755_v45, %v2755_v45  ;;  %v5674_v7 = vcombine.high %v2755_v45, %v2755_v45  ;;  %2996 = vst [vmem:[#allocation2 + $0xc8] sm:$0x1] %v5675_v6  ;;  %v3449_v18 = vrot.slane %v7141_v5, 1  ;;  %v3383_v24 = vshll.u32 %v7141_v5, 16 }
 0x287   : > { %v8910_v27 = vld [vmem:[#allocation2 + $0xb4] sm:$0xff]   ;;  %v8914_v38 = vsel %vm565_vm0, %v3369_v22, %v3373_v13  ;;  %v3205_v6 = vrot.slane %v3203_v63, 1  ;;  %v3404_v54 = vrot.slane %v7151_v58, 1  ;;  %v7164_v63 = vld [vmem:[#allocation6 + $0x228] sm:$0xff]  }
 0x288   : > { %3863 = vmatmul.mubr.bf16.gmra.mxu1 %v8871_v52  ;;  %2994 = vst [vmem:[#allocation2 + $0xc0] sm:$0xf] %v5673_v33  ;;  %2995 = vst [vmem:[#allocation2 + $0xc4] sm:$0xf] %v5674_v7  ;;  %v3448_v29 = vrot.slane %v8910_v27, 1  ;;  %v3378_v56 = vshll.u32 %v8910_v27, 16 }
 0x289   : > { %3870 = vmatprep.mubr.bf16.mxu1 %v8914_v38  ;;  %v3376_v21 = vshrl.u32 %v8910_v27, 16  ;;  %v3385_v62 = vrot.slane %v3383_v24, 1  ;;  %v3206_v7 = vsel %vm565_vm0, %v3201_v32, %v3205_v6  ;;  %v7157_v58 = vld [vmem:[#allocation6 + $0x1e8] sm:$0xff]   ;;  %v7173_v32 = vld [vmem:[#allocation6 + $0x210] sm:$0xff]   ;;  %v8954_v6 = vld [vmem:[#allocation2 + $0x18] sm:$0xff]  }
 0x28a   : > { %v8921_v30 = vsel %vm774_vm1, %v3448_v29, %v3449_v18  ;;  %v3380_v9 = vrot.slane %v3378_v56, 1 }
 0x28b   : > { %6797 = vmatprep.mubr.bf16.mxu0 %v8921_v30 }
 0x28c   : > { %v3381_v43 = vor.u32 %v3380_v9, %v3376_v21  ;;  %v7159_v21 = vld [vmem:[#allocation6 + $0x230] sm:$0xff]   ;;  %v3405_v9 = vsel %vm774_vm1, %v3403_v15, %v3404_v54  ;;  %v7167_v15 = vld [vmem:[#allocation6 + $0x1c8] sm:$0xff]   ;;  %v8966_v54 = vld [vmem:[#allocation2 + $0x30] sm:$0xff]  }
 0x28d   : > { %v7146_v60 = vld [vmem:[#allocation2 + $0xc8] ss:$0 sps:$4 sm:$0x11]  }
 0x28e   : > { %v8926_v3 = vsel %vm565_vm0, %v3381_v43, %v3385_v62  ;;  %v3538_v45 = vrot.slane %v7146_v60, 1  ;;  %v3532_v33 = vshll.u32 %v7146_v60, 16  ;;  %v7169_v43 = vld [vmem:[#allocation6 + $0x220] sm:$0xff]   ;;  %v7153_v62 = vld [vmem:[#allocation6 + $0x1b8] sm:$0xff]  }
 0x28f   : > { %v8929_v40 = vld [vmem:[#allocation2 + $0xc0] sm:$0xff]   ;;  %v7195_v60 = vld [vmem:[#allocation2 + $0xc] sm:$0xff]  }
 0x290   : > { %3871 = vmatmul.mubr.bf16.gmra.mxu1 %v8893_v53  ;;  %v3537_v5 = vrot.slane %v8929_v40, 1  ;;  %v3527_v42 = vshll.u32 %v8929_v40, 16  ;;  %v3525_v13 = vshrl.u32 %v8929_v40, 16  ;;  %v3534_v56 = vrot.slane %v3532_v33, 1  ;;  %v7162_v33 = vld [vmem:[#allocation6 + $0x1d8] sm:$0xff]  }
 0x291   : > { %3878 = vmatprep.mubr.bf16.mxu1 %v8926_v3 }
 0x292   : > { %v8936_v22 = vsel %vm774_vm1, %v3537_v5, %v3538_v45  ;;  %v3529_v18 = vrot.slane %v3527_v42, 1  ;;  %v7158_v5 = vld [vmem:[#allocation6 + $0x1a8] sm:$0xff]   ;;  %v7160_v45 = vld [vmem:[#allocation6 + $0x1e0] sm:$0xff]  }
 0x293   : > { %6798 = vmatmul.mubr.bf16.gmra.mxu0 %v8936_v22  ;;  %v7161_v42 = vld [vmem:[#allocation6 + $0x1a0] sm:$0xff]  }
 0x294   : > { %v3530_v29 = vor.u32 %v3529_v18, %v3525_v13  ;;  %4232 = vmatprep.mubr.bf16.mxu0 %v3206_v7  ;;  %v7175_v7 = vld [vmem:[#allocation6 + $0x200] sm:$0xff]   ;;  %v8960_v13 = vld [vmem:[#allocation2 + $0x24] sm:$0xff]   ;;  %v7163_v18 = vld [vmem:[#allocation6 + $0x198] sm:$0xff]  }
 0x296   : > { %v8942_v24 = vsel %vm565_vm0, %v3530_v29, %v3534_v56  ;;  %v7165_v29 = vld [vmem:[#allocation6 + $0x1d0] sm:$0xff]  }
 0x297   : > { %v7166_v56 = vld [vmem:[#allocation6 + $0x190] sm:$0xff]  }
 0x298   : > { %3879 = vmatmul.mubr.bf16.gmra.mxu1 %v8910_v27 }
 0x299   : > { %3886 = vmatprep.mubr.bf16.mxu1 %v8942_v24 }
 0x29b   : > { %4233 = vmatmul.mubr.bf16.vlgmr.msra.gmra.mxu0 %v8896_v35  ;;  %v7155_v35 = vld [vmem:[#allocation6 + $0x1f0] sm:$0xff]  }
 0x29c   : > { %4240 = vmatprep.mubr.bf16.mxu0 %v8514_v11  ;;  %6850 = vmatpush3.bf16.msra.mxu0 %v8639_v51  ;;  %v7172_v11 = vld [vmem:[#allocation6 + $0x218] sm:$0xff]   ;;  %v7156_v51 = vld [vmem:[#allocation6 + $0x1b0] sm:$0xff]  }
 0x29d   : > { %6851 = vmatprep.subr.bf16.mxu0 %v7159_v21 }
 0x2a0   : > { %3887 = vmatmul.mubr.bf16.gmra.mxu1 %v8929_v40  ;;  %6852 = vmatpush3.bf16.msra.mxu0 %v7159_v21  ;;  %v7168_v21 = vld [vmem:[#allocation6 + $0x188] sm:$0xff]  }
 0x2a1   : > { %6817 = vmatprep.mubr.bf16.mxu1 %v3405_v9  ;;  %6853 = vmatprep.subr.bf16.mxu0 %v7164_v63  ;;  %v7170_v9 = vld [vmem:[#allocation6 + $0x1c0] sm:$0xff]  }
 0x2a3   : > { %4241 = vmatmul.mubr.bf16.gmra.mxu0 %v7195_v60 }
 0x2a4   : > { %4248 = vmatprep.mubr.bf16.mxu0 %v8544_v37  ;;  %6854 = vmatpush3.bf16.msra.mxu0 %v7164_v63  ;;  %v7171_v63 = vld [vmem:[#allocation6 + $0x180] sm:$0xff]  }
 0x2a5   : > { %6855 = vmatprep.subr.bf16.mxu0 %v7169_v43 }
 0x2a8   : > { %6818 = vmatmul.mubr.bf16.vlgmr.msra.gmra.mxu1 %v8497_v17  ;;  %6856 = vmatpush3.bf16.msra.mxu0 %v7169_v43  ;;  %v7174_v17 = vld [vmem:[#allocation6 + $0x208] sm:$0xff]  }
 0x2a9   : > { %6821 = vmatprep.mubr.bf16.mxu1 %v8525_v2  ;;  %6474 = vmatpush3.bf16.msra.mxu1 %v7153_v62  ;;  %v8972_v43 = vld [vmem:[#allocation2 + $0x3c] sm:$0xff]   ;;  %v8978_v62 = vld [vmem:[#allocation2 + $0x48] sm:$0xff]  }
 0x2aa   : > { %6475 = vmatprep.subr.bf16.mxu1 %v7155_v35  ;;  %6857 = vmatprep.subr.bf16.mxu0 %v7172_v11 }
 0x2ab   : > { %4249 = vmatmul.mubr.bf16.gmra.mxu0 %v8954_v6 }
 0x2ac   : > { %4256 = vmatprep.mubr.bf16.mxu0 %v8581_v28  ;;  %6858 = vmatpush3.bf16.msra.mxu0 %v7172_v11 }
 0x2ad   : > { %6476 = vmatpush3.bf16.msra.mxu1 %v7156_v51  ;;  %6859 = vmatprep.subr.bf16.mxu0 %v7173_v32 }
 0x2ae   : > { %6477 = vmatprep.subr.bf16.mxu1 %v7157_v58 }
 0x2b0   : > { %6822 = vmatmul.mubr.bf16.gmra.mxu1 %v8561_v23  ;;  %6860 = vmatpush3.bf16.msra.mxu0 %v7173_v32 }
 0x2b1   : > { %6825 = vmatprep.mubr.bf16.mxu1 %v8593_v31  ;;  %6478 = vmatpush3.bf16.msra.mxu1 %v7158_v5 }
 0x2b2   : > { %6479 = vmatprep.subr.bf16.mxu1 %v7160_v45  ;;  %6861 = vmatprep.subr.bf16.mxu0 %v7174_v17 }
 0x2b3   : > { %4257 = vmatmul.mubr.bf16.gmra.mxu0 %v8960_v13 }
 0x2b4   : > { %4264 = vmatprep.mubr.bf16.mxu0 %v8615_v49  ;;  %6862 = vmatpush3.bf16.msra.mxu0 %v7174_v17 }
 0x2b5   : > { %6480 = vmatpush3.bf16.msra.mxu1 %v7161_v42  ;;  %6863 = vmatprep.subr.bf16.mxu0 %v7175_v7 }
 0x2b6   : > { %6481 = vmatprep.subr.bf16.mxu1 %v7162_v33 }
 0x2b8   : > { %6826 = vmatmul.mubr.bf16.gmra.mxu1 %v8625_v14  ;;  %6864 = vmatpush3.bf16.msra.mxu0 %v7175_v7 }
 0x2b9   : > { %6829 = vmatprep.mubr.bf16.mxu1 %v8661_v25  ;;  %6482 = vmatpush3.bf16.msra.mxu1 %v7163_v18 }
 0x2ba   : > { %6483 = vmatprep.subr.bf16.mxu1 %v7165_v29 }
 0x2bb   : > { %4265 = vmatmul.mubr.bf16.gmra.mxu0 %v8966_v54 }
 0x2bc   : > { %4272 = vmatprep.mubr.bf16.mxu0 %v8655_v50 }
 0x2bd   : > { %6484 = vmatpush3.bf16.msra.mxu1 %v7166_v56 }
 0x2be   : > { %6485 = vmatprep.subr.bf16.mxu1 %v7167_v15 }
 0x2c0   : > { %6830 = vmatmul.mubr.bf16.gmra.mxu1 %v8692_v16 }
 0x2c1   : > { %6833 = vmatprep.mubr.bf16.mxu1 %v8737_v10  ;;  %6486 = vmatpush3.bf16.msra.mxu1 %v7168_v21 }
 0x2c2   : > { %6487 = vmatprep.subr.bf16.mxu1 %v7170_v9 }
 0x2c3   : > { %4273 = vmatmul.mubr.bf16.gmra.mxu0 %v8972_v43 }
 0x2c4   : > { %4280 = vmatprep.mubr.bf16.mxu0 %v8687_v36 }
 0x2c5   : > { %6488 = vmatpush3.bf16.msra.mxu1 %v7171_v63 }
 0x2c8   : > { %6834 = vmatmul.mubr.bf16.gmra.mxu1 %v8771_v19 }
 0x2c9   : > { %6837 = vmatprep.mubr.bf16.mxu1 %v8799_v41 }
 0x2cb   : > { %4281 = vmatmul.mubr.bf16.gmra.mxu0 %v8978_v62 }
 0x2cc   : > { %4288 = vmatprep.mubr.bf16.mxu0 %v8734_v48 }
 0x2d0   : > { %6838 = vmatmul.mubr.bf16.gmra.mxu1 %v8829_v8 }
 0x2d1   : > { %6841 = vmatprep.mubr.bf16.mxu1 %v8863_v12 }
 0x2d3   : > { %4289 = vmatmul.mubr.bf16.gmra.mxu0 %v8677_v61 }
 0x2d4   : > { %4296 = vmatprep.mubr.bf16.mxu0 %v8764_v20 }
 0x2d8   : > { %6842 = vmatmul.mubr.bf16.gmra.mxu1 %v8882_v34 }
 0x2d9   : > { %6845 = vmatprep.mubr.bf16.mxu1 %v8904_v57 }
 0x2db   : > { %4297 = vmatmul.mubr.bf16.gmra.mxu0 %v8717_v46 }
 0x2dc   : > { %4304 = vmatprep.mubr.bf16.mxu0 %v8810_v4 }
 0x2e0   : > { %6846 = vmatmul.mubr.bf16.gmra.mxu1 %v8921_v30 }
 0x2e1   : > { %4773 = vmatprep.mubr.bf16.mxu1 %v8544_v37  ;;  %v6217_v60 = vpop.f32.mrf.mxu1 }
 0x2e2   : > { %v6771_v11 = vpop.f32.mrf.mxu0 }
 0x2e3   : > { %v6218_v35 = vpop.f32.mrf.mxu1  ;;  %4305 = vmatmul.mubr.bf16.gmra.mxu0 %v8753_v55 }
 0x2e4   : > { %v6219_v51 = vadd.f32 %v6218_v35, %v6217_v60  ;;  %4312 = vmatprep.mubr.bf16.mxu0 %v8835_v26  ;;  %v3929_v58 = vpop.f32.mrf.mxu0 }
 0x2e5   : > { %v6220_v61 = vpop.f32.mrf.mxu1 }
 0x2e6   : > { %v8994_v32 = vadd.f32 %v6219_v51, %v3929_v58  ;;  %v6772_v33 = vpop.f32.mrf.mxu0 }
 0x2e7   : > { %v6221_v46 = vpop.f32.mrf.mxu1 }
 0x2e8   : > { %4774 = vmatmul.mubr.bf16.vlgmr.msra.gmra.mxu1 %v8954_v6  ;;  %v8998_v5 = vadd.f32 %v6221_v46, %v6220_v61 }
 0x2e9   : > { %4781 = vmatprep.mubr.bf16.mxu1 %v8581_v28  ;;  %v6223_v37 = vpop.f32.mrf.mxu1  ;;  %v9006_v28 = vpop.f32.mrf.mxu0 }
 0x2eb   : > { %v6224_v45 = vpop.f32.mrf.mxu1  ;;  %4313 = vmatmul.mubr.bf16.gmra.mxu0 %v8788_v47 }
 0x2ec   : > { %v6225_v17 = vadd.f32 %v6224_v45, %v6223_v37  ;;  %4320 = vmatprep.mubr.bf16.mxu0 %v8860_v0 }
 0x2ed   : > { %v6226_v42 = vpop.f32.mrf.mxu1 }
 0x2ee   : > { %v9002_v7 = vadd.f32 %v6771_v11, %v6225_v17 }
 0x2ef   : > { %v6227_v18 = vpop.f32.mrf.mxu1 }
 0x2f0   : > { %4782 = vmatmul.mubr.bf16.gmra.mxu1 %v8960_v13  ;;  %v6228_v6 = vadd.f32 %v6227_v18, %v6226_v42 }
 0x2f1   : > { %4789 = vmatprep.mubr.bf16.mxu1 %v8615_v49 }
 0x2f2   : > { %v9008_v29 = vadd.f32 %v6772_v33, %v6228_v6 }
 0x2f3   : > { %v6229_v56 = vpop.f32.mrf.mxu1  ;;  %4321 = vmatmul.mubr.bf16.gmra.mxu0 %v8818_v1 }
 0x2f4   : > { %v6775_v21 = vpop.f32.mrf.mxu0  ;;  %4328 = vmatprep.mubr.bf16.mxu0 %v8879_v39 }
 0x2f5   : > { %v6230_v15 = vpop.f32.mrf.mxu1 }
 0x2f6   : > { %v6231_v9 = vadd.f32 %v6230_v15, %v6229_v56  ;;  %v3945_v60 = vpop.f32.mrf.mxu0 }
 0x2f7   : > { %v6232_v63 = vpop.f32.mrf.mxu1 }
 0x2f8   : > { %4790 = vmatmul.mubr.bf16.gmra.mxu1 %v8966_v54  ;;  %v9013_v13 = vadd.f32 %v6231_v9, %v3945_v60  ;;  %v6776_v58 = vpop.f32.mrf.mxu0 }
 0x2f9   : > { %4797 = vmatprep.mubr.bf16.mxu1 %v8655_v50  ;;  %v6233_v49 = vpop.f32.mrf.mxu1 }
 0x2fa   : > { %v9016_v35 = vadd.f32 %v6233_v49, %v6232_v63  ;;  %v9024_v45 = vpop.f32.mrf.mxu0 }
 0x2fb   : > { %4329 = vmatmul.mubr.bf16.gmra.mxu0 %v8848_v44 }
 0x2fc   : > { %v6235_v11 = vpop.f32.mrf.mxu1  ;;  %4336 = vmatprep.mubr.bf16.mxu0 %v8891_v59 }
 0x2fe   : > { %v6236_v51 = vpop.f32.mrf.mxu1 }
 0x2ff   : > { %v6237_v61 = vadd.f32 %v6236_v51, %v6235_v11 }
 0x300   : > { %4798 = vmatmul.mubr.bf16.gmra.mxu1 %v8972_v43  ;;  %v6238_v46 = vpop.f32.mrf.mxu1 }
 0x301   : > { %4805 = vmatprep.mubr.bf16.mxu1 %v8687_v36  ;;  %v9022_v54 = vadd.f32 %v6775_v21, %v6237_v61 }
 0x302   : > { %v6239_v37 = vpop.f32.mrf.mxu1 }
 0x303   : > { %v6240_v50 = vadd.f32 %v6239_v37, %v6238_v46  ;;  %4337 = vmatmul.mubr.bf16.gmra.mxu0 %v8871_v52 }
 0x304   : > { %4344 = vmatprep.mubr.bf16.mxu0 %v8914_v38 }
 0x305   : > { %v9026_v17 = vadd.f32 %v6776_v58, %v6240_v50  ;;  %v6241_v42 = vpop.f32.mrf.mxu1  ;;  %v6779_v33 = vpop.f32.mrf.mxu0 }
 0x307   : > { %v6242_v18 = vpop.f32.mrf.mxu1  ;;  %v3961_v6 = vpop.f32.mrf.mxu0 }
 0x308   : > { %4806 = vmatmul.mubr.bf16.gmra.mxu1 %v8978_v62  ;;  %v6243_v43 = vadd.f32 %v6242_v18, %v6241_v42  ;;  %v7201_v62 = vld [vmem:[#allocation2 + $0x54] sm:$0xff]   ;;  %v7202_v18 = vld [vmem:[#allocation2 + $0x60] sm:$0xff]  }
 0x309   : > { %4813 = vmatprep.mubr.bf16.mxu1 %v8734_v48  ;;  %v6244_v36 = vpop.f32.mrf.mxu1  ;;  %v6780_v15 = vpop.f32.mrf.mxu0 }
 0x30a   : > { %v9032_v56 = vadd.f32 %v6243_v43, %v3961_v6 }
 0x30b   : > { %v6245_v21 = vpop.f32.mrf.mxu1  ;;  %v3964_v63 = vpop.f32.mrf.mxu0  ;;  %4345 = vmatmul.mubr.bf16.gmra.mxu0 %v8893_v53 }
 0x30c   : > { %v6246_v9 = vadd.f32 %v6245_v21, %v6244_v36  ;;  %4352 = vmatprep.mubr.bf16.mxu0 %v8926_v3 }
 0x30d   : > { %v6247_v60 = vpop.f32.mrf.mxu1 }
 0x30e   : > { %v9035_v49 = vadd.f32 %v6246_v9, %v3964_v63 }
 0x30f   : > { %v6248_v11 = vpop.f32.mrf.mxu1 }
 0x310   : > { %4814 = vmatmul.mubr.bf16.gmra.mxu1 %v7201_v62  ;;  %v6249_v51 = vadd.f32 %v6248_v11, %v6247_v60 }
 0x311   : > { %4821 = vmatprep.mubr.bf16.mxu1 %v8764_v20  ;;  %v6250_v48 = vpop.f32.mrf.mxu1 }
 0x312   : > { %v9039_v61 = vadd.f32 %v6779_v33, %v6249_v51 }
 0x313   : > { %v6251_v58 = vpop.f32.mrf.mxu1  ;;  %4353 = vmatmul.mubr.bf16.gmra.mxu0 %v8910_v27 }
 0x314   : > { %v6252_v46 = vadd.f32 %v6251_v58, %v6250_v48  ;;  %6865 = vmatprep.mubr.bf16.mxu0 %v8525_v2 }
 0x315   : > { %v6783_v42 = vpop.f32.mrf.mxu0 }
 0x316   : > { %v9042_v37 = vadd.f32 %v6780_v15, %v6252_v46  ;;  %v6253_v50 = vpop.f32.mrf.mxu1 }
 0x317   : > { %v3977_v6 = vpop.f32.mrf.mxu0 }
 0x318   : > { %4822 = vmatmul.mubr.bf16.gmra.mxu1 %v7202_v18  ;;  %v6254_v43 = vpop.f32.mrf.mxu1 }
 0x319   : > { %4829 = vmatprep.mubr.bf16.mxu1 %v8810_v4  ;;  %v6255_v20 = vadd.f32 %v6254_v43, %v6253_v50  ;;  %v6784_v33 = vpop.f32.mrf.mxu0 }
 0x31a   : > { %v6256_v36 = vpop.f32.mrf.mxu1 }
 0x31b   : > { %v9046_v21 = vadd.f32 %v6255_v20, %v3977_v6  ;;  %v3980_v63 = vpop.f32.mrf.mxu0  ;;  %6866 = vmatmul.mubr.bf16.vlgmr.msra.gmra.mxu0 %v8561_v23 }
 0x31c   : > { %v6257_v9 = vpop.f32.mrf.mxu1  ;;  %6869 = vmatprep.mubr.bf16.mxu0 %v8593_v31 }
 0x31d   : > { %v6258_v60 = vadd.f32 %v6257_v9, %v6256_v36 }
 0x31e   : > { %v6259_v15 = vpop.f32.mrf.mxu1 }
 0x31f   : > { %v9050_v2 = vadd.f32 %v6258_v60, %v3980_v63 }
 0x320   : > { %4830 = vmatmul.mubr.bf16.gmra.mxu1 %v8753_v55  ;;  %v6260_v11 = vpop.f32.mrf.mxu1 }
 0x321   : > { %4837 = vmatprep.mubr.bf16.mxu1 %v8835_v26  ;;  %v6261_v4 = vadd.f32 %v6260_v11, %v6259_v15 }
 0x322   : > { %v6262_v62 = vpop.f32.mrf.mxu1 }
 0x323   : > { %v9054_v51 = vadd.f32 %v6783_v42, %v6261_v4  ;;  %6870 = vmatmul.mubr.bf16.gmra.mxu0 %v8625_v14 }
 0x324   : > { %v6263_v48 = vpop.f32.mrf.mxu1  ;;  %6873 = vmatprep.mubr.bf16.mxu0 %v8661_v25 }
 0x325   : > { %v6264_v58 = vadd.f32 %v6263_v48, %v6262_v62  ;;  %v6787_v46 = vpop.f32.mrf.mxu0 }
 0x327   : > { %v9058_v23 = vadd.f32 %v6784_v33, %v6264_v58  ;;  %v3993_v31 = vpop.f32.mrf.mxu0 }
 0x328   : > { %v6265_v50 = vpop.f32.mrf.mxu1  ;;  %4838 = vmatmul.mubr.bf16.gmra.mxu1 %v8788_v47 }
 0x329   : > { %4845 = vmatprep.mubr.bf16.mxu1 %v8860_v0  ;;  %v6788_v26 = vpop.f32.mrf.mxu0 }
 0x32a   : > { %v6266_v55 = vpop.f32.mrf.mxu1 }
 0x32b   : > { %v6267_v18 = vadd.f32 %v6266_v55, %v6265_v50  ;;  %6874 = vmatmul.mubr.bf16.gmra.mxu0 %v8692_v16  ;;  %v3996_v14 = vpop.f32.mrf.mxu0 }
 0x32c   : > { %v6268_v42 = vpop.f32.mrf.mxu1  ;;  %6877 = vmatprep.mubr.bf16.mxu0 %v8737_v10 }
 0x32d   : > { %v9062_v43 = vadd.f32 %v6267_v18, %v3993_v31 }
 0x32e   : > { %v6269_v6 = vpop.f32.mrf.mxu1 }
 0x32f   : > { %v6270_v25 = vadd.f32 %v6269_v6, %v6268_v42 }
 0x330   : > { %v6271_v20 = vpop.f32.mrf.mxu1  ;;  %4846 = vmatmul.mubr.bf16.gmra.mxu1 %v8818_v1 }
 0x331   : > { %v9067_v36 = vadd.f32 %v6270_v25, %v3996_v14  ;;  %4853 = vmatprep.mubr.bf16.mxu1 %v8879_v39  ;;  %v7177_v25 = vld [vmem:[#allocation2 + $0xd4] ss:$0 sps:$4 sm:$0x11]  }
 0x332   : > { %v6272_v47 = vpop.f32.mrf.mxu1 }
 0x333   : > { %v6273_v0 = vadd.f32 %v6272_v47, %v6271_v20  ;;  %6878 = vmatmul.mubr.bf16.gmra.mxu0 %v8771_v19 }
 0x334   : > { %v6274_v33 = vpop.f32.mrf.mxu1  ;;  %6881 = vmatprep.mubr.bf16.mxu0 %v8799_v41 }
 0x335   : > { %v9070_v9 = vadd.f32 %v6787_v46, %v6273_v0 }
 0x336   : > { %v6275_v16 = vpop.f32.mrf.mxu1 }
 0x337   : > { %v6276_v63 = vadd.f32 %v6275_v16, %v6274_v33  ;;  %v6791_v10 = vpop.f32.mrf.mxu0 }
 0x338   : > { %v6277_v60 = vpop.f32.mrf.mxu1  ;;  %4854 = vmatmul.mubr.bf16.gmra.mxu1 %v8848_v44 }
 0x339   : > { %v9075_v1 = vadd.f32 %v6788_v26, %v6276_v63  ;;  %4861 = vmatprep.mubr.bf16.mxu1 %v8891_v59  ;;  %v4009_v39 = vpop.f32.mrf.mxu0 }
 0x33a   : > { %v6278_v15 = vpop.f32.mrf.mxu1 }
 0x33b   : > { %v6279_v11 = vadd.f32 %v6278_v15, %v6277_v60  ;;  %v6792_v4 = vpop.f32.mrf.mxu0  ;;  %6882 = vmatmul.mubr.bf16.gmra.mxu0 %v8829_v8  ;;  %v4539_v60 = vshll.u32 %v7177_v25, 16 }
 0x33c   : > { %v6280_v62 = vpop.f32.mrf.mxu1  ;;  %6885 = vmatprep.mubr.bf16.mxu0 %v8863_v12  ;;  %v7176_v12 = vld [vmem:[#allocation2 + $0xcc] sm:$0xff]  }
 0x33d   : > { %v9078_v48 = vadd.f32 %v6279_v11, %v4009_v39  ;;  %v4012_v41 = vpop.f32.mrf.mxu0  ;;  %v4534_v20 = vshll.u32 %v7176_v12, 16  ;;  %v4532_v63 = vshrl.u32 %v7176_v12, 16 }
 0x33e   : > { %v6281_v19 = vpop.f32.mrf.mxu1 }
 0x33f   : > { %v6282_v58 = vadd.f32 %v6281_v19, %v6280_v62  ;;  %v4541_v62 = vrot.slane %v4539_v60, 1  ;;  %v3933_v60 = vadd.f32 %v8998_v5, %v9006_v28 }
 0x340   : > { %v6283_v46 = vpop.f32.mrf.mxu1  ;;  %4862 = vmatmul.mubr.bf16.gmra.mxu1 %v8871_v52 }
 0x341   : > { %v9083_v44 = vadd.f32 %v6282_v58, %v4012_v41  ;;  %4869 = vmatprep.mubr.bf16.mxu1 %v8914_v38 }
 0x342   : > { %v6284_v59 = vpop.f32.mrf.mxu1 }
 0x343   : > { %v6285_v31 = vadd.f32 %v6284_v59, %v6283_v46  ;;  %6886 = vmatmul.mubr.bf16.gmra.mxu0 %v8882_v34 }
 0x344   : > { %v6286_v50 = vpop.f32.mrf.mxu1  ;;  %v6795_v26 = vpop.f32.mrf.mxu0  ;;  %6889 = vmatprep.mubr.bf16.mxu0 %v8904_v57  ;;  %v4544_v57 = vrot.slane %v7176_v12, 1 }
 0x345   : > { %v9086_v55 = vadd.f32 %v6791_v10, %v6285_v31  ;;  %v4536_v10 = vrot.slane %v4534_v20, 1 }
 0x346   : > { %v6287_v8 = vpop.f32.mrf.mxu1  ;;  %v4025_v52 = vpop.f32.mrf.mxu0 }
 0x347   : > { %v6288_v18 = vadd.f32 %v6287_v8, %v6286_v50 }
 0x348   : > { %v6289_v42 = vpop.f32.mrf.mxu1  ;;  %4870 = vmatmul.mubr.bf16.gmra.mxu1 %v8893_v53  ;;  %v6796_v14 = vpop.f32.mrf.mxu0  ;;  %v4545_v53 = vrot.slane %v7177_v25, 1 }
 0x349   : > { %v9091_v6 = vadd.f32 %v6792_v4, %v6288_v18  ;;  %4877 = vmatprep.mubr.bf16.mxu1 %v8926_v3  ;;  %v4537_v4 = vor.u32 %v4536_v10, %v4532_v63 }
 0x34a   : > { %v6290_v38 = vpop.f32.mrf.mxu1  ;;  %v4028_v16 = vpop.f32.mrf.mxu0 }
 0x34b   : > { %v6291_v47 = vadd.f32 %v6290_v38, %v6289_v42  ;;  %6890 = vmatmul.mubr.bf16.gmra.mxu0 %v8921_v30  ;;  %v4546_v30 = vsel %vm774_vm1, %v4544_v57, %v4545_v53  ;;  %v4542_v59 = vsel %vm565_vm0, %v4537_v4, %v4541_v62 }
 0x34c   : > { %v6292_v34 = vpop.f32.mrf.mxu1  ;;  %6893 = vmatprep.mubr.bf16.mxu0 %v8936_v22 }
 0x34d   : > { %v9094_v0 = vadd.f32 %v6291_v47, %v4025_v52 }
 0x34e   : > { %v6293_v33 = vpop.f32.mrf.mxu1 }
 0x34f   : > { %v6294_v3 = vadd.f32 %v6293_v33, %v6292_v34 }
 0x350   : > { %v6295_v39 = vpop.f32.mrf.mxu1  ;;  %4878 = vmatmul.mubr.bf16.gmra.mxu1 %v8910_v27 }
 0x351   : > { %v9099_v15 = vadd.f32 %v6294_v3, %v4028_v16  ;;  %4885 = vmatprep.mubr.bf16.mxu1 %v8942_v24 }
 0x352   : > { %v6296_v11 = vpop.f32.mrf.mxu1 }
 0x353   : > { %v6297_v19 = vadd.f32 %v6296_v11, %v6295_v39  ;;  %v6799_v58 = vpop.f32.mrf.mxu0  ;;  %6894 = vmatmul.mubr.bf16.gmra.mxu0 %v4546_v30 }
 0x354   : > { %v6298_v41 = vpop.f32.mrf.mxu1 }
 0x355   : > { %v9103_v22 = vadd.f32 %v6795_v26, %v6297_v19  ;;  %v4041_v27 = vpop.f32.mrf.mxu0 }
 0x356   : > { %v6299_v46 = vpop.f32.mrf.mxu1 }
 0x357   : > { %v6300_v31 = vadd.f32 %v6299_v46, %v6298_v41  ;;  %v6800_v8 = vpop.f32.mrf.mxu0 }
 0x358   : > { %v6301_v50 = vpop.f32.mrf.mxu1  ;;  %4886 = vmatmul.mubr.bf16.gmra.mxu1 %v8929_v40 }
 0x359   : > { %v9107_v24 = vadd.f32 %v6796_v14, %v6300_v31  ;;  %4893 = vmatprep.mubr.bf16.mxu1 %v4542_v59  ;;  %v4044_v52 = vpop.f32.mrf.mxu0 }
 0x35a   : > { %v6302_v18 = vpop.f32.mrf.mxu1 }
 0x35b   : > { %v6303_v42 = vadd.f32 %v6302_v18, %v6301_v50  ;;  %v6353_v25 = vpop.f32.mrf.mxu0 }
 0x35c   : > { %v6304_v38 = vpop.f32.mrf.mxu1 }
 0x35d   : > { %v9109_v26 = vadd.f32 %v6303_v42, %v4041_v27  ;;  %v6354_v34 = vpop.f32.mrf.mxu0 }
 0x35e   : > { %v6305_v20 = vpop.f32.mrf.mxu1  ;;  %v6355_v33 = vadd.f32 %v6354_v34, %v6353_v25 }
 0x35f   : > { %v6306_v47 = vadd.f32 %v6305_v20, %v6304_v38  ;;  %v6356_v40 = vpop.f32.mrf.mxu0 }
 0x360   : > { %v6307_v57 = vpop.f32.mrf.mxu1  ;;  %4894 = vmatmul.mubr.bf16.gmra.mxu1 %v7176_v12  ;;  %v4235_v53 = vadd.f32 %v6355_v33, %v8994_v32 }
 0x361   : > { %v9111_v16 = vadd.f32 %v6306_v47, %v4044_v52  ;;  %v6357_v10 = vpop.f32.mrf.mxu0 }
 0x362   : > { %v6308_v14 = vpop.f32.mrf.mxu1  ;;  %v6358_v39 = vadd.f32 %v6357_v10, %v6356_v40 }
 0x363   : > { %v6309_v63 = vadd.f32 %v6308_v14, %v6307_v57  ;;  %v6359_v30 = vpop.f32.mrf.mxu0  ;;  %v3949_v14 = vadd.f32 %v9016_v35, %v9024_v45 }
 0x364   : > { %v6310_v3 = vpop.f32.mrf.mxu1  ;;  %v4238_v62 = vadd.f32 %v6358_v39, %v3933_v60 }
 0x365   : > { %v9116_v11 = vadd.f32 %v6799_v58, %v6309_v63  ;;  %v6360_v19 = vpop.f32.mrf.mxu0 }
 0x366   : > { %v6311_v4 = vpop.f32.mrf.mxu1  ;;  %v6361_v46 = vadd.f32 %v6360_v19, %v6359_v30 }
 0x367   : > { %v6312_v12 = vadd.f32 %v6311_v4, %v6310_v3  ;;  %v6362_v31 = vpop.f32.mrf.mxu0 }
 0x368   : > { %v6819_v41 = vpop.f32.mrf.mxu1  ;;  %v4243_v27 = vadd.f32 %v6361_v46, %v9002_v7 }
 0x369   : > { %v9118_v59 = vadd.f32 %v6800_v8, %v6312_v12  ;;  %v6363_v5 = vpop.f32.mrf.mxu0 }
 0x36a   : > { %v4395_v32 = vpop.f32.mrf.mxu1  ;;  %v6364_v18 = vadd.f32 %v6363_v5, %v6362_v31  ;;  %v9123_v58 = vadd.f32 %v6819_v41, %v4243_v27 }
 0x36b   : > { %v9121_v50 = vadd.f32 %v4395_v32, %v4235_v53  ;;  %v6365_v42 = vpop.f32.mrf.mxu0 }
 0x36c   : > { %v6820_v28 = vpop.f32.mrf.mxu1  ;;  %v4246_v38 = vadd.f32 %v6364_v18, %v9008_v29 }
 0x36d   : > { %v6366_v20 = vpop.f32.mrf.mxu0 }
 0x36e   : > { %v4398_v52 = vpop.f32.mrf.mxu1  ;;  %v6367_v47 = vadd.f32 %v6366_v20, %v6365_v42  ;;  %v9128_v34 = vadd.f32 %v6820_v28, %v4246_v38 }
 0x36f   : > { %v9126_v25 = vadd.f32 %v4398_v52, %v4238_v62  ;;  %v6368_v57 = vpop.f32.mrf.mxu0 }
 0x370   : > { %v6823_v8 = vpop.f32.mrf.mxu1  ;;  %v4251_v33 = vadd.f32 %v6367_v47, %v9013_v13 }
 0x371   : > { %v6369_v40 = vpop.f32.mrf.mxu0 }
 0x372   : > { %v4411_v7 = vpop.f32.mrf.mxu1  ;;  %v6370_v63 = vadd.f32 %v6369_v40, %v6368_v57 }
 0x373   : > { %v9133_v10 = vadd.f32 %v4411_v7, %v4251_v33  ;;  %v6371_v29 = vpop.f32.mrf.mxu0 }
 0x374   : > { %v6824_v53 = vpop.f32.mrf.mxu1  ;;  %v4254_v3 = vadd.f32 %v6370_v63, %v3949_v14 }
 0x375   : > { %v6372_v39 = vpop.f32.mrf.mxu0 }
 0x376   : > { %v4414_v60 = vpop.f32.mrf.mxu1  ;;  %v6373_v4 = vadd.f32 %v6372_v39, %v6371_v29 }
 0x377   : > { %v9135_v62 = vadd.f32 %v4414_v60, %v4254_v3  ;;  %v6374_v12 = vpop.f32.mrf.mxu0 }
 0x378   : > { %v6827_v30 = vpop.f32.mrf.mxu1  ;;  %v4259_v13 = vadd.f32 %v6373_v4, %v9022_v54 }
 0x379   : > { %v6375_v41 = vpop.f32.mrf.mxu0 }
 0x37a   : > { %v4427_v19 = vpop.f32.mrf.mxu1  ;;  %v6376_v31 = vadd.f32 %v6375_v41, %v6374_v12  ;;  %v9138_v35 = vadd.f32 %v6823_v8, %v4259_v13 }
 0x37b   : > { %v6377_v45 = vpop.f32.mrf.mxu0 }
 0x37c   : > { %v6828_v46 = vpop.f32.mrf.mxu1  ;;  %v4262_v27 = vadd.f32 %v6376_v31, %v9026_v17 }
 0x37d   : > { %v6378_v5 = vpop.f32.mrf.mxu0 }
 0x37e   : > { %v4430_v32 = vpop.f32.mrf.mxu1  ;;  %v6379_v18 = vadd.f32 %v6378_v5, %v6377_v45  ;;  %v9141_v42 = vadd.f32 %v6824_v53, %v4262_v27 }
 0x37f   : > { %v6380_v52 = vpop.f32.mrf.mxu0 }
 0x380   : > { %v6831_v28 = vpop.f32.mrf.mxu1  ;;  %v4267_v20 = vadd.f32 %v6379_v18, %v9032_v56 }
 0x381   : > { %v6381_v47 = vpop.f32.mrf.mxu0 }
 0x382   : > { %v4443_v38 = vpop.f32.mrf.mxu1  ;;  %v6382_v57 = vadd.f32 %v6381_v47, %v6380_v52  ;;  %v9144_v7 = vadd.f32 %v4427_v19, %v4267_v20 }
 0x383   : > { %v6383_v8 = vpop.f32.mrf.mxu0 }
 0x384   : > { %v6832_v54 = vpop.f32.mrf.mxu1  ;;  %v4270_v40 = vadd.f32 %v6382_v57, %v9035_v49 }
 0x385   : > { %v6384_v14 = vpop.f32.mrf.mxu0 }
 0x386   : > { %v4446_v33 = vpop.f32.mrf.mxu1  ;;  %v6385_v63 = vadd.f32 %v6384_v14, %v6383_v8  ;;  %v9149_v29 = vadd.f32 %v4430_v32, %v4270_v40 }
 0x387   : > { %v6386_v53 = vpop.f32.mrf.mxu0 }
 0x388   : > { %v9147_v17 = vpop.f32.mrf.mxu1  ;;  %v4275_v3 = vadd.f32 %v6385_v63, %v9039_v61 }
 0x389   : > { %v6387_v56 = vpop.f32.mrf.mxu0 }
 0x38a   : > { %v4459_v60 = vpop.f32.mrf.mxu1  ;;  %v6388_v4 = vadd.f32 %v6387_v56, %v6386_v53  ;;  %v9154_v12 = vadd.f32 %v6827_v30, %v4275_v3 }
 0x38b   : > { %v6389_v19 = vpop.f32.mrf.mxu0 }
 0x38c   : > { %v9152_v39 = vpop.f32.mrf.mxu1  ;;  %v4278_v49 = vadd.f32 %v6388_v4, %v9042_v37 }
 0x38d   : > { %v6390_v41 = vpop.f32.mrf.mxu0 }
 0x38e   : > { %v4462_v13 = vpop.f32.mrf.mxu1  ;;  %v6391_v45 = vadd.f32 %v6390_v41, %v6389_v19  ;;  %v9159_v32 = vadd.f32 %v6828_v46, %v4278_v49 }
 0x38f   : > { %v6392_v27 = vpop.f32.mrf.mxu0 }
 0x390   : > { %v9157_v31 = vpop.f32.mrf.mxu1  ;;  %v4283_v61 = vadd.f32 %v6391_v45, %v9046_v21 }
 0x391   : > { %v6393_v18 = vpop.f32.mrf.mxu0 }
 0x392   : > { %v4475_v5 = vpop.f32.mrf.mxu1  ;;  %v6394_v20 = vadd.f32 %v6393_v18, %v6392_v27  ;;  %v9164_v30 = vadd.f32 %v4443_v38, %v4283_v61 }
 0x393   : > { %v6395_v47 = vpop.f32.mrf.mxu0 }
 0x394   : > { %v9162_v52 = vpop.f32.mrf.mxu1  ;;  %v4286_v37 = vadd.f32 %v6394_v20, %v9050_v2 }
 0x395   : > { %v6396_v8 = vpop.f32.mrf.mxu0 }
 0x396   : > { %v4478_v57 = vpop.f32.mrf.mxu1  ;;  %v6397_v14 = vadd.f32 %v6396_v8, %v6395_v47  ;;  %v9169_v46 = vadd.f32 %v4446_v33, %v4286_v37 }
 0x397   : > { %v6398_v63 = vpop.f32.mrf.mxu0 }
 0x398   : > { %v9167_v40 = vpop.f32.mrf.mxu1  ;;  %v4291_v21 = vadd.f32 %v6397_v14, %v9054_v51 }
 0x399   : > { %v6399_v3 = vpop.f32.mrf.mxu0 }
 0x39a   : > { %v9171_v53 = vpop.f32.mrf.mxu1  ;;  %v6400_v38 = vadd.f32 %v6399_v3, %v6398_v63  ;;  %v9176_v4 = vadd.f32 %v6831_v28, %v4291_v21 }
 0x39b   : > { %v6401_v19 = vpop.f32.mrf.mxu0 }
 0x39c   : > { %v9174_v56 = vpop.f32.mrf.mxu1  ;;  %v4294_v2 = vadd.f32 %v6400_v38, %v9058_v23 }
 0x39d   : > { %v6402_v41 = vpop.f32.mrf.mxu0 }
 0x39e   : > { %v9178_v49 = vpop.f32.mrf.mxu1  ;;  %v6403_v33 = vadd.f32 %v6402_v41, %v6401_v19  ;;  %v9183_v27 = vadd.f32 %v6832_v54, %v4294_v2 }
 0x39f   : > { %v6404_v61 = vpop.f32.mrf.mxu0 }
 0x3a0   : > { %v9181_v45 = vpop.f32.mrf.mxu1  ;;  %v4299_v51 = vadd.f32 %v6403_v33, %v9062_v43 }
 0x3a1   : > { %v6405_v20 = vpop.f32.mrf.mxu0 }
 0x3a2   : > { %v9185_v18 = vpop.f32.mrf.mxu1  ;;  %v6406_v28 = vadd.f32 %v6405_v20, %v6404_v61  ;;  %v9190_v37 = vadd.f32 %v4459_v60, %v4299_v51 }
 0x3a3   : > { %v6407_v8 = vpop.f32.mrf.mxu0 }
 0x3a4   : > { %v9188_v47 = vpop.f32.mrf.mxu1  ;;  %v4302_v23 = vadd.f32 %v6406_v28, %v9067_v36 }
 0x3a5   : > { %v6408_v63 = vpop.f32.mrf.mxu0 }
 0x3a6   : > { %v9192_v14 = vpop.f32.mrf.mxu1  ;;  %v6409_v54 = vadd.f32 %v6408_v63, %v6407_v8  ;;  %v9197_v3 = vadd.f32 %v4462_v13, %v4302_v23 }
 0x3a7   : > { %v6410_v38 = vpop.f32.mrf.mxu0 }
 0x3a8   : > { %v9195_v21 = vpop.f32.mrf.mxu1  ;;  %9638 = vst [vmem:[#allocation13_spill] sm:$0xff] %v9197_v3  ;;  %v4307_v43 = vadd.f32 %v6409_v54, %v9070_v9 }
 0x3a9   : > { %v6411_v2 = vpop.f32.mrf.mxu0 }
 0x3aa   : > { %v9199_v19 = vpop.f32.mrf.mxu1  ;;  %v6412_v60 = vadd.f32 %v6411_v2, %v6410_v38  ;;  %v9205_v33 = vadd.f32 %v9147_v17, %v4307_v43 }
 0x3ab   : > { %v6413_v61 = vpop.f32.mrf.mxu0 }
 0x3ac   : > { %v9202_v41 = vpop.f32.mrf.mxu1  ;;  %v4310_v51 = vadd.f32 %v6412_v60, %v9075_v1 }
 0x3ad   : > { %v6414_v20 = vpop.f32.mrf.mxu0 }
 0x3ae   : > { %v9207_v36 = vpop.f32.mrf.mxu1  ;;  %v6415_v28 = vadd.f32 %v6414_v20, %v6413_v61  ;;  %v9213_v8 = vadd.f32 %v9152_v39, %v4310_v51 }
 0x3af   : > { %v6416_v9 = vpop.f32.mrf.mxu0 }
 0x3b0   : > { %v9210_v13 = vpop.f32.mrf.mxu1  ;;  %9639 = vst [vmem:[#allocation14_spill] sm:$0xff] %v9213_v8  ;;  %v4315_v63 = vadd.f32 %v6415_v28, %v9078_v48 }
 0x3b1   : > { %v6417_v54 = vpop.f32.mrf.mxu0 }
 0x3b2   : > { %v9215_v23 = vpop.f32.mrf.mxu1  ;;  %v6418_v38 = vadd.f32 %v6417_v54, %v6416_v9  ;;  %v9220_v43 = vadd.f32 %v4475_v5, %v4315_v63 }
 0x3b3   : > { %v6419_v2 = vpop.f32.mrf.mxu0 }
 0x3b4   : > { %v9218_v17 = vpop.f32.mrf.mxu1  ;;  %v4318_v60 = vadd.f32 %v6418_v38, %v9083_v44 }
 0x3b5   : > { %v6420_v61 = vpop.f32.mrf.mxu0 }
 0x3b6   : > { %v9222_v1 = vpop.f32.mrf.mxu1  ;;  %v6421_v39 = vadd.f32 %v6420_v61, %v6419_v2  ;;  %v9227_v51 = vadd.f32 %v4478_v57, %v4318_v60 }
 0x3b7   : > { %v6422_v3 = vpop.f32.mrf.mxu0 }
 0x3b8   : > { %v9225_v20 = vpop.f32.mrf.mxu1  ;;  %9640 = vst [vmem:[#allocation15_spill] sm:$0xff] %v9227_v51  ;;  %v4323_v48 = vadd.f32 %v6421_v39, %v9086_v55 }
 0x3b9   : > { %v6423_v28 = vpop.f32.mrf.mxu0 }
 0x3ba   : > { %v9229_v8 = vpop.f32.mrf.mxu1  ;;  %v6424_v5 = vadd.f32 %v6423_v28, %v6422_v3  ;;  %v9235_v63 = vadd.f32 %v9157_v31, %v4323_v48 }
 0x3bb   : > { %v6425_v54 = vpop.f32.mrf.mxu0 }
 0x3bc   : > { %v9232_v9 = vpop.f32.mrf.mxu1  ;;  %v4326_v38 = vadd.f32 %v6424_v5, %v9091_v6 }
 0x3bd   : > { %v6426_v2 = vpop.f32.mrf.mxu0 }
 0x3be   : > { %v9237_v44 = vpop.f32.mrf.mxu1  ;;  %v6427_v60 = vadd.f32 %v6426_v2, %v6425_v54  ;;  %v9243_v61 = vadd.f32 %v9162_v52, %v4326_v38 }
 0x3bf   : > { %v6428_v55 = vpop.f32.mrf.mxu0 }
 0x3c0   : > { %v9240_v57 = vpop.f32.mrf.mxu1  ;;  %9641 = vst [vmem:[#allocation16_spill] sm:$0xff] %v9243_v61  ;;  %v4331_v3 = vadd.f32 %v6427_v60, %v9094_v0 }
 0x3c1   : > { %v6429_v28 = vpop.f32.mrf.mxu0 }
 0x3c2   : > { %v9245_v39 = vpop.f32.mrf.mxu1  ;;  %v6430_v48 = vadd.f32 %v6429_v28, %v6428_v55  ;;  %v9251_v51 = vadd.f32 %v9171_v53, %v4331_v3 }
 0x3c3   : > { %v6431_v6 = vpop.f32.mrf.mxu0 }
 0x3c4   : > { %v9248_v31 = vpop.f32.mrf.mxu1  ;;  %9642 = vst [vmem:[#allocation17_spill] sm:$0xff] %v9251_v51  ;;  %v4334_v54 = vadd.f32 %v6430_v48, %v9099_v15 }
 0x3c5   : > { %v6432_v2 = vpop.f32.mrf.mxu0 }
 0x3c6   : > { %v9253_v5 = vpop.f32.mrf.mxu1  ;;  %v6433_v38 = vadd.f32 %v6432_v2, %v6431_v6  ;;  %v9259_v61 = vadd.f32 %v9178_v49, %v4334_v54 }
 0x3c7   : > { %v6434_v0 = vpop.f32.mrf.mxu0 }
 0x3c8   : > { %v9256_v52 = vpop.f32.mrf.mxu1  ;;  %9643 = vst [vmem:[#allocation18_spill] sm:$0xff] %v9259_v61  ;;  %v4339_v55 = vadd.f32 %v6433_v38, %v9103_v22 }
 0x3c9   : > { %v6435_v28 = vpop.f32.mrf.mxu0 }
 0x3ca   : > { %v9261_v60 = vpop.f32.mrf.mxu1  ;;  %v6436_v3 = vadd.f32 %v6435_v28, %v6434_v0  ;;  %v9267_v51 = vadd.f32 %v9167_v40, %v4339_v55 }
 0x3cb   : > { %v6437_v15 = vpop.f32.mrf.mxu0 }
 0x3cc   : > { %v9264_v53 = vpop.f32.mrf.mxu1  ;;  %9644 = vst [vmem:[#allocation19_spill] sm:$0xff] %v9267_v51  ;;  %v4342_v6 = vadd.f32 %v6436_v3, %v9107_v24 }
 0x3cd   : > { %v6438_v2 = vpop.f32.mrf.mxu0 }
 0x3ce   : > { %v9269_v48 = vpop.f32.mrf.mxu1  ;;  %v6439_v54 = vadd.f32 %v6438_v2, %v6437_v15  ;;  %v9275_v61 = vadd.f32 %v9174_v56, %v4342_v6 }
 0x3cf   : > { %v6440_v22 = vpop.f32.mrf.mxu0 }
 0x3d0   : > { %v9272_v49 = vpop.f32.mrf.mxu1  ;;  %9645 = vst [vmem:[#allocation20_spill] sm:$0xff] %v9275_v61  ;;  %v4347_v0 = vadd.f32 %v6439_v54, %v9109_v26 }
 0x3d1   : > { %v6441_v28 = vpop.f32.mrf.mxu0 }
 0x3d2   : > { %v9277_v38 = vpop.f32.mrf.mxu1  ;;  %v6442_v55 = vadd.f32 %v6441_v28, %v6440_v22  ;;  %v9283_v51 = vadd.f32 %v9185_v18, %v4347_v0  ;;  %v6497_v18 = vadd.f32 %v9215_v23, %v9210_v13  ;;  %v9311_v13 = vld [vmem:[%s9601_s6] ss:$0 sm:$0xff] }
 0x3d3   : > { %v6443_v24 = vpop.f32.mrf.mxu0 }
 0x3d4   : > { %v9280_v40 = vpop.f32.mrf.mxu1  ;;  %9646 = vst [vmem:[#allocation21_spill] sm:$0xff] %v9283_v51  ;;  %v4350_v15 = vadd.f32 %v6442_v55, %v9111_v16 }
 0x3d5   : > { %v6444_v2 = vpop.f32.mrf.mxu0 }
 0x3d6   : > { %v9285_v3 = vpop.f32.mrf.mxu1  ;;  %v6445_v6 = vadd.f32 %v6444_v2, %v6443_v24  ;;  %v9291_v61 = vadd.f32 %v9192_v14, %v4350_v15  ;;  %v6491_v14 = vadd.f32 %v9199_v19, %v9195_v21 }
 0x3d7   : > { %v6446_v26 = vpop.f32.mrf.mxu0 }
 0x3d8   : > { %v9288_v56 = vpop.f32.mrf.mxu1  ;;  %v4355_v22 = vadd.f32 %v6445_v6, %v9116_v11 }
 0x3d9   : > { %v6447_v28 = vpop.f32.mrf.mxu0 }
 0x3da   : > { %v9293_v54 = vpop.f32.mrf.mxu1  ;;  %v9301_v16 = vadd.f32 %v9181_v45, %v4355_v22  ;;  %v6448_v55 = vadd.f32 %v6447_v28, %v6446_v26  ;;  %v6500_v45 = vadd.f32 %v9222_v1, %v9218_v17  ;;  %v6494_v26 = vadd.f32 %v9207_v36, %v9202_v41  ;;  %v5175_v28 = vld [vmem:[%s7504_s16 + $0x10] sm:$0xff]  ;;  %v5173_v36 = vld [vmem:[%s7504_s16] sm:$0xff] }
 0x3db   : > { %v6867_v51 = vpop.f32.mrf.mxu0  ;;  %v6509_v41 = vadd.f32 %v9245_v39, %v9240_v57  ;;  %v5176_v57 = vld [vmem:[%s7504_s16 + $0x18] sm:$0xff] }
 0x3dc   : > { %v9298_v0 = vpop.f32.mrf.mxu1  ;;  %v4358_v15 = vadd.f32 %v6448_v55, %v9118_v59  ;;  %v4945_v11 = vadd.f32 %v6867_v51, %v6497_v18  ;;  %v9324_v59 = vld [vmem:[%s9602_s7] ss:$0 sm:$0xff] }
 0x3dd   : > { %v4936_v23 = vpop.f32.mrf.mxu0 }
 0x3de   : > { %v9305_v24 = vpop.f32.mrf.mxu1  ;;  %v9318_v6 = vadd.f32 %v9188_v47, %v4358_v15  ;;  %v5065_v21 = vadd.f32 %v4945_v11, %v9123_v58  ;;  %v4937_v19 = vadd.f32 %v6491_v14, %v4936_v23 }
 0x3df   : > { %v6868_v51 = vpop.f32.mrf.mxu0 }
 0x3e0   : > { %v9315_v2 = vpop.f32.mrf.mxu1  ;;  %v5104_v17 = vmul.f32 %v9311_v13, %v5065_v21  ;;  %v5063_v47 = vadd.f32 %v4937_v19, %v9121_v50  ;;  %v4948_v1 = vadd.f32 %v6868_v51, %v6500_v45 }
 0x3e1   : > { %v4939_v58 = vpop.f32.mrf.mxu0 }
 0x3e2   : > { %v9328_v22 = vpop.f32.mrf.mxu1  ;;  %v5143_v18 = vadd.f32 %v9324_v59, %v5104_v17  ;;  %v5102_v14 = vmul.f32 %v9311_v13, %v5063_v47  ;;  %v5066_v15 = vadd.f32 %v4948_v1, %v9128_v34  ;;  %v4940_v11 = vadd.f32 %v6494_v26, %v4939_v58 }
 0x3e3   : > { %v6871_v23 = vpop.f32.mrf.mxu0  ;;  %v6503_v34 = vadd.f32 %v9229_v8, %v9225_v20  ;;  %v6512_v26 = vadd.f32 %v9253_v5, %v9248_v31 }
 0x3e4   : > { %v9334_v55 = vpop.f32.mrf.mxu1  ;;  %v5207_v21 = vadd.f32 %v5175_v28, %v5143_v18  ;;  %v5141_v50 = vadd.f32 %v9324_v59, %v5102_v14  ;;  %v5105_v19 = vmul.f32 %v9311_v13, %v5066_v15  ;;  %v5064_v51 = vadd.f32 %v4940_v11, %v9126_v25  ;;  %v5174_v14 = vld [vmem:[%s7504_s16 + $0x8] sm:$0xff] }
 0x3e5   : > { %v4961_v39 = vadd.f32 %v6871_v23, %v6509_v41  ;;  %v4952_v17 = vpop.f32.mrf.mxu0  ;;  %v6506_v25 = vadd.f32 %v9237_v44, %v9232_v9 }
 0x3e6   : > { %v9342_v45 = vpop.f32.mrf.mxu1  ;;  %v5239_v47 = vmax.f32 %v5207_v21, 0.0  ;;  %v5205_v1 = vadd.f32 %v5173_v36, %v5141_v50  ;;  %v5144_v28 = vadd.f32 %v9324_v59, %v5105_v19  ;;  %v5103_v18 = vmul.f32 %v9311_v13, %v5064_v51  ;;  %v5179_v19 = vld [vmem:[%s7504_s16 + $0x30] sm:$0xff] }
 0x3e7   : > { %v5069_v8 = vadd.f32 %v4961_v39, %v9138_v35  ;;  %v4953_v20 = vadd.f32 %v6503_v34, %v4952_v17  ;;  %v6872_v31 = vpop.f32.mrf.mxu0  ;;  %v6521_v35 = vadd.f32 %v9277_v38, %v9272_v49  ;;  %v6515_v49 = vadd.f32 %v9261_v60, %v9256_v52  ;;  %v5177_v17 = vld [vmem:[%s7504_s16 + $0x20] sm:$0xff]  ;;  %v5180_v52 = vld [vmem:[%s7504_s16 + $0x38] sm:$0xff] }
 0x3e8   : > { %v9352_v58 = vpop.f32.mrf.mxu1  ;;  %5271 = vst [vmem:[%s9361_s24 + $0x10] sm:$0xff] %v5239_v47  ;;  %v5237_v5 = vmax.f32 %v5205_v1, 0.0  ;;  %v5208_v15 = vadd.f32 %v5176_v57, %v5144_v28  ;;  %v5142_v11 = vadd.f32 %v9324_v59, %v5103_v18  ;;  %v4964_v36 = vadd.f32 %v6872_v31, %v6512_v26 }
 0x3e9   : > { %v5108_v9 = vmul.f32 %v9311_v13, %v5069_v8  ;;  %v5067_v44 = vadd.f32 %v4953_v20, %v9133_v10  ;;  %v4955_v23 = vpop.f32.mrf.mxu0 }
 0x3ea   : > { %v9365_v41 = vpop.f32.mrf.mxu1  ;;  %5269 = vst [vmem:[%s9361_s24] sm:$0xff] %v5237_v5  ;;  %v5240_v21 = vmax.f32 %v5208_v15, 0.0  ;;  %v5206_v50 = vadd.f32 %v5174_v14, %v5142_v11  ;;  %v5070_v34 = vadd.f32 %v4964_v36, %v9141_v42  ;;  %v4956_v26 = vadd.f32 %v6506_v25, %v4955_v23  ;;  %v5178_v36 = vld [vmem:[%s7504_s16 + $0x28] sm:$0xff] }
 0x3eb   : > { %v5147_v38 = vadd.f32 %v9324_v59, %v5108_v9  ;;  %v5106_v57 = vmul.f32 %v9311_v13, %v5067_v44  ;;  %v6875_v10 = vpop.f32.mrf.mxu0 }
 0x3ec   : > { %v9373_v51 = vpop.f32.mrf.mxu1  ;;  %5272 = vst [vmem:[%s9361_s24 + $0x18] sm:$0xff] %v5240_v21  ;;  %v5238_v39 = vmax.f32 %v5206_v50, 0.0  ;;  %v5109_v1 = vmul.f32 %v9311_v13, %v5070_v34  ;;  %v5068_v42 = vadd.f32 %v4956_v26, %v9135_v62  ;;  %v4977_v28 = vadd.f32 %v6875_v10, %v6521_v35 }
 0x3ed   : > { %v5211_v18 = vadd.f32 %v5179_v19, %v5147_v38  ;;  %v5145_v25 = vadd.f32 %v9324_v59, %v5106_v57  ;;  %v4968_v60 = vpop.f32.mrf.mxu0  ;;  %v6524_v62 = vadd.f32 %v9285_v3, %v9280_v40  ;;  %v6533_v40 = vadd.f32 %v9328_v22, %v9315_v2  ;;  %v5183_v19 = vld [vmem:[%s7504_s16 + $0x50] sm:$0xff] }
 0x3ee   : > { %v9382_v47 = vpop.f32.mrf.mxu1  ;;  %5270 = vst [vmem:[%s9361_s24 + $0x8] sm:$0xff] %v5238_v39  ;;  %v5148_v14 = vadd.f32 %v9324_v59, %v5109_v1  ;;  %v5107_v20 = vmul.f32 %v9311_v13, %v5068_v42  ;;  %v5073_v31 = vadd.f32 %v4977_v28, %v9154_v12  ;;  %v4969_v5 = vadd.f32 %v6515_v49, %v4968_v60 }
 0x3ef   : > { %v5243_v15 = vmax.f32 %v5211_v18, 0.0  ;;  %v5209_v11 = vadd.f32 %v5177_v17, %v5145_v25  ;;  %v6876_v35 = vpop.f32.mrf.mxu0  ;;  %v6518_v12 = vadd.f32 %v9269_v48, %v9264_v53  ;;  %v5181_v53 = vld [vmem:[%s7504_s16 + $0x40] sm:$0xff]  ;;  %v6536_v25 = vadd.f32 %v9342_v45, %v9334_v55 }
 0x3f0   : > { %v9390_v8 = vpop.f32.mrf.mxu1  ;;  %v5212_v9 = vadd.f32 %v5180_v52, %v5148_v14  ;;  %v5146_v44 = vadd.f32 %v9324_v59, %v5107_v20  ;;  %v5112_v21 = vmul.f32 %v9311_v13, %v5073_v31  ;;  %v5071_v50 = vadd.f32 %v4969_v5, %v9144_v7  ;;  %v5184_v14 = vld [vmem:[%s7504_s16 + $0x58] sm:$0xff] }
 0x3f1   : > { %5275 = vst [vmem:[%s9361_s24 + $0x30] sm:$0xff] %v5243_v15  ;;  %v5241_v3 = vmax.f32 %v5209_v11, 0.0  ;;  %v4980_v34 = vadd.f32 %v6876_v35, %v6524_v62  ;;  %v4971_v26 = vpop.f32.mrf.mxu0  ;;  %v6527_v7 = vadd.f32 %v9293_v54, %v9288_v56  ;;  %v6530_v55 = vadd.f32 %v9305_v24, %v9298_v0  ;;  %v5182_v11 = vld [vmem:[%s7504_s16 + $0x48] sm:$0xff] }
 0x3f2   : > { %v6544_v23 = vpop.f32.mrf.mxu1  ;;  %v5244_v49 = vmax.f32 %v5212_v9, 0.0  ;;  %v5210_v38 = vadd.f32 %v5178_v36, %v5146_v44  ;;  %v5151_v57 = vadd.f32 %v9324_v59, %v5112_v21  ;;  %v5110_v39 = vmul.f32 %v9311_v13, %v5071_v50  ;;  %v5187_v50 = vld [vmem:[%s7504_s16 + $0x70] sm:$0xff] }
 0x3f3   : > { %5273 = vst [vmem:[%s9361_s24 + $0x20] sm:$0xff] %v5241_v3  ;;  %v5074_v48 = vadd.f32 %v4980_v34, %v9159_v32  ;;  %v4972_v2 = vadd.f32 %v6518_v12, %v4971_v26  ;;  %v6879_v22 = vpop.f32.mrf.mxu0 }
 0x3f4   : > { %v6546_v10 = vpop.f32.mrf.mxu1  ;;  %5276 = vst [vmem:[%s9361_s24 + $0x38] sm:$0xff] %v5244_v49  ;;  %v5242_v17 = vmax.f32 %v5210_v38, 0.0  ;;  %v5215_v1 = vadd.f32 %v5183_v19, %v5151_v57  ;;  %v5149_v42 = vadd.f32 %v9324_v59, %v5110_v39  ;;  %v4993_v18 = vadd.f32 %v6879_v22, %v6533_v40  ;;  %v5185_v49 = vld [vmem:[%s7504_s16 + $0x60] sm:$0xff] }
 0x3f5   : > { %v5113_v56 = vmul.f32 %v9311_v13, %v5074_v48  ;;  %v5072_v54 = vadd.f32 %v4972_v2, %v9149_v29  ;;  %v4984_v32 = vpop.f32.mrf.mxu0 }
 0x3f6   : > { %v6547_v28 = vpop.f32.mrf.mxu1  ;;  %5274 = vst [vmem:[%s9361_s24 + $0x28] sm:$0xff] %v5242_v17  ;;  %v5247_v52 = vmax.f32 %v5215_v1, 0.0  ;;  %v5213_v60 = vadd.f32 %v5181_v53, %v5149_v42  ;;  %v5077_v31 = vadd.f32 %v4993_v18, %v9176_v4  ;;  %v4985_v5 = vadd.f32 %v6527_v7, %v4984_v32 }
 0x3f7   : > { %v5152_v45 = vadd.f32 %v9324_v59, %v5113_v56  ;;  %v5111_v62 = vmul.f32 %v9311_v13, %v5072_v54  ;;  %v6880_v29 = vpop.f32.mrf.mxu0  ;;  %v6548_v2 = vadd.f32 %v6547_v28, %v6546_v10 }
 0x3f8   : > { %v9421_v20 = vpop.f32.mrf.mxu1  ;;  %5279 = vst [vmem:[%s9361_s24 + $0x50] sm:$0xff] %v5247_v52  ;;  %v5245_v15 = vmax.f32 %v5213_v60, 0.0  ;;  %v5116_v35 = vmul.f32 %v9311_v13, %v5077_v31  ;;  %v5075_v9 = vadd.f32 %v4985_v5, %v9164_v30  ;;  %v4996_v4 = vadd.f32 %v6880_v29, %v6536_v25  ;;  %v9647_v29 = vld [vmem:[#allocation14_spill] sm:$0xff] }
 0x3f9   : > { %v5216_v44 = vadd.f32 %v5184_v14, %v5152_v45  ;;  %v5150_v21 = vadd.f32 %v9324_v59, %v5111_v62  ;;  %v4987_v0 = vpop.f32.mrf.mxu0  ;;  %v6545_v30 = vadd.f32 %v6544_v23, %v9390_v8  ;;  %v5188_v23 = vld [vmem:[%s7504_s16 + $0x78] sm:$0xff]  ;;  %v5191_v45 = vld [vmem:[%s7504_s16 + $0x90] sm:$0xff] }
 0x3fa   : > { %v6550_v36 = vpop.f32.mrf.mxu1  ;;  %5277 = vst [vmem:[%s9361_s24 + $0x40] sm:$0xff] %v5245_v15  ;;  %v5155_v24 = vadd.f32 %v9324_v59, %v5116_v35  ;;  %v5114_v40 = vmul.f32 %v9311_v13, %v5075_v9  ;;  %v5078_v3 = vadd.f32 %v4996_v4, %v9183_v27  ;;  %v4988_v19 = vadd.f32 %v6530_v55, %v4987_v0 }
 0x3fb   : > { %v5248_v34 = vmax.f32 %v5216_v44, 0.0  ;;  %v5214_v26 = vadd.f32 %v5182_v11, %v5150_v21  ;;  %v6883_v38 = vpop.f32.mrf.mxu0  ;;  %v6539_v27 = vadd.f32 %v9365_v41, %v9352_v58  ;;  %v5186_v58 = vld [vmem:[%s7504_s16 + $0x68] sm:$0xff]  ;;  %v6551_v35 = vadd.f32 %v6550_v36, %v9421_v20  ;;  %v5189_v21 = vld [vmem:[%s7504_s16 + $0x80] sm:$0xff] }
 0x3fc   : > { %v9436_v12 = vpop.f32.mrf.mxu1  ;;  %v5219_v57 = vadd.f32 %v5187_v50, %v5155_v24  ;;  %v5153_v39 = vadd.f32 %v9324_v59, %v5114_v40  ;;  %v5117_v53 = vmul.f32 %v9311_v13, %v5078_v3  ;;  %v5076_v48 = vadd.f32 %v4988_v19, %v9169_v46  ;;  %v9648_v24 = vld [vmem:[#allocation13_spill] sm:$0xff] }
 0x3fd   : > { %5280 = vst [vmem:[%s9361_s24 + $0x58] sm:$0xff] %v5248_v34  ;;  %v5246_v8 = vmax.f32 %v5214_v26, 0.0  ;;  %v5009_v22 = vadd.f32 %v6883_v38, %v6545_v30  ;;  %v5000_v17 = vpop.f32.mrf.mxu0  ;;  %v6542_v46 = vadd.f32 %v9382_v47, %v9373_v51  ;;  %v5192_v34 = vld [vmem:[%s7504_s16 + $0x98] sm:$0xff] }
 0x3fe   : > { %v9443_v7 = vpop.f32.mrf.mxu1  ;;  %v5251_v1 = vmax.f32 %v5219_v57, 0.0  ;;  %v5217_v42 = vadd.f32 %v5185_v49, %v5153_v39  ;;  %v5156_v18 = vadd.f32 %v9324_v59, %v5117_v53  ;;  %v5115_v56 = vmul.f32 %v9311_v13, %v5076_v48 }
 0x3ff   : > { %5278 = vst [vmem:[%s9361_s24 + $0x48] sm:$0xff] %v5246_v8  ;;  %v5081_v41 = vadd.f32 %v5009_v22, %v9205_v33  ;;  %v5001_v10 = vadd.f32 %v6539_v27, %v5000_v17  ;;  %v6884_v28 = vpop.f32.mrf.mxu0  ;;  %v5190_v27 = vld [vmem:[%s7504_s16 + $0x88] sm:$0xff] }
 0x400   : > { %v6555_v25 = vpop.f32.mrf.mxu1  ;;  %5283 = vst [vmem:[%s9361_s24 + $0x70] sm:$0xff] %v5251_v1  ;;  %v5249_v54 = vmax.f32 %v5217_v42, 0.0  ;;  %v5220_v32 = vadd.f32 %v5188_v23, %v5156_v18  ;;  %v5154_v52 = vadd.f32 %v9324_v59, %v5115_v56  ;;  %v5012_v14 = vadd.f32 %v6884_v28, %v6548_v2  ;;  %v5195_v18 = vld [vmem:[%s7504_s16 + $0xb0] sm:$0xff] }
 0x401   : > { %v5120_v5 = vmul.f32 %v9311_v13, %v5081_v41  ;;  %v5079_v51 = vadd.f32 %v5001_v10, %v9190_v37  ;;  %v5003_v47 = vpop.f32.mrf.mxu0  ;;  %v6554_v42 = vadd.f32 %v9443_v7, %v9436_v12 }
 0x402   : > { %v6556_v60 = vpop.f32.mrf.mxu1  ;;  %5281 = vst [vmem:[%s9361_s24 + $0x60] sm:$0xff] %v5249_v54  ;;  %v5252_v33 = vmax.f32 %v5220_v32, 0.0  ;;  %v5218_v55 = vadd.f32 %v5186_v58, %v5154_v52  ;;  %v5082_v15 = vadd.f32 %v5012_v14, %v9647_v29  ;;  %v5004_v11 = vadd.f32 %v6542_v46, %v5003_v47  ;;  %v5193_v54 = vld [vmem:[%s7504_s16 + $0xa0] sm:$0xff]  ;;  %v9650_v47 = vld [vmem:[#allocation15_spill] sm:$0xff]  ;;  %v5196_v29 = vld [vmem:[%s7504_s16 + $0xb8] sm:$0xff] }
 0x403   : > { %v6557_v31 = vadd.f32 %v6556_v60, %v6555_v25  ;;  %v5159_v9 = vadd.f32 %v9324_v59, %v5120_v5  ;;  %v5118_v4 = vmul.f32 %v9311_v13, %v5079_v51  ;;  %v6887_v44 = vpop.f32.mrf.mxu0 }
 0x404   : > { %v6558_v62 = vpop.f32.mrf.mxu1  ;;  %5284 = vst [vmem:[%s9361_s24 + $0x78] sm:$0xff] %v5252_v33  ;;  %v5250_v37 = vmax.f32 %v5218_v55, 0.0  ;;  %v5121_v0 = vmul.f32 %v9311_v13, %v5082_v15  ;;  %v5080_v40 = vadd.f32 %v5004_v11, %v9648_v24 }
 0x405   : > { %v5025_v3 = vadd.f32 %v6887_v44, %v6557_v31  ;;  %v5223_v19 = vadd.f32 %v5191_v45, %v5159_v9  ;;  %v5157_v30 = vadd.f32 %v9324_v59, %v5118_v4  ;;  %v5016_v20 = vpop.f32.mrf.mxu0 }
 0x406   : > { %v6559_v50 = vpop.f32.mrf.mxu1  ;;  %5282 = vst [vmem:[%s9361_s24 + $0x68] sm:$0xff] %v5250_v37  ;;  %v5160_v36 = vadd.f32 %v9324_v59, %v5121_v0  ;;  %v5119_v49 = vmul.f32 %v9311_v13, %v5080_v40  ;;  %v5017_v57 = vadd.f32 %v6551_v35, %v5016_v20  ;;  %v9651_v0 = vld [vmem:[#allocation17_spill] sm:$0xff] }
 0x407   : > { %v5085_v38 = vadd.f32 %v5025_v3, %v9235_v63  ;;  %v5255_v39 = vmax.f32 %v5223_v19, 0.0  ;;  %v5221_v53 = vadd.f32 %v5189_v21, %v5157_v30  ;;  %v6560_v48 = vadd.f32 %v6559_v50, %v6558_v62  ;;  %v6888_v2 = vpop.f32.mrf.mxu0  ;;  %v5194_v21 = vld [vmem:[%s7504_s16 + $0xa8] sm:$0xff] }
 0x408   : > { %v6561_v26 = vpop.f32.mrf.mxu1  ;;  %v5224_v8 = vadd.f32 %v5192_v34, %v5160_v36  ;;  %v5158_v23 = vadd.f32 %v9324_v59, %v5119_v49  ;;  %v5083_v1 = vadd.f32 %v5017_v57, %v9220_v43  ;;  %v9649_v43 = vld [vmem:[#allocation16_spill] sm:$0xff]  ;;  %v5197_v57 = vld [vmem:[%s7504_s16 + $0xc0] sm:$0xff] }
 0x409   : > { %v5124_v17 = vmul.f32 %v9311_v13, %v5085_v38  ;;  %5287 = vst [vmem:[%s9361_s24 + $0x90] sm:$0xff] %v5255_v39  ;;  %v5253_v63 = vmax.f32 %v5221_v53, 0.0  ;;  %v5028_v25 = vadd.f32 %v6888_v2, %v6560_v48  ;;  %v5019_v56 = vpop.f32.mrf.mxu0 }
 0x40a   : > { %v6562_v22 = vpop.f32.mrf.mxu1  ;;  %v5256_v46 = vmax.f32 %v5224_v8, 0.0  ;;  %v5222_v58 = vadd.f32 %v5190_v27, %v5158_v23  ;;  %v5122_v28 = vmul.f32 %v9311_v13, %v5083_v1  ;;  %v5020_v12 = vadd.f32 %v6554_v42, %v5019_v56  ;;  %v9652_v27 = vld [vmem:[#allocation18_spill] sm:$0xff]  ;;  %v9653_v23 = vld [vmem:[#allocation19_spill] sm:$0xff] }
 0x40b   : > { %v5163_v41 = vadd.f32 %v9324_v59, %v5124_v17  ;;  %5285 = vst [vmem:[%s9361_s24 + $0x80] sm:$0xff] %v5253_v63  ;;  %v5086_v32 = vadd.f32 %v5028_v25, %v9649_v43  ;;  %v6891_v7 = vpop.f32.mrf.mxu0  ;;  %v6563_v60 = vadd.f32 %v6562_v22, %v6561_v26 }
 0x40c   : > { %v6564_v10 = vpop.f32.mrf.mxu1  ;;  %5288 = vst [vmem:[%s9361_s24 + $0x98] sm:$0xff] %v5256_v46  ;;  %v5254_v52 = vmax.f32 %v5222_v58, 0.0  ;;  %v5161_v31 = vadd.f32 %v9324_v59, %v5122_v28  ;;  %v5084_v33 = vadd.f32 %v5020_v12, %v9650_v47  ;;  %v5198_v46 = vld [vmem:[%s7504_s16 + $0xc8] sm:$0xff]  ;;  %v5199_v58 = vld [vmem:[%s7504_s16 + $0xd0] sm:$0xff] }
 0x40d   : > { %v5227_v14 = vadd.f32 %v5195_v18, %v5163_v41  ;;  %v5125_v51 = vmul.f32 %v9311_v13, %v5086_v32  ;;  %v5032_v55 = vpop.f32.mrf.mxu0  ;;  %v9654_v32 = vld [vmem:[#allocation20_spill] sm:$0xff] }
 0x40e   : > { %v6565_v5 = vpop.f32.mrf.mxu1  ;;  %5286 = vst [vmem:[%s9361_s24 + $0x88] sm:$0xff] %v5254_v52  ;;  %v5225_v62 = vadd.f32 %v5193_v54, %v5161_v31  ;;  %v5033_v11 = vadd.f32 %v6563_v60, %v5032_v55  ;;  %v5123_v9 = vmul.f32 %v9311_v13, %v5084_v33 }
 0x40f   : > { %v5259_v45 = vmax.f32 %v5227_v14, 0.0  ;;  %v5164_v35 = vadd.f32 %v9324_v59, %v5125_v51  ;;  %v6892_v4 = vpop.f32.mrf.mxu0  ;;  %v6566_v37 = vadd.f32 %v6565_v5, %v6564_v10  ;;  %v5200_v51 = vld [vmem:[%s7504_s16 + $0xd8] sm:$0xff] }
 0x410   : > { %v6567_v15 = vpop.f32.mrf.mxu1  ;;  %v5257_v44 = vmax.f32 %v5225_v62, 0.0  ;;  %v5087_v24 = vadd.f32 %v5033_v11, %v9651_v0  ;;  %v5162_v3 = vadd.f32 %v9324_v59, %v5123_v9 }
 0x411   : > { %5291 = vst [vmem:[%s9361_s24 + $0xb0] sm:$0xff] %v5259_v45  ;;  %v5228_v40 = vadd.f32 %v5196_v29, %v5164_v35  ;;  %v5035_v30 = vpop.f32.mrf.mxu0  ;;  %v9655_v29 = vld [vmem:[#allocation21_spill] sm:$0xff] }
 0x412   : > { %v6568_v50 = vpop.f32.mrf.mxu1  ;;  %5289 = vst [vmem:[%s9361_s24 + $0xa0] sm:$0xff] %v5257_v44  ;;  %v5126_v20 = vmul.f32 %v9311_v13, %v5087_v24  ;;  %v5036_v36 = vadd.f32 %v6566_v37, %v5035_v30  ;;  %v5226_v49 = vadd.f32 %v5194_v21, %v5162_v3  ;;  %v5201_v37 = vld [vmem:[%s7504_s16 + $0xe0] sm:$0xff] }
 0x413   : > { %v6569_v19 = vadd.f32 %v6568_v50, %v6567_v15  ;;  %v5260_v26 = vmax.f32 %v5228_v40, 0.0  ;;  %v6895_v39 = vpop.f32.mrf.mxu0 }
 0x414   : > { %v6570_v34 = vpop.f32.mrf.mxu1  ;;  %v5165_v53 = vadd.f32 %v9324_v59, %v5126_v20  ;;  %v5088_v2 = vadd.f32 %v5036_v36, %v9652_v27  ;;  %v5258_v8 = vmax.f32 %v5226_v49, 0.0  ;;  %v5202_v20 = vld [vmem:[%s7504_s16 + $0xe8] sm:$0xff]  ;;  %v5203_v27 = vld [vmem:[%s7504_s16 + $0xf0] sm:$0xff] }
 0x415   : > { %v5041_v38 = vadd.f32 %v6891_v7, %v6569_v19  ;;  %5292 = vst [vmem:[%s9361_s24 + $0xb8] sm:$0xff] %v5260_v26  ;;  %v5048_v1 = vpop.f32.mrf.mxu0 }
 0x416   : > { %v6571_v48 = vpop.f32.mrf.mxu1  ;;  %v5229_v42 = vadd.f32 %v5197_v57, %v5165_v53  ;;  %v5127_v18 = vmul.f32 %v9311_v13, %v5088_v2  ;;  %5290 = vst [vmem:[%s9361_s24 + $0xa8] sm:$0xff] %v5258_v8 }
 0x417   : > { %v5089_v22 = vadd.f32 %v5041_v38, %v9653_v23  ;;  %v6572_v17 = vadd.f32 %v6571_v48, %v6570_v34  ;;  %v6896_v54 = vpop.f32.mrf.mxu0 }
 0x418   : > { %v6573_v63 = vpop.f32.mrf.mxu1  ;;  %v5261_v41 = vmax.f32 %v5229_v42, 0.0  ;;  %v5166_v10 = vadd.f32 %v9324_v59, %v5127_v18 }
 0x419   : > { %v5128_v25 = vmul.f32 %v9311_v13, %v5089_v22  ;;  %v5044_v56 = vadd.f32 %v6892_v4, %v6572_v17  ;;  %v5051_v55 = vpop.f32.mrf.mxu0  ;;  %v5204_v22 = vld [vmem:[%s7504_s16 + $0xf8] sm:$0xff]  ;;  %s5302_s16 = scalar_lea.sflag [#allocation5], %s7498_s14 }
 0x41a   : > { %v6574_v28 = vpop.f32.mrf.mxu1  ;;  %5293 = vst [vmem:[%s9361_s24 + $0xc0] sm:$0xff] %v5261_v41  ;;  %v5230_v52 = vadd.f32 %v5198_v46, %v5166_v10 }
 0x41b   : > { %v5167_v43 = vadd.f32 %v9324_v59, %v5128_v25  ;;  %v5090_v12 = vadd.f32 %v5044_v56, %v9654_v32  ;;  %v6575_v7 = vadd.f32 %v6574_v28, %v6573_v63 }
 0x41c   : > { %v6576_v60 = vpop.f32.mrf.mxu1  ;;  %v5262_v47 = vmax.f32 %v5230_v52, 0.0 }
 0x41d   : > { %v5231_v14 = vadd.f32 %v5199_v58, %v5167_v43  ;;  %v5129_v31 = vmul.f32 %v9311_v13, %v5090_v12  ;;  %v5049_v5 = vadd.f32 %v6575_v7, %v5048_v1 }
 0x41e   : > { %v6577_v33 = vpop.f32.mrf.mxu1  ;;  %5294 = vst [vmem:[%s9361_s24 + $0xc8] sm:$0xff] %v5262_v47 }
 0x41f   : > { %v5263_v45 = vmax.f32 %v5231_v14, 0.0  ;;  %v5168_v62 = vadd.f32 %v9324_v59, %v5129_v31  ;;  %v5091_v15 = vadd.f32 %v5049_v5, %v9655_v29  ;;  %v6578_v11 = vadd.f32 %v6577_v33, %v6576_v60 }
 0x420   : > { %v6579_v35 = vpop.f32.mrf.mxu1 }
 0x421   : > { %5295 = vst [vmem:[%s9361_s24 + $0xd0] sm:$0xff] %v5263_v45  ;;  %v5232_v9 = vadd.f32 %v5200_v51, %v5168_v62  ;;  %v5130_v4 = vmul.f32 %v9311_v13, %v5091_v15  ;;  %v5052_v44 = vadd.f32 %v6578_v11, %v5051_v55 }
 0x422   : > { %v6580_v21 = vpop.f32.mrf.mxu1 }
 0x423   : > { %v5264_v50 = vmax.f32 %v5232_v9, 0.0  ;;  %v5169_v0 = vadd.f32 %v9324_v59, %v5130_v4  ;;  %v5092_v24 = vadd.f32 %v5052_v44, %v9291_v61  ;;  %v6581_v40 = vadd.f32 %v6580_v21, %v6579_v35 }
 0x424   : > { %v6582_v3 = vpop.f32.mrf.mxu1 }
 0x425   : > { %5296 = vst [vmem:[%s9361_s24 + $0xd8] sm:$0xff] %v5264_v50  ;;  %v5233_v19 = vadd.f32 %v5201_v37, %v5169_v0  ;;  %v5131_v30 = vmul.f32 %v9311_v13, %v5092_v24  ;;  %v5057_v34 = vadd.f32 %v6895_v39, %v6581_v40 }
 0x426   : > { %v6583_v36 = vpop.f32.mrf.mxu1 }
 0x427   : > { %v5265_v26 = vmax.f32 %v5233_v19, 0.0  ;;  %v5170_v49 = vadd.f32 %v9324_v59, %v5131_v30  ;;  %v5093_v38 = vadd.f32 %v5057_v34, %v9301_v16  ;;  %v6584_v57 = vadd.f32 %v6583_v36, %v6582_v3 }
 0x429   : > { %5297 = vst [vmem:[%s9361_s24 + $0xe0] sm:$0xff] %v5265_v26  ;;  %v5234_v61 = vadd.f32 %v5202_v20, %v5170_v49  ;;  %v5132_v53 = vmul.f32 %v9311_v13, %v5093_v38  ;;  %v5060_v48 = vadd.f32 %v6896_v54, %v6584_v57 }
 0x42b   : > { %v5266_v2 = vmax.f32 %v5234_v61, 0.0  ;;  %v5171_v39 = vadd.f32 %v9324_v59, %v5132_v53  ;;  %v5094_v8 = vadd.f32 %v5060_v48, %v9318_v6 }
 0x42d   : > { %5298 = vst [vmem:[%s9361_s24 + $0xe8] sm:$0xff] %v5266_v2  ;;  %v5235_v23 = vadd.f32 %v5203_v27, %v5171_v39  ;;  %v5133_v16 = vmul.f32 %v9311_v13, %v5094_v8 }
 0x42f   : > { %v5267_v17 = vmax.f32 %v5235_v23, 0.0  ;;  %v5172_v1 = vadd.f32 %v9324_v59, %v5133_v16 }
 0x431   : > { %5299 = vst [vmem:[%s9361_s24 + $0xf0] sm:$0xff] %v5267_v17  ;;  %v5236_v42 = vadd.f32 %v5204_v22, %v5172_v1 }
 0x433   : > { %v5268_v6 = vmax.f32 %v5236_v42, 0.0 }
 0x435   : > { %5300 = vst [vmem:[%s9361_s24 + $0xf8] sm:$0xff] %v5268_v6 }
 0x436   : > { %7270 = shalt.err (!%p7267_p5)
}
 0x437   : > { %s7271_s22 = scalar_lea.hbm %s9549_s11, 4096  ;;  %s7275_s18 = scalar_lea.hbm %s9603_s8, 8192 }
 0x438   : > { %p7272_p9 = scmp.ne.s32.totalorder %s9549_s11, %s7271_s22  ;;  %p7276_p6 = scmp.lt.s32.totalorder %s9549_s11, %s9603_s8 }
 0x439   : > { %p7277_p8 = scmp.lt.s32.totalorder %s7275_s18, %s7271_s22 }
 0x43a   : > { %p7273_p1 = pnand %p7272_p9, %p9656_p7 }
 0x43b   : > { %p7278_p3 = por %p7277_p8, %p7276_p6 }
 0x43c   : > { %p7274_p4 = pneg %p7273_p1 }
 0x43e   : > { %p7279_p11 = pnand %p7278_p3, %p7274_p4 }
 0x440   : > { %7282 = shalt.err (!%p7279_p11)
}
 0x441   : > { %s7335_s20 = smov 128   ;;  %s7336_s10 = smov 8  }
 0x442   : > { %6904 = dma.vmem_to_hbm [thread:$0]  (%p9656_p7), %s9551_s19, 4096, %s9549_s11, %s5302_s16, %s7335_s20, %s7335_s20, %s7336_s10  }
 0x443 PF: > { %s5330_s15 = sand.u32 1, %s7313_s27   ;;  %p9657_p12 = scmp.ne.s32.totalorder %s9618_s12, 0 }
 0x444   : > { %p9658_p10 = scmp.ge.s32.totalorder %s7325_s30, 2  ;;  %s5331_s9 = scalar_lea.sflag [#allocation5], %s5330_s15 }
 0x446   : > { %p6915_p2 = pnand %p9658_p10, %p9657_p12 }
 0x448   : > { %p6916_p13 = pneg %p6915_p2 }
 0x44a   : > { %7308 = dma.done.wait (%p6916_p13), %s5331_s9, 4096  }
 0x44b   : > { %7310 = vsyncadd (%p6916_p13), %s5331_s9, 4294963200  ;;  %s9659_s30 = sld [smem:[#allocation12_spill]]  ;;  %s9660_s27 = smov %s7317_s28 }
 0x44c   : > { %s9661_s28 = smov %s7321_s29  ;;  %s9662_s29 = smov %s7453_s25 }
 0x451   : > { %p22_p0 = scmp.ge.s32.totalorder %s9659_s30, 4  }
 0x453   :  { %24 = sbr.rel (!%p22_p0) target bundleno = 8 (0x8), region = 110 }
 0x458   :  { %5336 = vsyncpa [#allocation4], 1 }
 0x459   :  { %5338 = vsyncpa [#allocation4 + $0x1], 1 }
 0x45a   :  { %5339 = vsyncpa [#allocation7], 1 }
 0x45b   :  { %5340 = vsyncpa [#allocation5], 1 }
 0x45c   :  { %5342 = vsyncpa [#allocation5 + $0x1], 1 }

</bundles_post_ra>
